<compile_context>
chip_gen: v6e
topology: v6e:2x2x1
jax: 0.10.0
libtpu: 0.0.40
codegen_flags: <defaults>
</compile_context>

<pallas_src>
import functools

import jax
import jax.numpy as jnp
from jax.experimental import pallas as pl
from jax.experimental.pallas import tpu as pltpu

HIDDEN = 32          # hidden_dim
INPUT_DIM = 5        # node feature width (column 4 carries the detector-layer id)
FEAT_PAD = 8         # features padded 5 -> 8 so 4 packed nodes fill 32 lanes
PACK = 4             # nodes packed per 128-lane row (4 * HIDDEN = 128)
N_LAYERS = 7         # self.n_layers
N_GRAPH_ITERS = 3    # n_graph_iters
MLP_DEPTH = 4        # NodeNetwork: [output_dim] * 4
PRED_DEPTH = 3       # graph_pred_mlp hidden layers
LN_EPS = 1e-5
BN_EPS = 1e-5


def _round_up(x, m):
    return ((x + m - 1) // m) * m


# --------------------------------------------------------------------------------------
# Kernel 1: packed node MLP + one-hot scatter-add pooling (per TensorCore partials)
# --------------------------------------------------------------------------------------
def _node_pool_kernel(x_ref, seg_ref,
                      win_ref, bin_ref, gin_ref, bein_ref,
                      wn_ref, bn_ref, gn_ref, ben_ref, amean_ref,
                      out_ref):
    j = pl.program_id(1)

    @pl.when(j == 0)
    def _init():
        out_ref[...] = jnp.zeros_like(out_ref)

    a_mean = amean_ref[...]                              # [128,128] block-averaging matrix
    hidden = a_mean.shape[0] // PACK

    def ln_tanh(h, gamma, beta):
        # Per-node LayerNorm over each 32-lane block of the 4-node packed layout.
        # One-pass statistics (E[h], E[h^2]) via MXU block-averaging matmuls.
        mu = jnp.dot(h, a_mean, preferred_element_type=jnp.float32)
        m2 = jnp.dot(h * h, a_mean, preferred_element_type=jnp.float32)
        var = jnp.maximum(m2 - mu * mu, 0.0)
        return jnp.tanh((h - mu) * jax.lax.rsqrt(var + LN_EPS) * gamma + beta)

    # input_network: Linear(5->H) + LayerNorm + Tanh, 4 nodes per 128-lane row.
    h = jnp.dot(x_ref[...], win_ref[...], preferred_element_type=jnp.float32) + bin_ref[...]
    h = ln_tanh(h, gin_ref[...], bein_ref[...])

    # n_graph_iters x (shared NodeNetwork MLP + residual).  Kept in f32 (portable to v5e).
    for _ in range(N_GRAPH_ITERS):
        h0 = h
        for l in range(MLP_DEPTH):
            h = jnp.dot(h, wn_ref[l], preferred_element_type=jnp.float32) + bn_ref[l]
            h = ln_tanh(h, gn_ref[l], ben_ref[l])
        h = h + h0

    # Scatter-add (sums + counts) into the split-resident accumulator.  For each packed
    # sub-block b, pool nodes 4q+b with one f32 one-hot MXU matmul; the appended ones
    # column carries the segment counts on the same matmul (no XLU cross-lane reduce).
    tq = h.shape[0]
    s_pad = out_ref.shape[1]
    segb = seg_ref[...]                                   # [PACK, tq] int32
    seg_iota = jax.lax.broadcasted_iota(jnp.int32, (s_pad, tq), 0)
    ones_col = jnp.ones((tq, 1), jnp.float32)
    pooled = jnp.zeros((s_pad, hidden + 1), jnp.float32)
    for b in range(PACK):
        onehot = (seg_iota == segb[b:b + 1, :]).astype(jnp.float32)       # [s_pad, tq]
        h_b = jnp.concatenate([h[:, b * hidden:(b + 1) * hidden], ones_col], axis=-1)
        pooled = pooled + jnp.dot(onehot, h_b, preferred_element_type=jnp.float32)
    out_ref[...] += pooled[None]


# --------------------------------------------------------------------------------------
# Kernel 2: combine per-core partials -> scatter-mean -> fused graph_pred_mlp
# --------------------------------------------------------------------------------------
def _pred_kernel(pool_ref, wp_ref, bp_ref, sc_ref, sh_ref, wo_ref, bo_ref, out_ref):
    hidden = pool_ref.shape[2] - 1
    b_pad = out_ref.shape[0]
    d7 = wo_ref.shape[0]

    pooled = jnp.sum(pool_ref[...], axis=0)               # combine TensorCore partials
    # First pred layer directly from the per-layer pooled blocks: with z = [B, 7H] in
    # layer-major H-blocks, z @ W0 == sum_l mean_l @ W0[l*H:(l+1)*H, :], so the [B, 7H]
    # concat is never materialized.
    w0 = wp_ref[0]
    zsum = jnp.zeros((b_pad, d7), jnp.float32)
    for l in range(N_LAYERS):
        blk = pooled[l * b_pad:(l + 1) * b_pad, :]
        mean_l = blk[:, :hidden] / jnp.maximum(blk[:, hidden:hidden + 1], 1.0)
        zsum = zsum + jnp.dot(mean_l, w0[l * hidden:(l + 1) * hidden, :],
                              preferred_element_type=jnp.float32)
    z = jnp.tanh((zsum + bp_ref[0]) * sc_ref[0] + sh_ref[0])   # folded eval BatchNorm
    for l in range(1, PRED_DEPTH):
        z = jnp.dot(z, wp_ref[l], preferred_element_type=jnp.float32) + bp_ref[l]
        z = jnp.tanh(z * sc_ref[l] + sh_ref[l])
    out_ref[...] = jnp.dot(z, wo_ref[...], preferred_element_type=jnp.float32) + bo_ref[...]


def _vmem_limit_bytes(tile_n, s_pad, hidden):
    f32 = 4
    tq = tile_n // PACK
    pk = PACK * hidden
    est = (2 * tq * 128 * f32                     # packed node-feature tiles (x2 buffers)
           + 2 * 8 * tq * 4                       # seg tiles (x2 buffers, sublane pad)
           + 2 * s_pad * 128 * f32                # per-split pooled accumulator (x2 buffers)
           + 2 * (MLP_DEPTH + 2) * pk * pk * f32  # wn_blk, win_blk, a_mean (x2 buffers)
           + 32 * pk * f32                        # biases / LN params
           + 12 * tq * pk * f32                   # live activations (h, h0, stats, temps)
           + 2 * s_pad * tq * f32                 # one-hot + iota
           + 2 * tq * 128 * f32)                  # per-block pooling RHS temporaries
    # ~2x actual footprint, well under v7x's 64 MiB physical VMEM.
    return int(min(2 * est + (8 << 20), 56 << 20))


def gnn_graph_classifier(x, batch, num_graphs, params, *, tile_n=2048):
    """Forward pass. x: [N, INPUT_DIM] f32, batch: [N] i32 -> [num_graphs] f32."""
    n = x.shape[0]
    hidden = params["w_in"].shape[1]
    d7 = N_LAYERS * hidden
    pk = PACK * hidden
    c_dim = hidden + 1                                   # pooled sums + counts column

    # Accumulator layout: seg = layer * b_pad + batch (b_pad multiple of 8) so per-layer
    # pooled blocks are contiguous and sublane-aligned in the prediction kernel.
    b_pad = _round_up(max(num_graphs, 8), 8)
    s_pad = N_LAYERS * b_pad

    tile_n = max(128, min(_round_up(tile_n, 128), _round_up(n, 128)))
    tq = tile_n // PACK
    num_tiles = pl.cdiv(n, tile_n)
    n_splits = 2 if num_tiles >= 2 else 1                # 2-TC split on v7x; serial elsewhere
    tiles_per_split = pl.cdiv(num_tiles, n_splits)
    t_total = n_splits * tiles_per_split
    n_pad = t_total * tile_n

    # ---- node features: pad 5->8 feats, pack 4 nodes/row -> lane-dense [n_pad/4, 32].
    x_pk = jnp.pad(x.astype(jnp.float32),
                   ((0, n_pad - n), (0, FEAT_PAD - INPUT_DIM)))
    x_pk = x_pk.reshape(n_pad // PACK, PACK * FEAT_PAD)

    # ---- segment ids: seg = layer * b_pad + batch; padded / invalid nodes -> -1 (dropped).
    layer = x[:, 4].astype(jnp.int32)
    bvec = batch.astype(jnp.int32)
    valid = (layer >= 0) & (layer < N_LAYERS) & (bvec >= 0) & (bvec < num_graphs)
    seg = jnp.where(valid, layer * b_pad + bvec, -1)
    seg = jnp.pad(seg, (0, n_pad - n), constant_values=-1)
    seg_blk = seg.reshape(t_total, tq, PACK).transpose(0, 2, 1)   # [T, PACK, tq]

    # ---- packed (block-diagonal) weights + per-node tiled params.
    eye4 = jnp.eye(PACK, dtype=jnp.float32)
    w_in_pad = jnp.pad(params["w_in"].astype(jnp.float32),
                       ((0, FEAT_PAD - INPUT_DIM), (0, 0)))
    win_blk = jnp.kron(eye4, w_in_pad)                                     # [32, 128]
    wn_blk = jnp.stack([jnp.kron(eye4, params["wn"][l]) for l in range(MLP_DEPTH)])
    a_mean = jnp.kron(eye4, jnp.full((hidden, hidden), 1.0 / hidden, jnp.float32))

    def _t4(v):
        return jnp.tile(v, (1,) * (v.ndim - 1) + (PACK,))

    bin_t, gin_t, bein_t = _t4(params["b_in"]), _t4(params["g_in"]), _t4(params["be_in"])
    bn_t, gn_t, ben_t = _t4(params["bn"]), _t4(params["gn"]), _t4(params["ben"])

    # Fold eval-mode BatchNorm1d (running stats) into per-layer scale/shift.
    # TODO(synk): training-mode batch statistics are not reproduced.
    bn_scale = params["bng"] * jax.lax.rsqrt(params["bnv"] + BN_EPS)
    bn_shift = params["bnb"] - params["bnm"] * bn_scale

    def _const(shape):
        return pl.BlockSpec(shape, lambda i, j: (0,) * len(shape))

    tile_idx = lambda i, j: (i * tiles_per_split + j, 0)
    seg_idx = lambda i, j: (i * tiles_per_split + j, 0, 0)

    partial_pool = pl.pallas_call(
        _node_pool_kernel,
        out_shape=jax.ShapeDtypeStruct((n_splits, s_pad, c_dim), jnp.float32),
        grid=(n_splits, tiles_per_split),
        in_specs=[
            pl.BlockSpec((tq, PACK * FEAT_PAD), tile_idx),        # packed node features
            pl.BlockSpec((None, PACK, tq), seg_idx),              # per-block segment ids
            _const((PACK * FEAT_PAD, pk)), _const((1, pk)), _const((1, pk)), _const((1, pk)),
            _const((MLP_DEPTH, pk, pk)), _const((MLP_DEPTH, 1, pk)),
            _const((MLP_DEPTH, 1, pk)), _const((MLP_DEPTH, 1, pk)),
            _const((pk, pk)),
        ],
        out_specs=pl.BlockSpec((1, s_pad, c_dim), lambda i, j: (i, 0, 0)),
        compiler_params=pltpu.CompilerParams(
            dimension_semantics=("parallel", "arbitrary"),
            vmem_limit_bytes=_vmem_limit_bytes(tile_n, s_pad, hidden)),
    )(x_pk, seg_blk, win_blk, bin_t, gin_t, bein_t,
      wn_blk, bn_t, gn_t, ben_t, a_mean)

    def _full(shape):
        return pl.BlockSpec(shape, lambda i: (0,) * len(shape))

    out = pl.pallas_call(
        _pred_kernel,
        out_shape=jax.ShapeDtypeStruct((b_pad, 1), jnp.float32),
        grid=(1,),
        in_specs=[_full((n_splits, s_pad, c_dim)),
                  _full((PRED_DEPTH, d7, d7)), _full((PRED_DEPTH, 1, d7)),
                  _full((PRED_DEPTH, 1, d7)), _full((PRED_DEPTH, 1, d7)),
                  _full((d7, 1)), _full((1, 1))],
        out_specs=_full((b_pad, 1)),
        compiler_params=pltpu.CompilerParams(dimension_semantics=("arbitrary",)),
    )(partial_pool, params["wp"], params["bp"], bn_scale, bn_shift,
      params["wo"], params["bo"])

    return out[:num_graphs, 0]                                     # .squeeze(-1)


# --------------------------------------------------------------------------------------
# Pure-JAX f32 reference of the PyTorch forward (for validation)
# --------------------------------------------------------------------------------------
def _layer_norm_ref(h, gamma, beta):
    mu = jnp.mean(h, axis=-1, keepdims=True)
    var = jnp.mean((h - mu) ** 2, axis=-1, keepdims=True)
    return (h - mu) * jax.lax.rsqrt(var + LN_EPS) * gamma + beta


def gnn_reference(x, batch, num_graphs, params):
    h = jnp.tanh(_layer_norm_ref(x @ params["w_in"] + params["b_in"],
                                 params["g_in"], params["be_in"]))
    for _ in range(N_GRAPH_ITERS):
        h0 = h
        for l in range(MLP_DEPTH):
            h = jnp.tanh(_layer_norm_ref(h @ params["wn"][l] + params["bn"][l],
                                         params["gn"][l], params["ben"][l]))
        h = h + h0
    seg = batch.astype(jnp.int32) * N_LAYERS + x[:, 4].astype(jnp.int32)
    s_dim = num_graphs * N_LAYERS
    sums = jnp.zeros((s_dim, h.shape[1]), jnp.float32).at[seg].add(h)
    cnts = jnp.zeros((s_dim,), jnp.float32).at[seg].add(1.0)
    means = sums / jnp.maximum(cnts, 1.0)[:, None]
    z = means.reshape(num_graphs, N_LAYERS * h.shape[1])
    for l in range(PRED_DEPTH):
        z = z @ params["wp"][l] + params["bp"][l]
        z = (z - params["bnm"][l]) * jax.lax.rsqrt(params["bnv"][l] + BN_EPS) \
            * params["bng"][l] + params["bnb"][l]
        z = jnp.tanh(z)
    return (z @ params["wo"] + params["bo"])[:, 0]


def init_params(key, input_dim=INPUT_DIM, hidden=HIDDEN):
    """Deterministic synthetic parameters (PyTorch Linear-style uniform(+-1/sqrt(fan_in)))."""
    keys = jax.random.split(key, 10)

    def lin(k, fan_in, shape):
        bound = 1.0 / float(fan_in) ** 0.5
        return jax.random.uniform(k, shape, jnp.float32, -bound, bound)

    d7 = N_LAYERS * hidden
    return dict(
        # input_network: Linear(input_dim, hidden) + LayerNorm(hidden) + Tanh
        w_in=lin(keys[0], input_dim, (input_dim, hidden)),
        b_in=lin(keys[1], input_dim, (1, hidden)),
        g_in=jnp.ones((1, hidden), jnp.float32),
        be_in=jnp.zeros((1, hidden), jnp.float32),
        # node_network: 4x [Linear(hidden, hidden) + LayerNorm(hidden) + Tanh]
        wn=lin(keys[2], hidden, (MLP_DEPTH, hidden, hidden)),
        bn=lin(keys[3], hidden, (MLP_DEPTH, 1, hidden)),
        gn=jnp.ones((MLP_DEPTH, 1, hidden), jnp.float32),
        ben=jnp.zeros((MLP_DEPTH, 1, hidden), jnp.float32),
        # graph_pred_mlp: 3x [Linear(7H,7H) + BatchNorm1d(7H) + Tanh] + Linear(7H,1)
        wp=lin(keys[4], d7, (PRED_DEPTH, d7, d7)),
        bp=lin(keys[5], d7, (PRED_DEPTH, 1, d7)),
        bng=jnp.ones((PRED_DEPTH, 1, d7), jnp.float32),
        bnb=jnp.zeros((PRED_DEPTH, 1, d7), jnp.float32),
        bnm=0.1 * jax.random.normal(keys[8], (PRED_DEPTH, 1, d7), jnp.float32),
        bnv=jax.random.uniform(keys[9], (PRED_DEPTH, 1, d7), jnp.float32, 0.5, 1.5),
        wo=lin(keys[6], d7, (d7, 1)),
        bo=lin(keys[7], d7, (1, 1)),
    )


if __name__ == "__main__":
    key = jax.random.PRNGKey(0)
    k_feat, k_params, k_feat2, k_layer2, k_batch2 = jax.random.split(key, 5)
    params = init_params(k_params)

    # --- test 1: small graph batch, single tile / single split ------------------------
    num_graphs = 2
    nodes_per_layer = 8
    n_nodes = num_graphs * N_LAYERS * nodes_per_layer              # 112 nodes total
    feats = jax.random.normal(k_feat, (n_nodes, INPUT_DIM), jnp.float32)
    layer_id = jnp.tile(jnp.repeat(jnp.arange(N_LAYERS), nodes_per_layer), num_graphs)
    feats = feats.at[:, 4].set(layer_id.astype(jnp.float32))       # col 4 = detector layer
    batch = jnp.repeat(jnp.arange(num_graphs, dtype=jnp.int32),
                       N_LAYERS * nodes_per_layer)

    fwd = jax.jit(functools.partial(gnn_graph_classifier, num_graphs=num_graphs))
    out = jax.block_until_ready(fwd(feats, batch, params=params))
    assert out.shape == (num_graphs,)
    assert bool(jnp.all(jnp.isfinite(out)))
    ref = gnn_reference(feats, batch, num_graphs, params)
    assert jnp.allclose(out, ref, rtol=5e-2, atol=5e-2), (out, ref)

    # --- test 2: multi-tile, 2-way split (exercises parallel axis, accumulation, padding)
    num_graphs2 = 3
    n_nodes2 = 333
    feats2 = jax.random.normal(k_feat2, (n_nodes2, INPUT_DIM), jnp.float32)
    layer2 = jax.random.randint(k_layer2, (n_nodes2,), 0, N_LAYERS)
    feats2 = feats2.at[:, 4].set(layer2.astype(jnp.float32))
    batch2 = jnp.sort(jax.random.randint(k_batch2, (n_nodes2,), 0, num_graphs2)).astype(jnp.int32)

    fwd2 = jax.jit(functools.partial(gnn_graph_classifier, num_graphs=num_graphs2,
                                     tile_n=128))
    out2 = jax.block_until_ready(fwd2(feats2, batch2, params=params))
    assert out2.shape == (num_graphs2,)
    ref2 = gnn_reference(feats2, batch2, num_graphs2, params)
    assert jnp.allclose(out2, ref2, rtol=5e-2, atol=5e-2), (out2, ref2)

    print("KERNEL_OK")
</pallas_src>

<mosaic_0001>
module attributes {stable_mosaic.version = 11 : i64} {
  func.func @_pred_kernel(%arg0: i32, %arg1: memref<1x56x33xf32, #tpu.memory_space<vmem>>, %arg2: memref<3x224x224xf32, #tpu.memory_space<vmem>>, %arg3: memref<3x1x224xf32, #tpu.memory_space<vmem>>, %arg4: memref<3x1x224xf32, #tpu.memory_space<vmem>>, %arg5: memref<3x1x224xf32, #tpu.memory_space<vmem>>, %arg6: memref<224x1xf32, #tpu.memory_space<vmem>>, %arg7: memref<1x1xf32, #tpu.memory_space<vmem>>, %arg8: memref<8x1xf32, #tpu.memory_space<vmem>>) attributes {dimension_semantics = [#tpu.dimension_semantics<arbitrary>], iteration_bounds = array<i64: 1>, scalar_prefetch = 0 : i64, scratch_operands = 0 : i64, tpu.core_type = #tpu.core_type<tc>, window_params = [{pipeline_mode = #tpu.pipeline_mode<synchronous>, transform_indices = @transform_0, window_bounds = array<i64: 1, 56, 33>}, {pipeline_mode = #tpu.pipeline_mode<synchronous>, transform_indices = @transform_1, window_bounds = array<i64: 3, 224, 224>}, {pipeline_mode = #tpu.pipeline_mode<synchronous>, transform_indices = @transform_2, window_bounds = array<i64: 3, 1, 224>}, {pipeline_mode = #tpu.pipeline_mode<synchronous>, transform_indices = @transform_3, window_bounds = array<i64: 3, 1, 224>}, {pipeline_mode = #tpu.pipeline_mode<synchronous>, transform_indices = @transform_4, window_bounds = array<i64: 3, 1, 224>}, {pipeline_mode = #tpu.pipeline_mode<synchronous>, transform_indices = @transform_5, window_bounds = array<i64: 224, 1>}, {pipeline_mode = #tpu.pipeline_mode<synchronous>, transform_indices = @transform_6, window_bounds = array<i64: 1, 1>}, {pipeline_mode = #tpu.pipeline_mode<synchronous>, transform_indices = @transform_7, window_bounds = array<i64: 8, 1>}]} {
    %c0 = arith.constant 0 : index
    %c0_0 = arith.constant 0 : index
    %c0_1 = arith.constant 0 : index
    %0 = vector.load %arg1[%c0, %c0_0, %c0_1] : memref<1x56x33xf32, #tpu.memory_space<vmem>>, vector<1x56x33xf32>
    %cst = arith.constant dense<0.000000e+00> : vector<56x33xf32>
    %1 = vector.multi_reduction <add>, %0, %cst [0] : vector<1x56x33xf32> to vector<56x33xf32>
    %c0_2 = arith.constant 0 : index
    %c0_3 = arith.constant 0 : index
    %c0_4 = arith.constant 0 : index
    %2 = vector.load %arg2[%c0_2, %c0_3, %c0_4] : memref<3x224x224xf32, #tpu.memory_space<vmem>>, vector<1x224x224xf32>
    %3 = vector.shape_cast %2 : vector<1x224x224xf32> to vector<224x224xf32>
    %cst_5 = arith.constant 0.000000e+00 : f32
    %4 = vector.broadcast %cst_5 : f32 to vector<8x224xf32>
    %5 = vector.extract_strided_slice %1 {offsets = [0, 0], sizes = [8, 33], strides = [1, 1]} : vector<56x33xf32> to vector<8x33xf32>
    %6 = vector.extract_strided_slice %5 {offsets = [0, 0], sizes = [8, 32], strides = [1, 1]} : vector<8x33xf32> to vector<8x32xf32>
    %7 = vector.extract_strided_slice %5 {offsets = [0, 32], sizes = [8, 1], strides = [1, 1]} : vector<8x33xf32> to vector<8x1xf32>
    %cst_6 = arith.constant 1.000000e+00 : f32
    %8 = vector.broadcast %cst_6 : f32 to vector<8x1xf32>
    %9 = arith.maximumf %7, %8 : vector<8x1xf32>
    %10 = vector.broadcast %9 : vector<8x1xf32> to vector<8x32xf32>
    %11 = arith.divf %6, %10 : vector<8x32xf32>
    %12 = vector.extract_strided_slice %3 {offsets = [0, 0], sizes = [32, 224], strides = [1, 1]} : vector<224x224xf32> to vector<32x224xf32>
    %cst_7 = arith.constant dense<0.000000e+00> : vector<8x224xf32>
    %13 = tpu.matmul %11, %12, %cst_7 {dimension_numbers = #tpu.dot_dimension_numbers<[1], [0], [0], [1], [0, 0, 1, 1], [], []>} : vector<8x32xf32>, vector<32x224xf32>, vector<8x224xf32> -> vector<8x224xf32>
    %14 = arith.addf %4, %13 : vector<8x224xf32>
    %15 = vector.extract_strided_slice %1 {offsets = [8, 0], sizes = [8, 33], strides = [1, 1]} : vector<56x33xf32> to vector<8x33xf32>
    %16 = vector.extract_strided_slice %15 {offsets = [0, 0], sizes = [8, 32], strides = [1, 1]} : vector<8x33xf32> to vector<8x32xf32>
    %17 = vector.extract_strided_slice %15 {offsets = [0, 32], sizes = [8, 1], strides = [1, 1]} : vector<8x33xf32> to vector<8x1xf32>
    %cst_8 = arith.constant 1.000000e+00 : f32
    %18 = vector.broadcast %cst_8 : f32 to vector<8x1xf32>
    %19 = arith.maximumf %17, %18 : vector<8x1xf32>
    %20 = vector.broadcast %19 : vector<8x1xf32> to vector<8x32xf32>
    %21 = arith.divf %16, %20 : vector<8x32xf32>
    %22 = vector.extract_strided_slice %3 {offsets = [32, 0], sizes = [32, 224], strides = [1, 1]} : vector<224x224xf32> to vector<32x224xf32>
    %cst_9 = arith.constant dense<0.000000e+00> : vector<8x224xf32>
    %23 = tpu.matmul %21, %22, %cst_9 {dimension_numbers = #tpu.dot_dimension_numbers<[1], [0], [0], [1], [0, 0, 1, 1], [], []>} : vector<8x32xf32>, vector<32x224xf32>, vector<8x224xf32> -> vector<8x224xf32>
    %24 = arith.addf %14, %23 : vector<8x224xf32>
    %25 = vector.extract_strided_slice %1 {offsets = [16, 0], sizes = [8, 33], strides = [1, 1]} : vector<56x33xf32> to vector<8x33xf32>
    %26 = vector.extract_strided_slice %25 {offsets = [0, 0], sizes = [8, 32], strides = [1, 1]} : vector<8x33xf32> to vector<8x32xf32>
    %27 = vector.extract_strided_slice %25 {offsets = [0, 32], sizes = [8, 1], strides = [1, 1]} : vector<8x33xf32> to vector<8x1xf32>
    %cst_10 = arith.constant 1.000000e+00 : f32
    %28 = vector.broadcast %cst_10 : f32 to vector<8x1xf32>
    %29 = arith.maximumf %27, %28 : vector<8x1xf32>
    %30 = vector.broadcast %29 : vector<8x1xf32> to vector<8x32xf32>
    %31 = arith.divf %26, %30 : vector<8x32xf32>
    %32 = vector.extract_strided_slice %3 {offsets = [64, 0], sizes = [32, 224], strides = [1, 1]} : vector<224x224xf32> to vector<32x224xf32>
    %cst_11 = arith.constant dense<0.000000e+00> : vector<8x224xf32>
    %33 = tpu.matmul %31, %32, %cst_11 {dimension_numbers = #tpu.dot_dimension_numbers<[1], [0], [0], [1], [0, 0, 1, 1], [], []>} : vector<8x32xf32>, vector<32x224xf32>, vector<8x224xf32> -> vector<8x224xf32>
    %34 = arith.addf %24, %33 : vector<8x224xf32>
    %35 = vector.extract_strided_slice %1 {offsets = [24, 0], sizes = [8, 33], strides = [1, 1]} : vector<56x33xf32> to vector<8x33xf32>
    %36 = vector.extract_strided_slice %35 {offsets = [0, 0], sizes = [8, 32], strides = [1, 1]} : vector<8x33xf32> to vector<8x32xf32>
    %37 = vector.extract_strided_slice %35 {offsets = [0, 32], sizes = [8, 1], strides = [1, 1]} : vector<8x33xf32> to vector<8x1xf32>
    %cst_12 = arith.constant 1.000000e+00 : f32
    %38 = vector.broadcast %cst_12 : f32 to vector<8x1xf32>
    %39 = arith.maximumf %37, %38 : vector<8x1xf32>
    %40 = vector.broadcast %39 : vector<8x1xf32> to vector<8x32xf32>
    %41 = arith.divf %36, %40 : vector<8x32xf32>
    %42 = vector.extract_strided_slice %3 {offsets = [96, 0], sizes = [32, 224], strides = [1, 1]} : vector<224x224xf32> to vector<32x224xf32>
    %cst_13 = arith.constant dense<0.000000e+00> : vector<8x224xf32>
    %43 = tpu.matmul %41, %42, %cst_13 {dimension_numbers = #tpu.dot_dimension_numbers<[1], [0], [0], [1], [0, 0, 1, 1], [], []>} : vector<8x32xf32>, vector<32x224xf32>, vector<8x224xf32> -> vector<8x224xf32>
    %44 = arith.addf %34, %43 : vector<8x224xf32>
    %45 = vector.extract_strided_slice %1 {offsets = [32, 0], sizes = [8, 33], strides = [1, 1]} : vector<56x33xf32> to vector<8x33xf32>
    %46 = vector.extract_strided_slice %45 {offsets = [0, 0], sizes = [8, 32], strides = [1, 1]} : vector<8x33xf32> to vector<8x32xf32>
    %47 = vector.extract_strided_slice %45 {offsets = [0, 32], sizes = [8, 1], strides = [1, 1]} : vector<8x33xf32> to vector<8x1xf32>
    %cst_14 = arith.constant 1.000000e+00 : f32
    %48 = vector.broadcast %cst_14 : f32 to vector<8x1xf32>
    %49 = arith.maximumf %47, %48 : vector<8x1xf32>
    %50 = vector.broadcast %49 : vector<8x1xf32> to vector<8x32xf32>
    %51 = arith.divf %46, %50 : vector<8x32xf32>
    %52 = vector.extract_strided_slice %3 {offsets = [128, 0], sizes = [32, 224], strides = [1, 1]} : vector<224x224xf32> to vector<32x224xf32>
    %cst_15 = arith.constant dense<0.000000e+00> : vector<8x224xf32>
    %53 = tpu.matmul %51, %52, %cst_15 {dimension_numbers = #tpu.dot_dimension_numbers<[1], [0], [0], [1], [0, 0, 1, 1], [], []>} : vector<8x32xf32>, vector<32x224xf32>, vector<8x224xf32> -> vector<8x224xf32>
    %54 = arith.addf %44, %53 : vector<8x224xf32>
    %55 = vector.extract_strided_slice %1 {offsets = [40, 0], sizes = [8, 33], strides = [1, 1]} : vector<56x33xf32> to vector<8x33xf32>
    %56 = vector.extract_strided_slice %55 {offsets = [0, 0], sizes = [8, 32], strides = [1, 1]} : vector<8x33xf32> to vector<8x32xf32>
    %57 = vector.extract_strided_slice %55 {offsets = [0, 32], sizes = [8, 1], strides = [1, 1]} : vector<8x33xf32> to vector<8x1xf32>
    %cst_16 = arith.constant 1.000000e+00 : f32
    %58 = vector.broadcast %cst_16 : f32 to vector<8x1xf32>
    %59 = arith.maximumf %57, %58 : vector<8x1xf32>
    %60 = vector.broadcast %59 : vector<8x1xf32> to vector<8x32xf32>
    %61 = arith.divf %56, %60 : vector<8x32xf32>
    %62 = vector.extract_strided_slice %3 {offsets = [160, 0], sizes = [32, 224], strides = [1, 1]} : vector<224x224xf32> to vector<32x224xf32>
    %cst_17 = arith.constant dense<0.000000e+00> : vector<8x224xf32>
    %63 = tpu.matmul %61, %62, %cst_17 {dimension_numbers = #tpu.dot_dimension_numbers<[1], [0], [0], [1], [0, 0, 1, 1], [], []>} : vector<8x32xf32>, vector<32x224xf32>, vector<8x224xf32> -> vector<8x224xf32>
    %64 = arith.addf %54, %63 : vector<8x224xf32>
    %65 = vector.extract_strided_slice %1 {offsets = [48, 0], sizes = [8, 33], strides = [1, 1]} : vector<56x33xf32> to vector<8x33xf32>
    %66 = vector.extract_strided_slice %65 {offsets = [0, 0], sizes = [8, 32], strides = [1, 1]} : vector<8x33xf32> to vector<8x32xf32>
    %67 = vector.extract_strided_slice %65 {offsets = [0, 32], sizes = [8, 1], strides = [1, 1]} : vector<8x33xf32> to vector<8x1xf32>
    %cst_18 = arith.constant 1.000000e+00 : f32
    %68 = vector.broadcast %cst_18 : f32 to vector<8x1xf32>
    %69 = arith.maximumf %67, %68 : vector<8x1xf32>
    %70 = vector.broadcast %69 : vector<8x1xf32> to vector<8x32xf32>
    %71 = arith.divf %66, %70 : vector<8x32xf32>
    %72 = vector.extract_strided_slice %3 {offsets = [192, 0], sizes = [32, 224], strides = [1, 1]} : vector<224x224xf32> to vector<32x224xf32>
    %cst_19 = arith.constant dense<0.000000e+00> : vector<8x224xf32>
    %73 = tpu.matmul %71, %72, %cst_19 {dimension_numbers = #tpu.dot_dimension_numbers<[1], [0], [0], [1], [0, 0, 1, 1], [], []>} : vector<8x32xf32>, vector<32x224xf32>, vector<8x224xf32> -> vector<8x224xf32>
    %74 = arith.addf %64, %73 : vector<8x224xf32>
    %c0_20 = arith.constant 0 : index
    %c0_21 = arith.constant 0 : index
    %c0_22 = arith.constant 0 : index
    %75 = vector.load %arg3[%c0_20, %c0_21, %c0_22] : memref<3x1x224xf32, #tpu.memory_space<vmem>>, vector<1x1x224xf32>
    %76 = vector.shape_cast %75 : vector<1x1x224xf32> to vector<1x224xf32>
    %77 = vector.broadcast %76 : vector<1x224xf32> to vector<8x224xf32>
    %78 = arith.addf %74, %77 : vector<8x224xf32>
    %c0_23 = arith.constant 0 : index
    %c0_24 = arith.constant 0 : index
    %c0_25 = arith.constant 0 : index
    %79 = vector.load %arg4[%c0_23, %c0_24, %c0_25] : memref<3x1x224xf32, #tpu.memory_space<vmem>>, vector<1x1x224xf32>
    %80 = vector.shape_cast %79 : vector<1x1x224xf32> to vector<1x224xf32>
    %81 = vector.broadcast %80 : vector<1x224xf32> to vector<8x224xf32>
    %82 = arith.mulf %78, %81 : vector<8x224xf32>
    %c0_26 = arith.constant 0 : index
    %c0_27 = arith.constant 0 : index
    %c0_28 = arith.constant 0 : index
    %83 = vector.load %arg5[%c0_26, %c0_27, %c0_28] : memref<3x1x224xf32, #tpu.memory_space<vmem>>, vector<1x1x224xf32>
    %84 = vector.shape_cast %83 : vector<1x1x224xf32> to vector<1x224xf32>
    %85 = vector.broadcast %84 : vector<1x224xf32> to vector<8x224xf32>
    %86 = arith.addf %82, %85 : vector<8x224xf32>
    %87 = math.tanh %86 : vector<8x224xf32>
    %c1 = arith.constant 1 : index
    %c0_29 = arith.constant 0 : index
    %c0_30 = arith.constant 0 : index
    %88 = vector.load %arg2[%c1, %c0_29, %c0_30] : memref<3x224x224xf32, #tpu.memory_space<vmem>>, vector<1x224x224xf32>
    %89 = vector.shape_cast %88 : vector<1x224x224xf32> to vector<224x224xf32>
    %cst_31 = arith.constant dense<0.000000e+00> : vector<8x224xf32>
    %90 = tpu.matmul %87, %89, %cst_31 {dimension_numbers = #tpu.dot_dimension_numbers<[1], [0], [0], [1], [0, 0, 1, 1], [], []>} : vector<8x224xf32>, vector<224x224xf32>, vector<8x224xf32> -> vector<8x224xf32>
    %c1_32 = arith.constant 1 : index
    %c0_33 = arith.constant 0 : index
    %c0_34 = arith.constant 0 : index
    %91 = vector.load %arg3[%c1_32, %c0_33, %c0_34] : memref<3x1x224xf32, #tpu.memory_space<vmem>>, vector<1x1x224xf32>
    %92 = vector.shape_cast %91 : vector<1x1x224xf32> to vector<1x224xf32>
    %93 = vector.broadcast %92 : vector<1x224xf32> to vector<8x224xf32>
    %94 = arith.addf %90, %93 : vector<8x224xf32>
    %c1_35 = arith.constant 1 : index
    %c0_36 = arith.constant 0 : index
    %c0_37 = arith.constant 0 : index
    %95 = vector.load %arg4[%c1_35, %c0_36, %c0_37] : memref<3x1x224xf32, #tpu.memory_space<vmem>>, vector<1x1x224xf32>
    %96 = vector.shape_cast %95 : vector<1x1x224xf32> to vector<1x224xf32>
    %97 = vector.broadcast %96 : vector<1x224xf32> to vector<8x224xf32>
    %98 = arith.mulf %94, %97 : vector<8x224xf32>
    %c1_38 = arith.constant 1 : index
    %c0_39 = arith.constant 0 : index
    %c0_40 = arith.constant 0 : index
    %99 = vector.load %arg5[%c1_38, %c0_39, %c0_40] : memref<3x1x224xf32, #tpu.memory_space<vmem>>, vector<1x1x224xf32>
    %100 = vector.shape_cast %99 : vector<1x1x224xf32> to vector<1x224xf32>
    %101 = vector.broadcast %100 : vector<1x224xf32> to vector<8x224xf32>
    %102 = arith.addf %98, %101 : vector<8x224xf32>
    %103 = math.tanh %102 : vector<8x224xf32>
    %c2 = arith.constant 2 : index
    %c0_41 = arith.constant 0 : index
    %c0_42 = arith.constant 0 : index
    %104 = vector.load %arg2[%c2, %c0_41, %c0_42] : memref<3x224x224xf32, #tpu.memory_space<vmem>>, vector<1x224x224xf32>
    %105 = vector.shape_cast %104 : vector<1x224x224xf32> to vector<224x224xf32>
    %cst_43 = arith.constant dense<0.000000e+00> : vector<8x224xf32>
    %106 = tpu.matmul %103, %105, %cst_43 {dimension_numbers = #tpu.dot_dimension_numbers<[1], [0], [0], [1], [0, 0, 1, 1], [], []>} : vector<8x224xf32>, vector<224x224xf32>, vector<8x224xf32> -> vector<8x224xf32>
    %c2_44 = arith.constant 2 : index
    %c0_45 = arith.constant 0 : index
    %c0_46 = arith.constant 0 : index
    %107 = vector.load %arg3[%c2_44, %c0_45, %c0_46] : memref<3x1x224xf32, #tpu.memory_space<vmem>>, vector<1x1x224xf32>
    %108 = vector.shape_cast %107 : vector<1x1x224xf32> to vector<1x224xf32>
    %109 = vector.broadcast %108 : vector<1x224xf32> to vector<8x224xf32>
    %110 = arith.addf %106, %109 : vector<8x224xf32>
    %c2_47 = arith.constant 2 : index
    %c0_48 = arith.constant 0 : index
    %c0_49 = arith.constant 0 : index
    %111 = vector.load %arg4[%c2_47, %c0_48, %c0_49] : memref<3x1x224xf32, #tpu.memory_space<vmem>>, vector<1x1x224xf32>
    %112 = vector.shape_cast %111 : vector<1x1x224xf32> to vector<1x224xf32>
    %113 = vector.broadcast %112 : vector<1x224xf32> to vector<8x224xf32>
    %114 = arith.mulf %110, %113 : vector<8x224xf32>
    %c2_50 = arith.constant 2 : index
    %c0_51 = arith.constant 0 : index
    %c0_52 = arith.constant 0 : index
    %115 = vector.load %arg5[%c2_50, %c0_51, %c0_52] : memref<3x1x224xf32, #tpu.memory_space<vmem>>, vector<1x1x224xf32>
    %116 = vector.shape_cast %115 : vector<1x1x224xf32> to vector<1x224xf32>
    %117 = vector.broadcast %116 : vector<1x224xf32> to vector<8x224xf32>
    %118 = arith.addf %114, %117 : vector<8x224xf32>
    %119 = math.tanh %118 : vector<8x224xf32>
    %c0_53 = arith.constant 0 : index
    %c0_54 = arith.constant 0 : index
    %120 = vector.load %arg6[%c0_53, %c0_54] : memref<224x1xf32, #tpu.memory_space<vmem>>, vector<224x1xf32>
    %cst_55 = arith.constant dense<0.000000e+00> : vector<8x1xf32>
    %121 = tpu.matmul %119, %120, %cst_55 {dimension_numbers = #tpu.dot_dimension_numbers<[1], [0], [0], [1], [0, 0, 1, 1], [], []>} : vector<8x224xf32>, vector<224x1xf32>, vector<8x1xf32> -> vector<8x1xf32>
    %c0_56 = arith.constant 0 : index
    %c0_57 = arith.constant 0 : index
    %122 = vector.load %arg7[%c0_56, %c0_57] : memref<1x1xf32, #tpu.memory_space<vmem>>, vector<1x1xf32>
    %123 = vector.broadcast %122 : vector<1x1xf32> to vector<8x1xf32>
    %124 = arith.addf %121, %123 : vector<8x1xf32>
    %c0_58 = arith.constant 0 : index
    %c0_59 = arith.constant 0 : index
    %125 = vector.load %arg8[%c0_58, %c0_59] : memref<8x1xf32, #tpu.memory_space<vmem>>, vector<8x1xf32>
    tpu.vector_store %arg8[%c0_58, %c0_59], %124 {strides = array<i32>} : memref<8x1xf32, #tpu.memory_space<vmem>>, vector<8x1xf32>,
    return
  }
  func.func @transform_0(%arg0: i32) -> (i32, i32, i32) {
    %c0_i32 = arith.constant 0 : i32
    %c0_i32_0 = arith.constant 0 : i32
    %c0_i32_1 = arith.constant 0 : i32
    %c0_i32_2 = arith.constant 0 : i32
    return %c0_i32, %c0_i32_0, %c0_i32_1 : i32, i32, i32
  }
  func.func @transform_1(%arg0: i32) -> (i32, i32, i32) {
    %c0_i32 = arith.constant 0 : i32
    %c0_i32_0 = arith.constant 0 : i32
    %c0_i32_1 = arith.constant 0 : i32
    %c0_i32_2 = arith.constant 0 : i32
    return %c0_i32, %c0_i32_0, %c0_i32_1 : i32, i32, i32
  }
  func.func @transform_2(%arg0: i32) -> (i32, i32, i32) {
    %c0_i32 = arith.constant 0 : i32
    %c0_i32_0 = arith.constant 0 : i32
    %c0_i32_1 = arith.constant 0 : i32
    %c0_i32_2 = arith.constant 0 : i32
    return %c0_i32, %c0_i32_0, %c0_i32_1 : i32, i32, i32
  }
  func.func @transform_3(%arg0: i32) -> (i32, i32, i32) {
    %c0_i32 = arith.constant 0 : i32
    %c0_i32_0 = arith.constant 0 : i32
    %c0_i32_1 = arith.constant 0 : i32
    %c0_i32_2 = arith.constant 0 : i32
    return %c0_i32, %c0_i32_0, %c0_i32_1 : i32, i32, i32
  }
  func.func @transform_4(%arg0: i32) -> (i32, i32, i32) {
    %c0_i32 = arith.constant 0 : i32
    %c0_i32_0 = arith.constant 0 : i32
    %c0_i32_1 = arith.constant 0 : i32
    %c0_i32_2 = arith.constant 0 : i32
    return %c0_i32, %c0_i32_0, %c0_i32_1 : i32, i32, i32
  }
  func.func @transform_5(%arg0: i32) -> (i32, i32) {
    %c0_i32 = arith.constant 0 : i32
    %c0_i32_0 = arith.constant 0 : i32
    %c0_i32_1 = arith.constant 0 : i32
    return %c0_i32, %c0_i32_0 : i32, i32
  }
  func.func @transform_6(%arg0: i32) -> (i32, i32) {
    %c0_i32 = arith.constant 0 : i32
    %c0_i32_0 = arith.constant 0 : i32
    %c0_i32_1 = arith.constant 0 : i32
    return %c0_i32, %c0_i32_0 : i32, i32
  }
  func.func @transform_7(%arg0: i32) -> (i32, i32) {
    %c0_i32 = arith.constant 0 : i32
    %c0_i32_0 = arith.constant 0 : i32
    %c0_i32_1 = arith.constant 0 : i32
    return %c0_i32, %c0_i32_0 : i32, i32
  }
}

module attributes {stable_mosaic.version = 11 : i64} {
  func.func @_node_pool_kernel(%arg0: i32, %arg1: i32, %arg2: memref<32x32xf32, #tpu.memory_space<vmem>>, %arg3: memref<1x4x32xi32, #tpu.memory_space<vmem>>, %arg4: memref<32x128xf32, #tpu.memory_space<vmem>>, %arg5: memref<1x128xf32, #tpu.memory_space<vmem>>, %arg6: memref<1x128xf32, #tpu.memory_space<vmem>>, %arg7: memref<1x128xf32, #tpu.memory_space<vmem>>, %arg8: memref<4x128x128xf32, #tpu.memory_space<vmem>>, %arg9: memref<4x1x128xf32, #tpu.memory_space<vmem>>, %arg10: memref<4x1x128xf32, #tpu.memory_space<vmem>>, %arg11: memref<4x1x128xf32, #tpu.memory_space<vmem>>, %arg12: memref<128x128xf32, #tpu.memory_space<vmem>>, %arg13: memref<1x56x33xf32, #tpu.memory_space<vmem>>) attributes {dimension_semantics = [#tpu.dimension_semantics<parallel>, #tpu.dimension_semantics<arbitrary>], iteration_bounds = array<i64: 1, 1>, scalar_prefetch = 0 : i64, scratch_operands = 0 : i64, tpu.core_type = #tpu.core_type<tc>, window_params = [{transform_indices = @transform_0, window_bounds = array<i64: 32, 32>}, {transform_indices = @transform_1, window_bounds = array<i64: 1, 4, 32>}, {pipeline_mode = #tpu.pipeline_mode<synchronous>, transform_indices = @transform_2, window_bounds = array<i64: 32, 128>}, {pipeline_mode = #tpu.pipeline_mode<synchronous>, transform_indices = @transform_3, window_bounds = array<i64: 1, 128>}, {pipeline_mode = #tpu.pipeline_mode<synchronous>, transform_indices = @transform_4, window_bounds = array<i64: 1, 128>}, {pipeline_mode = #tpu.pipeline_mode<synchronous>, transform_indices = @transform_5, window_bounds = array<i64: 1, 128>}, {pipeline_mode = #tpu.pipeline_mode<synchronous>, transform_indices = @transform_6, window_bounds = array<i64: 4, 128, 128>}, {pipeline_mode = #tpu.pipeline_mode<synchronous>, transform_indices = @transform_7, window_bounds = array<i64: 4, 1, 128>}, {pipeline_mode = #tpu.pipeline_mode<synchronous>, transform_indices = @transform_8, window_bounds = array<i64: 4, 1, 128>}, {pipeline_mode = #tpu.pipeline_mode<synchronous>, transform_indices = @transform_9, window_bounds = array<i64: 4, 1, 128>}, {pipeline_mode = #tpu.pipeline_mode<synchronous>, transform_indices = @transform_10, window_bounds = array<i64: 128, 128>}, {transform_indices = @transform_11, window_bounds = array<i64: 1, 56, 33>}]} {
    %c0_i32 = arith.constant 0 : i32
    %0 = arith.cmpi eq, %arg1, %c0_i32 : i32
    %1 = arith.extui %0 : i1 to i32
    %c0_i32_0 = arith.constant 0 : i32
    %2 = arith.cmpi ne, %1, %c0_i32_0 : i32
    scf.if %2 {
      %cst_232 = arith.constant 0.000000e+00 : f32
      %413 = vector.broadcast %cst_232 : f32 to vector<1x56x33xf32>
      %c0_233 = arith.constant 0 : index
      %c0_234 = arith.constant 0 : index
      %c0_235 = arith.constant 0 : index
      %414 = vector.load %arg13[%c0_233, %c0_234, %c0_235] : memref<1x56x33xf32, #tpu.memory_space<vmem>>, vector<1x56x33xf32>
      tpu.vector_store %arg13[%c0_233, %c0_234, %c0_235], %413 {strides = array<i32>} : memref<1x56x33xf32, #tpu.memory_space<vmem>>, vector<1x56x33xf32>,
    } else {
    }
    %c0 = arith.constant 0 : index
    %c0_1 = arith.constant 0 : index
    %3 = vector.load %arg12[%c0, %c0_1] : memref<128x128xf32, #tpu.memory_space<vmem>>, vector<128x128xf32>
    %c0_2 = arith.constant 0 : index
    %c0_3 = arith.constant 0 : index
    %4 = vector.load %arg2[%c0_2, %c0_3] : memref<32x32xf32, #tpu.memory_space<vmem>>, vector<32x32xf32>
    %c0_4 = arith.constant 0 : index
    %c0_5 = arith.constant 0 : index
    %5 = vector.load %arg4[%c0_4, %c0_5] : memref<32x128xf32, #tpu.memory_space<vmem>>, vector<32x128xf32>
    %cst = arith.constant dense<0.000000e+00> : vector<32x128xf32>
    %6 = tpu.matmul %4, %5, %cst {dimension_numbers = #tpu.dot_dimension_numbers<[1], [0], [0], [1], [0, 0, 1, 1], [], []>} : vector<32x32xf32>, vector<32x128xf32>, vector<32x128xf32> -> vector<32x128xf32>
    %c0_6 = arith.constant 0 : index
    %c0_7 = arith.constant 0 : index
    %7 = vector.load %arg5[%c0_6, %c0_7] : memref<1x128xf32, #tpu.memory_space<vmem>>, vector<1x128xf32>
    %8 = vector.broadcast %7 : vector<1x128xf32> to vector<32x128xf32>
    %9 = arith.addf %6, %8 : vector<32x128xf32>
    %c0_8 = arith.constant 0 : index
    %c0_9 = arith.constant 0 : index
    %10 = vector.load %arg6[%c0_8, %c0_9] : memref<1x128xf32, #tpu.memory_space<vmem>>, vector<1x128xf32>
    %c0_10 = arith.constant 0 : index
    %c0_11 = arith.constant 0 : index
    %11 = vector.load %arg7[%c0_10, %c0_11] : memref<1x128xf32, #tpu.memory_space<vmem>>, vector<1x128xf32>
    %cst_12 = arith.constant dense<0.000000e+00> : vector<32x128xf32>
    %12 = tpu.matmul %9, %3, %cst_12 {dimension_numbers = #tpu.dot_dimension_numbers<[1], [0], [0], [1], [0, 0, 1, 1], [], []>} : vector<32x128xf32>, vector<128x128xf32>, vector<32x128xf32> -> vector<32x128xf32>
    %13 = arith.mulf %9, %9 : vector<32x128xf32>
    %cst_13 = arith.constant dense<0.000000e+00> : vector<32x128xf32>
    %14 = tpu.matmul %13, %3, %cst_13 {dimension_numbers = #tpu.dot_dimension_numbers<[1], [0], [0], [1], [0, 0, 1, 1], [], []>} : vector<32x128xf32>, vector<128x128xf32>, vector<32x128xf32> -> vector<32x128xf32>
    %15 = arith.mulf %12, %12 : vector<32x128xf32>
    %16 = arith.subf %14, %15 : vector<32x128xf32>
    %cst_14 = arith.constant 0.000000e+00 : f32
    %17 = vector.broadcast %cst_14 : f32 to vector<32x128xf32>
    %18 = arith.maximumf %16, %17 : vector<32x128xf32>
    %19 = arith.subf %9, %12 : vector<32x128xf32>
    %cst_15 = arith.constant 9.99999974E-6 : f32
    %20 = vector.broadcast %cst_15 : f32 to vector<32x128xf32>
    %21 = arith.addf %18, %20 : vector<32x128xf32>
    %22 = math.rsqrt %21 : vector<32x128xf32>
    %23 = arith.mulf %19, %22 : vector<32x128xf32>
    %24 = vector.broadcast %10 : vector<1x128xf32> to vector<32x128xf32>
    %25 = arith.mulf %23, %24 : vector<32x128xf32>
    %26 = vector.broadcast %11 : vector<1x128xf32> to vector<32x128xf32>
    %27 = arith.addf %25, %26 : vector<32x128xf32>
    %28 = math.tanh %27 : vector<32x128xf32>
    %c0_16 = arith.constant 0 : index
    %c0_17 = arith.constant 0 : index
    %c0_18 = arith.constant 0 : index
    %29 = vector.load %arg8[%c0_16, %c0_17, %c0_18] : memref<4x128x128xf32, #tpu.memory_space<vmem>>, vector<1x128x128xf32>
    %30 = vector.shape_cast %29 : vector<1x128x128xf32> to vector<128x128xf32>
    %cst_19 = arith.constant dense<0.000000e+00> : vector<32x128xf32>
    %31 = tpu.matmul %28, %30, %cst_19 {dimension_numbers = #tpu.dot_dimension_numbers<[1], [0], [0], [1], [0, 0, 1, 1], [], []>} : vector<32x128xf32>, vector<128x128xf32>, vector<32x128xf32> -> vector<32x128xf32>
    %c0_20 = arith.constant 0 : index
    %c0_21 = arith.constant 0 : index
    %c0_22 = arith.constant 0 : index
    %32 = vector.load %arg9[%c0_20, %c0_21, %c0_22] : memref<4x1x128xf32, #tpu.memory_space<vmem>>, vector<1x1x128xf32>
    %33 = vector.shape_cast %32 : vector<1x1x128xf32> to vector<1x128xf32>
    %34 = vector.broadcast %33 : vector<1x128xf32> to vector<32x128xf32>
    %35 = arith.addf %31, %34 : vector<32x128xf32>
    %c0_23 = arith.constant 0 : index
    %c0_24 = arith.constant 0 : index
    %c0_25 = arith.constant 0 : index
    %36 = vector.load %arg10[%c0_23, %c0_24, %c0_25] : memref<4x1x128xf32, #tpu.memory_space<vmem>>, vector<1x1x128xf32>
    %37 = vector.shape_cast %36 : vector<1x1x128xf32> to vector<1x128xf32>
    %c0_26 = arith.constant 0 : index
    %c0_27 = arith.constant 0 : index
    %c0_28 = arith.constant 0 : index
    %38 = vector.load %arg11[%c0_26, %c0_27, %c0_28] : memref<4x1x128xf32, #tpu.memory_space<vmem>>, vector<1x1x128xf32>
    %39 = vector.shape_cast %38 : vector<1x1x128xf32> to vector<1x128xf32>
    %cst_29 = arith.constant dense<0.000000e+00> : vector<32x128xf32>
    %40 = tpu.matmul %35, %3, %cst_29 {dimension_numbers = #tpu.dot_dimension_numbers<[1], [0], [0], [1], [0, 0, 1, 1], [], []>} : vector<32x128xf32>, vector<128x128xf32>, vector<32x128xf32> -> vector<32x128xf32>
    %41 = arith.mulf %35, %35 : vector<32x128xf32>
    %cst_30 = arith.constant dense<0.000000e+00> : vector<32x128xf32>
    %42 = tpu.matmul %41, %3, %cst_30 {dimension_numbers = #tpu.dot_dimension_numbers<[1], [0], [0], [1], [0, 0, 1, 1], [], []>} : vector<32x128xf32>, vector<128x128xf32>, vector<32x128xf32> -> vector<32x128xf32>
    %43 = arith.mulf %40, %40 : vector<32x128xf32>
    %44 = arith.subf %42, %43 : vector<32x128xf32>
    %cst_31 = arith.constant 0.000000e+00 : f32
    %45 = vector.broadcast %cst_31 : f32 to vector<32x128xf32>
    %46 = arith.maximumf %44, %45 : vector<32x128xf32>
    %47 = arith.subf %35, %40 : vector<32x128xf32>
    %cst_32 = arith.constant 9.99999974E-6 : f32
    %48 = vector.broadcast %cst_32 : f32 to vector<32x128xf32>
    %49 = arith.addf %46, %48 : vector<32x128xf32>
    %50 = math.rsqrt %49 : vector<32x128xf32>
    %51 = arith.mulf %47, %50 : vector<32x128xf32>
    %52 = vector.broadcast %37 : vector<1x128xf32> to vector<32x128xf32>
    %53 = arith.mulf %51, %52 : vector<32x128xf32>
    %54 = vector.broadcast %39 : vector<1x128xf32> to vector<32x128xf32>
    %55 = arith.addf %53, %54 : vector<32x128xf32>
    %56 = math.tanh %55 : vector<32x128xf32>
    %c1 = arith.constant 1 : index
    %c0_33 = arith.constant 0 : index
    %c0_34 = arith.constant 0 : index
    %57 = vector.load %arg8[%c1, %c0_33, %c0_34] : memref<4x128x128xf32, #tpu.memory_space<vmem>>, vector<1x128x128xf32>
    %58 = vector.shape_cast %57 : vector<1x128x128xf32> to vector<128x128xf32>
    %cst_35 = arith.constant dense<0.000000e+00> : vector<32x128xf32>
    %59 = tpu.matmul %56, %58, %cst_35 {dimension_numbers = #tpu.dot_dimension_numbers<[1], [0], [0], [1], [0, 0, 1, 1], [], []>} : vector<32x128xf32>, vector<128x128xf32>, vector<32x128xf32> -> vector<32x128xf32>
    %c1_36 = arith.constant 1 : index
    %c0_37 = arith.constant 0 : index
    %c0_38 = arith.constant 0 : index
    %60 = vector.load %arg9[%c1_36, %c0_37, %c0_38] : memref<4x1x128xf32, #tpu.memory_space<vmem>>, vector<1x1x128xf32>
    %61 = vector.shape_cast %60 : vector<1x1x128xf32> to vector<1x128xf32>
    %62 = vector.broadcast %61 : vector<1x128xf32> to vector<32x128xf32>
    %63 = arith.addf %59, %62 : vector<32x128xf32>
    %c1_39 = arith.constant 1 : index
    %c0_40 = arith.constant 0 : index
    %c0_41 = arith.constant 0 : index
    %64 = vector.load %arg10[%c1_39, %c0_40, %c0_41] : memref<4x1x128xf32, #tpu.memory_space<vmem>>, vector<1x1x128xf32>
    %65 = vector.shape_cast %64 : vector<1x1x128xf32> to vector<1x128xf32>
    %c1_42 = arith.constant 1 : index
    %c0_43 = arith.constant 0 : index
    %c0_44 = arith.constant 0 : index
    %66 = vector.load %arg11[%c1_42, %c0_43, %c0_44] : memref<4x1x128xf32, #tpu.memory_space<vmem>>, vector<1x1x128xf32>
    %67 = vector.shape_cast %66 : vector<1x1x128xf32> to vector<1x128xf32>
    %cst_45 = arith.constant dense<0.000000e+00> : vector<32x128xf32>
    %68 = tpu.matmul %63, %3, %cst_45 {dimension_numbers = #tpu.dot_dimension_numbers<[1], [0], [0], [1], [0, 0, 1, 1], [], []>} : vector<32x128xf32>, vector<128x128xf32>, vector<32x128xf32> -> vector<32x128xf32>
    %69 = arith.mulf %63, %63 : vector<32x128xf32>
    %cst_46 = arith.constant dense<0.000000e+00> : vector<32x128xf32>
    %70 = tpu.matmul %69, %3, %cst_46 {dimension_numbers = #tpu.dot_dimension_numbers<[1], [0], [0], [1], [0, 0, 1, 1], [], []>} : vector<32x128xf32>, vector<128x128xf32>, vector<32x128xf32> -> vector<32x128xf32>
    %71 = arith.mulf %68, %68 : vector<32x128xf32>
    %72 = arith.subf %70, %71 : vector<32x128xf32>
    %cst_47 = arith.constant 0.000000e+00 : f32
    %73 = vector.broadcast %cst_47 : f32 to vector<32x128xf32>
    %74 = arith.maximumf %72, %73 : vector<32x128xf32>
    %75 = arith.subf %63, %68 : vector<32x128xf32>
    %cst_48 = arith.constant 9.99999974E-6 : f32
    %76 = vector.broadcast %cst_48 : f32 to vector<32x128xf32>
    %77 = arith.addf %74, %76 : vector<32x128xf32>
    %78 = math.rsqrt %77 : vector<32x128xf32>
    %79 = arith.mulf %75, %78 : vector<32x128xf32>
    %80 = vector.broadcast %65 : vector<1x128xf32> to vector<32x128xf32>
    %81 = arith.mulf %79, %80 : vector<32x128xf32>
    %82 = vector.broadcast %67 : vector<1x128xf32> to vector<32x128xf32>
    %83 = arith.addf %81, %82 : vector<32x128xf32>
    %84 = math.tanh %83 : vector<32x128xf32>
    %c2 = arith.constant 2 : index
    %c0_49 = arith.constant 0 : index
    %c0_50 = arith.constant 0 : index
    %85 = vector.load %arg8[%c2, %c0_49, %c0_50] : memref<4x128x128xf32, #tpu.memory_space<vmem>>, vector<1x128x128xf32>
    %86 = vector.shape_cast %85 : vector<1x128x128xf32> to vector<128x128xf32>
    %cst_51 = arith.constant dense<0.000000e+00> : vector<32x128xf32>
    %87 = tpu.matmul %84, %86, %cst_51 {dimension_numbers = #tpu.dot_dimension_numbers<[1], [0], [0], [1], [0, 0, 1, 1], [], []>} : vector<32x128xf32>, vector<128x128xf32>, vector<32x128xf32> -> vector<32x128xf32>
    %c2_52 = arith.constant 2 : index
    %c0_53 = arith.constant 0 : index
    %c0_54 = arith.constant 0 : index
    %88 = vector.load %arg9[%c2_52, %c0_53, %c0_54] : memref<4x1x128xf32, #tpu.memory_space<vmem>>, vector<1x1x128xf32>
    %89 = vector.shape_cast %88 : vector<1x1x128xf32> to vector<1x128xf32>
    %90 = vector.broadcast %89 : vector<1x128xf32> to vector<32x128xf32>
    %91 = arith.addf %87, %90 : vector<32x128xf32>
    %c2_55 = arith.constant 2 : index
    %c0_56 = arith.constant 0 : index
    %c0_57 = arith.constant 0 : index
    %92 = vector.load %arg10[%c2_55, %c0_56, %c0_57] : memref<4x1x128xf32, #tpu.memory_space<vmem>>, vector<1x1x128xf32>
    %93 = vector.shape_cast %92 : vector<1x1x128xf32> to vector<1x128xf32>
    %c2_58 = arith.constant 2 : index
    %c0_59 = arith.constant 0 : index
    %c0_60 = arith.constant 0 : index
    %94 = vector.load %arg11[%c2_58, %c0_59, %c0_60] : memref<4x1x128xf32, #tpu.memory_space<vmem>>, vector<1x1x128xf32>
    %95 = vector.shape_cast %94 : vector<1x1x128xf32> to vector<1x128xf32>
    %cst_61 = arith.constant dense<0.000000e+00> : vector<32x128xf32>
    %96 = tpu.matmul %91, %3, %cst_61 {dimension_numbers = #tpu.dot_dimension_numbers<[1], [0], [0], [1], [0, 0, 1, 1], [], []>} : vector<32x128xf32>, vector<128x128xf32>, vector<32x128xf32> -> vector<32x128xf32>
    %97 = arith.mulf %91, %91 : vector<32x128xf32>
    %cst_62 = arith.constant dense<0.000000e+00> : vector<32x128xf32>
    %98 = tpu.matmul %97, %3, %cst_62 {dimension_numbers = #tpu.dot_dimension_numbers<[1], [0], [0], [1], [0, 0, 1, 1], [], []>} : vector<32x128xf32>, vector<128x128xf32>, vector<32x128xf32> -> vector<32x128xf32>
    %99 = arith.mulf %96, %96 : vector<32x128xf32>
    %100 = arith.subf %98, %99 : vector<32x128xf32>
    %cst_63 = arith.constant 0.000000e+00 : f32
    %101 = vector.broadcast %cst_63 : f32 to vector<32x128xf32>
    %102 = arith.maximumf %100, %101 : vector<32x128xf32>
    %103 = arith.subf %91, %96 : vector<32x128xf32>
    %cst_64 = arith.constant 9.99999974E-6 : f32
    %104 = vector.broadcast %cst_64 : f32 to vector<32x128xf32>
    %105 = arith.addf %102, %104 : vector<32x128xf32>
    %106 = math.rsqrt %105 : vector<32x128xf32>
    %107 = arith.mulf %103, %106 : vector<32x128xf32>
    %108 = vector.broadcast %93 : vector<1x128xf32> to vector<32x128xf32>
    %109 = arith.mulf %107, %108 : vector<32x128xf32>
    %110 = vector.broadcast %95 : vector<1x128xf32> to vector<32x128xf32>
    %111 = arith.addf %109, %110 : vector<32x128xf32>
    %112 = math.tanh %111 : vector<32x128xf32>
    %c3 = arith.constant 3 : index
    %c0_65 = arith.constant 0 : index
    %c0_66 = arith.constant 0 : index
    %113 = vector.load %arg8[%c3, %c0_65, %c0_66] : memref<4x128x128xf32, #tpu.memory_space<vmem>>, vector<1x128x128xf32>
    %114 = vector.shape_cast %113 : vector<1x128x128xf32> to vector<128x128xf32>
    %cst_67 = arith.constant dense<0.000000e+00> : vector<32x128xf32>
    %115 = tpu.matmul %112, %114, %cst_67 {dimension_numbers = #tpu.dot_dimension_numbers<[1], [0], [0], [1], [0, 0, 1, 1], [], []>} : vector<32x128xf32>, vector<128x128xf32>, vector<32x128xf32> -> vector<32x128xf32>
    %c3_68 = arith.constant 3 : index
    %c0_69 = arith.constant 0 : index
    %c0_70 = arith.constant 0 : index
    %116 = vector.load %arg9[%c3_68, %c0_69, %c0_70] : memref<4x1x128xf32, #tpu.memory_space<vmem>>, vector<1x1x128xf32>
    %117 = vector.shape_cast %116 : vector<1x1x128xf32> to vector<1x128xf32>
    %118 = vector.broadcast %117 : vector<1x128xf32> to vector<32x128xf32>
    %119 = arith.addf %115, %118 : vector<32x128xf32>
    %c3_71 = arith.constant 3 : index
    %c0_72 = arith.constant 0 : index
    %c0_73 = arith.constant 0 : index
    %120 = vector.load %arg10[%c3_71, %c0_72, %c0_73] : memref<4x1x128xf32, #tpu.memory_space<vmem>>, vector<1x1x128xf32>
    %121 = vector.shape_cast %120 : vector<1x1x128xf32> to vector<1x128xf32>
    %c3_74 = arith.constant 3 : index
    %c0_75 = arith.constant 0 : index
    %c0_76 = arith.constant 0 : index
    %122 = vector.load %arg11[%c3_74, %c0_75, %c0_76] : memref<4x1x128xf32, #tpu.memory_space<vmem>>, vector<1x1x128xf32>
    %123 = vector.shape_cast %122 : vector<1x1x128xf32> to vector<1x128xf32>
    %cst_77 = arith.constant dense<0.000000e+00> : vector<32x128xf32>
    %124 = tpu.matmul %119, %3, %cst_77 {dimension_numbers = #tpu.dot_dimension_numbers<[1], [0], [0], [1], [0, 0, 1, 1], [], []>} : vector<32x128xf32>, vector<128x128xf32>, vector<32x128xf32> -> vector<32x128xf32>
    %125 = arith.mulf %119, %119 : vector<32x128xf32>
    %cst_78 = arith.constant dense<0.000000e+00> : vector<32x128xf32>
    %126 = tpu.matmul %125, %3, %cst_78 {dimension_numbers = #tpu.dot_dimension_numbers<[1], [0], [0], [1], [0, 0, 1, 1], [], []>} : vector<32x128xf32>, vector<128x128xf32>, vector<32x128xf32> -> vector<32x128xf32>
    %127 = arith.mulf %124, %124 : vector<32x128xf32>
    %128 = arith.subf %126, %127 : vector<32x128xf32>
    %cst_79 = arith.constant 0.000000e+00 : f32
    %129 = vector.broadcast %cst_79 : f32 to vector<32x128xf32>
    %130 = arith.maximumf %128, %129 : vector<32x128xf32>
    %131 = arith.subf %119, %124 : vector<32x128xf32>
    %cst_80 = arith.constant 9.99999974E-6 : f32
    %132 = vector.broadcast %cst_80 : f32 to vector<32x128xf32>
    %133 = arith.addf %130, %132 : vector<32x128xf32>
    %134 = math.rsqrt %133 : vector<32x128xf32>
    %135 = arith.mulf %131, %134 : vector<32x128xf32>
    %136 = vector.broadcast %121 : vector<1x128xf32> to vector<32x128xf32>
    %137 = arith.mulf %135, %136 : vector<32x128xf32>
    %138 = vector.broadcast %123 : vector<1x128xf32> to vector<32x128xf32>
    %139 = arith.addf %137, %138 : vector<32x128xf32>
    %140 = math.tanh %139 : vector<32x128xf32>
    %141 = arith.addf %140, %28 : vector<32x128xf32>
    %c0_81 = arith.constant 0 : index
    %c0_82 = arith.constant 0 : index
    %c0_83 = arith.constant 0 : index
    %142 = vector.load %arg8[%c0_81, %c0_82, %c0_83] : memref<4x128x128xf32, #tpu.memory_space<vmem>>, vector<1x128x128xf32>
    %143 = vector.shape_cast %142 : vector<1x128x128xf32> to vector<128x128xf32>
    %cst_84 = arith.constant dense<0.000000e+00> : vector<32x128xf32>
    %144 = tpu.matmul %141, %143, %cst_84 {dimension_numbers = #tpu.dot_dimension_numbers<[1], [0], [0], [1], [0, 0, 1, 1], [], []>} : vector<32x128xf32>, vector<128x128xf32>, vector<32x128xf32> -> vector<32x128xf32>
    %c0_85 = arith.constant 0 : index
    %c0_86 = arith.constant 0 : index
    %c0_87 = arith.constant 0 : index
    %145 = vector.load %arg9[%c0_85, %c0_86, %c0_87] : memref<4x1x128xf32, #tpu.memory_space<vmem>>, vector<1x1x128xf32>
    %146 = vector.shape_cast %145 : vector<1x1x128xf32> to vector<1x128xf32>
    %147 = vector.broadcast %146 : vector<1x128xf32> to vector<32x128xf32>
    %148 = arith.addf %144, %147 : vector<32x128xf32>
    %c0_88 = arith.constant 0 : index
    %c0_89 = arith.constant 0 : index
    %c0_90 = arith.constant 0 : index
    %149 = vector.load %arg10[%c0_88, %c0_89, %c0_90] : memref<4x1x128xf32, #tpu.memory_space<vmem>>, vector<1x1x128xf32>
    %150 = vector.shape_cast %149 : vector<1x1x128xf32> to vector<1x128xf32>
    %c0_91 = arith.constant 0 : index
    %c0_92 = arith.constant 0 : index
    %c0_93 = arith.constant 0 : index
    %151 = vector.load %arg11[%c0_91, %c0_92, %c0_93] : memref<4x1x128xf32, #tpu.memory_space<vmem>>, vector<1x1x128xf32>
    %152 = vector.shape_cast %151 : vector<1x1x128xf32> to vector<1x128xf32>
    %cst_94 = arith.constant dense<0.000000e+00> : vector<32x128xf32>
    %153 = tpu.matmul %148, %3, %cst_94 {dimension_numbers = #tpu.dot_dimension_numbers<[1], [0], [0], [1], [0, 0, 1, 1], [], []>} : vector<32x128xf32>, vector<128x128xf32>, vector<32x128xf32> -> vector<32x128xf32>
    %154 = arith.mulf %148, %148 : vector<32x128xf32>
    %cst_95 = arith.constant dense<0.000000e+00> : vector<32x128xf32>
    %155 = tpu.matmul %154, %3, %cst_95 {dimension_numbers = #tpu.dot_dimension_numbers<[1], [0], [0], [1], [0, 0, 1, 1], [], []>} : vector<32x128xf32>, vector<128x128xf32>, vector<32x128xf32> -> vector<32x128xf32>
    %156 = arith.mulf %153, %153 : vector<32x128xf32>
    %157 = arith.subf %155, %156 : vector<32x128xf32>
    %cst_96 = arith.constant 0.000000e+00 : f32
    %158 = vector.broadcast %cst_96 : f32 to vector<32x128xf32>
    %159 = arith.maximumf %157, %158 : vector<32x128xf32>
    %160 = arith.subf %148, %153 : vector<32x128xf32>
    %cst_97 = arith.constant 9.99999974E-6 : f32
    %161 = vector.broadcast %cst_97 : f32 to vector<32x128xf32>
    %162 = arith.addf %159, %161 : vector<32x128xf32>
    %163 = math.rsqrt %162 : vector<32x128xf32>
    %164 = arith.mulf %160, %163 : vector<32x128xf32>
    %165 = vector.broadcast %150 : vector<1x128xf32> to vector<32x128xf32>
    %166 = arith.mulf %164, %165 : vector<32x128xf32>
    %167 = vector.broadcast %152 : vector<1x128xf32> to vector<32x128xf32>
    %168 = arith.addf %166, %167 : vector<32x128xf32>
    %169 = math.tanh %168 : vector<32x128xf32>
    %c1_98 = arith.constant 1 : index
    %c0_99 = arith.constant 0 : index
    %c0_100 = arith.constant 0 : index
    %170 = vector.load %arg8[%c1_98, %c0_99, %c0_100] : memref<4x128x128xf32, #tpu.memory_space<vmem>>, vector<1x128x128xf32>
    %171 = vector.shape_cast %170 : vector<1x128x128xf32> to vector<128x128xf32>
    %cst_101 = arith.constant dense<0.000000e+00> : vector<32x128xf32>
    %172 = tpu.matmul %169, %171, %cst_101 {dimension_numbers = #tpu.dot_dimension_numbers<[1], [0], [0], [1], [0, 0, 1, 1], [], []>} : vector<32x128xf32>, vector<128x128xf32>, vector<32x128xf32> -> vector<32x128xf32>
    %c1_102 = arith.constant 1 : index
    %c0_103 = arith.constant 0 : index
    %c0_104 = arith.constant 0 : index
    %173 = vector.load %arg9[%c1_102, %c0_103, %c0_104] : memref<4x1x128xf32, #tpu.memory_space<vmem>>, vector<1x1x128xf32>
    %174 = vector.shape_cast %173 : vector<1x1x128xf32> to vector<1x128xf32>
    %175 = vector.broadcast %174 : vector<1x128xf32> to vector<32x128xf32>
    %176 = arith.addf %172, %175 : vector<32x128xf32>
    %c1_105 = arith.constant 1 : index
    %c0_106 = arith.constant 0 : index
    %c0_107 = arith.constant 0 : index
    %177 = vector.load %arg10[%c1_105, %c0_106, %c0_107] : memref<4x1x128xf32, #tpu.memory_space<vmem>>, vector<1x1x128xf32>
    %178 = vector.shape_cast %177 : vector<1x1x128xf32> to vector<1x128xf32>
    %c1_108 = arith.constant 1 : index
    %c0_109 = arith.constant 0 : index
    %c0_110 = arith.constant 0 : index
    %179 = vector.load %arg11[%c1_108, %c0_109, %c0_110] : memref<4x1x128xf32, #tpu.memory_space<vmem>>, vector<1x1x128xf32>
    %180 = vector.shape_cast %179 : vector<1x1x128xf32> to vector<1x128xf32>
    %cst_111 = arith.constant dense<0.000000e+00> : vector<32x128xf32>
    %181 = tpu.matmul %176, %3, %cst_111 {dimension_numbers = #tpu.dot_dimension_numbers<[1], [0], [0], [1], [0, 0, 1, 1], [], []>} : vector<32x128xf32>, vector<128x128xf32>, vector<32x128xf32> -> vector<32x128xf32>
    %182 = arith.mulf %176, %176 : vector<32x128xf32>
    %cst_112 = arith.constant dense<0.000000e+00> : vector<32x128xf32>
    %183 = tpu.matmul %182, %3, %cst_112 {dimension_numbers = #tpu.dot_dimension_numbers<[1], [0], [0], [1], [0, 0, 1, 1], [], []>} : vector<32x128xf32>, vector<128x128xf32>, vector<32x128xf32> -> vector<32x128xf32>
    %184 = arith.mulf %181, %181 : vector<32x128xf32>
    %185 = arith.subf %183, %184 : vector<32x128xf32>
    %cst_113 = arith.constant 0.000000e+00 : f32
    %186 = vector.broadcast %cst_113 : f32 to vector<32x128xf32>
    %187 = arith.maximumf %185, %186 : vector<32x128xf32>
    %188 = arith.subf %176, %181 : vector<32x128xf32>
    %cst_114 = arith.constant 9.99999974E-6 : f32
    %189 = vector.broadcast %cst_114 : f32 to vector<32x128xf32>
    %190 = arith.addf %187, %189 : vector<32x128xf32>
    %191 = math.rsqrt %190 : vector<32x128xf32>
    %192 = arith.mulf %188, %191 : vector<32x128xf32>
    %193 = vector.broadcast %178 : vector<1x128xf32> to vector<32x128xf32>
    %194 = arith.mulf %192, %193 : vector<32x128xf32>
    %195 = vector.broadcast %180 : vector<1x128xf32> to vector<32x128xf32>
    %196 = arith.addf %194, %195 : vector<32x128xf32>
    %197 = math.tanh %196 : vector<32x128xf32>
    %c2_115 = arith.constant 2 : index
    %c0_116 = arith.constant 0 : index
    %c0_117 = arith.constant 0 : index
    %198 = vector.load %arg8[%c2_115, %c0_116, %c0_117] : memref<4x128x128xf32, #tpu.memory_space<vmem>>, vector<1x128x128xf32>
    %199 = vector.shape_cast %198 : vector<1x128x128xf32> to vector<128x128xf32>
    %cst_118 = arith.constant dense<0.000000e+00> : vector<32x128xf32>
    %200 = tpu.matmul %197, %199, %cst_118 {dimension_numbers = #tpu.dot_dimension_numbers<[1], [0], [0], [1], [0, 0, 1, 1], [], []>} : vector<32x128xf32>, vector<128x128xf32>, vector<32x128xf32> -> vector<32x128xf32>
    %c2_119 = arith.constant 2 : index
    %c0_120 = arith.constant 0 : index
    %c0_121 = arith.constant 0 : index
    %201 = vector.load %arg9[%c2_119, %c0_120, %c0_121] : memref<4x1x128xf32, #tpu.memory_space<vmem>>, vector<1x1x128xf32>
    %202 = vector.shape_cast %201 : vector<1x1x128xf32> to vector<1x128xf32>
    %203 = vector.broadcast %202 : vector<1x128xf32> to vector<32x128xf32>
    %204 = arith.addf %200, %203 : vector<32x128xf32>
    %c2_122 = arith.constant 2 : index
    %c0_123 = arith.constant 0 : index
    %c0_124 = arith.constant 0 : index
    %205 = vector.load %arg10[%c2_122, %c0_123, %c0_124] : memref<4x1x128xf32, #tpu.memory_space<vmem>>, vector<1x1x128xf32>
    %206 = vector.shape_cast %205 : vector<1x1x128xf32> to vector<1x128xf32>
    %c2_125 = arith.constant 2 : index
    %c0_126 = arith.constant 0 : index
    %c0_127 = arith.constant 0 : index
    %207 = vector.load %arg11[%c2_125, %c0_126, %c0_127] : memref<4x1x128xf32, #tpu.memory_space<vmem>>, vector<1x1x128xf32>
    %208 = vector.shape_cast %207 : vector<1x1x128xf32> to vector<1x128xf32>
    %cst_128 = arith.constant dense<0.000000e+00> : vector<32x128xf32>
    %209 = tpu.matmul %204, %3, %cst_128 {dimension_numbers = #tpu.dot_dimension_numbers<[1], [0], [0], [1], [0, 0, 1, 1], [], []>} : vector<32x128xf32>, vector<128x128xf32>, vector<32x128xf32> -> vector<32x128xf32>
    %210 = arith.mulf %204, %204 : vector<32x128xf32>
    %cst_129 = arith.constant dense<0.000000e+00> : vector<32x128xf32>
    %211 = tpu.matmul %210, %3, %cst_129 {dimension_numbers = #tpu.dot_dimension_numbers<[1], [0], [0], [1], [0, 0, 1, 1], [], []>} : vector<32x128xf32>, vector<128x128xf32>, vector<32x128xf32> -> vector<32x128xf32>
    %212 = arith.mulf %209, %209 : vector<32x128xf32>
    %213 = arith.subf %211, %212 : vector<32x128xf32>
    %cst_130 = arith.constant 0.000000e+00 : f32
    %214 = vector.broadcast %cst_130 : f32 to vector<32x128xf32>
    %215 = arith.maximumf %213, %214 : vector<32x128xf32>
    %216 = arith.subf %204, %209 : vector<32x128xf32>
    %cst_131 = arith.constant 9.99999974E-6 : f32
    %217 = vector.broadcast %cst_131 : f32 to vector<32x128xf32>
    %218 = arith.addf %215, %217 : vector<32x128xf32>
    %219 = math.rsqrt %218 : vector<32x128xf32>
    %220 = arith.mulf %216, %219 : vector<32x128xf32>
    %221 = vector.broadcast %206 : vector<1x128xf32> to vector<32x128xf32>
    %222 = arith.mulf %220, %221 : vector<32x128xf32>
    %223 = vector.broadcast %208 : vector<1x128xf32> to vector<32x128xf32>
    %224 = arith.addf %222, %223 : vector<32x128xf32>
    %225 = math.tanh %224 : vector<32x128xf32>
    %c3_132 = arith.constant 3 : index
    %c0_133 = arith.constant 0 : index
    %c0_134 = arith.constant 0 : index
    %226 = vector.load %arg8[%c3_132, %c0_133, %c0_134] : memref<4x128x128xf32, #tpu.memory_space<vmem>>, vector<1x128x128xf32>
    %227 = vector.shape_cast %226 : vector<1x128x128xf32> to vector<128x128xf32>
    %cst_135 = arith.constant dense<0.000000e+00> : vector<32x128xf32>
    %228 = tpu.matmul %225, %227, %cst_135 {dimension_numbers = #tpu.dot_dimension_numbers<[1], [0], [0], [1], [0, 0, 1, 1], [], []>} : vector<32x128xf32>, vector<128x128xf32>, vector<32x128xf32> -> vector<32x128xf32>
    %c3_136 = arith.constant 3 : index
    %c0_137 = arith.constant 0 : index
    %c0_138 = arith.constant 0 : index
    %229 = vector.load %arg9[%c3_136, %c0_137, %c0_138] : memref<4x1x128xf32, #tpu.memory_space<vmem>>, vector<1x1x128xf32>
    %230 = vector.shape_cast %229 : vector<1x1x128xf32> to vector<1x128xf32>
    %231 = vector.broadcast %230 : vector<1x128xf32> to vector<32x128xf32>
    %232 = arith.addf %228, %231 : vector<32x128xf32>
    %c3_139 = arith.constant 3 : index
    %c0_140 = arith.constant 0 : index
    %c0_141 = arith.constant 0 : index
    %233 = vector.load %arg10[%c3_139, %c0_140, %c0_141] : memref<4x1x128xf32, #tpu.memory_space<vmem>>, vector<1x1x128xf32>
    %234 = vector.shape_cast %233 : vector<1x1x128xf32> to vector<1x128xf32>
    %c3_142 = arith.constant 3 : index
    %c0_143 = arith.constant 0 : index
    %c0_144 = arith.constant 0 : index
    %235 = vector.load %arg11[%c3_142, %c0_143, %c0_144] : memref<4x1x128xf32, #tpu.memory_space<vmem>>, vector<1x1x128xf32>
    %236 = vector.shape_cast %235 : vector<1x1x128xf32> to vector<1x128xf32>
    %cst_145 = arith.constant dense<0.000000e+00> : vector<32x128xf32>
    %237 = tpu.matmul %232, %3, %cst_145 {dimension_numbers = #tpu.dot_dimension_numbers<[1], [0], [0], [1], [0, 0, 1, 1], [], []>} : vector<32x128xf32>, vector<128x128xf32>, vector<32x128xf32> -> vector<32x128xf32>
    %238 = arith.mulf %232, %232 : vector<32x128xf32>
    %cst_146 = arith.constant dense<0.000000e+00> : vector<32x128xf32>
    %239 = tpu.matmul %238, %3, %cst_146 {dimension_numbers = #tpu.dot_dimension_numbers<[1], [0], [0], [1], [0, 0, 1, 1], [], []>} : vector<32x128xf32>, vector<128x128xf32>, vector<32x128xf32> -> vector<32x128xf32>
    %240 = arith.mulf %237, %237 : vector<32x128xf32>
    %241 = arith.subf %239, %240 : vector<32x128xf32>
    %cst_147 = arith.constant 0.000000e+00 : f32
    %242 = vector.broadcast %cst_147 : f32 to vector<32x128xf32>
    %243 = arith.maximumf %241, %242 : vector<32x128xf32>
    %244 = arith.subf %232, %237 : vector<32x128xf32>
    %cst_148 = arith.constant 9.99999974E-6 : f32
    %245 = vector.broadcast %cst_148 : f32 to vector<32x128xf32>
    %246 = arith.addf %243, %245 : vector<32x128xf32>
    %247 = math.rsqrt %246 : vector<32x128xf32>
    %248 = arith.mulf %244, %247 : vector<32x128xf32>
    %249 = vector.broadcast %234 : vector<1x128xf32> to vector<32x128xf32>
    %250 = arith.mulf %248, %249 : vector<32x128xf32>
    %251 = vector.broadcast %236 : vector<1x128xf32> to vector<32x128xf32>
    %252 = arith.addf %250, %251 : vector<32x128xf32>
    %253 = math.tanh %252 : vector<32x128xf32>
    %254 = arith.addf %253, %141 : vector<32x128xf32>
    %c0_149 = arith.constant 0 : index
    %c0_150 = arith.constant 0 : index
    %c0_151 = arith.constant 0 : index
    %255 = vector.load %arg8[%c0_149, %c0_150, %c0_151] : memref<4x128x128xf32, #tpu.memory_space<vmem>>, vector<1x128x128xf32>
    %256 = vector.shape_cast %255 : vector<1x128x128xf32> to vector<128x128xf32>
    %cst_152 = arith.constant dense<0.000000e+00> : vector<32x128xf32>
    %257 = tpu.matmul %254, %256, %cst_152 {dimension_numbers = #tpu.dot_dimension_numbers<[1], [0], [0], [1], [0, 0, 1, 1], [], []>} : vector<32x128xf32>, vector<128x128xf32>, vector<32x128xf32> -> vector<32x128xf32>
    %c0_153 = arith.constant 0 : index
    %c0_154 = arith.constant 0 : index
    %c0_155 = arith.constant 0 : index
    %258 = vector.load %arg9[%c0_153, %c0_154, %c0_155] : memref<4x1x128xf32, #tpu.memory_space<vmem>>, vector<1x1x128xf32>
    %259 = vector.shape_cast %258 : vector<1x1x128xf32> to vector<1x128xf32>
    %260 = vector.broadcast %259 : vector<1x128xf32> to vector<32x128xf32>
    %261 = arith.addf %257, %260 : vector<32x128xf32>
    %c0_156 = arith.constant 0 : index
    %c0_157 = arith.constant 0 : index
    %c0_158 = arith.constant 0 : index
    %262 = vector.load %arg10[%c0_156, %c0_157, %c0_158] : memref<4x1x128xf32, #tpu.memory_space<vmem>>, vector<1x1x128xf32>
    %263 = vector.shape_cast %262 : vector<1x1x128xf32> to vector<1x128xf32>
    %c0_159 = arith.constant 0 : index
    %c0_160 = arith.constant 0 : index
    %c0_161 = arith.constant 0 : index
    %264 = vector.load %arg11[%c0_159, %c0_160, %c0_161] : memref<4x1x128xf32, #tpu.memory_space<vmem>>, vector<1x1x128xf32>
    %265 = vector.shape_cast %264 : vector<1x1x128xf32> to vector<1x128xf32>
    %cst_162 = arith.constant dense<0.000000e+00> : vector<32x128xf32>
    %266 = tpu.matmul %261, %3, %cst_162 {dimension_numbers = #tpu.dot_dimension_numbers<[1], [0], [0], [1], [0, 0, 1, 1], [], []>} : vector<32x128xf32>, vector<128x128xf32>, vector<32x128xf32> -> vector<32x128xf32>
    %267 = arith.mulf %261, %261 : vector<32x128xf32>
    %cst_163 = arith.constant dense<0.000000e+00> : vector<32x128xf32>
    %268 = tpu.matmul %267, %3, %cst_163 {dimension_numbers = #tpu.dot_dimension_numbers<[1], [0], [0], [1], [0, 0, 1, 1], [], []>} : vector<32x128xf32>, vector<128x128xf32>, vector<32x128xf32> -> vector<32x128xf32>
    %269 = arith.mulf %266, %266 : vector<32x128xf32>
    %270 = arith.subf %268, %269 : vector<32x128xf32>
    %cst_164 = arith.constant 0.000000e+00 : f32
    %271 = vector.broadcast %cst_164 : f32 to vector<32x128xf32>
    %272 = arith.maximumf %270, %271 : vector<32x128xf32>
    %273 = arith.subf %261, %266 : vector<32x128xf32>
    %cst_165 = arith.constant 9.99999974E-6 : f32
    %274 = vector.broadcast %cst_165 : f32 to vector<32x128xf32>
    %275 = arith.addf %272, %274 : vector<32x128xf32>
    %276 = math.rsqrt %275 : vector<32x128xf32>
    %277 = arith.mulf %273, %276 : vector<32x128xf32>
    %278 = vector.broadcast %263 : vector<1x128xf32> to vector<32x128xf32>
    %279 = arith.mulf %277, %278 : vector<32x128xf32>
    %280 = vector.broadcast %265 : vector<1x128xf32> to vector<32x128xf32>
    %281 = arith.addf %279, %280 : vector<32x128xf32>
    %282 = math.tanh %281 : vector<32x128xf32>
    %c1_166 = arith.constant 1 : index
    %c0_167 = arith.constant 0 : index
    %c0_168 = arith.constant 0 : index
    %283 = vector.load %arg8[%c1_166, %c0_167, %c0_168] : memref<4x128x128xf32, #tpu.memory_space<vmem>>, vector<1x128x128xf32>
    %284 = vector.shape_cast %283 : vector<1x128x128xf32> to vector<128x128xf32>
    %cst_169 = arith.constant dense<0.000000e+00> : vector<32x128xf32>
    %285 = tpu.matmul %282, %284, %cst_169 {dimension_numbers = #tpu.dot_dimension_numbers<[1], [0], [0], [1], [0, 0, 1, 1], [], []>} : vector<32x128xf32>, vector<128x128xf32>, vector<32x128xf32> -> vector<32x128xf32>
    %c1_170 = arith.constant 1 : index
    %c0_171 = arith.constant 0 : index
    %c0_172 = arith.constant 0 : index
    %286 = vector.load %arg9[%c1_170, %c0_171, %c0_172] : memref<4x1x128xf32, #tpu.memory_space<vmem>>, vector<1x1x128xf32>
    %287 = vector.shape_cast %286 : vector<1x1x128xf32> to vector<1x128xf32>
    %288 = vector.broadcast %287 : vector<1x128xf32> to vector<32x128xf32>
    %289 = arith.addf %285, %288 : vector<32x128xf32>
    %c1_173 = arith.constant 1 : index
    %c0_174 = arith.constant 0 : index
    %c0_175 = arith.constant 0 : index
    %290 = vector.load %arg10[%c1_173, %c0_174, %c0_175] : memref<4x1x128xf32, #tpu.memory_space<vmem>>, vector<1x1x128xf32>
    %291 = vector.shape_cast %290 : vector<1x1x128xf32> to vector<1x128xf32>
    %c1_176 = arith.constant 1 : index
    %c0_177 = arith.constant 0 : index
    %c0_178 = arith.constant 0 : index
    %292 = vector.load %arg11[%c1_176, %c0_177, %c0_178] : memref<4x1x128xf32, #tpu.memory_space<vmem>>, vector<1x1x128xf32>
    %293 = vector.shape_cast %292 : vector<1x1x128xf32> to vector<1x128xf32>
    %cst_179 = arith.constant dense<0.000000e+00> : vector<32x128xf32>
    %294 = tpu.matmul %289, %3, %cst_179 {dimension_numbers = #tpu.dot_dimension_numbers<[1], [0], [0], [1], [0, 0, 1, 1], [], []>} : vector<32x128xf32>, vector<128x128xf32>, vector<32x128xf32> -> vector<32x128xf32>
    %295 = arith.mulf %289, %289 : vector<32x128xf32>
    %cst_180 = arith.constant dense<0.000000e+00> : vector<32x128xf32>
    %296 = tpu.matmul %295, %3, %cst_180 {dimension_numbers = #tpu.dot_dimension_numbers<[1], [0], [0], [1], [0, 0, 1, 1], [], []>} : vector<32x128xf32>, vector<128x128xf32>, vector<32x128xf32> -> vector<32x128xf32>
    %297 = arith.mulf %294, %294 : vector<32x128xf32>
    %298 = arith.subf %296, %297 : vector<32x128xf32>
    %cst_181 = arith.constant 0.000000e+00 : f32
    %299 = vector.broadcast %cst_181 : f32 to vector<32x128xf32>
    %300 = arith.maximumf %298, %299 : vector<32x128xf32>
    %301 = arith.subf %289, %294 : vector<32x128xf32>
    %cst_182 = arith.constant 9.99999974E-6 : f32
    %302 = vector.broadcast %cst_182 : f32 to vector<32x128xf32>
    %303 = arith.addf %300, %302 : vector<32x128xf32>
    %304 = math.rsqrt %303 : vector<32x128xf32>
    %305 = arith.mulf %301, %304 : vector<32x128xf32>
    %306 = vector.broadcast %291 : vector<1x128xf32> to vector<32x128xf32>
    %307 = arith.mulf %305, %306 : vector<32x128xf32>
    %308 = vector.broadcast %293 : vector<1x128xf32> to vector<32x128xf32>
    %309 = arith.addf %307, %308 : vector<32x128xf32>
    %310 = math.tanh %309 : vector<32x128xf32>
    %c2_183 = arith.constant 2 : index
    %c0_184 = arith.constant 0 : index
    %c0_185 = arith.constant 0 : index
    %311 = vector.load %arg8[%c2_183, %c0_184, %c0_185] : memref<4x128x128xf32, #tpu.memory_space<vmem>>, vector<1x128x128xf32>
    %312 = vector.shape_cast %311 : vector<1x128x128xf32> to vector<128x128xf32>
    %cst_186 = arith.constant dense<0.000000e+00> : vector<32x128xf32>
    %313 = tpu.matmul %310, %312, %cst_186 {dimension_numbers = #tpu.dot_dimension_numbers<[1], [0], [0], [1], [0, 0, 1, 1], [], []>} : vector<32x128xf32>, vector<128x128xf32>, vector<32x128xf32> -> vector<32x128xf32>
    %c2_187 = arith.constant 2 : index
    %c0_188 = arith.constant 0 : index
    %c0_189 = arith.constant 0 : index
    %314 = vector.load %arg9[%c2_187, %c0_188, %c0_189] : memref<4x1x128xf32, #tpu.memory_space<vmem>>, vector<1x1x128xf32>
    %315 = vector.shape_cast %314 : vector<1x1x128xf32> to vector<1x128xf32>
    %316 = vector.broadcast %315 : vector<1x128xf32> to vector<32x128xf32>
    %317 = arith.addf %313, %316 : vector<32x128xf32>
    %c2_190 = arith.constant 2 : index
    %c0_191 = arith.constant 0 : index
    %c0_192 = arith.constant 0 : index
    %318 = vector.load %arg10[%c2_190, %c0_191, %c0_192] : memref<4x1x128xf32, #tpu.memory_space<vmem>>, vector<1x1x128xf32>
    %319 = vector.shape_cast %318 : vector<1x1x128xf32> to vector<1x128xf32>
    %c2_193 = arith.constant 2 : index
    %c0_194 = arith.constant 0 : index
    %c0_195 = arith.constant 0 : index
    %320 = vector.load %arg11[%c2_193, %c0_194, %c0_195] : memref<4x1x128xf32, #tpu.memory_space<vmem>>, vector<1x1x128xf32>
    %321 = vector.shape_cast %320 : vector<1x1x128xf32> to vector<1x128xf32>
    %cst_196 = arith.constant dense<0.000000e+00> : vector<32x128xf32>
    %322 = tpu.matmul %317, %3, %cst_196 {dimension_numbers = #tpu.dot_dimension_numbers<[1], [0], [0], [1], [0, 0, 1, 1], [], []>} : vector<32x128xf32>, vector<128x128xf32>, vector<32x128xf32> -> vector<32x128xf32>
    %323 = arith.mulf %317, %317 : vector<32x128xf32>
    %cst_197 = arith.constant dense<0.000000e+00> : vector<32x128xf32>
    %324 = tpu.matmul %323, %3, %cst_197 {dimension_numbers = #tpu.dot_dimension_numbers<[1], [0], [0], [1], [0, 0, 1, 1], [], []>} : vector<32x128xf32>, vector<128x128xf32>, vector<32x128xf32> -> vector<32x128xf32>
    %325 = arith.mulf %322, %322 : vector<32x128xf32>
    %326 = arith.subf %324, %325 : vector<32x128xf32>
    %cst_198 = arith.constant 0.000000e+00 : f32
    %327 = vector.broadcast %cst_198 : f32 to vector<32x128xf32>
    %328 = arith.maximumf %326, %327 : vector<32x128xf32>
    %329 = arith.subf %317, %322 : vector<32x128xf32>
    %cst_199 = arith.constant 9.99999974E-6 : f32
    %330 = vector.broadcast %cst_199 : f32 to vector<32x128xf32>
    %331 = arith.addf %328, %330 : vector<32x128xf32>
    %332 = math.rsqrt %331 : vector<32x128xf32>
    %333 = arith.mulf %329, %332 : vector<32x128xf32>
    %334 = vector.broadcast %319 : vector<1x128xf32> to vector<32x128xf32>
    %335 = arith.mulf %333, %334 : vector<32x128xf32>
    %336 = vector.broadcast %321 : vector<1x128xf32> to vector<32x128xf32>
    %337 = arith.addf %335, %336 : vector<32x128xf32>
    %338 = math.tanh %337 : vector<32x128xf32>
    %c3_200 = arith.constant 3 : index
    %c0_201 = arith.constant 0 : index
    %c0_202 = arith.constant 0 : index
    %339 = vector.load %arg8[%c3_200, %c0_201, %c0_202] : memref<4x128x128xf32, #tpu.memory_space<vmem>>, vector<1x128x128xf32>
    %340 = vector.shape_cast %339 : vector<1x128x128xf32> to vector<128x128xf32>
    %cst_203 = arith.constant dense<0.000000e+00> : vector<32x128xf32>
    %341 = tpu.matmul %338, %340, %cst_203 {dimension_numbers = #tpu.dot_dimension_numbers<[1], [0], [0], [1], [0, 0, 1, 1], [], []>} : vector<32x128xf32>, vector<128x128xf32>, vector<32x128xf32> -> vector<32x128xf32>
    %c3_204 = arith.constant 3 : index
    %c0_205 = arith.constant 0 : index
    %c0_206 = arith.constant 0 : index
    %342 = vector.load %arg9[%c3_204, %c0_205, %c0_206] : memref<4x1x128xf32, #tpu.memory_space<vmem>>, vector<1x1x128xf32>
    %343 = vector.shape_cast %342 : vector<1x1x128xf32> to vector<1x128xf32>
    %344 = vector.broadcast %343 : vector<1x128xf32> to vector<32x128xf32>
    %345 = arith.addf %341, %344 : vector<32x128xf32>
    %c3_207 = arith.constant 3 : index
    %c0_208 = arith.constant 0 : index
    %c0_209 = arith.constant 0 : index
    %346 = vector.load %arg10[%c3_207, %c0_208, %c0_209] : memref<4x1x128xf32, #tpu.memory_space<vmem>>, vector<1x1x128xf32>
    %347 = vector.shape_cast %346 : vector<1x1x128xf32> to vector<1x128xf32>
    %c3_210 = arith.constant 3 : index
    %c0_211 = arith.constant 0 : index
    %c0_212 = arith.constant 0 : index
    %348 = vector.load %arg11[%c3_210, %c0_211, %c0_212] : memref<4x1x128xf32, #tpu.memory_space<vmem>>, vector<1x1x128xf32>
    %349 = vector.shape_cast %348 : vector<1x1x128xf32> to vector<1x128xf32>
    %cst_213 = arith.constant dense<0.000000e+00> : vector<32x128xf32>
    %350 = tpu.matmul %345, %3, %cst_213 {dimension_numbers = #tpu.dot_dimension_numbers<[1], [0], [0], [1], [0, 0, 1, 1], [], []>} : vector<32x128xf32>, vector<128x128xf32>, vector<32x128xf32> -> vector<32x128xf32>
    %351 = arith.mulf %345, %345 : vector<32x128xf32>
    %cst_214 = arith.constant dense<0.000000e+00> : vector<32x128xf32>
    %352 = tpu.matmul %351, %3, %cst_214 {dimension_numbers = #tpu.dot_dimension_numbers<[1], [0], [0], [1], [0, 0, 1, 1], [], []>} : vector<32x128xf32>, vector<128x128xf32>, vector<32x128xf32> -> vector<32x128xf32>
    %353 = arith.mulf %350, %350 : vector<32x128xf32>
    %354 = arith.subf %352, %353 : vector<32x128xf32>
    %cst_215 = arith.constant 0.000000e+00 : f32
    %355 = vector.broadcast %cst_215 : f32 to vector<32x128xf32>
    %356 = arith.maximumf %354, %355 : vector<32x128xf32>
    %357 = arith.subf %345, %350 : vector<32x128xf32>
    %cst_216 = arith.constant 9.99999974E-6 : f32
    %358 = vector.broadcast %cst_216 : f32 to vector<32x128xf32>
    %359 = arith.addf %356, %358 : vector<32x128xf32>
    %360 = math.rsqrt %359 : vector<32x128xf32>
    %361 = arith.mulf %357, %360 : vector<32x128xf32>
    %362 = vector.broadcast %347 : vector<1x128xf32> to vector<32x128xf32>
    %363 = arith.mulf %361, %362 : vector<32x128xf32>
    %364 = vector.broadcast %349 : vector<1x128xf32> to vector<32x128xf32>
    %365 = arith.addf %363, %364 : vector<32x128xf32>
    %366 = math.tanh %365 : vector<32x128xf32>
    %367 = arith.addf %366, %254 : vector<32x128xf32>
    %c0_217 = arith.constant 0 : index
    %c0_218 = arith.constant 0 : index
    %c0_219 = arith.constant 0 : index
    %368 = vector.load %arg3[%c0_217, %c0_218, %c0_219] : memref<1x4x32xi32, #tpu.memory_space<vmem>>, vector<1x4x32xi32>
    %369 = vector.shape_cast %368 : vector<1x4x32xi32> to vector<4x32xi32>
    %370 = tpu.iota {dimensions = array<i32: 0>} : vector<56x32xi32>
    %cst_220 = arith.constant 1.000000e+00 : f32
    %371 = vector.broadcast %cst_220 : f32 to vector<32x1xf32>
    %cst_221 = arith.constant 0.000000e+00 : f32
    %372 = vector.broadcast %cst_221 : f32 to vector<56x33xf32>
    %373 = vector.extract_strided_slice %369 {offsets = [0, 0], sizes = [1, 32], strides = [1, 1]} : vector<4x32xi32> to vector<1x32xi32>
    %374 = vector.broadcast %373 : vector<1x32xi32> to vector<56x32xi32>
    %375 = arith.cmpi eq, %370, %374 : vector<56x32xi32>
    %376 = arith.extui %375 : vector<56x32xi1> to vector<56x32xi32>
    %377 = arith.sitofp %376 : vector<56x32xi32> to vector<56x32xf32>
    %378 = vector.extract_strided_slice %367 {offsets = [0, 0], sizes = [32, 32], strides = [1, 1]} : vector<32x128xf32> to vector<32x32xf32>
    %379 = tpu.concatenate %378, %371 in 1 : vector<32x32xf32>, vector<32x1xf32> -> vector<32x33xf32>
    %cst_222 = arith.constant dense<0.000000e+00> : vector<56x33xf32>
    %380 = tpu.matmul %377, %379, %cst_222 {dimension_numbers = #tpu.dot_dimension_numbers<[1], [0], [0], [1], [0, 0, 1, 1], [], []>} : vector<56x32xf32>, vector<32x33xf32>, vector<56x33xf32> -> vector<56x33xf32>
    %381 = arith.addf %372, %380 : vector<56x33xf32>
    %382 = vector.extract_strided_slice %369 {offsets = [1, 0], sizes = [1, 32], strides = [1, 1]} : vector<4x32xi32> to vector<1x32xi32>
    %383 = vector.broadcast %382 : vector<1x32xi32> to vector<56x32xi32>
    %384 = arith.cmpi eq, %370, %383 : vector<56x32xi32>
    %385 = arith.extui %384 : vector<56x32xi1> to vector<56x32xi32>
    %386 = arith.sitofp %385 : vector<56x32xi32> to vector<56x32xf32>
    %387 = vector.extract_strided_slice %367 {offsets = [0, 32], sizes = [32, 32], strides = [1, 1]} : vector<32x128xf32> to vector<32x32xf32>
    %388 = tpu.concatenate %387, %371 in 1 : vector<32x32xf32>, vector<32x1xf32> -> vector<32x33xf32>
    %cst_223 = arith.constant dense<0.000000e+00> : vector<56x33xf32>
    %389 = tpu.matmul %386, %388, %cst_223 {dimension_numbers = #tpu.dot_dimension_numbers<[1], [0], [0], [1], [0, 0, 1, 1], [], []>} : vector<56x32xf32>, vector<32x33xf32>, vector<56x33xf32> -> vector<56x33xf32>
    %390 = arith.addf %381, %389 : vector<56x33xf32>
    %391 = vector.extract_strided_slice %369 {offsets = [2, 0], sizes = [1, 32], strides = [1, 1]} : vector<4x32xi32> to vector<1x32xi32>
    %392 = vector.broadcast %391 : vector<1x32xi32> to vector<56x32xi32>
    %393 = arith.cmpi eq, %370, %392 : vector<56x32xi32>
    %394 = arith.extui %393 : vector<56x32xi1> to vector<56x32xi32>
    %395 = arith.sitofp %394 : vector<56x32xi32> to vector<56x32xf32>
    %396 = vector.extract_strided_slice %367 {offsets = [0, 64], sizes = [32, 32], strides = [1, 1]} : vector<32x128xf32> to vector<32x32xf32>
    %397 = tpu.concatenate %396, %371 in 1 : vector<32x32xf32>, vector<32x1xf32> -> vector<32x33xf32>
    %cst_224 = arith.constant dense<0.000000e+00> : vector<56x33xf32>
    %398 = tpu.matmul %395, %397, %cst_224 {dimension_numbers = #tpu.dot_dimension_numbers<[1], [0], [0], [1], [0, 0, 1, 1], [], []>} : vector<56x32xf32>, vector<32x33xf32>, vector<56x33xf32> -> vector<56x33xf32>
    %399 = arith.addf %390, %398 : vector<56x33xf32>
    %400 = vector.extract_strided_slice %369 {offsets = [3, 0], sizes = [1, 32], strides = [1, 1]} : vector<4x32xi32> to vector<1x32xi32>
    %401 = vector.broadcast %400 : vector<1x32xi32> to vector<56x32xi32>
    %402 = arith.cmpi eq, %370, %401 : vector<56x32xi32>
    %403 = arith.extui %402 : vector<56x32xi1> to vector<56x32xi32>
    %404 = arith.sitofp %403 : vector<56x32xi32> to vector<56x32xf32>
    %405 = vector.extract_strided_slice %367 {offsets = [0, 96], sizes = [32, 32], strides = [1, 1]} : vector<32x128xf32> to vector<32x32xf32>
    %406 = tpu.concatenate %405, %371 in 1 : vector<32x32xf32>, vector<32x1xf32> -> vector<32x33xf32>
    %cst_225 = arith.constant dense<0.000000e+00> : vector<56x33xf32>
    %407 = tpu.matmul %404, %406, %cst_225 {dimension_numbers = #tpu.dot_dimension_numbers<[1], [0], [0], [1], [0, 0, 1, 1], [], []>} : vector<56x32xf32>, vector<32x33xf32>, vector<56x33xf32> -> vector<56x33xf32>
    %408 = arith.addf %399, %407 : vector<56x33xf32>
    %c0_226 = arith.constant 0 : index
    %c0_227 = arith.constant 0 : index
    %c0_228 = arith.constant 0 : index
    %409 = vector.load %arg13[%c0_226, %c0_227, %c0_228] : memref<1x56x33xf32, #tpu.memory_space<vmem>>, vector<1x56x33xf32>
    %410 = vector.shape_cast %408 : vector<56x33xf32> to vector<1x56x33xf32>
    %411 = arith.addf %409, %410 : vector<1x56x33xf32>
    %c0_229 = arith.constant 0 : index
    %c0_230 = arith.constant 0 : index
    %c0_231 = arith.constant 0 : index
    %412 = vector.load %arg13[%c0_229, %c0_230, %c0_231] : memref<1x56x33xf32, #tpu.memory_space<vmem>>, vector<1x56x33xf32>
    tpu.vector_store %arg13[%c0_229, %c0_230, %c0_231], %411 {strides = array<i32>} : memref<1x56x33xf32, #tpu.memory_space<vmem>>, vector<1x56x33xf32>,
    return
  }
  func.func @transform_0(%arg0: i32, %arg1: i32) -> (i32, i32) {
    %c1_i32 = arith.constant 1 : i32
    %0 = arith.muli %arg0, %c1_i32 : i32
    %1 = arith.addi %0, %arg1 : i32
    %c0_i32 = arith.constant 0 : i32
    %c0_i32_0 = arith.constant 0 : i32
    return %1, %c0_i32 : i32, i32
  }
  func.func @transform_1(%arg0: i32, %arg1: i32) -> (i32, i32, i32) {
    %c1_i32 = arith.constant 1 : i32
    %0 = arith.muli %arg0, %c1_i32 : i32
    %1 = arith.addi %0, %arg1 : i32
    %c0_i32 = arith.constant 0 : i32
    %c0_i32_0 = arith.constant 0 : i32
    %c0_i32_1 = arith.constant 0 : i32
    return %1, %c0_i32, %c0_i32_0 : i32, i32, i32
  }
  func.func @transform_2(%arg0: i32, %arg1: i32) -> (i32, i32) {
    %c0_i32 = arith.constant 0 : i32
    %c0_i32_0 = arith.constant 0 : i32
    %c0_i32_1 = arith.constant 0 : i32
    return %c0_i32, %c0_i32_0 : i32, i32
  }
  func.func @transform_3(%arg0: i32, %arg1: i32) -> (i32, i32) {
    %c0_i32 = arith.constant 0 : i32
    %c0_i32_0 = arith.constant 0 : i32
    %c0_i32_1 = arith.constant 0 : i32
    return %c0_i32, %c0_i32_0 : i32, i32
  }
  func.func @transform_4(%arg0: i32, %arg1: i32) -> (i32, i32) {
    %c0_i32 = arith.constant 0 : i32
    %c0_i32_0 = arith.constant 0 : i32
    %c0_i32_1 = arith.constant 0 : i32
    return %c0_i32, %c0_i32_0 : i32, i32
  }
  func.func @transform_5(%arg0: i32, %arg1: i32) -> (i32, i32) {
    %c0_i32 = arith.constant 0 : i32
    %c0_i32_0 = arith.constant 0 : i32
    %c0_i32_1 = arith.constant 0 : i32
    return %c0_i32, %c0_i32_0 : i32, i32
  }
  func.func @transform_6(%arg0: i32, %arg1: i32) -> (i32, i32, i32) {
    %c0_i32 = arith.constant 0 : i32
    %c0_i32_0 = arith.constant 0 : i32
    %c0_i32_1 = arith.constant 0 : i32
    %c0_i32_2 = arith.constant 0 : i32
    return %c0_i32, %c0_i32_0, %c0_i32_1 : i32, i32, i32
  }
  func.func @transform_7(%arg0: i32, %arg1: i32) -> (i32, i32, i32) {
    %c0_i32 = arith.constant 0 : i32
    %c0_i32_0 = arith.constant 0 : i32
    %c0_i32_1 = arith.constant 0 : i32
    %c0_i32_2 = arith.constant 0 : i32
    return %c0_i32, %c0_i32_0, %c0_i32_1 : i32, i32, i32
  }
  func.func @transform_8(%arg0: i32, %arg1: i32) -> (i32, i32, i32) {
    %c0_i32 = arith.constant 0 : i32
    %c0_i32_0 = arith.constant 0 : i32
    %c0_i32_1 = arith.constant 0 : i32
    %c0_i32_2 = arith.constant 0 : i32
    return %c0_i32, %c0_i32_0, %c0_i32_1 : i32, i32, i32
  }
  func.func @transform_9(%arg0: i32, %arg1: i32) -> (i32, i32, i32) {
    %c0_i32 = arith.constant 0 : i32
    %c0_i32_0 = arith.constant 0 : i32
    %c0_i32_1 = arith.constant 0 : i32
    %c0_i32_2 = arith.constant 0 : i32
    return %c0_i32, %c0_i32_0, %c0_i32_1 : i32, i32, i32
  }
  func.func @transform_10(%arg0: i32, %arg1: i32) -> (i32, i32) {
    %c0_i32 = arith.constant 0 : i32
    %c0_i32_0 = arith.constant 0 : i32
    %c0_i32_1 = arith.constant 0 : i32
    return %c0_i32, %c0_i32_0 : i32, i32
  }
  func.func @transform_11(%arg0: i32, %arg1: i32) -> (i32, i32, i32) {
    %c0_i32 = arith.constant 0 : i32
    %c0_i32_0 = arith.constant 0 : i32
    %c0_i32_1 = arith.constant 0 : i32
    return %arg0, %c0_i32, %c0_i32_0 : i32, i32, i32
  }
}

</mosaic_0001>

<bundles_post_ra>
// kernel: gnn_graph_classifier.3
= control target key start
LH: loop header
LB: loop body
LE: loop exit
PB: predicated region body
PF: predicated region fallthrough
CT: control target
= control target key end

     0   :  { %v1353_v0 = vmov 32   ;;  %v1354_v23 = vmov 0.0   ;;  %vm114_vm0 = vcmask 261120   ;;  %vm797_vm1 = vcmask 785408   ;;  %s2128_s0 = inlined_call_operand.vmem [shape: f32[1,56,33], index: 0, kind: input, shape index: {}]   ;;  %s2129_s1 = inlined_call_operand.vmem [shape: f32[3,224,224], index: 1, kind: input, shape index: {}]   ;;  %s2130_s2 = inlined_call_operand.vmem [shape: f32[3,1,224], index: 2, kind: input, shape index: {}]   ;;  %s2131_s3 = inlined_call_operand.vmem [shape: f32[3,1,224], index: 3, kind: input, shape index: {}]   ;;  %s2132_s4 = inlined_call_operand.vmem [shape: f32[3,1,224], index: 4, kind: input, shape index: {}]   ;;  %s2133_s5 = inlined_call_operand.vmem [shape: f32[224,1], index: 5, kind: input, shape index: {}]   ;;  %s2134_s6 = inlined_call_operand.<no memory space> [shape: f32[1,1], index: 6, kind: input, shape index: {}]   ;;  %s2135_s7 = inlined_call_operand.vmem [shape: f32[8,1], index: 7, kind: output, shape index: {}]  }
   0x1   :  { %1325 = vset.pattern.permute.xlu0 %v1353_v0  ;;  %v29_v1 = vld [vmem:[%s2128_s0 + $0x8] sm:$0xff]  ;;  %v1401_v2 = vld [vmem:[%s2128_s0] sm:$0xff]  ;;  %1326 = vset.pattern.permute.xlu1 %v1353_v0  ;;  %v1406_v3 = vld [vmem:[%s2128_s0 + $0x10] sm:$0xff]  ;;  %vm1188_vm2 = vcmask 7168  }
   0x2   :  { %v106_v4 = vmax.f32 %v29_v1, 1.0  ;;  %v263_v5 = vmax.f32 %v1406_v3, 1.0  ;;  %v1412_v6 = vld [vmem:[%s2128_s0 + $0x18] sm:$0xff]  ;;  %v98_v7 = vmax.f32 %v1401_v2, 1.0  ;;  %v1419_v9 = vld [vmem:[%s2128_s0 + $0x20] sm:$0xff]  ;;  %v1424_v10 = vld [vmem:[%s2128_s0 + $0x28] sm:$0xff]  ;;  %182 = vmatprep.mubr.f32.mxu0 %v1354_v23 }
   0x3   :  { %v347_v8 = vmax.f32 %v1412_v6, 1.0  ;;  %v57_v11 = vld [vmem:[%s2129_s1 + $0x78] sm:$0xff]  ;;  %v56_v12 = vld [vmem:[%s2129_s1 + $0x70] sm:$0xff]  ;;  %v431_v13 = vmax.f32 %v1419_v9, 1.0  ;;  %v515_v14 = vmax.f32 %v1424_v10, 1.0  ;;  %v55_v15 = vld [vmem:[%s2129_s1 + $0x68] sm:$0xff] }
   0x4   :  { %109 = vperm.xlu0 %1325, %v106_v4   ;;  %266 = vperm.xlu1 %1326, %v263_v5   ;;  %v54_v16 = vld [vmem:[%s2129_s1 + $0x60] sm:$0xff]  ;;  %v1443_v17 = vld [vmem:[%s2128_s0 + $0x30] sm:$0xff]  ;;  %v53_v18 = vld [vmem:[%s2129_s1 + $0x58] sm:$0xff] }
   0x5   :  { %142 = vmatprep.subr.mxu0 %v57_v11  ;;  %v52_v19 = vld [vmem:[%s2129_s1 + $0x50] sm:$0xff]  ;;  %v599_v20 = vmax.f32 %v1443_v17, 1.0  ;;  %v51_v21 = vld [vmem:[%s2129_s1 + $0x48] sm:$0xff]  ;;  %v50_v22 = vld [vmem:[%s2129_s1 + $0x40] sm:$0xff] }
   0x6   :  { %143 = vmatpush1.msra.mxu0 %v56_v12  ;;  %v49_v24 = vld [vmem:[%s2129_s1 + $0x38] sm:$0xff]  ;;  %v48_v30 = vld [vmem:[%s2129_s1 + $0x30] sm:$0xff]  ;;  %v47_v31 = vld [vmem:[%s2129_s1 + $0x28] sm:$0xff] }
   0x7   :  { %144 = vmatprep.subr.mxu0 %v55_v15  ;;  %v46_v32 = vld [vmem:[%s2129_s1 + $0x20] sm:$0xff]  ;;  %v45_v33 = vld [vmem:[%s2129_s1 + $0x18] sm:$0xff]  ;;  %v44_v34 = vld [vmem:[%s2129_s1 + $0x10] sm:$0xff] }
   0x8   :  { %101 = vperm.xlu0 %1325, %v98_v7   ;;  %350 = vperm.xlu1 %1326, %v347_v8   ;;  %v43_v36 = vld [vmem:[%s2129_s1 + $0x8] sm:$0xff]  ;;  %v42_v37 = vld [vmem:[%s2129_s1] sm:$0xff]  ;;  %v65_v39 = vld [vmem:[%s2129_s1 + $0xb8] sm:$0xff] }
   0x9   :  { %145 = vmatpush1.msra.mxu0 %v54_v16  ;;  %v64_v41 = vld [vmem:[%s2129_s1 + $0xb0] sm:$0xff]  ;;  %v63_v42 = vld [vmem:[%s2129_s1 + $0xa8] sm:$0xff]  ;;  %v62_v43 = vld [vmem:[%s2129_s1 + $0xa0] sm:$0xff] }
   0xa   :  { %146 = vmatprep.subr.mxu0 %v53_v18  ;;  %v61_v45 = vld [vmem:[%s2129_s1 + $0x98] sm:$0xff]  ;;  %v60_v46 = vld [vmem:[%s2129_s1 + $0x90] sm:$0xff]  ;;  %v59_v48 = vld [vmem:[%s2129_s1 + $0x88] sm:$0xff] }
   0xb   :  { %147 = vmatpush1.msra.mxu0 %v52_v19  ;;  %v58_v49 = vld [vmem:[%s2129_s1 + $0x80] sm:$0xff]  ;;  %v73_v51 = vld [vmem:[%s2129_s1 + $0xf8] sm:$0xff]  ;;  %v72_v52 = vld [vmem:[%s2129_s1 + $0xf0] sm:$0xff] }
   0xc   :  { %434 = vperm.xlu0 %1325, %v431_v13   ;;  %518 = vperm.xlu1 %1326, %v515_v14   ;;  %v71_v53 = vld [vmem:[%s2129_s1 + $0xe8] sm:$0xff]  ;;  %v70_v54 = vld [vmem:[%s2129_s1 + $0xe0] sm:$0xff]  ;;  %v69_v55 = vld [vmem:[%s2129_s1 + $0xd8] sm:$0xff] }
   0xd   :  { %148 = vmatprep.subr.mxu0 %v51_v21  ;;  %v68_v56 = vld [vmem:[%s2129_s1 + $0xd0] sm:$0xff]  ;;  %v67_v59 = vld [vmem:[%s2129_s1 + $0xc8] sm:$0xff]  ;;  %v66_v60 = vld [vmem:[%s2129_s1 + $0xc0] sm:$0xff] }
   0xe   :  { %149 = vmatpush1.msra.mxu0 %v50_v22  ;;  %v81_v61 = vld [vmem:[%s2129_s1 + $0x138] sm:$0xff]  ;;  %v80_v63 = vld [vmem:[%s2129_s1 + $0x130] sm:$0xff]  ;;  %v79_v0 = vld [vmem:[%s2129_s1 + $0x128] sm:$0xff] }
   0xf   :  { %216 = vmatprep.subr.mxu0 %v49_v24  ;;  %v74_v7 = vld [vmem:[%s2129_s1 + $0x100] sm:$0xff]  ;;  %v89_v8 = vld [vmem:[%s2129_s1 + $0x178] sm:$0xff]  ;;  %v88_v12 = vld [vmem:[%s2129_s1 + $0x170] sm:$0xff] }
  0x10   :  { %602 = vperm.xlu0 %1325, %v599_v20   ;;  %v87_v13 = vld [vmem:[%s2129_s1 + $0x168] sm:$0xff]  ;;  %v86_v14 = vld [vmem:[%s2129_s1 + $0x160] sm:$0xff]  ;;  %v84_v15 = vld [vmem:[%s2129_s1 + $0x150] sm:$0xff] }
  0x11   :  { %v83_v18 = vld [vmem:[%s2129_s1 + $0x148] sm:$0xff]  ;;  %v82_v19 = vld [vmem:[%s2129_s1 + $0x140] sm:$0xff]  ;;  %v97_v20 = vld [vmem:[%s2129_s1 + $0x1b8] sm:$0xff] }
  0x12   :  { %v96_v22 = vld [vmem:[%s2129_s1 + $0x1b0] sm:$0xff]  ;;  %v95_v24 = vld [vmem:[%s2129_s1 + $0x1a8] sm:$0xff] }
  0x7f   :  { %v110_v25 = vpop.permute.xlu0 %109  ;;  %v267_v27 = vpop.permute.xlu1 %266 }
  0x80   :  { %1327 = vrcp.f32 %v110_v25  ;;  %v94_v25 = vld [vmem:[%s2129_s1 + $0x1a0] sm:$0xff] }
  0x83   :  { %v102_v26 = vpop.permute.xlu0 %101  ;;  %v351_v38 = vpop.permute.xlu1 %350 }
  0x84   :  { %1329 = vrcp.f32 %v102_v26  ;;  %v92_v26 = vld [vmem:[%s2129_s1 + $0x190] sm:$0xff] }
  0x85   :  { %1331 = vrcp.f32 %v267_v27 }
  0x86   :  { %1333 = vrcp.f32 %v351_v38  ;;  %v1224_v38 = vld [vmem:[%s2129_s1 + $0x278] sm:$0xff] }
  0x87   :  { %v435_v47 = vpop.permute.xlu0 %434  ;;  %v519_v58 = vpop.permute.xlu1 %518 }
  0x88   :  { %1335 = vrcp.f32 %v435_v47  ;;  %v1215_v47 = vld [vmem:[%s2129_s1 + $0x230] sm:$0xff] }
  0x89   :  { %1337 = vrcp.f32 %v519_v58  ;;  %v1204_v58 = vld [vmem:[%s2129_s1 + $0x1d8] sm:$0xff] }
  0x8b   :  { %v603_v5 = vpop.permute.xlu0 %602 }
  0x8c   :  { %1339 = vrcp.f32 %v603_v5  ;;  %v1249_v5 = vld [vmem:[%s2129_s1 + $0x340] sm:$0xff] }
  0x8d   :  { %v1328_v28 = vpop.eup %1327 }
  0x8e   :  { %v113_v29 = vmul.f32 %v1328_v28, %v29_v1  ;;  %v78_v1 = vld [vmem:[%s2129_s1 + $0x120] sm:$0xff]  ;;  %v91_v28 = vld [vmem:[%s2129_s1 + $0x188] sm:$0xff] }
  0x90   :  { %1194 = vmatmul.mubr.msk.f32.vlgmr.msra.gmra.mxu0 %vm114_vm0, %v113_v29  ;;  %v90_v29 = vld [vmem:[%s2129_s1 + $0x180] sm:$0xff] }
  0x91   :  { %217 = vmatpush1.msra.mxu0 %v48_v30  ;;  %256 = vmatprep.mubr.f32.mxu0 %v1354_v23  ;;  %v1330_v35 = vpop.eup %1329 }
  0x92   :  { %218 = vmatprep.subr.mxu0 %v47_v31  ;;  %v105_v40 = vmul.f32 %v1330_v35, %v1401_v2  ;;  %v1332_v44 = vpop.eup %1331  ;;  %v77_v2 = vld [vmem:[%s2129_s1 + $0x118] sm:$0xff]  ;;  %v1227_v35 = vld [vmem:[%s2129_s1 + $0x290] sm:$0xff] }
  0x93   :  { %219 = vmatpush1.msra.mxu0 %v46_v32  ;;  %v270_v50 = vmul.f32 %v1332_v44, %v1406_v3  ;;  %v1334_v57 = vpop.eup %1333  ;;  %v76_v3 = vld [vmem:[%s2129_s1 + $0x110] sm:$0xff]  ;;  %v1232_v31 = vld [vmem:[%s2129_s1 + $0x2b8] sm:$0xff]  ;;  %v1218_v44 = vld [vmem:[%s2129_s1 + $0x248] sm:$0xff] }
  0x94   :  { %220 = vmatprep.subr.mxu0 %v45_v33  ;;  %v354_v62 = vmul.f32 %v1334_v57, %v1412_v6  ;;  %v75_v6 = vld [vmem:[%s2129_s1 + $0x108] sm:$0xff]  ;;  %801 = vmatprep.subr.mxu1 %v1232_v31  ;;  %v1231_v32 = vld [vmem:[%s2129_s1 + $0x2b0] sm:$0xff]  ;;  %v1205_v57 = vld [vmem:[%s2129_s1 + $0x1e0] sm:$0xff] }
  0x95   :  { %221 = vmatpush1.msra.mxu0 %v44_v34  ;;  %v1336_v4 = vpop.eup %1335  ;;  %802 = vmatpush1.msra.mxu1 %v1231_v32  ;;  %v1230_v33 = vld [vmem:[%s2129_s1 + $0x2a8] sm:$0xff]  ;;  %v1228_v34 = vld [vmem:[%s2129_s1 + $0x298] sm:$0xff]  ;;  %v1285_v31 = vld [vmem:[%s2129_s1 + $0x440] sm:$0xff] }
  0x96   :  { %222 = vmatprep.subr.mxu0 %v43_v36  ;;  %v438_v11 = vmul.f32 %v1336_v4, %v1419_v9  ;;  %v85_v9 = vld [vmem:[%s2129_s1 + $0x158] sm:$0xff]  ;;  %v1338_v16 = vpop.eup %1337  ;;  %803 = vmatprep.subr.mxu1 %v1230_v33  ;;  %v1226_v36 = vld [vmem:[%s2129_s1 + $0x288] sm:$0xff]  ;;  %v1283_v33 = vld [vmem:[%s2129_s1 + $0x430] sm:$0xff] }
  0x97   :  { %223 = vmatpush1.msra.mxu0 %v42_v37  ;;  %v522_v21 = vmul.f32 %v1338_v16, %v1424_v10  ;;  %v93_v10 = vld [vmem:[%s2129_s1 + $0x198] sm:$0xff]  ;;  %v1225_v37 = vld [vmem:[%s2129_s1 + $0x280] sm:$0xff]  ;;  %v1250_v4 = vld [vmem:[%s2129_s1 + $0x348] sm:$0xff] }
  0x98   :  { %1195 = vmatmul.mubr.msk.f32.vlgmr.msra.gmra.mxu0 %vm114_vm0, %v105_v40  ;;  %298 = vmatprep.subr.mxu0 %v65_v39  ;;  %v1223_v39 = vld [vmem:[%s2129_s1 + $0x270] sm:$0xff]  ;;  %v1222_v40 = vld [vmem:[%s2129_s1 + $0x268] sm:$0xff]  ;;  %v1284_v32 = vld [vmem:[%s2129_s1 + $0x438] sm:$0xff] }
  0x99   :  { %299 = vmatpush1.msra.mxu0 %v64_v41  ;;  %338 = vmatprep.mubr.f32.mxu0 %v1354_v23  ;;  %v1340_v27 = vpop.eup %1339  ;;  %v1221_v41 = vld [vmem:[%s2129_s1 + $0x260] sm:$0xff]  ;;  %v1239_v16 = vld [vmem:[%s2129_s1 + $0x2f0] sm:$0xff] }
  0x9a   :  { %300 = vmatprep.subr.mxu0 %v63_v42  ;;  %v606_v30 = vmul.f32 %v1340_v27, %v1443_v17  ;;  %v1229_v17 = vld [vmem:[%s2129_s1 + $0x2a0] sm:$0xff]  ;;  %v1220_v42 = vld [vmem:[%s2129_s1 + $0x258] sm:$0xff] }
  0x9b   :  { %301 = vmatpush1.msra.mxu0 %v62_v43  ;;  %804 = vmatpush1.msra.mxu1 %v1229_v17  ;;  %v1219_v43 = vld [vmem:[%s2129_s1 + $0x250] sm:$0xff]  ;;  %v1289_v27 = vld [vmem:[%s2129_s1 + $0x460] sm:$0xff]  ;;  %v1282_v17 = vld [vmem:[%s2129_s1 + $0x428] sm:$0xff] }
  0x9c   :  { %302 = vmatprep.subr.mxu0 %v61_v45  ;;  %805 = vmatprep.subr.mxu1 %v1228_v34  ;;  %v1217_v45 = vld [vmem:[%s2129_s1 + $0x240] sm:$0xff] }
  0x9d   :  { %303 = vmatpush1.msra.mxu0 %v60_v46  ;;  %806 = vmatpush1.msra.mxu1 %v1227_v35  ;;  %v1216_v46 = vld [vmem:[%s2129_s1 + $0x238] sm:$0xff]  ;;  %v1281_v34 = vld [vmem:[%s2129_s1 + $0x420] sm:$0xff] }
  0x9e   :  { %304 = vmatprep.subr.mxu0 %v59_v48  ;;  %807 = vmatprep.subr.mxu1 %v1226_v36  ;;  %v1214_v48 = vld [vmem:[%s2129_s1 + $0x228] sm:$0xff]  ;;  %v1280_v35 = vld [vmem:[%s2129_s1 + $0x418] sm:$0xff]  ;;  %v1279_v36 = vld [vmem:[%s2129_s1 + $0x410] sm:$0xff] }
  0x9f   :  { %305 = vmatpush1.msra.mxu0 %v58_v49  ;;  %808 = vmatpush1.msra.mxu1 %v1225_v37  ;;  %v1213_v49 = vld [vmem:[%s2129_s1 + $0x220] sm:$0xff]  ;;  %v1278_v37 = vld [vmem:[%s2129_s1 + $0x408] sm:$0xff] }
  0xa0   :  { %1196 = vmatmul.mubr.msk.f32.vlgmr.msra.gmra.mxu0 %vm114_vm0, %v270_v50  ;;  %382 = vmatprep.subr.mxu0 %v73_v51  ;;  %v1212_v50 = vld [vmem:[%s2129_s1 + $0x218] sm:$0xff]  ;;  %v1211_v51 = vld [vmem:[%s2129_s1 + $0x210] sm:$0xff] }
  0xa1   :  { %383 = vmatpush1.msra.mxu0 %v72_v52  ;;  %422 = vmatprep.mubr.f32.mxu0 %v1354_v23  ;;  %v1210_v52 = vld [vmem:[%s2129_s1 + $0x208] sm:$0xff] }
  0xa2   :  { %384 = vmatprep.subr.mxu0 %v71_v53  ;;  %809 = vmatprep.subr.mxu1 %v1224_v38  ;;  %v1209_v53 = vld [vmem:[%s2129_s1 + $0x200] sm:$0xff] }
  0xa3   :  { %385 = vmatpush1.msra.mxu0 %v70_v54  ;;  %810 = vmatpush1.msra.mxu1 %v1223_v39  ;;  %v1208_v54 = vld [vmem:[%s2129_s1 + $0x1f8] sm:$0xff]  ;;  %v1277_v38 = vld [vmem:[%s2129_s1 + $0x400] sm:$0xff] }
  0xa4   :  { %386 = vmatprep.subr.mxu0 %v69_v55  ;;  %811 = vmatprep.subr.mxu1 %v1222_v40  ;;  %v1207_v55 = vld [vmem:[%s2129_s1 + $0x1f0] sm:$0xff]  ;;  %v1276_v39 = vld [vmem:[%s2129_s1 + $0x3f8] sm:$0xff] }
  0xa5   :  { %387 = vmatpush1.msra.mxu0 %v68_v56  ;;  %812 = vmatpush1.msra.mxu1 %v1221_v41  ;;  %v1206_v56 = vld [vmem:[%s2129_s1 + $0x1e8] sm:$0xff]  ;;  %v1275_v40 = vld [vmem:[%s2129_s1 + $0x3f0] sm:$0xff] }
  0xa6   :  { %388 = vmatprep.subr.mxu0 %v67_v59  ;;  %813 = vmatprep.subr.mxu1 %v1220_v42  ;;  %v1203_v59 = vld [vmem:[%s2129_s1 + $0x1d0] sm:$0xff]  ;;  %v1274_v41 = vld [vmem:[%s2129_s1 + $0x3e8] sm:$0xff]  ;;  %v1273_v42 = vld [vmem:[%s2129_s1 + $0x3e0] sm:$0xff] }
  0xa7   :  { %389 = vmatpush1.msra.mxu0 %v66_v60  ;;  %814 = vmatpush1.msra.mxu1 %v1219_v43  ;;  %v1202_v60 = vld [vmem:[%s2129_s1 + $0x1c8] sm:$0xff]  ;;  %v1272_v43 = vld [vmem:[%s2129_s1 + $0x3d8] sm:$0xff] }
  0xa8   :  { %1197 = vmatmul.mubr.msk.f32.vlgmr.msra.gmra.mxu0 %vm114_vm0, %v354_v62  ;;  %466 = vmatprep.subr.mxu0 %v81_v61  ;;  %v1201_v61 = vld [vmem:[%s2129_s1 + $0x1c0] sm:$0xff]  ;;  %v1256_v62 = vld [vmem:[%s2129_s1 + $0x378] sm:$0xff] }
  0xa9   :  { %467 = vmatpush1.msra.mxu0 %v80_v63  ;;  %506 = vmatprep.mubr.f32.mxu0 %v1354_v23  ;;  %v1255_v63 = vld [vmem:[%s2129_s1 + $0x370] sm:$0xff] }
  0xaa   :  { %468 = vmatprep.subr.mxu0 %v79_v0  ;;  %815 = vmatprep.subr.mxu1 %v1218_v44  ;;  %v1254_v0 = vld [vmem:[%s2129_s1 + $0x368] sm:$0xff]  ;;  %v1271_v44 = vld [vmem:[%s2129_s1 + $0x3d0] sm:$0xff] }
  0xab   :  { %469 = vmatpush1.msra.mxu0 %v78_v1  ;;  %816 = vmatpush1.msra.mxu1 %v1217_v45  ;;  %v1253_v1 = vld [vmem:[%s2129_s1 + $0x360] sm:$0xff]  ;;  %v1270_v45 = vld [vmem:[%s2129_s1 + $0x3c8] sm:$0xff] }
  0xac   :  { %470 = vmatprep.subr.mxu0 %v77_v2  ;;  %817 = vmatprep.subr.mxu1 %v1216_v46  ;;  %v1252_v2 = vld [vmem:[%s2129_s1 + $0x358] sm:$0xff]  ;;  %v1269_v46 = vld [vmem:[%s2129_s1 + $0x3c0] sm:$0xff] }
  0xad   :  { %471 = vmatpush1.msra.mxu0 %v76_v3  ;;  %818 = vmatpush1.msra.mxu1 %v1215_v47  ;;  %v1251_v3 = vld [vmem:[%s2129_s1 + $0x350] sm:$0xff]  ;;  %v1268_v47 = vld [vmem:[%s2129_s1 + $0x3b8] sm:$0xff] }
  0xae   :  { %472 = vmatprep.subr.mxu0 %v75_v6  ;;  %819 = vmatprep.subr.mxu1 %v1214_v48  ;;  %v1248_v6 = vld [vmem:[%s2129_s1 + $0x338] sm:$0xff]  ;;  %v1267_v48 = vld [vmem:[%s2129_s1 + $0x3b0] sm:$0xff] }
  0xaf   :  { %473 = vmatpush1.msra.mxu0 %v74_v7  ;;  %820 = vmatpush1.msra.mxu1 %v1213_v49  ;;  %v1247_v7 = vld [vmem:[%s2129_s1 + $0x330] sm:$0xff]  ;;  %v1266_v49 = vld [vmem:[%s2129_s1 + $0x3a8] sm:$0xff] }
  0xb0   :  { %1198 = vmatmul.mubr.msk.f32.vlgmr.msra.gmra.mxu0 %vm114_vm0, %v438_v11  ;;  %550 = vmatprep.subr.mxu0 %v89_v8  ;;  %v1246_v8 = vld [vmem:[%s2129_s1 + $0x328] sm:$0xff]  ;;  %v1245_v11 = vld [vmem:[%s2129_s1 + $0x320] sm:$0xff] }
  0xb1   :  { %551 = vmatpush1.msra.mxu0 %v88_v12  ;;  %590 = vmatprep.mubr.f32.mxu0 %v1354_v23  ;;  %v1244_v12 = vld [vmem:[%s2129_s1 + $0x318] sm:$0xff] }
  0xb2   :  { %552 = vmatprep.subr.mxu0 %v87_v13  ;;  %821 = vmatprep.subr.mxu1 %v1212_v50  ;;  %v1243_v13 = vld [vmem:[%s2129_s1 + $0x310] sm:$0xff]  ;;  %v1265_v50 = vld [vmem:[%s2129_s1 + $0x3a0] sm:$0xff] }
  0xb3   :  { %553 = vmatpush1.msra.mxu0 %v86_v14  ;;  %822 = vmatpush1.msra.mxu1 %v1211_v51  ;;  %v1242_v14 = vld [vmem:[%s2129_s1 + $0x308] sm:$0xff]  ;;  %v1264_v51 = vld [vmem:[%s2129_s1 + $0x398] sm:$0xff] }
  0xb4   :  { %554 = vmatprep.subr.mxu0 %v85_v9  ;;  %823 = vmatprep.subr.mxu1 %v1210_v52  ;;  %v1241_v9 = vld [vmem:[%s2129_s1 + $0x300] sm:$0xff]  ;;  %v1263_v52 = vld [vmem:[%s2129_s1 + $0x390] sm:$0xff] }
  0xb5   :  { %555 = vmatpush1.msra.mxu0 %v84_v15  ;;  %824 = vmatpush1.msra.mxu1 %v1209_v53  ;;  %v1240_v15 = vld [vmem:[%s2129_s1 + $0x2f8] sm:$0xff]  ;;  %v1262_v53 = vld [vmem:[%s2129_s1 + $0x388] sm:$0xff] }
  0xb6   :  { %556 = vmatprep.subr.mxu0 %v83_v18  ;;  %825 = vmatprep.subr.mxu1 %v1208_v54  ;;  %v1238_v18 = vld [vmem:[%s2129_s1 + $0x2e8] sm:$0xff]  ;;  %v1261_v54 = vld [vmem:[%s2129_s1 + $0x380] sm:$0xff] }
  0xb7   :  { %557 = vmatpush1.msra.mxu0 %v82_v19  ;;  %826 = vmatpush1.msra.mxu1 %v1207_v55  ;;  %v1237_v19 = vld [vmem:[%s2129_s1 + $0x2e0] sm:$0xff] }
  0xb8   :  { %1199 = vmatmul.mubr.msk.f32.vlgmr.msra.gmra.mxu0 %vm114_vm0, %v522_v21  ;;  %634 = vmatprep.subr.mxu0 %v97_v20  ;;  %v1236_v20 = vld [vmem:[%s2129_s1 + $0x2d8] sm:$0xff]  ;;  %v1235_v21 = vld [vmem:[%s2129_s1 + $0x2d0] sm:$0xff] }
  0xb9   :  { %635 = vmatpush1.msra.mxu0 %v96_v22  ;;  %674 = vmatprep.mubr.f32.mxu0 %v1354_v23  ;;  %v1234_v22 = vld [vmem:[%s2129_s1 + $0x2c8] sm:$0xff] }
  0xba   :  { %636 = vmatprep.subr.mxu0 %v95_v24  ;;  %827 = vmatprep.subr.mxu1 %v1206_v56  ;;  %v1233_v24 = vld [vmem:[%s2129_s1 + $0x2c0] sm:$0xff] }
  0xbb   :  { %637 = vmatpush1.msra.mxu0 %v94_v25  ;;  %828 = vmatpush1.msra.mxu1 %v1205_v57  ;;  %v1292_v25 = vld [vmem:[%s2129_s1 + $0x478] sm:$0xff] }
  0xbc   :  { %638 = vmatprep.subr.mxu0 %v93_v10  ;;  %829 = vmatprep.subr.mxu1 %v1204_v58  ;;  %v1291_v10 = vld [vmem:[%s2129_s1 + $0x470] sm:$0xff] }
  0xbd   :  { %639 = vmatpush1.msra.mxu0 %v92_v26  ;;  %830 = vmatpush1.msra.mxu1 %v1203_v59  ;;  %v1290_v26 = vld [vmem:[%s2129_s1 + $0x468] sm:$0xff] }
  0xbe   :  { %640 = vmatprep.subr.mxu0 %v91_v28  ;;  %831 = vmatprep.subr.mxu1 %v1202_v60  ;;  %v1288_v28 = vld [vmem:[%s2129_s1 + $0x458] sm:$0xff] }
  0xbf   :  { %641 = vmatpush1.msra.mxu0 %v90_v29  ;;  %832 = vmatpush1.msra.mxu1 %v1201_v61  ;;  %v1287_v29 = vld [vmem:[%s2129_s1 + $0x450] sm:$0xff] }
  0xc0   :  { %1200 = vmatmul.mubr.msk.f32.vlgmr.msra.gmra.mxu0 %vm114_vm0, %v606_v30  ;;  %841 = vmatprep.subr.mxu1 %v1256_v62  ;;  %v1286_v30 = vld [vmem:[%s2129_s1 + $0x448] sm:$0xff] }
  0xc1   :  { %842 = vmatpush2.msra.mxu1 %v1255_v63  ;;  %977 = vmatprep.subr.mxu0 %v1292_v25  ;;  %v685_v63 = vlaneseq }
  0xc2   :  { %843 = vmatprep.subr.mxu1 %v1254_v0  ;;  %978 = vmatpush1.msra.mxu0 %v1291_v10  ;;  %v711_v10 = vld [vmem:[%s2132_s4] sm:$0x3] }
  0xc3   :  { %844 = vmatpush2.msra.mxu1 %v1253_v1  ;;  %979 = vmatprep.subr.mxu0 %v1290_v26 }
  0xc4   :  { %845 = vmatprep.subr.mxu1 %v1252_v2  ;;  %980 = vmatpush1.msra.mxu0 %v1289_v27  ;;  %v686_v2 = vshrl.u32 %v685_v63, 7  ;;  %v1095_v63 = vld [vmem:[%s2133_s5 + $0x78] sm:$0xff] }
  0xc5   :  { %846 = vmatpush2.msra.mxu1 %v1251_v3  ;;  %981 = vmatprep.subr.mxu0 %v1288_v28 }
  0xc6   :  { %847 = vmatprep.subr.mxu1 %v1250_v4  ;;  %982 = vmatpush1.msra.mxu0 %v1287_v29 }
  0xc7   :  { %848 = vmatpush2.msra.mxu1 %v1249_v5  ;;  %983 = vmatprep.subr.mxu0 %v1286_v30 }
  0xc8   :  { %849 = vmatprep.subr.mxu1 %v1248_v6  ;;  %984 = vmatpush1.msra.mxu0 %v1285_v31 }
  0xc9   :  { %850 = vmatpush2.msra.mxu1 %v1247_v7  ;;  %985 = vmatprep.subr.mxu0 %v1284_v32 }
  0xca   :  { %851 = vmatprep.subr.mxu1 %v1246_v8  ;;  %986 = vmatpush1.msra.mxu0 %v1283_v33 }
  0xcb   :  { %852 = vmatpush2.msra.mxu1 %v1245_v11  ;;  %987 = vmatprep.subr.mxu0 %v1282_v17  ;;  %v1887_v11 = vsub.s32 0, %v686_v2 }
  0xcc   :  { %853 = vmatprep.subr.mxu1 %v1244_v12  ;;  %988 = vmatpush1.msra.mxu0 %v1281_v34  ;;  %v683_v12 = vld [vmem:[%s2130_s2] sm:$0x3] }
  0xcd   :  { %854 = vmatpush2.msra.mxu1 %v1243_v13  ;;  %989 = vmatprep.subr.mxu0 %v1280_v35  ;;  %v716_v31 = vrot.slane %v711_v10, %v1887_v11 }
  0xce   :  { %855 = vmatprep.subr.mxu1 %v1242_v14  ;;  %990 = vmatpush1.msra.mxu0 %v1279_v36 }
  0xcf   :  { %856 = vmatpush2.msra.mxu1 %v1241_v9  ;;  %991 = vmatprep.subr.mxu0 %v1278_v37  ;;  %v1892_v9 = vsub.s32 1, %v686_v2  ;;  %v1092_v2 = vld [vmem:[%s2133_s5 + $0x60] sm:$0xff] }
  0xd0   :  { %857 = vmatprep.subr.mxu1 %v1240_v15  ;;  %992 = vmatpush1.msra.mxu0 %v1277_v38 }
  0xd1   :  { %858 = vmatpush2.msra.mxu1 %v1239_v16  ;;  %993 = vmatprep.subr.mxu0 %v1276_v39  ;;  %v697_v16 = vld [vmem:[%s2131_s3] sm:$0x3]  ;;  %v692_v26 = vrot.slane %v683_v12, %v1892_v9  ;;  %v720_v17 = vrot.slane %v711_v10, %v1892_v9  ;;  %v1316_v39 = vld [vmem:[%s2129_s1 + $0x538] sm:$0xff] }
  0xd2   :  { %859 = vmatprep.subr.mxu1 %v1238_v18  ;;  %994 = vmatpush1.msra.mxu0 %v1275_v40  ;;  %v702_v25 = vrot.slane %v697_v16, %v1887_v11  ;;  %v706_v30 = vrot.slane %v697_v16, %v1892_v9  ;;  %v1315_v40 = vld [vmem:[%s2129_s1 + $0x530] sm:$0xff]  ;;  %v1081_v16 = vld [vmem:[%s2133_s5 + $0x8] sm:$0xff] }
  0xd3   :  { %860 = vmatpush2.msra.mxu1 %v1237_v19  ;;  %995 = vmatprep.subr.mxu0 %v1274_v41  ;;  %v1314_v41 = vld [vmem:[%s2129_s1 + $0x528] sm:$0xff] }
  0xd4   :  { %861 = vmatprep.subr.mxu1 %v1236_v20  ;;  %996 = vmatpush1.msra.mxu0 %v1273_v42  ;;  %v688_v20 = vrot.slane %v683_v12, %v1887_v11  ;;  %v1313_v42 = vld [vmem:[%s2129_s1 + $0x520] sm:$0xff]  ;;  %v1085_v12 = vld [vmem:[%s2133_s5 + $0x28] sm:$0xff] }
  0xd5   :  { %862 = vmatpush2.msra.mxu1 %v1235_v21  ;;  %997 = vmatprep.subr.mxu0 %v1272_v43  ;;  %v1312_v43 = vld [vmem:[%s2129_s1 + $0x518] sm:$0xff] }
  0xd6   :  { %863 = vmatprep.subr.mxu1 %v1234_v22  ;;  %998 = vmatpush1.msra.mxu0 %v1271_v44  ;;  %v1311_v44 = vld [vmem:[%s2129_s1 + $0x510] sm:$0xff] }
  0xd7   :  { %864 = vmatpush2.msra.mxu1 %v1233_v24  ;;  %999 = vmatprep.subr.mxu0 %v1270_v45  ;;  %v1310_v45 = vld [vmem:[%s2129_s1 + $0x508] sm:$0xff] }
  0xd8   :  { %1118 = vmatprep.subr.mxu1 %v1354_v23  ;;  %1000 = vmatpush1.msra.mxu0 %v1269_v46  ;;  %v1309_v46 = vld [vmem:[%s2129_s1 + $0x500] sm:$0xff] }
  0xd9   :  { %1001 = vmatprep.subr.mxu0 %v1268_v47  ;;  %v1308_v47 = vld [vmem:[%s2129_s1 + $0x4f8] sm:$0xff] }
  0xda   :  { %1002 = vmatpush1.msra.mxu0 %v1267_v48  ;;  %v1307_v48 = vld [vmem:[%s2129_s1 + $0x4f0] sm:$0xff] }
  0xdb   :  { %1003 = vmatprep.subr.mxu0 %v1266_v49  ;;  %v1306_v49 = vld [vmem:[%s2129_s1 + $0x4e8] sm:$0xff] }
  0xdc   :  { %1004 = vmatpush1.msra.mxu0 %v1265_v50  ;;  %v1305_v50 = vld [vmem:[%s2129_s1 + $0x4e0] sm:$0xff] }
  0xdd   :  { %1005 = vmatprep.subr.mxu0 %v1264_v51  ;;  %v1304_v51 = vld [vmem:[%s2129_s1 + $0x4d8] sm:$0xff] }
  0xde   :  { %1006 = vmatpush1.msra.mxu0 %v1263_v52  ;;  %v1303_v52 = vld [vmem:[%s2129_s1 + $0x4d0] sm:$0xff] }
  0xdf   :  { %1007 = vmatprep.subr.mxu0 %v1262_v53  ;;  %v1302_v53 = vld [vmem:[%s2129_s1 + $0x4c8] sm:$0xff] }
  0xe0   :  { %1008 = vmatpush1.msra.mxu0 %v1261_v54  ;;  %v1301_v54 = vld [vmem:[%s2129_s1 + $0x4c0] sm:$0xff] }
  0xe1   :  { %1017 = vmatprep.subr.mxu0 %v1316_v39  ;;  %v1105_v39 = vld [vmem:[%s2133_s5 + $0xc8] sm:$0xff] }
  0xe2   :  { %1018 = vmatpush2.msra.mxu0 %v1315_v40  ;;  %v1104_v40 = vld [vmem:[%s2133_s5 + $0xc0] sm:$0xff] }
  0xe3   :  { %1019 = vmatprep.subr.mxu0 %v1314_v41  ;;  %v1103_v41 = vld [vmem:[%s2133_s5 + $0xb8] sm:$0xff] }
  0xe4   :  { %1020 = vmatpush2.msra.mxu0 %v1313_v42  ;;  %v1102_v42 = vld [vmem:[%s2133_s5 + $0xb0] sm:$0xff] }
  0xe5   :  { %1021 = vmatprep.subr.mxu0 %v1312_v43  ;;  %v1101_v43 = vld [vmem:[%s2133_s5 + $0xa8] sm:$0xff] }
  0xe6   :  { %1022 = vmatpush2.msra.mxu0 %v1311_v44  ;;  %v1100_v44 = vld [vmem:[%s2133_s5 + $0xa0] sm:$0xff] }
  0xe7   :  { %1023 = vmatprep.subr.mxu0 %v1310_v45  ;;  %v1099_v45 = vld [vmem:[%s2133_s5 + $0x98] sm:$0xff] }
  0xe8   :  { %1024 = vmatpush2.msra.mxu0 %v1309_v46  ;;  %v1098_v46 = vld [vmem:[%s2133_s5 + $0x90] sm:$0xff] }
  0xe9   :  { %1025 = vmatprep.subr.mxu0 %v1308_v47  ;;  %v1097_v47 = vld [vmem:[%s2133_s5 + $0x88] sm:$0xff] }
  0xea   :  { %1026 = vmatpush2.msra.mxu0 %v1307_v48  ;;  %v1096_v48 = vld [vmem:[%s2133_s5 + $0x80] sm:$0xff] }
  0xeb   :  { %1027 = vmatprep.subr.mxu0 %v1306_v49  ;;  %v12_v49 = vstv %s2134_s6 }
  0xec   :  { %1028 = vmatpush2.msra.mxu0 %v1305_v50  ;;  %13 = vst [vmem:[#allocation2] sm:$0x1] %v12_v49  ;;  %v1317_v50 = vld [vmem:[%s2130_s2 + $0x4] sm:$0x3] }
  0xed   :  { %1029 = vmatprep.subr.mxu0 %v1304_v51  ;;  %v1319_v51 = vld [vmem:[%s2131_s3 + $0x4] sm:$0x3] }
  0xee   :  { %1030 = vmatpush2.msra.mxu0 %v1303_v52  ;;  %v967_v52 = vrot.slane %v1317_v50, %v1887_v11 }
  0xef   :  { %1031 = vmatprep.subr.mxu0 %v1302_v53  ;;  %v1054_v53 = vrot.slane %v1319_v51, %v1887_v11 }
  0xf0   :  { %1032 = vmatpush2.msra.mxu0 %v1301_v54  ;;  %v971_v54 = vrot.slane %v1317_v50, %v1892_v9 }
 0x150   :  { %v184_v55 = vpop.f32.mrf.mxu0 }
 0x152   :  { %v186_v56 = vpop.f32.mrf.mxu0 }
 0x158   :  { %v258_v57 = vpop.f32.mrf.mxu0 }
 0x159   :  { %v259_v1 = vadd.f32 %v258_v57, %v184_v55  ;;  %v1300_v55 = vld [vmem:[%s2129_s1 + $0x4b8] sm:$0xff]  ;;  %v1298_v57 = vld [vmem:[%s2129_s1 + $0x4a8] sm:$0xff] }
 0x15a   :  { %v260_v58 = vpop.f32.mrf.mxu0  ;;  %1033 = vmatprep.subr.mxu0 %v1300_v55 }
 0x15b   :  { %v261_v4 = vadd.f32 %v260_v58, %v186_v56  ;;  %v1299_v56 = vld [vmem:[%s2129_s1 + $0x4b0] sm:$0xff]  ;;  %v1297_v58 = vld [vmem:[%s2129_s1 + $0x4a0] sm:$0xff] }
 0x15c   :  { %1034 = vmatpush2.msra.mxu0 %v1299_v56 }
 0x15d   :  { %1035 = vmatprep.subr.mxu0 %v1298_v57  ;;  %v1058_v57 = vrot.slane %v1319_v51, %v1892_v9 }
 0x15e   :  { %1036 = vmatpush2.msra.mxu0 %v1297_v58 }
 0x160   :  { %v340_v59 = vpop.f32.mrf.mxu0 }
 0x161   :  { %v345_v5 = vadd.f32 %v340_v59, %v259_v1  ;;  %v1296_v59 = vld [vmem:[%s2129_s1 + $0x498] sm:$0xff]  ;;  %v1093_v1 = vld [vmem:[%s2133_s5 + $0x68] sm:$0xff] }
 0x162   :  { %v342_v60 = vpop.f32.mrf.mxu0  ;;  %1037 = vmatprep.subr.mxu0 %v1296_v59 }
 0x163   :  { %v346_v7 = vadd.f32 %v342_v60, %v261_v4  ;;  %v1295_v60 = vld [vmem:[%s2129_s1 + $0x490] sm:$0xff] }
 0x164   :  { %1038 = vmatpush2.msra.mxu0 %v1295_v60  ;;  %v1090_v4 = vld [vmem:[%s2133_s5 + $0x50] sm:$0xff] }
 0x168   :  { %v424_v61 = vpop.f32.mrf.mxu0 }
 0x169   :  { %v429_v8 = vadd.f32 %v424_v61, %v345_v5  ;;  %v1294_v61 = vld [vmem:[%s2129_s1 + $0x488] sm:$0xff] }
 0x16a   :  { %v426_v62 = vpop.f32.mrf.mxu0  ;;  %1039 = vmatprep.subr.mxu0 %v1294_v61  ;;  %v1089_v5 = vld [vmem:[%s2133_s5 + $0x48] sm:$0xff] }
 0x16b   :  { %v430_v13 = vadd.f32 %v426_v62, %v346_v7  ;;  %v1293_v62 = vld [vmem:[%s2129_s1 + $0x480] sm:$0xff]  ;;  %v1087_v7 = vld [vmem:[%s2133_s5 + $0x38] sm:$0xff] }
 0x16c   :  { %1040 = vmatpush2.msra.mxu0 %v1293_v62 }
 0x170   :  { %v508_v0 = vpop.f32.mrf.mxu0 }
 0x171   :  { %v513_v14 = vadd.f32 %v508_v0, %v429_v8  ;;  %v1094_v0 = vld [vmem:[%s2133_s5 + $0x70] sm:$0xff] }
 0x172   :  { %v510_v3 = vpop.f32.mrf.mxu0  ;;  %v1086_v8 = vld [vmem:[%s2133_s5 + $0x30] sm:$0xff] }
 0x173   :  { %v514_v18 = vadd.f32 %v510_v3, %v430_v13  ;;  %v1091_v3 = vld [vmem:[%s2133_s5 + $0x58] sm:$0xff]  ;;  %v1084_v13 = vld [vmem:[%s2133_s5 + $0x20] sm:$0xff] }
 0x178   :  { %v592_v6 = vpop.f32.mrf.mxu0 }
 0x179   :  { %v597_v19 = vadd.f32 %v592_v6, %v513_v14  ;;  %v1088_v6 = vld [vmem:[%s2133_s5 + $0x40] sm:$0xff]  ;;  %v1083_v14 = vld [vmem:[%s2133_s5 + $0x18] sm:$0xff] }
 0x17a   :  { %v594_v15 = vpop.f32.mrf.mxu0 }
 0x17b   :  { %v598_v22 = vadd.f32 %v594_v15, %v514_v18  ;;  %v1082_v15 = vld [vmem:[%s2133_s5 + $0x10] sm:$0xff]  ;;  %v1080_v18 = vld [vmem:[%s2133_s5] sm:$0xff] }
 0x180   :  { %v676_v21 = vpop.f32.mrf.mxu0 }
 0x181   :  { %v681_v24 = vadd.f32 %v676_v21, %v597_v19  ;;  %v1257_v19 = vld [vmem:[%s2130_s2 + $0x2] sm:$0x3] }
 0x182   :  { %v678_v27 = vpop.f32.mrf.mxu0  ;;  %v790_v21 = vrot.slane %v1257_v19, %v1887_v11 }
 0x183   :  { %v695_v28 = vadd.f32 %v688_v20, %v681_v24  ;;  %v682_v29 = vadd.f32 %v678_v27, %v598_v22  ;;  %v1259_v20 = vld [vmem:[%s2131_s3 + $0x2] sm:$0x3] }
 0x184   :  { %v878_v22 = vrot.slane %v1259_v20, %v1887_v11  ;;  %v1260_v24 = vld [vmem:[%s2132_s4 + $0x2] sm:$0x3]  ;;  %v882_v27 = vrot.slane %v1259_v20, %v1892_v9 }
 0x185   :  { %v709_v32 = vmul.f32 %v702_v25, %v695_v28  ;;  %v696_v33 = vadd.f32 %v692_v26, %v682_v29  ;;  %v794_v25 = vrot.slane %v1257_v19, %v1892_v9  ;;  %v893_v28 = vrot.slane %v1260_v24, %v1887_v11 }
 0x187   :  { %v710_v34 = vmul.f32 %v706_v30, %v696_v33  ;;  %v723_v35 = vadd.f32 %v716_v31, %v709_v32  ;;  %v897_v32 = vrot.slane %v1260_v24, %v1892_v9 }
 0x189   :  { %v724_v36 = vadd.f32 %v720_v17, %v710_v34 }
 0x18b   :  { %1341 = vtanh.f32 %v724_v36 }
 0x18c   :  { %1343 = vtanh.f32 %v723_v35 }
 0x198   :  { %v1342_v37 = vpop.eup %1341 }
 0x199   :  { %v1344_v38 = vpop.eup %1343  ;;  %1258 = vmatprep.mubr.msk.f32.mxu1 %vm797_vm1, %v1342_v37  ;;  %v1107_v37 = vld [vmem:[%s2133_s5 + $0xd8] sm:$0xff] }
 0x19a   :  { %866 = vmatmul.mubr.f32.vlgmr.msra.gmra.mxu1 %v1344_v38  ;;  %v1106_v38 = vld [vmem:[%s2133_s5 + $0xd0] sm:$0xff] }
 0x19b   :  { %1119 = vmatpush1.msra.mxu1 %v1095_v63 }
 0x19c   :  { %1120 = vmatprep.subr.mxu1 %v1354_v23 }
 0x19d   :  { %1121 = vmatpush1.msra.mxu1 %v1094_v0 }
 0x19e   :  { %1122 = vmatprep.subr.mxu1 %v1354_v23 }
 0x19f   :  { %1123 = vmatpush1.msra.mxu1 %v1093_v1 }
 0x1a0   :  { %1124 = vmatprep.subr.mxu1 %v1354_v23 }
 0x1a1   :  { %1125 = vmatpush1.msra.mxu1 %v1092_v2 }
 0x1a2   :  { %1126 = vmatprep.subr.mxu1 %v1354_v23 }
 0x1a3   :  { %1127 = vmatpush1.msra.mxu1 %v1091_v3 }
 0x1a4   :  { %1128 = vmatprep.subr.mxu1 %v1354_v23 }
 0x1a5   :  { %1129 = vmatpush1.msra.mxu1 %v1090_v4  ;;  %v1321_v4 = vld [vmem:[#allocation2] ss:$0 sm:$0xff] }
 0x1a6   :  { %1130 = vmatprep.subr.mxu1 %v1354_v23 }
 0x1a7   :  { %1131 = vmatpush1.msra.mxu1 %v1089_v5 }
 0x1a8   :  { %1132 = vmatprep.subr.mxu1 %v1354_v23 }
 0x1a9   :  { %1133 = vmatpush1.msra.mxu1 %v1088_v6 }
 0x1aa   :  { %1134 = vmatprep.subr.mxu1 %v1354_v23 }
 0x1ab   :  { %1135 = vmatpush1.msra.mxu1 %v1087_v7 }
 0x1ac   :  { %1136 = vmatprep.subr.mxu1 %v1354_v23 }
 0x1ad   :  { %1137 = vmatpush1.msra.mxu1 %v1086_v8 }
 0x1ae   :  { %1138 = vmatprep.subr.mxu1 %v1354_v23 }
 0x1af   :  { %1139 = vmatpush1.msra.mxu1 %v1085_v12 }
 0x1b0   :  { %1140 = vmatprep.subr.mxu1 %v1354_v23 }
 0x1b1   :  { %1141 = vmatpush1.msra.mxu1 %v1084_v13 }
 0x1b2   :  { %1142 = vmatprep.subr.mxu1 %v1354_v23 }
 0x1b3   :  { %1143 = vmatpush1.msra.mxu1 %v1083_v14 }
 0x1b4   :  { %1144 = vmatprep.subr.mxu1 %v1354_v23 }
 0x1b5   :  { %1145 = vmatpush1.msra.mxu1 %v1082_v15 }
 0x1b6   :  { %1146 = vmatprep.subr.mxu1 %v1354_v23 }
 0x1b7   :  { %1147 = vmatpush1.msra.mxu1 %v1081_v16 }
 0x1b8   :  { %1148 = vmatprep.subr.mxu1 %v1354_v23 }
 0x1b9   :  { %1149 = vmatpush1.msra.mxu1 %v1080_v18 }
 0x1ba   :  { %1158 = vmatprep.subr.mxu1 %v1354_v23 }
 0x1bb   :  { %1159 = vmatpush2.msra.mxu1 %v1107_v37 }
 0x1bc   :  { %1160 = vmatprep.subr.mxu1 %v1354_v23 }
 0x1bd   :  { %1161 = vmatpush2.msra.mxu1 %v1106_v38 }
 0x1be   :  { %1162 = vmatprep.subr.mxu1 %v1354_v23 }
 0x1bf   :  { %1163 = vmatpush2.msra.mxu1 %v1105_v39 }
 0x1c0   :  { %1164 = vmatprep.subr.mxu1 %v1354_v23 }
 0x1c1   :  { %1165 = vmatpush2.msra.mxu1 %v1104_v40 }
 0x1c2   :  { %1166 = vmatprep.subr.mxu1 %v1354_v23 }
 0x1c3   :  { %1167 = vmatpush2.msra.mxu1 %v1103_v41 }
 0x1c4   :  { %1168 = vmatprep.subr.mxu1 %v1354_v23 }
 0x1c5   :  { %1169 = vmatpush2.msra.mxu1 %v1102_v42 }
 0x1c6   :  { %1170 = vmatprep.subr.mxu1 %v1354_v23 }
 0x1c7   :  { %1171 = vmatpush2.msra.mxu1 %v1101_v43 }
 0x1c8   :  { %1172 = vmatprep.subr.mxu1 %v1354_v23 }
 0x1c9   :  { %1173 = vmatpush2.msra.mxu1 %v1100_v44 }
 0x1ca   :  { %1174 = vmatprep.subr.mxu1 %v1354_v23 }
 0x1cb   :  { %1175 = vmatpush2.msra.mxu1 %v1099_v45 }
 0x1cc   :  { %1176 = vmatprep.subr.mxu1 %v1354_v23 }
 0x1cd   :  { %1177 = vmatpush2.msra.mxu1 %v1098_v46 }
 0x1ce   :  { %1178 = vmatprep.subr.mxu1 %v1354_v23 }
 0x1cf   :  { %1179 = vmatpush2.msra.mxu1 %v1097_v47 }
 0x1d0   :  { %1180 = vmatprep.subr.mxu1 %v1354_v23  ;;  %v1320_v23 = vld [vmem:[%s2132_s4 + $0x4] sm:$0x3] }
 0x1d1   :  { %1181 = vmatpush2.msra.mxu1 %v1096_v48  ;;  %v1069_v58 = vrot.slane %v1320_v23, %v1887_v11  ;;  %v1073_v62 = vrot.slane %v1320_v23, %v1892_v9 }
 0x25a   :  { %v867_v10 = vpop.f32.mrf.mxu1 }
 0x25b   :  { %v868_v26 = vadd.f32 %v867_v10, %v790_v21 }
 0x25c   :  { %v869_v29 = vpop.f32.mrf.mxu1 }
 0x25d   :  { %v885_v30 = vmul.f32 %v878_v22, %v868_v26  ;;  %v870_v31 = vadd.f32 %v869_v29, %v794_v25 }
 0x25f   :  { %v886_v33 = vmul.f32 %v882_v27, %v870_v31  ;;  %v900_v17 = vadd.f32 %v893_v28, %v885_v30 }
 0x261   :  { %v901_v34 = vadd.f32 %v897_v32, %v886_v33 }
 0x263   :  { %1345 = vtanh.f32 %v901_v34 }
 0x264   :  { %1347 = vtanh.f32 %v900_v17 }
 0x270   :  { %v1346_v35 = vpop.eup %1345 }
 0x271   :  { %v1348_v36 = vpop.eup %1347  ;;  %1318 = vmatprep.mubr.msk.f32.mxu0 %vm797_vm1, %v1346_v35 }
 0x272   :  { %1042 = vmatmul.mubr.f32.vlgmr.msra.gmra.mxu0 %v1348_v36 }
 0x332   :  { %v1043_v55 = vpop.f32.mrf.mxu0 }
 0x333   :  { %v1044_v56 = vadd.f32 %v1043_v55, %v967_v52 }
 0x334   :  { %v1045_v59 = vpop.f32.mrf.mxu0 }
 0x335   :  { %v1061_v60 = vmul.f32 %v1054_v53, %v1044_v56  ;;  %v1046_v61 = vadd.f32 %v1045_v59, %v971_v54 }
 0x337   :  { %v1062_v63 = vmul.f32 %v1058_v57, %v1046_v61  ;;  %v1076_v0 = vadd.f32 %v1069_v58, %v1061_v60 }
 0x339   :  { %v1077_v1 = vadd.f32 %v1073_v62, %v1062_v63 }
 0x33b   :  { %1349 = vtanh.f32 %v1077_v1 }
 0x33c   :  { %1351 = vtanh.f32 %v1076_v0 }
 0x348   :  { %v1350_v2 = vpop.eup %1349 }
 0x349   :  { %v1352_v3 = vpop.eup %1351  ;;  %1322 = vmatprep.mubr.msk.f32.mxu1 %vm797_vm1, %v1350_v2 }
 0x34a   :  { %1183 = vmatmul.mubr.f32.vlgmr.msra.gmra.mxu1 %v1352_v3 }
 0x40a   :  { %v1184_v5 = vpop.f32.mrf.mxu1 }
 0x40b   :  { %v1185_v6 = vadd.f32 %v1321_v4, %v1184_v5 }
 0x40c   :  { %v1186_v11 = vpop.f32.mrf.mxu1 }
 0x40d   :  { %1189 = vst.msk [vmem:[%s2135_s7] sm:$0xff] %vm1188_vm2, %v1185_v6 }

// kernel: gnn_graph_classifier.2
= control target key start
LH: loop header
LB: loop body
LE: loop exit
PB: predicated region body
PF: predicated region fallthrough
CT: control target
= control target key end

     0   :  { %vm120_vm0 = vcmask 261120   ;;  %s7863_s15 = smov 96   ;;  %vm7864_vm2 = vmmov 0   ;;  %s7866_s16 = smov 32   ;;  %s10595_s2 = inlined_call_operand.vmem [shape: f32[32,128], index: 2, kind: input, shape index: {}]   ;;  %s10596_s0 = inlined_call_operand.vmem [shape: f32[32,32], index: 0, kind: input, shape index: {}]   ;;  %s10597_s10 = inlined_call_operand.vmem [shape: f32[128,128], index: 10, kind: input, shape index: {}]   ;;  %s10598_s3 = inlined_call_operand.vmem [shape: f32[1,128], index: 3, kind: input, shape index: {}]   ;;  %s10599_s6 = inlined_call_operand.vmem [shape: f32[4,128,128], index: 6, kind: input, shape index: {}]   ;;  %s10600_s4 = inlined_call_operand.vmem [shape: f32[1,128], index: 4, kind: input, shape index: {}]   ;;  %s10601_s5 = inlined_call_operand.vmem [shape: f32[1,128], index: 5, kind: input, shape index: {}]   ;;  %s10602_s7 = inlined_call_operand.vmem [shape: f32[4,1,128], index: 7, kind: input, shape index: {}]   ;;  %s10603_s8 = inlined_call_operand.vmem [shape: f32[4,1,128], index: 8, kind: input, shape index: {}]   ;;  %s10604_s9 = inlined_call_operand.vmem [shape: f32[4,1,128], index: 9, kind: input, shape index: {}]   ;;  %s10605_s1 = inlined_call_operand.vmem [shape: s32[1,4,32], index: 1, kind: input, shape index: {}]   ;;  %s10606_s11 = inlined_call_operand.vmem [shape: f32[1,56,33], index: 11, kind: output, shape index: {}]  }
   0x1   :  { %v112_v0 = vld [vmem:[%s10595_s2 + $0x18] sm:$0xff]  ;;  %v111_v1 = vld [vmem:[%s10595_s2 + $0x10] sm:$0xff]  ;;  %v105_v2 = vld [vmem:[%s10596_s0] sm:$0xff] }
   0x2   :  { %5851 = vmatprep.subr.mxu0 %v112_v0  ;;  %v110_v3 = vld [vmem:[%s10595_s2 + $0x8] sm:$0xff]  ;;  %5859 = vmatprep.mubr.msk.f32.mxu0 %vm120_vm0, %v105_v2  ;;  %v7943_v4 = vld [vmem:[%s10597_s10 + $0x78] sm:$0xff]  ;;  %v7949_v5 = vld [vmem:[%s10597_s10 + $0x70] sm:$0xff] }
   0x3   :  { %5852 = vmatpush3.msra.mxu0 %v112_v0  ;;  %5865 = vmatprep.subr.mxu1 %v7943_v4  ;;  %v109_v6 = vld [vmem:[%s10595_s2] sm:$0xff]  ;;  %v7958_v7 = vld [vmem:[%s10597_s10 + $0x68] sm:$0xff]  ;;  %v107_v9 = vld [vmem:[%s10596_s0 + $0x10] sm:$0xff] }
   0x4   :  { %5853 = vmatprep.subr.mxu0 %v111_v1  ;;  %5866 = vmatpush3.msra.mxu1 %v7943_v4  ;;  %v106_v8 = vld [vmem:[%s10596_s0 + $0x8] sm:$0xff]  ;;  %v7973_v10 = vld [vmem:[%s10597_s10 + $0x60] sm:$0xff]  ;;  %v108_v11 = vld [vmem:[%s10596_s0 + $0x18] sm:$0xff] }
   0x5   :  { %5854 = vmatpush3.msra.mxu0 %v111_v1  ;;  %5867 = vmatprep.subr.mxu1 %v7949_v5  ;;  %v7987_v12 = vld [vmem:[%s10597_s10 + $0x58] sm:$0xff]  ;;  %v7996_v13 = vld [vmem:[%s10597_s10 + $0x50] sm:$0xff]  ;;  %v8005_v14 = vld [vmem:[%s10597_s10 + $0x48] sm:$0xff] }
   0x6   :  { %5855 = vmatprep.subr.mxu0 %v110_v3  ;;  %5868 = vmatpush3.msra.mxu1 %v7949_v5  ;;  %v8014_v15 = vld [vmem:[%s10597_s10 + $0x40] sm:$0xff]  ;;  %v8023_v16 = vld [vmem:[%s10597_s10 + $0x38] sm:$0xff]  ;;  %v8032_v17 = vld [vmem:[%s10597_s10 + $0x30] sm:$0xff] }
   0x7   :  { %5856 = vmatpush3.msra.mxu0 %v110_v3  ;;  %5869 = vmatprep.subr.mxu1 %v7958_v7  ;;  %v8041_v18 = vld [vmem:[%s10597_s10 + $0x28] sm:$0xff]  ;;  %v8050_v19 = vld [vmem:[%s10597_s10 + $0x20] sm:$0xff]  ;;  %v8059_v20 = vld [vmem:[%s10597_s10 + $0x18] sm:$0xff] }
   0x8   :  { %5857 = vmatprep.subr.mxu0 %v109_v6  ;;  %5870 = vmatpush3.msra.mxu1 %v7958_v7  ;;  %v8075_v21 = vld [vmem:[%s10597_s10 + $0x10] sm:$0xff]  ;;  %v8083_v22 = vld [vmem:[%s10597_s10 + $0x8] sm:$0xff]  ;;  %v8092_v23 = vld [vmem:[%s10597_s10] sm:$0xff] }
   0x9   :  { %5858 = vmatpush3.msra.mxu0 %v109_v6  ;;  %5871 = vmatprep.subr.mxu1 %v7973_v10  ;;  %v4907_v24 = vld [vmem:[%s10598_s3] ss:$0 sm:$0xff]  ;;  %v461_v37 = vld [vmem:[%s10599_s6 + $0x78] sm:$0xff]  ;;  %v460_v38 = vld [vmem:[%s10599_s6 + $0x70] sm:$0xff] }
   0xa   :  { %5860 = vmatmul.mubr.msk.f32.vlgmr.msra.gmra.mxu0 %vm120_vm0, %v106_v8  ;;  %5903 = vmatprep.subr.mxu0 %v7943_v4  ;;  %v459_v39 = vld [vmem:[%s10599_s6 + $0x68] sm:$0xff]  ;;  %v458_v40 = vld [vmem:[%s10599_s6 + $0x60] sm:$0xff]  ;;  %v457_v41 = vld [vmem:[%s10599_s6 + $0x58] sm:$0xff] }
   0xb   :  { %5862 = vmatprep.mubr.msk.f32.mxu0 %vm120_vm0, %v107_v9  ;;  %5904 = vmatpush3.msra.mxu0 %v7943_v4  ;;  %v456_v42 = vld [vmem:[%s10599_s6 + $0x50] sm:$0xff]  ;;  %v455_v43 = vld [vmem:[%s10599_s6 + $0x48] sm:$0xff]  ;;  %v454_v44 = vld [vmem:[%s10599_s6 + $0x40] sm:$0xff] }
   0xc   :  { %5905 = vmatprep.subr.mxu0 %v7949_v5  ;;  %5872 = vmatpush3.msra.mxu1 %v7973_v10  ;;  %v453_v45 = vld [vmem:[%s10599_s6 + $0x38] sm:$0xff]  ;;  %v452_v46 = vld [vmem:[%s10599_s6 + $0x30] sm:$0xff]  ;;  %v451_v47 = vld [vmem:[%s10599_s6 + $0x28] sm:$0xff] }
   0xd   :  { %5906 = vmatpush3.msra.mxu0 %v7949_v5  ;;  %5873 = vmatprep.subr.mxu1 %v7987_v12  ;;  %v450_v48 = vld [vmem:[%s10599_s6 + $0x20] sm:$0xff]  ;;  %v449_v49 = vld [vmem:[%s10599_s6 + $0x18] sm:$0xff]  ;;  %v448_v50 = vld [vmem:[%s10599_s6 + $0x10] sm:$0xff] }
   0xe   :  { %5863 = vmatmul.mubr.msk.f32.gmra.mxu0 %vm120_vm0, %v108_v11  ;;  %5907 = vmatprep.subr.mxu0 %v7958_v7  ;;  %v447_v51 = vld [vmem:[%s10599_s6 + $0x8] sm:$0xff]  ;;  %v446_v52 = vld [vmem:[%s10599_s6] sm:$0xff] }
   0xf   :  { %5908 = vmatpush3.msra.mxu0 %v7958_v7  ;;  %5874 = vmatpush3.msra.mxu1 %v7987_v12 }
  0x10   :  { %5909 = vmatprep.subr.mxu0 %v7973_v10  ;;  %5875 = vmatprep.subr.mxu1 %v7996_v13 }
  0x11   :  { %5910 = vmatpush3.msra.mxu0 %v7973_v10  ;;  %5876 = vmatpush3.msra.mxu1 %v7996_v13 }
  0x12   :  { %5911 = vmatprep.subr.mxu0 %v7987_v12  ;;  %5877 = vmatprep.subr.mxu1 %v8005_v14 }
  0x13   :  { %5912 = vmatpush3.msra.mxu0 %v7987_v12  ;;  %5878 = vmatpush3.msra.mxu1 %v8005_v14 }
  0x14   :  { %5913 = vmatprep.subr.mxu0 %v7996_v13  ;;  %5879 = vmatprep.subr.mxu1 %v8014_v15 }
  0x15   :  { %5914 = vmatpush3.msra.mxu0 %v7996_v13  ;;  %5880 = vmatpush3.msra.mxu1 %v8014_v15 }
  0x16   :  { %5915 = vmatprep.subr.mxu0 %v8005_v14  ;;  %5881 = vmatprep.subr.mxu1 %v8023_v16 }
  0x17   :  { %5916 = vmatpush3.msra.mxu0 %v8005_v14  ;;  %5882 = vmatpush3.msra.mxu1 %v8023_v16 }
  0x18   :  { %5917 = vmatprep.subr.mxu0 %v8014_v15  ;;  %5883 = vmatprep.subr.mxu1 %v8032_v17 }
  0x19   :  { %5918 = vmatpush3.msra.mxu0 %v8014_v15  ;;  %5884 = vmatpush3.msra.mxu1 %v8032_v17 }
  0x1a   :  { %5919 = vmatprep.subr.mxu0 %v8023_v16  ;;  %5885 = vmatprep.subr.mxu1 %v8041_v18 }
  0x1b   :  { %5920 = vmatpush3.msra.mxu0 %v8023_v16  ;;  %5886 = vmatpush3.msra.mxu1 %v8041_v18 }
  0x1c   :  { %5921 = vmatprep.subr.mxu0 %v8032_v17  ;;  %5887 = vmatprep.subr.mxu1 %v8050_v19 }
  0x1d   :  { %5922 = vmatpush3.msra.mxu0 %v8032_v17  ;;  %5888 = vmatpush3.msra.mxu1 %v8050_v19 }
  0x1e   :  { %5923 = vmatprep.subr.mxu0 %v8041_v18  ;;  %5889 = vmatprep.subr.mxu1 %v8059_v20 }
  0x1f   :  { %5924 = vmatpush3.msra.mxu0 %v8041_v18  ;;  %5890 = vmatpush3.msra.mxu1 %v8059_v20 }
  0x20   :  { %5925 = vmatprep.subr.mxu0 %v8050_v19  ;;  %5891 = vmatprep.subr.mxu1 %v8075_v21 }
  0x21   :  { %5926 = vmatpush3.msra.mxu0 %v8050_v19  ;;  %5892 = vmatpush3.msra.mxu1 %v8075_v21 }
  0x22   :  { %5927 = vmatprep.subr.mxu0 %v8059_v20  ;;  %5893 = vmatprep.subr.mxu1 %v8083_v22 }
  0x23   :  { %5928 = vmatpush3.msra.mxu0 %v8059_v20  ;;  %5894 = vmatpush3.msra.mxu1 %v8083_v22 }
  0x24   :  { %5929 = vmatprep.subr.mxu0 %v8075_v21  ;;  %5895 = vmatprep.subr.mxu1 %v8092_v23 }
  0x25   :  { %5930 = vmatpush3.msra.mxu0 %v8075_v21  ;;  %5896 = vmatpush3.msra.mxu1 %v8092_v23 }
  0x26   :  { %5931 = vmatprep.subr.mxu0 %v8083_v22  ;;  %5941 = vmatprep.subr.mxu1 %v461_v37 }
  0x27   :  { %5932 = vmatpush3.msra.mxu0 %v8083_v22 }
  0x28   :  { %5933 = vmatprep.subr.mxu0 %v8092_v23 }
  0x29   :  { %5934 = vmatpush3.msra.mxu0 %v8092_v23 }
  0x2a   :  { %5979 = vmatprep.subr.mxu0 %v7943_v4 }
  0xca   :  { %v5861_v25 = vpop.f32.mrf.mxu0 }
  0xcb   :  { %v8103_v26 = vadd.f32 %v5861_v25, %v4907_v24 }
  0xcc   :  { %v199_v27 = vpop.f32.mrf.mxu0 }
  0xcd   :  { %v8105_v28 = vadd.f32 %v4907_v24, %v199_v27  ;;  %v306_v31 = vmul.f32 %v8103_v26, %v8103_v26 }
  0xce   :  { %v5864_v29 = vpop.f32.mrf.mxu0 }
  0xcf   :  { %5897 = vmatprep.mubr.f32.mxu1 %v8105_v28  ;;  %v305_v30 = vmul.f32 %v8105_v28, %v8105_v28  ;;  %v8112_v32 = vadd.f32 %v5864_v29, %v4907_v24 }
  0xd0   :  { %v209_v33 = vpop.f32.mrf.mxu0  ;;  %5898 = vmatmul.mubr.f32.vlgmr.msra.gmra.mxu1 %v8103_v26 }
  0xd1   :  { %v8115_v34 = vadd.f32 %v4907_v24, %v209_v33  ;;  %5935 = vmatprep.mubr.f32.mxu0 %v305_v30  ;;  %v308_v36 = vmul.f32 %v8112_v32, %v8112_v32  ;;  %5942 = vmatpush3.msra.mxu1 %v461_v37 }
  0xd2   :  { %5936 = vmatmul.mubr.f32.vlgmr.msra.gmra.mxu0 %v306_v31  ;;  %5943 = vmatprep.subr.mxu1 %v460_v38 }
  0xd3   :  { %5900 = vmatprep.mubr.f32.mxu1 %v8115_v34  ;;  %v307_v35 = vmul.f32 %v8115_v34, %v8115_v34  ;;  %5980 = vmatpush3.msra.mxu0 %v7943_v4 }
  0xd4   :  { %5901 = vmatmul.mubr.f32.gmra.mxu1 %v8112_v32  ;;  %5981 = vmatprep.subr.mxu0 %v7949_v5 }
  0xd5   :  { %5938 = vmatprep.mubr.f32.mxu0 %v307_v35  ;;  %5982 = vmatpush3.msra.mxu0 %v7949_v5  ;;  %v4912_v35 = vld [vmem:[%s10600_s4] ss:$0 sm:$0xff] }
  0xd6   :  { %5939 = vmatmul.mubr.f32.gmra.mxu0 %v308_v36  ;;  %5983 = vmatprep.subr.mxu0 %v7958_v7 }
  0xd7   :  { %5984 = vmatpush3.msra.mxu0 %v7958_v7  ;;  %5944 = vmatpush3.msra.mxu1 %v460_v38 }
  0xd8   :  { %5985 = vmatprep.subr.mxu0 %v7973_v10  ;;  %5945 = vmatprep.subr.mxu1 %v459_v39 }
  0xd9   :  { %5986 = vmatpush3.msra.mxu0 %v7973_v10  ;;  %5946 = vmatpush3.msra.mxu1 %v459_v39  ;;  %v4913_v39 = vld [vmem:[%s10601_s5] ss:$0 sm:$0xff] }
  0xda   :  { %5987 = vmatprep.subr.mxu0 %v7987_v12  ;;  %5947 = vmatprep.subr.mxu1 %v458_v40 }
  0xdb   :  { %5988 = vmatpush3.msra.mxu0 %v7987_v12  ;;  %5948 = vmatpush3.msra.mxu1 %v458_v40 }
  0xdc   :  { %5989 = vmatprep.subr.mxu0 %v7996_v13  ;;  %5949 = vmatprep.subr.mxu1 %v457_v41 }
  0xdd   :  { %5990 = vmatpush3.msra.mxu0 %v7996_v13  ;;  %5950 = vmatpush3.msra.mxu1 %v457_v41 }
  0xde   :  { %5991 = vmatprep.subr.mxu0 %v8005_v14  ;;  %5951 = vmatprep.subr.mxu1 %v456_v42 }
  0xdf   :  { %5992 = vmatpush3.msra.mxu0 %v8005_v14  ;;  %5952 = vmatpush3.msra.mxu1 %v456_v42 }
  0xe0   :  { %5993 = vmatprep.subr.mxu0 %v8014_v15  ;;  %5953 = vmatprep.subr.mxu1 %v455_v43 }
  0xe1   :  { %5994 = vmatpush3.msra.mxu0 %v8014_v15  ;;  %5954 = vmatpush3.msra.mxu1 %v455_v43 }
  0xe2   :  { %5995 = vmatprep.subr.mxu0 %v8023_v16  ;;  %5955 = vmatprep.subr.mxu1 %v454_v44 }
  0xe3   :  { %5996 = vmatpush3.msra.mxu0 %v8023_v16  ;;  %5956 = vmatpush3.msra.mxu1 %v454_v44 }
  0xe4   :  { %5997 = vmatprep.subr.mxu0 %v8032_v17  ;;  %5957 = vmatprep.subr.mxu1 %v453_v45 }
  0xe5   :  { %5998 = vmatpush3.msra.mxu0 %v8032_v17  ;;  %5958 = vmatpush3.msra.mxu1 %v453_v45 }
  0xe6   :  { %5999 = vmatprep.subr.mxu0 %v8041_v18  ;;  %5959 = vmatprep.subr.mxu1 %v452_v46 }
  0xe7   :  { %6000 = vmatpush3.msra.mxu0 %v8041_v18  ;;  %5960 = vmatpush3.msra.mxu1 %v452_v46 }
  0xe8   :  { %6001 = vmatprep.subr.mxu0 %v8050_v19  ;;  %5961 = vmatprep.subr.mxu1 %v451_v47 }
  0xe9   :  { %6002 = vmatpush3.msra.mxu0 %v8050_v19  ;;  %5962 = vmatpush3.msra.mxu1 %v451_v47 }
  0xea   :  { %6003 = vmatprep.subr.mxu0 %v8059_v20  ;;  %5963 = vmatprep.subr.mxu1 %v450_v48 }
  0xeb   :  { %6004 = vmatpush3.msra.mxu0 %v8059_v20  ;;  %5964 = vmatpush3.msra.mxu1 %v450_v48 }
  0xec   :  { %6005 = vmatprep.subr.mxu0 %v8075_v21  ;;  %5965 = vmatprep.subr.mxu1 %v449_v49 }
  0xed   :  { %6006 = vmatpush3.msra.mxu0 %v8075_v21  ;;  %5966 = vmatpush3.msra.mxu1 %v449_v49 }
  0xee   :  { %6007 = vmatprep.subr.mxu0 %v8083_v22  ;;  %5967 = vmatprep.subr.mxu1 %v448_v50 }
  0xef   :  { %6008 = vmatpush3.msra.mxu0 %v8083_v22  ;;  %5968 = vmatpush3.msra.mxu1 %v448_v50 }
  0xf0   :  { %6009 = vmatprep.subr.mxu0 %v8092_v23  ;;  %5969 = vmatprep.subr.mxu1 %v447_v51 }
  0xf1   :  { %6010 = vmatpush3.msra.mxu0 %v8092_v23  ;;  %5970 = vmatpush3.msra.mxu1 %v447_v51 }
  0xf2   :  { %5971 = vmatprep.subr.mxu1 %v446_v52 }
  0xf3   :  { %5972 = vmatpush3.msra.mxu1 %v446_v52 }
  0xf4   :  { %6017 = vmatprep.subr.mxu1 %v7943_v4 }
 0x190   :  { %v5899_v53 = vpop.f32.mrf.mxu1 }
 0x191   :  { %v395_v54 = vmul.f32 %v5899_v53, %v5899_v53  ;;  %v407_v31 = vsub.f32 %v8103_v26, %v5899_v53 }
 0x192   :  { %v286_v55 = vpop.f32.mrf.mxu1  ;;  %v5937_v56 = vpop.f32.mrf.mxu0 }
 0x193   :  { %v394_v57 = vmul.f32 %v286_v55, %v286_v55  ;;  %v399_v58 = vsub.f32 %v5937_v56, %v395_v54  ;;  %v406_v36 = vsub.f32 %v8105_v28, %v286_v55  ;;  %v4914_v55 = vld [vmem:[%s10602_s7] ss:$0 sm:$0xff] }
 0x194   :  { %v5902_v59 = vpop.f32.mrf.mxu1  ;;  %v375_v60 = vpop.f32.mrf.mxu0 }
 0x195   :  { %v403_v61 = vmax.f32 %v399_v58, 0.0  ;;  %v397_v62 = vmul.f32 %v5902_v59, %v5902_v59  ;;  %v398_v63 = vsub.f32 %v375_v60, %v394_v57  ;;  %v409_v42 = vsub.f32 %v8112_v32, %v5902_v59 }
 0x196   :  { %v296_v0 = vpop.f32.mrf.mxu1  ;;  %v5940_v1 = vpop.f32.mrf.mxu0 }
 0x197   :  { %v411_v2 = vadd.f32 1e-05, %v403_v61  ;;  %v402_v3 = vmax.f32 %v398_v63, 0.0  ;;  %v396_v6 = vmul.f32 %v296_v0, %v296_v0  ;;  %v401_v8 = vsub.f32 %v5940_v1, %v397_v62 }
 0x198   :  { %v385_v9 = vpop.f32.mrf.mxu0  ;;  %v408_v26 = vsub.f32 %v8115_v34, %v296_v0 }
 0x199   :  { %7438 = vrsqrt.f32 %v411_v2  ;;  %v410_v11 = vadd.f32 1e-05, %v402_v3  ;;  %v400_v24 = vsub.f32 %v385_v9, %v396_v6  ;;  %v405_v25 = vmax.f32 %v401_v8, 0.0  ;;  %v4932_v6 = vld [vmem:[%s10599_s6 + $0xf8] sm:$0xff]  ;;  %v4931_v8 = vld [vmem:[%s10599_s6 + $0xf0] sm:$0xff]  ;;  %v4930_v9 = vld [vmem:[%s10599_s6 + $0xe8] sm:$0xff] }
 0x19a   :  { %6055 = vmatprep.subr.mxu0 %v4932_v6 }
 0x19b   :  { %7440 = vrsqrt.f32 %v410_v11  ;;  %v404_v27 = vmax.f32 %v400_v24, 0.0  ;;  %v413_v29 = vadd.f32 1e-05, %v405_v25  ;;  %v4929_v11 = vld [vmem:[%s10599_s6 + $0xe0] sm:$0xff]  ;;  %v4928_v24 = vld [vmem:[%s10599_s6 + $0xd8] sm:$0xff]  ;;  %v4927_v25 = vld [vmem:[%s10599_s6 + $0xd0] sm:$0xff] }
 0x19d   :  { %v412_v30 = vadd.f32 1e-05, %v404_v27  ;;  %7442 = vrsqrt.f32 %v413_v29  ;;  %v4926_v27 = vld [vmem:[%s10599_s6 + $0xc8] sm:$0xff]  ;;  %v4925_v29 = vld [vmem:[%s10599_s6 + $0xc0] sm:$0xff] }
 0x19f   :  { %7444 = vrsqrt.f32 %v412_v30  ;;  %v4924_v30 = vld [vmem:[%s10599_s6 + $0xb8] sm:$0xff] }
 0x1a6   :  { %v7439_v33 = vpop.eup %7438 }
 0x1a7   :  { %v419_v37 = vmul.f32 %v7439_v33, %v407_v31  ;;  %v4923_v31 = vld [vmem:[%s10599_s6 + $0xb0] sm:$0xff]  ;;  %v4922_v33 = vld [vmem:[%s10599_s6 + $0xa8] sm:$0xff] }
 0x1a8   :  { %v7441_v38 = vpop.eup %7440 }
 0x1a9   :  { %v429_v40 = vmul.f32 %v4912_v35, %v419_v37  ;;  %v418_v41 = vmul.f32 %v7441_v38, %v406_v36  ;;  %v4920_v36 = vld [vmem:[%s10599_s6 + $0x98] sm:$0xff]  ;;  %v4919_v37 = vld [vmem:[%s10599_s6 + $0x90] sm:$0xff]  ;;  %v4918_v38 = vld [vmem:[%s10599_s6 + $0x88] sm:$0xff] }
 0x1aa   :  { %v7443_v43 = vpop.eup %7442 }
 0x1ab   :  { %v428_v44 = vmul.f32 %v4912_v35, %v418_v41  ;;  %v439_v46 = vadd.f32 %v4913_v39, %v429_v40  ;;  %v421_v47 = vmul.f32 %v7443_v43, %v409_v42 }
 0x1ac   :  { %v7445_v45 = vpop.eup %7444 }
 0x1ad   :  { %v438_v48 = vadd.f32 %v4913_v39, %v428_v44  ;;  %v420_v49 = vmul.f32 %v7445_v45, %v408_v26  ;;  %v431_v28 = vmul.f32 %v4912_v35, %v421_v47 }
 0x1af   :  { %7446 = vtanh.f32 %v438_v48  ;;  %v430_v50 = vmul.f32 %v4912_v35, %v420_v49  ;;  %v441_v51 = vadd.f32 %v4913_v39, %v431_v28  ;;  %v4921_v35 = vld [vmem:[%s10599_s6 + $0xa0] sm:$0xff] }
 0x1b0   :  { %7448 = vtanh.f32 %v439_v46 }
 0x1b1   :  { %v440_v52 = vadd.f32 %v4913_v39, %v430_v50  ;;  %v4917_v39 = vld [vmem:[%s10599_s6 + $0x80] sm:$0xff] }
 0x1b3   :  { %7450 = vtanh.f32 %v440_v52 }
 0x1b4   :  { %7452 = vtanh.f32 %v441_v51 }
 0x1bc   :  { %v8213_v53 = vpop.eup %7446 }
 0x1bd   :  { %v8215_v32 = vpop.eup %7448  ;;  %5973 = vmatprep.mubr.f32.mxu1 %v8213_v53 }
 0x1be   :  { %5974 = vmatmul.mubr.f32.vlgmr.msra.gmra.mxu1 %v8215_v32 }
 0x1bf   :  { %6018 = vmatpush3.msra.mxu1 %v7943_v4 }
 0x1c0   :  { %v8220_v34 = vpop.eup %7450  ;;  %6019 = vmatprep.subr.mxu1 %v7949_v5 }
 0x1c1   :  { %v8223_v54 = vpop.eup %7452  ;;  %5976 = vmatprep.mubr.f32.mxu1 %v8220_v34  ;;  %6020 = vmatpush3.msra.mxu1 %v7949_v5 }
 0x1c2   :  { %5977 = vmatmul.mubr.f32.gmra.mxu1 %v8223_v54  ;;  %6021 = vmatprep.subr.mxu1 %v7958_v7 }
 0x1c3   :  { %6022 = vmatpush3.msra.mxu1 %v7958_v7 }
 0x1c4   :  { %6023 = vmatprep.subr.mxu1 %v7973_v10 }
 0x1c5   :  { %6024 = vmatpush3.msra.mxu1 %v7973_v10 }
 0x1c6   :  { %6025 = vmatprep.subr.mxu1 %v7987_v12 }
 0x1c7   :  { %6026 = vmatpush3.msra.mxu1 %v7987_v12 }
 0x1c8   :  { %6027 = vmatprep.subr.mxu1 %v7996_v13 }
 0x1c9   :  { %6028 = vmatpush3.msra.mxu1 %v7996_v13 }
 0x1ca   :  { %6029 = vmatprep.subr.mxu1 %v8005_v14 }
 0x1cb   :  { %6030 = vmatpush3.msra.mxu1 %v8005_v14 }
 0x1cc   :  { %6031 = vmatprep.subr.mxu1 %v8014_v15 }
 0x1cd   :  { %6032 = vmatpush3.msra.mxu1 %v8014_v15 }
 0x1ce   :  { %6033 = vmatprep.subr.mxu1 %v8023_v16 }
 0x1cf   :  { %6034 = vmatpush3.msra.mxu1 %v8023_v16 }
 0x1d0   :  { %6035 = vmatprep.subr.mxu1 %v8032_v17 }
 0x1d1   :  { %6036 = vmatpush3.msra.mxu1 %v8032_v17 }
 0x1d2   :  { %6037 = vmatprep.subr.mxu1 %v8041_v18 }
 0x1d3   :  { %6038 = vmatpush3.msra.mxu1 %v8041_v18 }
 0x1d4   :  { %6039 = vmatprep.subr.mxu1 %v8050_v19 }
 0x1d5   :  { %6040 = vmatpush3.msra.mxu1 %v8050_v19 }
 0x1d6   :  { %6041 = vmatprep.subr.mxu1 %v8059_v20 }
 0x1d7   :  { %6042 = vmatpush3.msra.mxu1 %v8059_v20 }
 0x1d8   :  { %6043 = vmatprep.subr.mxu1 %v8075_v21 }
 0x1d9   :  { %6044 = vmatpush3.msra.mxu1 %v8075_v21 }
 0x1da   :  { %6045 = vmatprep.subr.mxu1 %v8083_v22 }
 0x1db   :  { %6046 = vmatpush3.msra.mxu1 %v8083_v22 }
 0x1dc   :  { %6047 = vmatprep.subr.mxu1 %v8092_v23 }
 0x1dd   :  { %6048 = vmatpush3.msra.mxu1 %v8092_v23 }
 0x1de   :  { %6093 = vmatprep.subr.mxu1 %v7943_v4 }
 0x27e   :  { %v5975_v56 = vpop.f32.mrf.mxu1 }
 0x27f   :  { %v8260_v57 = vadd.f32 %v5975_v56, %v4914_v55 }
 0x280   :  { %v535_v58 = vpop.f32.mrf.mxu1 }
 0x281   :  { %v8262_v59 = vadd.f32 %v4914_v55, %v535_v58  ;;  %v642_v62 = vmul.f32 %v8260_v57, %v8260_v57 }
 0x282   :  { %v5978_v60 = vpop.f32.mrf.mxu1 }
 0x283   :  { %6011 = vmatprep.mubr.f32.mxu0 %v8262_v59  ;;  %v641_v61 = vmul.f32 %v8262_v59, %v8262_v59  ;;  %v8269_v63 = vadd.f32 %v5978_v60, %v4914_v55 }
 0x284   :  { %v545_v0 = vpop.f32.mrf.mxu1  ;;  %6012 = vmatmul.mubr.f32.vlgmr.msra.gmra.mxu0 %v8260_v57 }
 0x285   :  { %v8272_v1 = vadd.f32 %v4914_v55, %v545_v0  ;;  %6049 = vmatprep.mubr.f32.mxu1 %v641_v61  ;;  %v644_v3 = vmul.f32 %v8269_v63, %v8269_v63  ;;  %6056 = vmatpush3.msra.mxu0 %v4932_v6 }
 0x286   :  { %6050 = vmatmul.mubr.f32.vlgmr.msra.gmra.mxu1 %v642_v62  ;;  %6057 = vmatprep.subr.mxu0 %v4931_v8 }
 0x287   :  { %6014 = vmatprep.mubr.f32.mxu0 %v8272_v1  ;;  %v643_v2 = vmul.f32 %v8272_v1, %v8272_v1  ;;  %6094 = vmatpush3.msra.mxu1 %v7943_v4 }
 0x288   :  { %6015 = vmatmul.mubr.f32.gmra.mxu0 %v8269_v63  ;;  %6095 = vmatprep.subr.mxu1 %v7949_v5 }
 0x289   :  { %6052 = vmatprep.mubr.f32.mxu1 %v643_v2  ;;  %6096 = vmatpush3.msra.mxu1 %v7949_v5 }
 0x28a   :  { %6053 = vmatmul.mubr.f32.gmra.mxu1 %v644_v3  ;;  %6097 = vmatprep.subr.mxu1 %v7958_v7 }
 0x28b   :  { %6098 = vmatpush3.msra.mxu1 %v7958_v7  ;;  %6058 = vmatpush3.msra.mxu0 %v4931_v8 }
 0x28c   :  { %6099 = vmatprep.subr.mxu1 %v7973_v10  ;;  %6059 = vmatprep.subr.mxu0 %v4930_v9 }
 0x28d   :  { %6100 = vmatpush3.msra.mxu1 %v7973_v10  ;;  %6060 = vmatpush3.msra.mxu0 %v4930_v9  ;;  %v4915_v9 = vld [vmem:[%s10603_s8] ss:$0 sm:$0xff] }
 0x28e   :  { %6101 = vmatprep.subr.mxu1 %v7987_v12  ;;  %6061 = vmatprep.subr.mxu0 %v4929_v11 }
 0x28f   :  { %6102 = vmatpush3.msra.mxu1 %v7987_v12  ;;  %6062 = vmatpush3.msra.mxu0 %v4929_v11 }
 0x290   :  { %6103 = vmatprep.subr.mxu1 %v7996_v13  ;;  %6063 = vmatprep.subr.mxu0 %v4928_v24 }
 0x291   :  { %6104 = vmatpush3.msra.mxu1 %v7996_v13  ;;  %6064 = vmatpush3.msra.mxu0 %v4928_v24 }
 0x292   :  { %6105 = vmatprep.subr.mxu1 %v8005_v14  ;;  %6065 = vmatprep.subr.mxu0 %v4927_v25 }
 0x293   :  { %6106 = vmatpush3.msra.mxu1 %v8005_v14  ;;  %6066 = vmatpush3.msra.mxu0 %v4927_v25 }
 0x294   :  { %6107 = vmatprep.subr.mxu1 %v8014_v15  ;;  %6067 = vmatprep.subr.mxu0 %v4926_v27 }
 0x295   :  { %6108 = vmatpush3.msra.mxu1 %v8014_v15  ;;  %6068 = vmatpush3.msra.mxu0 %v4926_v27  ;;  %v4916_v27 = vld [vmem:[%s10604_s9] ss:$0 sm:$0xff] }
 0x296   :  { %6109 = vmatprep.subr.mxu1 %v8023_v16  ;;  %6069 = vmatprep.subr.mxu0 %v4925_v29 }
 0x297   :  { %6110 = vmatpush3.msra.mxu1 %v8023_v16  ;;  %6070 = vmatpush3.msra.mxu0 %v4925_v29 }
 0x298   :  { %6111 = vmatprep.subr.mxu1 %v8032_v17  ;;  %6071 = vmatprep.subr.mxu0 %v4924_v30 }
 0x299   :  { %6112 = vmatpush3.msra.mxu1 %v8032_v17  ;;  %6072 = vmatpush3.msra.mxu0 %v4924_v30 }
 0x29a   :  { %6113 = vmatprep.subr.mxu1 %v8041_v18  ;;  %6073 = vmatprep.subr.mxu0 %v4923_v31 }
 0x29b   :  { %6114 = vmatpush3.msra.mxu1 %v8041_v18  ;;  %6074 = vmatpush3.msra.mxu0 %v4923_v31 }
 0x29c   :  { %6115 = vmatprep.subr.mxu1 %v8050_v19  ;;  %6075 = vmatprep.subr.mxu0 %v4922_v33 }
 0x29d   :  { %6116 = vmatpush3.msra.mxu1 %v8050_v19  ;;  %6076 = vmatpush3.msra.mxu0 %v4922_v33 }
 0x29e   :  { %6117 = vmatprep.subr.mxu1 %v8059_v20  ;;  %6077 = vmatprep.subr.mxu0 %v4921_v35 }
 0x29f   :  { %6118 = vmatpush3.msra.mxu1 %v8059_v20  ;;  %6078 = vmatpush3.msra.mxu0 %v4921_v35 }
 0x2a0   :  { %6119 = vmatprep.subr.mxu1 %v8075_v21  ;;  %6079 = vmatprep.subr.mxu0 %v4920_v36 }
 0x2a1   :  { %6120 = vmatpush3.msra.mxu1 %v8075_v21  ;;  %6080 = vmatpush3.msra.mxu0 %v4920_v36 }
 0x2a2   :  { %6121 = vmatprep.subr.mxu1 %v8083_v22  ;;  %6081 = vmatprep.subr.mxu0 %v4919_v37 }
 0x2a3   :  { %6122 = vmatpush3.msra.mxu1 %v8083_v22  ;;  %6082 = vmatpush3.msra.mxu0 %v4919_v37 }
 0x2a4   :  { %6123 = vmatprep.subr.mxu1 %v8092_v23  ;;  %6083 = vmatprep.subr.mxu0 %v4918_v38 }
 0x2a5   :  { %6124 = vmatpush3.msra.mxu1 %v8092_v23  ;;  %6084 = vmatpush3.msra.mxu0 %v4918_v38 }
 0x2a6   :  { %6085 = vmatprep.subr.mxu0 %v4917_v39 }
 0x2a7   :  { %6086 = vmatpush3.msra.mxu0 %v4917_v39 }
 0x2a8   :  { %6131 = vmatprep.subr.mxu0 %v7943_v4 }
 0x344   :  { %v6013_v40 = vpop.f32.mrf.mxu0 }
 0x345   :  { %v731_v41 = vmul.f32 %v6013_v40, %v6013_v40  ;;  %v743_v6 = vsub.f32 %v8260_v57, %v6013_v40 }
 0x346   :  { %v622_v42 = vpop.f32.mrf.mxu0  ;;  %v6051_v43 = vpop.f32.mrf.mxu1 }
 0x347   :  { %v730_v44 = vmul.f32 %v622_v42, %v622_v42  ;;  %v735_v26 = vsub.f32 %v6051_v43, %v731_v41  ;;  %v742_v11 = vsub.f32 %v8262_v59, %v622_v42 }
 0x348   :  { %v6016_v45 = vpop.f32.mrf.mxu0  ;;  %v711_v46 = vpop.f32.mrf.mxu1 }
 0x349   :  { %v739_v47 = vmax.f32 %v735_v26, 0.0  ;;  %v733_v48 = vmul.f32 %v6016_v45, %v6016_v45  ;;  %v734_v49 = vsub.f32 %v711_v46, %v730_v44  ;;  %v745_v31 = vsub.f32 %v8269_v63, %v6016_v45  ;;  %v4934_v45 = vld [vmem:[%s10602_s7 + $0x1] ss:$0 sm:$0xff] }
 0x34a   :  { %v632_v28 = vpop.f32.mrf.mxu0  ;;  %v6054_v50 = vpop.f32.mrf.mxu1 }
 0x34b   :  { %v747_v51 = vadd.f32 1e-05, %v739_v47  ;;  %v738_v52 = vmax.f32 %v734_v49, 0.0  ;;  %v732_v55 = vmul.f32 %v632_v28, %v632_v28  ;;  %v737_v56 = vsub.f32 %v6054_v50, %v733_v48 }
 0x34c   :  { %v721_v58 = vpop.f32.mrf.mxu1  ;;  %v744_v57 = vsub.f32 %v8272_v1, %v632_v28 }
 0x34d   :  { %7454 = vrsqrt.f32 %v747_v51  ;;  %v746_v60 = vadd.f32 1e-05, %v738_v52  ;;  %v736_v61 = vsub.f32 %v721_v58, %v732_v55  ;;  %v741_v62 = vmax.f32 %v737_v56, 0.0 }
 0x34f   :  { %7456 = vrsqrt.f32 %v746_v60  ;;  %v740_v0 = vmax.f32 %v736_v61, 0.0  ;;  %v749_v2 = vadd.f32 1e-05, %v741_v62  ;;  %v8507_v61 = vld [vmem:[%s10597_s10 + $0x78] sm:$0xff] }
 0x351   :  { %v748_v3 = vadd.f32 1e-05, %v740_v0  ;;  %7458 = vrsqrt.f32 %v749_v2 }
 0x353   :  { %7460 = vrsqrt.f32 %v748_v3 }
 0x35a   :  { %v7455_v8 = vpop.eup %7454 }
 0x35b   :  { %v755_v24 = vmul.f32 %v7455_v8, %v743_v6 }
 0x35c   :  { %v7457_v25 = vpop.eup %7456 }
 0x35d   :  { %v765_v29 = vmul.f32 %v4915_v9, %v755_v24  ;;  %v754_v30 = vmul.f32 %v7457_v25, %v742_v11 }
 0x35e   :  { %v7459_v33 = vpop.eup %7458 }
 0x35f   :  { %v764_v35 = vmul.f32 %v4915_v9, %v754_v30  ;;  %v775_v37 = vadd.f32 %v4916_v27, %v765_v29  ;;  %v757_v38 = vmul.f32 %v7459_v33, %v745_v31 }
 0x360   :  { %v7461_v36 = vpop.eup %7460 }
 0x361   :  { %v774_v39 = vadd.f32 %v4916_v27, %v764_v35  ;;  %v756_v40 = vmul.f32 %v7461_v36, %v744_v57  ;;  %v767_v59 = vmul.f32 %v4915_v9, %v757_v38 }
 0x363   :  { %7462 = vtanh.f32 %v774_v39  ;;  %v766_v41 = vmul.f32 %v4915_v9, %v756_v40  ;;  %v777_v42 = vadd.f32 %v4916_v27, %v767_v59 }
 0x364   :  { %7464 = vtanh.f32 %v775_v37 }
 0x365   :  { %v776_v43 = vadd.f32 %v4916_v27, %v766_v41 }
 0x367   :  { %7466 = vtanh.f32 %v776_v43 }
 0x368   :  { %7468 = vtanh.f32 %v777_v42 }
 0x370   :  { %v7463_v44 = vpop.eup %7462 }
 0x371   :  { %v7465_v26 = vpop.eup %7464  ;;  %6087 = vmatprep.mubr.f32.mxu0 %v7463_v44  ;;  %v4937_v44 = vld [vmem:[%s10603_s8 + $0x1] ss:$0 sm:$0xff] }
 0x372   :  { %6088 = vmatmul.mubr.f32.vlgmr.msra.gmra.mxu0 %v7465_v26 }
 0x373   :  { %6132 = vmatpush3.msra.mxu0 %v7943_v4 }
 0x374   :  { %v7467_v63 = vpop.eup %7466  ;;  %6133 = vmatprep.subr.mxu0 %v7949_v5 }
 0x375   :  { %v7469_v1 = vpop.eup %7468  ;;  %6090 = vmatprep.mubr.f32.mxu0 %v7467_v63  ;;  %6134 = vmatpush3.msra.mxu0 %v7949_v5 }
 0x376   :  { %6091 = vmatmul.mubr.f32.gmra.mxu0 %v7469_v1  ;;  %6135 = vmatprep.subr.mxu0 %v7958_v7 }
 0x377   :  { %6136 = vmatpush3.msra.mxu0 %v7958_v7 }
 0x378   :  { %6137 = vmatprep.subr.mxu0 %v7973_v10 }
 0x379   :  { %6138 = vmatpush3.msra.mxu0 %v7973_v10 }
 0x37a   :  { %6139 = vmatprep.subr.mxu0 %v7987_v12 }
 0x37b   :  { %6140 = vmatpush3.msra.mxu0 %v7987_v12 }
 0x37c   :  { %6141 = vmatprep.subr.mxu0 %v7996_v13 }
 0x37d   :  { %6142 = vmatpush3.msra.mxu0 %v7996_v13 }
 0x37e   :  { %6143 = vmatprep.subr.mxu0 %v8005_v14 }
 0x37f   :  { %6144 = vmatpush3.msra.mxu0 %v8005_v14 }
 0x380   :  { %6145 = vmatprep.subr.mxu0 %v8014_v15 }
 0x381   :  { %6146 = vmatpush3.msra.mxu0 %v8014_v15 }
 0x382   :  { %6147 = vmatprep.subr.mxu0 %v8023_v16 }
 0x383   :  { %6148 = vmatpush3.msra.mxu0 %v8023_v16 }
 0x384   :  { %6149 = vmatprep.subr.mxu0 %v8032_v17 }
 0x385   :  { %6150 = vmatpush3.msra.mxu0 %v8032_v17 }
 0x386   :  { %6151 = vmatprep.subr.mxu0 %v8041_v18 }
 0x387   :  { %6152 = vmatpush3.msra.mxu0 %v8041_v18 }
 0x388   :  { %6153 = vmatprep.subr.mxu0 %v8050_v19 }
 0x389   :  { %6154 = vmatpush3.msra.mxu0 %v8050_v19 }
 0x38a   :  { %6155 = vmatprep.subr.mxu0 %v8059_v20 }
 0x38b   :  { %6156 = vmatpush3.msra.mxu0 %v8059_v20 }
 0x38c   :  { %6157 = vmatprep.subr.mxu0 %v8075_v21 }
 0x38d   :  { %6158 = vmatpush3.msra.mxu0 %v8075_v21 }
 0x38e   :  { %6159 = vmatprep.subr.mxu0 %v8083_v22 }
 0x38f   :  { %6160 = vmatpush3.msra.mxu0 %v8083_v22 }
 0x390   :  { %6161 = vmatprep.subr.mxu0 %v8092_v23 }
 0x391   :  { %6162 = vmatpush3.msra.mxu0 %v8092_v23 }
 0x392   :  { %6207 = vmatprep.subr.mxu0 %v7943_v4 }
 0x432   :  { %v6089_v46 = vpop.f32.mrf.mxu0 }
 0x433   :  { %v8405_v47 = vadd.f32 %v6089_v46, %v4934_v45 }
 0x434   :  { %v873_v48 = vpop.f32.mrf.mxu0 }
 0x435   :  { %v8407_v49 = vadd.f32 %v4934_v45, %v873_v48  ;;  %v982_v51 = vmul.f32 %v8405_v47, %v8405_v47 }
 0x436   :  { %v6092_v28 = vpop.f32.mrf.mxu0 }
 0x437   :  { %6125 = vmatprep.mubr.f32.mxu1 %v8407_v49  ;;  %v981_v50 = vmul.f32 %v8407_v49, %v8407_v49  ;;  %v8414_v52 = vadd.f32 %v6092_v28, %v4934_v45 }
 0x438   :  { %v883_v55 = vpop.f32.mrf.mxu0  ;;  %6126 = vmatmul.mubr.f32.vlgmr.msra.gmra.mxu1 %v8405_v47 }
 0x439   :  { %v8417_v56 = vadd.f32 %v4934_v45, %v883_v55  ;;  %6163 = vmatprep.mubr.f32.mxu0 %v981_v50  ;;  %v984_v60 = vmul.f32 %v8414_v52, %v8414_v52  ;;  %v4938_v45 = vld [vmem:[%s10604_s9 + $0x1] ss:$0 sm:$0xff] }
 0x43a   :  { %6164 = vmatmul.mubr.f32.vlgmr.msra.gmra.mxu0 %v982_v51 }
 0x43b   :  { %6128 = vmatprep.mubr.f32.mxu1 %v8417_v56  ;;  %v983_v58 = vmul.f32 %v8417_v56, %v8417_v56  ;;  %6208 = vmatpush3.msra.mxu0 %v7943_v4  ;;  %v4954_v4 = vld [vmem:[%s10599_s6 + $0x178] sm:$0xff] }
 0x43c   :  { %6129 = vmatmul.mubr.f32.gmra.mxu1 %v8414_v52  ;;  %6209 = vmatprep.subr.mxu0 %v7949_v5 }
 0x43d   :  { %6166 = vmatprep.mubr.f32.mxu0 %v983_v58  ;;  %6210 = vmatpush3.msra.mxu0 %v7949_v5  ;;  %v4953_v5 = vld [vmem:[%s10599_s6 + $0x170] sm:$0xff] }
 0x43e   :  { %6167 = vmatmul.mubr.f32.gmra.mxu0 %v984_v60  ;;  %6211 = vmatprep.subr.mxu0 %v7958_v7 }
 0x43f   :  { %6212 = vmatpush3.msra.mxu0 %v7958_v7  ;;  %6169 = vmatprep.subr.mxu1 %v4954_v4  ;;  %v4952_v7 = vld [vmem:[%s10599_s6 + $0x168] sm:$0xff] }
 0x440   :  { %6213 = vmatprep.subr.mxu0 %v7973_v10  ;;  %6170 = vmatpush3.msra.mxu1 %v4954_v4 }
 0x441   :  { %6214 = vmatpush3.msra.mxu0 %v7973_v10  ;;  %6171 = vmatprep.subr.mxu1 %v4953_v5  ;;  %v4951_v10 = vld [vmem:[%s10599_s6 + $0x160] sm:$0xff] }
 0x442   :  { %6215 = vmatprep.subr.mxu0 %v7987_v12  ;;  %6172 = vmatpush3.msra.mxu1 %v4953_v5 }
 0x443   :  { %6216 = vmatpush3.msra.mxu0 %v7987_v12  ;;  %6173 = vmatprep.subr.mxu1 %v4952_v7  ;;  %v4950_v12 = vld [vmem:[%s10599_s6 + $0x158] sm:$0xff] }
 0x444   :  { %6217 = vmatprep.subr.mxu0 %v7996_v13  ;;  %6174 = vmatpush3.msra.mxu1 %v4952_v7 }
 0x445   :  { %6218 = vmatpush3.msra.mxu0 %v7996_v13  ;;  %6175 = vmatprep.subr.mxu1 %v4951_v10  ;;  %v4949_v13 = vld [vmem:[%s10599_s6 + $0x150] sm:$0xff] }
 0x446   :  { %6219 = vmatprep.subr.mxu0 %v8005_v14  ;;  %6176 = vmatpush3.msra.mxu1 %v4951_v10 }
 0x447   :  { %6220 = vmatpush3.msra.mxu0 %v8005_v14  ;;  %6177 = vmatprep.subr.mxu1 %v4950_v12  ;;  %v4948_v14 = vld [vmem:[%s10599_s6 + $0x148] sm:$0xff] }
 0x448   :  { %6221 = vmatprep.subr.mxu0 %v8014_v15  ;;  %6178 = vmatpush3.msra.mxu1 %v4950_v12 }
 0x449   :  { %6222 = vmatpush3.msra.mxu0 %v8014_v15  ;;  %6179 = vmatprep.subr.mxu1 %v4949_v13  ;;  %v4947_v15 = vld [vmem:[%s10599_s6 + $0x140] sm:$0xff] }
 0x44a   :  { %6223 = vmatprep.subr.mxu0 %v8023_v16  ;;  %6180 = vmatpush3.msra.mxu1 %v4949_v13 }
 0x44b   :  { %6224 = vmatpush3.msra.mxu0 %v8023_v16  ;;  %6181 = vmatprep.subr.mxu1 %v4948_v14  ;;  %v4946_v16 = vld [vmem:[%s10599_s6 + $0x138] sm:$0xff] }
 0x44c   :  { %6225 = vmatprep.subr.mxu0 %v8032_v17  ;;  %6182 = vmatpush3.msra.mxu1 %v4948_v14 }
 0x44d   :  { %6226 = vmatpush3.msra.mxu0 %v8032_v17  ;;  %6183 = vmatprep.subr.mxu1 %v4947_v15  ;;  %v4945_v17 = vld [vmem:[%s10599_s6 + $0x130] sm:$0xff] }
 0x44e   :  { %6227 = vmatprep.subr.mxu0 %v8041_v18  ;;  %6184 = vmatpush3.msra.mxu1 %v4947_v15 }
 0x44f   :  { %6228 = vmatpush3.msra.mxu0 %v8041_v18  ;;  %6185 = vmatprep.subr.mxu1 %v4946_v16  ;;  %v4944_v18 = vld [vmem:[%s10599_s6 + $0x128] sm:$0xff] }
 0x450   :  { %6229 = vmatprep.subr.mxu0 %v8050_v19  ;;  %6186 = vmatpush3.msra.mxu1 %v4946_v16  ;;  %v8531_v16 = vld [vmem:[%s10597_s10 + $0x68] sm:$0xff] }
 0x451   :  { %6230 = vmatpush3.msra.mxu0 %v8050_v19  ;;  %6187 = vmatprep.subr.mxu1 %v4945_v17  ;;  %v4943_v19 = vld [vmem:[%s10599_s6 + $0x120] sm:$0xff] }
 0x452   :  { %6231 = vmatprep.subr.mxu0 %v8059_v20  ;;  %6188 = vmatpush3.msra.mxu1 %v4945_v17  ;;  %v8538_v17 = vld [vmem:[%s10597_s10 + $0x60] sm:$0xff] }
 0x453   :  { %6232 = vmatpush3.msra.mxu0 %v8059_v20  ;;  %6189 = vmatprep.subr.mxu1 %v4944_v18  ;;  %v4942_v20 = vld [vmem:[%s10599_s6 + $0x118] sm:$0xff] }
 0x454   :  { %6233 = vmatprep.subr.mxu0 %v8075_v21  ;;  %6190 = vmatpush3.msra.mxu1 %v4944_v18  ;;  %v8545_v18 = vld [vmem:[%s10597_s10 + $0x58] sm:$0xff] }
 0x455   :  { %6234 = vmatpush3.msra.mxu0 %v8075_v21  ;;  %6191 = vmatprep.subr.mxu1 %v4943_v19  ;;  %v4941_v21 = vld [vmem:[%s10599_s6 + $0x110] sm:$0xff] }
 0x456   :  { %6235 = vmatprep.subr.mxu0 %v8083_v22  ;;  %6192 = vmatpush3.msra.mxu1 %v4943_v19  ;;  %v8552_v19 = vld [vmem:[%s10597_s10 + $0x50] sm:$0xff] }
 0x457   :  { %6236 = vmatpush3.msra.mxu0 %v8083_v22  ;;  %6193 = vmatprep.subr.mxu1 %v4942_v20  ;;  %v4940_v22 = vld [vmem:[%s10599_s6 + $0x108] sm:$0xff] }
 0x458   :  { %6237 = vmatprep.subr.mxu0 %v8092_v23  ;;  %6194 = vmatpush3.msra.mxu1 %v4942_v20  ;;  %v8559_v20 = vld [vmem:[%s10597_s10 + $0x48] sm:$0xff] }
 0x459   :  { %6238 = vmatpush3.msra.mxu0 %v8092_v23  ;;  %6195 = vmatprep.subr.mxu1 %v4941_v21  ;;  %v4939_v23 = vld [vmem:[%s10599_s6 + $0x100] sm:$0xff] }
 0x45a   :  { %6196 = vmatpush3.msra.mxu1 %v4941_v21  ;;  %v8566_v21 = vld [vmem:[%s10597_s10 + $0x40] sm:$0xff] }
 0x45b   :  { %6197 = vmatprep.subr.mxu1 %v4940_v22 }
 0x45c   :  { %6198 = vmatpush3.msra.mxu1 %v4940_v22  ;;  %v8573_v22 = vld [vmem:[%s10597_s10 + $0x38] sm:$0xff] }
 0x45d   :  { %6199 = vmatprep.subr.mxu1 %v4939_v23 }
 0x45e   :  { %6200 = vmatpush3.msra.mxu1 %v4939_v23  ;;  %v8580_v23 = vld [vmem:[%s10597_s10 + $0x30] sm:$0xff] }
 0x45f   :  { %6245 = vmatprep.subr.mxu1 %v8507_v61 }
 0x4f8   :  { %v6127_v62 = vpop.f32.mrf.mxu1 }
 0x4f9   :  { %v1071_v0 = vmul.f32 %v6127_v62, %v6127_v62  ;;  %v1083_v42 = vsub.f32 %v8405_v47, %v6127_v62  ;;  %v8587_v62 = vld [vmem:[%s10597_s10 + $0x28] sm:$0xff] }
 0x4fa   :  { %v962_v2 = vpop.f32.mrf.mxu1  ;;  %v6165_v3 = vpop.f32.mrf.mxu0 }
 0x4fb   :  { %v1070_v6 = vmul.f32 %v962_v2, %v962_v2  ;;  %v1075_v8 = vsub.f32 %v6165_v3, %v1071_v0  ;;  %v1082_v26 = vsub.f32 %v8407_v49, %v962_v2  ;;  %v8594_v0 = vld [vmem:[%s10597_s10 + $0x20] sm:$0xff]  ;;  %v8601_v2 = vld [vmem:[%s10597_s10 + $0x18] sm:$0xff]  ;;  %v8608_v3 = vld [vmem:[%s10597_s10 + $0x10] sm:$0xff] }
 0x4fc   :  { %v6130_v9 = vpop.f32.mrf.mxu1  ;;  %v1051_v11 = vpop.f32.mrf.mxu0 }
 0x4fd   :  { %v1079_v24 = vmax.f32 %v1075_v8, 0.0  ;;  %v1073_v25 = vmul.f32 %v6130_v9, %v6130_v9  ;;  %v1074_v27 = vsub.f32 %v1051_v11, %v1070_v6  ;;  %v1085_v28 = vsub.f32 %v8414_v52, %v6130_v9  ;;  %v8615_v6 = vld [vmem:[%s10597_s10 + $0x8] sm:$0xff]  ;;  %v8622_v8 = vld [vmem:[%s10597_s10] sm:$0xff] }
 0x4fe   :  { %v972_v29 = vpop.f32.mrf.mxu1  ;;  %v6168_v30 = vpop.f32.mrf.mxu0  ;;  %v4956_v9 = vld [vmem:[%s10602_s7 + $0x2] ss:$0 sm:$0xff] }
 0x4ff   :  { %v1087_v31 = vadd.f32 1e-05, %v1079_v24  ;;  %v1078_v33 = vmax.f32 %v1074_v27, 0.0  ;;  %v1072_v35 = vmul.f32 %v972_v29, %v972_v29  ;;  %v1077_v57 = vsub.f32 %v6168_v30, %v1073_v25 }
 0x500   :  { %v1061_v36 = vpop.f32.mrf.mxu0  ;;  %v1084_v47 = vsub.f32 %v8417_v56, %v972_v29  ;;  %v8524_v56 = vld [vmem:[%s10597_s10 + $0x70] sm:$0xff] }
 0x501   :  { %7470 = vrsqrt.f32 %v1087_v31  ;;  %v1086_v37 = vadd.f32 1e-05, %v1078_v33  ;;  %v1076_v38 = vsub.f32 %v1061_v36, %v1072_v35  ;;  %v1081_v39 = vmax.f32 %v1077_v57, 0.0 }
 0x503   :  { %7472 = vrsqrt.f32 %v1086_v37  ;;  %v1080_v40 = vmax.f32 %v1076_v38, 0.0  ;;  %v1089_v59 = vadd.f32 1e-05, %v1081_v39  ;;  %v8684_v38 = vld [vmem:[%s10599_s6 + $0x78] sm:$0xff] }
 0x504   :  { %v4976_v39 = vld [vmem:[%s10599_s6 + $0x1f8] sm:$0xff] }
 0x505   :  { %v1088_v41 = vadd.f32 1e-05, %v1080_v40  ;;  %7474 = vrsqrt.f32 %v1089_v59  ;;  %6283 = vmatprep.subr.mxu0 %v4976_v39  ;;  %v4975_v40 = vld [vmem:[%s10599_s6 + $0x1f0] sm:$0xff]  ;;  %v4974_v59 = vld [vmem:[%s10599_s6 + $0x1e8] sm:$0xff] }
 0x507   :  { %7476 = vrsqrt.f32 %v1088_v41  ;;  %v4973_v41 = vld [vmem:[%s10599_s6 + $0x1e0] sm:$0xff] }
 0x50e   :  { %v7471_v43 = vpop.eup %7470 }
 0x50f   :  { %v1095_v63 = vmul.f32 %v7471_v43, %v1083_v42  ;;  %v4972_v42 = vld [vmem:[%s10599_s6 + $0x1d8] sm:$0xff]  ;;  %v4971_v43 = vld [vmem:[%s10599_s6 + $0x1d0] sm:$0xff] }
 0x510   :  { %v7473_v1 = vpop.eup %7472 }
 0x511   :  { %v1105_v46 = vmul.f32 %v4937_v44, %v1095_v63  ;;  %v1094_v48 = vmul.f32 %v7473_v1, %v1082_v26  ;;  %v4969_v26 = vld [vmem:[%s10599_s6 + $0x1c0] sm:$0xff]  ;;  %v4968_v63 = vld [vmem:[%s10599_s6 + $0x1b8] sm:$0xff]  ;;  %v4967_v1 = vld [vmem:[%s10599_s6 + $0x1b0] sm:$0xff] }
 0x512   :  { %v7475_v50 = vpop.eup %7474 }
 0x513   :  { %v1104_v51 = vmul.f32 %v4937_v44, %v1094_v48  ;;  %v1115_v58 = vadd.f32 %v4938_v45, %v1105_v46  ;;  %v1097_v60 = vmul.f32 %v7475_v50, %v1085_v28  ;;  %v4965_v46 = vld [vmem:[%s10599_s6 + $0x1a0] sm:$0xff]  ;;  %v4964_v48 = vld [vmem:[%s10599_s6 + $0x198] sm:$0xff]  ;;  %v4963_v28 = vld [vmem:[%s10599_s6 + $0x190] sm:$0xff] }
 0x514   :  { %v7477_v55 = vpop.eup %7476  ;;  %v4962_v50 = vld [vmem:[%s10599_s6 + $0x188] sm:$0xff] }
 0x515   :  { %v1114_v4 = vadd.f32 %v4938_v45, %v1104_v51  ;;  %v1096_v5 = vmul.f32 %v7477_v55, %v1084_v47  ;;  %v1107_v49 = vmul.f32 %v4937_v44, %v1097_v60  ;;  %v4961_v51 = vld [vmem:[%s10599_s6 + $0x180] sm:$0xff] }
 0x517   :  { %7478 = vtanh.f32 %v1114_v4  ;;  %v1106_v7 = vmul.f32 %v4937_v44, %v1096_v5  ;;  %v1117_v10 = vadd.f32 %v4938_v45, %v1107_v49  ;;  %v4970_v44 = vld [vmem:[%s10599_s6 + $0x1c8] sm:$0xff] }
 0x518   :  { %7480 = vtanh.f32 %v1115_v58 }
 0x519   :  { %v1116_v12 = vadd.f32 %v4938_v45, %v1106_v7  ;;  %v4966_v45 = vld [vmem:[%s10599_s6 + $0x1a8] sm:$0xff] }
 0x51b   :  { %7482 = vtanh.f32 %v1116_v12 }
 0x51c   :  { %7484 = vtanh.f32 %v1117_v10 }
 0x524   :  { %v7479_v13 = vpop.eup %7478 }
 0x525   :  { %v7481_v14 = vpop.eup %7480  ;;  %6201 = vmatprep.mubr.f32.mxu1 %v7479_v13 }
 0x526   :  { %6202 = vmatmul.mubr.f32.vlgmr.msra.gmra.mxu1 %v7481_v14 }
 0x527   :  { %6246 = vmatpush3.msra.mxu1 %v8507_v61 }
 0x528   :  { %v7483_v52 = vpop.eup %7482  ;;  %6247 = vmatprep.subr.mxu1 %v8524_v56 }
 0x529   :  { %v7485_v15 = vpop.eup %7484  ;;  %6204 = vmatprep.mubr.f32.mxu1 %v7483_v52  ;;  %6248 = vmatpush3.msra.mxu1 %v8524_v56 }
 0x52a   :  { %6205 = vmatmul.mubr.f32.gmra.mxu1 %v7485_v15  ;;  %6249 = vmatprep.subr.mxu1 %v8531_v16 }
 0x52b   :  { %6250 = vmatpush3.msra.mxu1 %v8531_v16 }
 0x52c   :  { %6251 = vmatprep.subr.mxu1 %v8538_v17 }
 0x52d   :  { %6252 = vmatpush3.msra.mxu1 %v8538_v17 }
 0x52e   :  { %6253 = vmatprep.subr.mxu1 %v8545_v18 }
 0x52f   :  { %6254 = vmatpush3.msra.mxu1 %v8545_v18 }
 0x530   :  { %6255 = vmatprep.subr.mxu1 %v8552_v19 }
 0x531   :  { %6256 = vmatpush3.msra.mxu1 %v8552_v19 }
 0x532   :  { %6257 = vmatprep.subr.mxu1 %v8559_v20 }
 0x533   :  { %6258 = vmatpush3.msra.mxu1 %v8559_v20 }
 0x534   :  { %6259 = vmatprep.subr.mxu1 %v8566_v21 }
 0x535   :  { %6260 = vmatpush3.msra.mxu1 %v8566_v21 }
 0x536   :  { %6261 = vmatprep.subr.mxu1 %v8573_v22 }
 0x537   :  { %6262 = vmatpush3.msra.mxu1 %v8573_v22 }
 0x538   :  { %6263 = vmatprep.subr.mxu1 %v8580_v23 }
 0x539   :  { %6264 = vmatpush3.msra.mxu1 %v8580_v23 }
 0x53a   :  { %6265 = vmatprep.subr.mxu1 %v8587_v62 }
 0x53b   :  { %6266 = vmatpush3.msra.mxu1 %v8587_v62 }
 0x53c   :  { %6267 = vmatprep.subr.mxu1 %v8594_v0 }
 0x53d   :  { %6268 = vmatpush3.msra.mxu1 %v8594_v0 }
 0x53e   :  { %6269 = vmatprep.subr.mxu1 %v8601_v2 }
 0x53f   :  { %6270 = vmatpush3.msra.mxu1 %v8601_v2 }
 0x540   :  { %6271 = vmatprep.subr.mxu1 %v8608_v3 }
 0x541   :  { %6272 = vmatpush3.msra.mxu1 %v8608_v3 }
 0x542   :  { %6273 = vmatprep.subr.mxu1 %v8615_v6 }
 0x543   :  { %6274 = vmatpush3.msra.mxu1 %v8615_v6 }
 0x544   :  { %6275 = vmatprep.subr.mxu1 %v8622_v8 }
 0x545   :  { %6276 = vmatpush3.msra.mxu1 %v8622_v8 }
 0x546   :  { %6321 = vmatprep.subr.mxu1 %v8507_v61 }
 0x5e6   :  { %v6203_v11 = vpop.f32.mrf.mxu1 }
 0x5e7   :  { %v8630_v24 = vadd.f32 %v6203_v11, %v4956_v9 }
 0x5e8   :  { %v1213_v25 = vpop.f32.mrf.mxu1 }
 0x5e9   :  { %v8632_v27 = vadd.f32 %v4956_v9, %v1213_v25  ;;  %v1322_v31 = vmul.f32 %v8630_v24, %v8630_v24 }
 0x5ea   :  { %v6206_v29 = vpop.f32.mrf.mxu1 }
 0x5eb   :  { %6239 = vmatprep.mubr.f32.mxu0 %v8632_v27  ;;  %v1321_v30 = vmul.f32 %v8632_v27, %v8632_v27  ;;  %v8639_v33 = vadd.f32 %v6206_v29, %v4956_v9 }
 0x5ec   :  { %v1223_v35 = vpop.f32.mrf.mxu1  ;;  %6240 = vmatmul.mubr.f32.vlgmr.msra.gmra.mxu0 %v8630_v24 }
 0x5ed   :  { %v8642_v57 = vadd.f32 %v4956_v9, %v1223_v35  ;;  %6277 = vmatprep.mubr.f32.mxu1 %v1321_v30  ;;  %v1324_v37 = vmul.f32 %v8639_v33, %v8639_v33  ;;  %6284 = vmatpush3.msra.mxu0 %v4976_v39 }
 0x5ee   :  { %6278 = vmatmul.mubr.f32.vlgmr.msra.gmra.mxu1 %v1322_v31  ;;  %6285 = vmatprep.subr.mxu0 %v4975_v40 }
 0x5ef   :  { %6242 = vmatprep.mubr.f32.mxu0 %v8642_v57  ;;  %v1323_v36 = vmul.f32 %v8642_v57, %v8642_v57  ;;  %6322 = vmatpush3.msra.mxu1 %v8507_v61 }
 0x5f0   :  { %6243 = vmatmul.mubr.f32.gmra.mxu0 %v8639_v33  ;;  %6323 = vmatprep.subr.mxu1 %v8524_v56 }
 0x5f1   :  { %6280 = vmatprep.mubr.f32.mxu1 %v1323_v36  ;;  %6324 = vmatpush3.msra.mxu1 %v8524_v56 }
 0x5f2   :  { %6281 = vmatmul.mubr.f32.gmra.mxu1 %v1324_v37  ;;  %6325 = vmatprep.subr.mxu1 %v8531_v16 }
 0x5f3   :  { %6326 = vmatpush3.msra.mxu1 %v8531_v16  ;;  %6286 = vmatpush3.msra.mxu0 %v4975_v40 }
 0x5f4   :  { %6327 = vmatprep.subr.mxu1 %v8538_v17  ;;  %6287 = vmatprep.subr.mxu0 %v4974_v59 }
 0x5f5   :  { %6328 = vmatpush3.msra.mxu1 %v8538_v17  ;;  %6288 = vmatpush3.msra.mxu0 %v4974_v59 }
 0x5f6   :  { %6329 = vmatprep.subr.mxu1 %v8545_v18  ;;  %6289 = vmatprep.subr.mxu0 %v4973_v41 }
 0x5f7   :  { %6330 = vmatpush3.msra.mxu1 %v8545_v18  ;;  %6290 = vmatpush3.msra.mxu0 %v4973_v41  ;;  %v4959_v41 = vld [vmem:[%s10603_s8 + $0x2] ss:$0 sm:$0xff] }
 0x5f8   :  { %6331 = vmatprep.subr.mxu1 %v8552_v19  ;;  %6291 = vmatprep.subr.mxu0 %v4972_v42 }
 0x5f9   :  { %6332 = vmatpush3.msra.mxu1 %v8552_v19  ;;  %6292 = vmatpush3.msra.mxu0 %v4972_v42 }
 0x5fa   :  { %6333 = vmatprep.subr.mxu1 %v8559_v20  ;;  %6293 = vmatprep.subr.mxu0 %v4971_v43 }
 0x5fb   :  { %6334 = vmatpush3.msra.mxu1 %v8559_v20  ;;  %6294 = vmatpush3.msra.mxu0 %v4971_v43 }
 0x5fc   :  { %6335 = vmatprep.subr.mxu1 %v8566_v21  ;;  %6295 = vmatprep.subr.mxu0 %v4970_v44 }
 0x5fd   :  { %6336 = vmatpush3.msra.mxu1 %v8566_v21  ;;  %6296 = vmatpush3.msra.mxu0 %v4970_v44 }
 0x5fe   :  { %6337 = vmatprep.subr.mxu1 %v8573_v22  ;;  %6297 = vmatprep.subr.mxu0 %v4969_v26 }
 0x5ff   :  { %6338 = vmatpush3.msra.mxu1 %v8573_v22  ;;  %6298 = vmatpush3.msra.mxu0 %v4969_v26  ;;  %v4960_v26 = vld [vmem:[%s10604_s9 + $0x2] ss:$0 sm:$0xff] }
 0x600   :  { %6339 = vmatprep.subr.mxu1 %v8580_v23  ;;  %6299 = vmatprep.subr.mxu0 %v4968_v63 }
 0x601   :  { %6340 = vmatpush3.msra.mxu1 %v8580_v23  ;;  %6300 = vmatpush3.msra.mxu0 %v4968_v63 }
 0x602   :  { %6341 = vmatprep.subr.mxu1 %v8587_v62  ;;  %6301 = vmatprep.subr.mxu0 %v4967_v1 }
 0x603   :  { %6342 = vmatpush3.msra.mxu1 %v8587_v62  ;;  %6302 = vmatpush3.msra.mxu0 %v4967_v1 }
 0x604   :  { %6343 = vmatprep.subr.mxu1 %v8594_v0  ;;  %6303 = vmatprep.subr.mxu0 %v4966_v45 }
 0x605   :  { %6344 = vmatpush3.msra.mxu1 %v8594_v0  ;;  %6304 = vmatpush3.msra.mxu0 %v4966_v45 }
 0x606   :  { %6345 = vmatprep.subr.mxu1 %v8601_v2  ;;  %6305 = vmatprep.subr.mxu0 %v4965_v46 }
 0x607   :  { %6346 = vmatpush3.msra.mxu1 %v8601_v2  ;;  %6306 = vmatpush3.msra.mxu0 %v4965_v46 }
 0x608   :  { %6347 = vmatprep.subr.mxu1 %v8608_v3  ;;  %6307 = vmatprep.subr.mxu0 %v4964_v48 }
 0x609   :  { %6348 = vmatpush3.msra.mxu1 %v8608_v3  ;;  %6308 = vmatpush3.msra.mxu0 %v4964_v48 }
 0x60a   :  { %6349 = vmatprep.subr.mxu1 %v8615_v6  ;;  %6309 = vmatprep.subr.mxu0 %v4963_v28 }
 0x60b   :  { %6350 = vmatpush3.msra.mxu1 %v8615_v6  ;;  %6310 = vmatpush3.msra.mxu0 %v4963_v28 }
 0x60c   :  { %6351 = vmatprep.subr.mxu1 %v8622_v8  ;;  %6311 = vmatprep.subr.mxu0 %v4962_v50 }
 0x60d   :  { %6352 = vmatpush3.msra.mxu1 %v8622_v8  ;;  %6312 = vmatpush3.msra.mxu0 %v4962_v50 }
 0x60e   :  { %6397 = vmatprep.subr.mxu1 %v8684_v38  ;;  %6313 = vmatprep.subr.mxu0 %v4961_v51 }
 0x60f   :  { %6314 = vmatpush3.msra.mxu0 %v4961_v51 }
 0x610   :  { %6359 = vmatprep.subr.mxu0 %v8507_v61 }
 0x6ac   :  { %v6241_v47 = vpop.f32.mrf.mxu0 }
 0x6ad   :  { %v1411_v55 = vmul.f32 %v6241_v47, %v6241_v47  ;;  %v1423_v40 = vsub.f32 %v8630_v24, %v6241_v47 }
 0x6ae   :  { %v1302_v58 = vpop.f32.mrf.mxu0  ;;  %v6279_v60 = vpop.f32.mrf.mxu1 }
 0x6af   :  { %v1410_v4 = vmul.f32 %v1302_v58, %v1302_v58  ;;  %v1415_v5 = vsub.f32 %v6279_v60, %v1411_v55  ;;  %v1422_v42 = vsub.f32 %v8632_v27, %v1302_v58 }
 0x6b0   :  { %v6244_v49 = vpop.f32.mrf.mxu0  ;;  %v1391_v7 = vpop.f32.mrf.mxu1 }
 0x6b1   :  { %v1419_v10 = vmax.f32 %v1415_v5, 0.0  ;;  %v1413_v12 = vmul.f32 %v6244_v49, %v6244_v49  ;;  %v1414_v13 = vsub.f32 %v1391_v7, %v1410_v4  ;;  %v1425_v45 = vsub.f32 %v8639_v33, %v6244_v49  ;;  %v4978_v49 = vld [vmem:[%s10602_s7 + $0x3] ss:$0 sm:$0xff] }
 0x6b2   :  { %v1312_v14 = vpop.f32.mrf.mxu0  ;;  %v6282_v52 = vpop.f32.mrf.mxu1 }
 0x6b3   :  { %v1427_v15 = vadd.f32 1e-05, %v1419_v10  ;;  %v1418_v9 = vmax.f32 %v1414_v13, 0.0  ;;  %v1412_v11 = vmul.f32 %v1312_v14, %v1312_v14  ;;  %v1417_v25 = vsub.f32 %v6282_v52, %v1413_v12 }
 0x6b4   :  { %v1401_v29 = vpop.f32.mrf.mxu1  ;;  %v1424_v24 = vsub.f32 %v8642_v57, %v1312_v14 }
 0x6b5   :  { %7486 = vrsqrt.f32 %v1427_v15  ;;  %v1426_v30 = vadd.f32 1e-05, %v1418_v9  ;;  %v1416_v31 = vsub.f32 %v1401_v29, %v1412_v11  ;;  %v1421_v35 = vmax.f32 %v1417_v25, 0.0 }
 0x6b7   :  { %7488 = vrsqrt.f32 %v1426_v30  ;;  %v1420_v36 = vmax.f32 %v1416_v31, 0.0  ;;  %v1429_v37 = vadd.f32 1e-05, %v1421_v35  ;;  %v7663_v30 = vld [vmem:[%s10599_s6 + $0x70] sm:$0xff] }
 0x6b9   :  { %v1428_v39 = vadd.f32 1e-05, %v1420_v36  ;;  %7490 = vrsqrt.f32 %v1429_v37  ;;  %v7665_v36 = vld [vmem:[%s10599_s6 + $0x60] sm:$0xff]  ;;  %v7666_v37 = vld [vmem:[%s10599_s6 + $0x58] sm:$0xff] }
 0x6bb   :  { %7492 = vrsqrt.f32 %v1428_v39  ;;  %v7667_v39 = vld [vmem:[%s10599_s6 + $0x50] sm:$0xff] }
 0x6c2   :  { %v7487_v59 = vpop.eup %7486 }
 0x6c3   :  { %v1435_v43 = vmul.f32 %v7487_v59, %v1423_v40  ;;  %v7668_v40 = vld [vmem:[%s10599_s6 + $0x48] sm:$0xff]  ;;  %v7669_v59 = vld [vmem:[%s10599_s6 + $0x40] sm:$0xff] }
 0x6c4   :  { %v7489_v44 = vpop.eup %7488 }
 0x6c5   :  { %v1445_v63 = vmul.f32 %v4959_v41, %v1435_v43  ;;  %v1434_v1 = vmul.f32 %v7489_v44, %v1422_v42  ;;  %v7671_v42 = vld [vmem:[%s10599_s6 + $0x30] sm:$0xff]  ;;  %v7672_v43 = vld [vmem:[%s10599_s6 + $0x28] sm:$0xff]  ;;  %v7673_v44 = vld [vmem:[%s10599_s6 + $0x20] sm:$0xff] }
 0x6c6   :  { %v7491_v46 = vpop.eup %7490 }
 0x6c7   :  { %v1444_v48 = vmul.f32 %v4959_v41, %v1434_v1  ;;  %v1455_v50 = vadd.f32 %v4960_v26, %v1445_v63  ;;  %v1437_v51 = vmul.f32 %v7491_v46, %v1425_v45  ;;  %v7675_v63 = vld [vmem:[%s10599_s6 + $0x10] sm:$0xff]  ;;  %v7676_v1 = vld [vmem:[%s10599_s6 + $0x8] sm:$0xff]  ;;  %v7677_v45 = vld [vmem:[%s10599_s6] sm:$0xff] }
 0x6c8   :  { %v7493_v28 = vpop.eup %7492  ;;  %v8882_v46 = vld [vmem:[%s10599_s6 + $0xf8] sm:$0xff] }
 0x6c9   :  { %v1454_v47 = vadd.f32 %v4960_v26, %v1444_v48  ;;  %v1436_v55 = vmul.f32 %v7493_v28, %v1424_v24  ;;  %v1447_v27 = vmul.f32 %v4959_v41, %v1437_v51 }
 0x6cb   :  { %7494 = vtanh.f32 %v1454_v47  ;;  %v1446_v58 = vmul.f32 %v4959_v41, %v1436_v55  ;;  %v1457_v60 = vadd.f32 %v4960_v26, %v1447_v27  ;;  %v7670_v41 = vld [vmem:[%s10599_s6 + $0x38] sm:$0xff] }
 0x6cc   :  { %7496 = vtanh.f32 %v1455_v50 }
 0x6cd   :  { %v1456_v4 = vadd.f32 %v4960_v26, %v1446_v58  ;;  %v7674_v26 = vld [vmem:[%s10599_s6 + $0x18] sm:$0xff] }
 0x6cf   :  { %7498 = vtanh.f32 %v1456_v4 }
 0x6d0   :  { %7500 = vtanh.f32 %v1457_v60 }
 0x6d8   :  { %v7495_v5 = vpop.eup %7494 }
 0x6d9   :  { %v7497_v7 = vpop.eup %7496  ;;  %6315 = vmatprep.mubr.f32.mxu0 %v7495_v5 }
 0x6da   :  { %6316 = vmatmul.mubr.f32.vlgmr.msra.gmra.mxu0 %v7497_v7 }
 0x6db   :  { %6360 = vmatpush3.msra.mxu0 %v8507_v61 }
 0x6dc   :  { %v7499_v33 = vpop.eup %7498  ;;  %6361 = vmatprep.subr.mxu0 %v8524_v56 }
 0x6dd   :  { %v7501_v57 = vpop.eup %7500  ;;  %6318 = vmatprep.mubr.f32.mxu0 %v7499_v33  ;;  %6362 = vmatpush3.msra.mxu0 %v8524_v56 }
 0x6de   :  { %6319 = vmatmul.mubr.f32.gmra.mxu0 %v7501_v57  ;;  %6363 = vmatprep.subr.mxu0 %v8531_v16 }
 0x6df   :  { %6364 = vmatpush3.msra.mxu0 %v8531_v16 }
 0x6e0   :  { %6365 = vmatprep.subr.mxu0 %v8538_v17 }
 0x6e1   :  { %6366 = vmatpush3.msra.mxu0 %v8538_v17 }
 0x6e2   :  { %6367 = vmatprep.subr.mxu0 %v8545_v18 }
 0x6e3   :  { %6368 = vmatpush3.msra.mxu0 %v8545_v18 }
 0x6e4   :  { %6369 = vmatprep.subr.mxu0 %v8552_v19 }
 0x6e5   :  { %6370 = vmatpush3.msra.mxu0 %v8552_v19 }
 0x6e6   :  { %6371 = vmatprep.subr.mxu0 %v8559_v20 }
 0x6e7   :  { %6372 = vmatpush3.msra.mxu0 %v8559_v20 }
 0x6e8   :  { %6373 = vmatprep.subr.mxu0 %v8566_v21 }
 0x6e9   :  { %6374 = vmatpush3.msra.mxu0 %v8566_v21 }
 0x6ea   :  { %6375 = vmatprep.subr.mxu0 %v8573_v22 }
 0x6eb   :  { %6376 = vmatpush3.msra.mxu0 %v8573_v22 }
 0x6ec   :  { %6377 = vmatprep.subr.mxu0 %v8580_v23 }
 0x6ed   :  { %6378 = vmatpush3.msra.mxu0 %v8580_v23 }
 0x6ee   :  { %6379 = vmatprep.subr.mxu0 %v8587_v62 }
 0x6ef   :  { %6380 = vmatpush3.msra.mxu0 %v8587_v62 }
 0x6f0   :  { %6381 = vmatprep.subr.mxu0 %v8594_v0 }
 0x6f1   :  { %6382 = vmatpush3.msra.mxu0 %v8594_v0 }
 0x6f2   :  { %6383 = vmatprep.subr.mxu0 %v8601_v2 }
 0x6f3   :  { %6384 = vmatpush3.msra.mxu0 %v8601_v2 }
 0x6f4   :  { %6385 = vmatprep.subr.mxu0 %v8608_v3 }
 0x6f5   :  { %6386 = vmatpush3.msra.mxu0 %v8608_v3 }
 0x6f6   :  { %6387 = vmatprep.subr.mxu0 %v8615_v6 }
 0x6f7   :  { %6388 = vmatpush3.msra.mxu0 %v8615_v6 }
 0x6f8   :  { %6389 = vmatprep.subr.mxu0 %v8622_v8 }
 0x6f9   :  { %6390 = vmatpush3.msra.mxu0 %v8622_v8 }
 0x6fa   :  { %6435 = vmatprep.subr.mxu0 %v8507_v61 }
 0x79a   :  { %v6317_v10 = vpop.f32.mrf.mxu0 }
 0x79b   :  { %v8781_v12 = vadd.f32 %v6317_v10, %v4978_v49 }
 0x79c   :  { %v1553_v13 = vpop.f32.mrf.mxu0 }
 0x79d   :  { %v8783_v14 = vadd.f32 %v4978_v49, %v1553_v13  ;;  %v1662_v9 = vmul.f32 %v8781_v12, %v8781_v12 }
 0x79e   :  { %v6320_v52 = vpop.f32.mrf.mxu0 }
 0x79f   :  { %6353 = vmatprep.mubr.f32.mxu1 %v8783_v14  ;;  %v1661_v15 = vmul.f32 %v8783_v14, %v8783_v14  ;;  %v8790_v11 = vadd.f32 %v6320_v52, %v4978_v49 }
 0x7a0   :  { %v1563_v25 = vpop.f32.mrf.mxu0  ;;  %6354 = vmatmul.mubr.f32.vlgmr.msra.gmra.mxu1 %v8781_v12 }
 0x7a1   :  { %v8793_v29 = vadd.f32 %v4978_v49, %v1563_v25  ;;  %6391 = vmatprep.mubr.f32.mxu0 %v1661_v15  ;;  %6398 = vmatpush3.msra.mxu1 %v8684_v38  ;;  %v1664_v35 = vmul.f32 %v8790_v11, %v8790_v11  ;;  %v7664_v38 = vld [vmem:[%s10599_s6 + $0x68] sm:$0xff] }
 0x7a2   :  { %6392 = vmatmul.mubr.f32.vlgmr.msra.gmra.mxu0 %v1662_v9  ;;  %6399 = vmatprep.subr.mxu1 %v7663_v30 }
 0x7a3   :  { %6356 = vmatprep.mubr.f32.mxu1 %v8793_v29  ;;  %v1663_v31 = vmul.f32 %v8793_v29, %v8793_v29  ;;  %6400 = vmatpush3.msra.mxu1 %v7663_v30 }
 0x7a4   :  { %6357 = vmatmul.mubr.f32.gmra.mxu1 %v8790_v11  ;;  %6401 = vmatprep.subr.mxu1 %v7664_v38 }
 0x7a5   :  { %6394 = vmatprep.mubr.f32.mxu0 %v1663_v31  ;;  %6402 = vmatpush3.msra.mxu1 %v7664_v38 }
 0x7a6   :  { %6395 = vmatmul.mubr.f32.gmra.mxu0 %v1664_v35  ;;  %6403 = vmatprep.subr.mxu1 %v7665_v36 }
 0x7a7   :  { %6404 = vmatpush3.msra.mxu1 %v7665_v36  ;;  %6436 = vmatpush3.msra.mxu0 %v8507_v61  ;;  %v4981_v36 = vld [vmem:[%s10603_s8 + $0x3] ss:$0 sm:$0xff] }
 0x7a8   :  { %6405 = vmatprep.subr.mxu1 %v7666_v37  ;;  %6437 = vmatprep.subr.mxu0 %v8524_v56 }
 0x7a9   :  { %6406 = vmatpush3.msra.mxu1 %v7666_v37  ;;  %6438 = vmatpush3.msra.mxu0 %v8524_v56 }
 0x7aa   :  { %6407 = vmatprep.subr.mxu1 %v7667_v39  ;;  %6439 = vmatprep.subr.mxu0 %v8531_v16 }
 0x7ab   :  { %6408 = vmatpush3.msra.mxu1 %v7667_v39  ;;  %6440 = vmatpush3.msra.mxu0 %v8531_v16 }
 0x7ac   :  { %6409 = vmatprep.subr.mxu1 %v7668_v40  ;;  %6441 = vmatprep.subr.mxu0 %v8538_v17 }
 0x7ad   :  { %6410 = vmatpush3.msra.mxu1 %v7668_v40  ;;  %6442 = vmatpush3.msra.mxu0 %v8538_v17 }
 0x7ae   :  { %6411 = vmatprep.subr.mxu1 %v7669_v59  ;;  %6443 = vmatprep.subr.mxu0 %v8545_v18 }
 0x7af   :  { %6412 = vmatpush3.msra.mxu1 %v7669_v59  ;;  %6444 = vmatpush3.msra.mxu0 %v8545_v18  ;;  %v4982_v59 = vld [vmem:[%s10604_s9 + $0x3] ss:$0 sm:$0xff] }
 0x7b0   :  { %6413 = vmatprep.subr.mxu1 %v7670_v41  ;;  %6445 = vmatprep.subr.mxu0 %v8552_v19 }
 0x7b1   :  { %6414 = vmatpush3.msra.mxu1 %v7670_v41  ;;  %6446 = vmatpush3.msra.mxu0 %v8552_v19 }
 0x7b2   :  { %6415 = vmatprep.subr.mxu1 %v7671_v42  ;;  %6447 = vmatprep.subr.mxu0 %v8559_v20 }
 0x7b3   :  { %6416 = vmatpush3.msra.mxu1 %v7671_v42  ;;  %6448 = vmatpush3.msra.mxu0 %v8559_v20 }
 0x7b4   :  { %6417 = vmatprep.subr.mxu1 %v7672_v43  ;;  %6449 = vmatprep.subr.mxu0 %v8566_v21 }
 0x7b5   :  { %6418 = vmatpush3.msra.mxu1 %v7672_v43  ;;  %6450 = vmatpush3.msra.mxu0 %v8566_v21 }
 0x7b6   :  { %6419 = vmatprep.subr.mxu1 %v7673_v44  ;;  %6451 = vmatprep.subr.mxu0 %v8573_v22 }
 0x7b7   :  { %6420 = vmatpush3.msra.mxu1 %v7673_v44  ;;  %6452 = vmatpush3.msra.mxu0 %v8573_v22 }
 0x7b8   :  { %6421 = vmatprep.subr.mxu1 %v7674_v26  ;;  %6453 = vmatprep.subr.mxu0 %v8580_v23 }
 0x7b9   :  { %6422 = vmatpush3.msra.mxu1 %v7674_v26  ;;  %6454 = vmatpush3.msra.mxu0 %v8580_v23 }
 0x7ba   :  { %6423 = vmatprep.subr.mxu1 %v7675_v63  ;;  %6455 = vmatprep.subr.mxu0 %v8587_v62 }
 0x7bb   :  { %6424 = vmatpush3.msra.mxu1 %v7675_v63  ;;  %6456 = vmatpush3.msra.mxu0 %v8587_v62 }
 0x7bc   :  { %6425 = vmatprep.subr.mxu1 %v7676_v1  ;;  %6457 = vmatprep.subr.mxu0 %v8594_v0 }
 0x7bd   :  { %6426 = vmatpush3.msra.mxu1 %v7676_v1  ;;  %6458 = vmatpush3.msra.mxu0 %v8594_v0 }
 0x7be   :  { %6427 = vmatprep.subr.mxu1 %v7677_v45  ;;  %6459 = vmatprep.subr.mxu0 %v8601_v2 }
 0x7bf   :  { %6428 = vmatpush3.msra.mxu1 %v7677_v45  ;;  %6460 = vmatpush3.msra.mxu0 %v8601_v2 }
 0x7c0   :  { %6473 = vmatprep.subr.mxu1 %v8507_v61  ;;  %6461 = vmatprep.subr.mxu0 %v8608_v3 }
 0x7c1   :  { %6462 = vmatpush3.msra.mxu0 %v8608_v3 }
 0x7c2   :  { %6463 = vmatprep.subr.mxu0 %v8615_v6 }
 0x7c3   :  { %6464 = vmatpush3.msra.mxu0 %v8615_v6 }
 0x7c4   :  { %6465 = vmatprep.subr.mxu0 %v8622_v8 }
 0x7c5   :  { %6466 = vmatpush3.msra.mxu0 %v8622_v8 }
 0x7c6   :  { %6511 = vmatprep.subr.mxu0 %v8882_v46 }
 0x860   :  { %v6355_v48 = vpop.f32.mrf.mxu1 }
 0x861   :  { %v1751_v24 = vmul.f32 %v6355_v48, %v6355_v48  ;;  %v1763_v35 = vsub.f32 %v8781_v12, %v6355_v48 }
 0x862   :  { %v1642_v28 = vpop.f32.mrf.mxu1  ;;  %v6393_v50 = vpop.f32.mrf.mxu0 }
 0x863   :  { %v1750_v51 = vmul.f32 %v1642_v28, %v1642_v28  ;;  %v1755_v47 = vsub.f32 %v6393_v50, %v1751_v24  ;;  %v1762_v37 = vsub.f32 %v8783_v14, %v1642_v28 }
 0x864   :  { %v6358_v55 = vpop.f32.mrf.mxu1  ;;  %v1731_v27 = vpop.f32.mrf.mxu0 }
 0x865   :  { %v1759_v58 = vmax.f32 %v1755_v47, 0.0  ;;  %v1753_v60 = vmul.f32 %v6358_v55, %v6358_v55  ;;  %v1754_v4 = vsub.f32 %v1731_v27, %v1750_v51  ;;  %v1765_v43 = vsub.f32 %v8790_v11, %v6358_v55 }
 0x866   :  { %v1652_v5 = vpop.f32.mrf.mxu1  ;;  %v6396_v7 = vpop.f32.mrf.mxu0 }
 0x867   :  { %v1767_v33 = vadd.f32 1e-05, %v1759_v58  ;;  %v1758_v57 = vmax.f32 %v1754_v4, 0.0  ;;  %v1752_v49 = vmul.f32 %v1652_v5, %v1652_v5  ;;  %v1757_v10 = vsub.f32 %v6396_v7, %v1753_v60 }
 0x868   :  { %v1741_v13 = vpop.f32.mrf.mxu0  ;;  %v1764_v63 = vsub.f32 %v8793_v29, %v1652_v5 }
 0x869   :  { %7502 = vrsqrt.f32 %v1767_v33  ;;  %v1766_v52 = vadd.f32 1e-05, %v1758_v57  ;;  %v1756_v15 = vsub.f32 %v1741_v13, %v1752_v49  ;;  %v1761_v9 = vmax.f32 %v1757_v10, 0.0 }
 0x86b   :  { %7504 = vrsqrt.f32 %v1766_v52  ;;  %v1760_v25 = vmax.f32 %v1756_v15, 0.0  ;;  %v1769_v30 = vadd.f32 1e-05, %v1761_v9  ;;  %v7680_v52 = vld [vmem:[%s10599_s6 + $0xf0] sm:$0xff] }
 0x86d   :  { %v1768_v31 = vadd.f32 1e-05, %v1760_v25  ;;  %7506 = vrsqrt.f32 %v1769_v30  ;;  %v7682_v25 = vld [vmem:[%s10599_s6 + $0xe0] sm:$0xff]  ;;  %v7683_v30 = vld [vmem:[%s10599_s6 + $0xd8] sm:$0xff] }
 0x86f   :  { %7508 = vrsqrt.f32 %v1768_v31  ;;  %v7684_v31 = vld [vmem:[%s10599_s6 + $0xd0] sm:$0xff] }
 0x876   :  { %v7503_v38 = vpop.eup %7502 }
 0x877   :  { %v1775_v39 = vmul.f32 %v7503_v38, %v1763_v35 }
 0x878   :  { %v7505_v40 = vpop.eup %7504 }
 0x879   :  { %v1785_v41 = vmul.f32 %v4981_v36, %v1775_v39  ;;  %v1774_v42 = vmul.f32 %v7505_v40, %v1762_v37 }
 0x87a   :  { %v7507_v44 = vpop.eup %7506 }
 0x87b   :  { %v1795_v26 = vadd.f32 %v4982_v59, %v1785_v41  ;;  %v1784_v12 = vmul.f32 %v4981_v36, %v1774_v42  ;;  %v1777_v45 = vmul.f32 %v7507_v44, %v1765_v43 }
 0x87c   :  { %v7509_v1 = vpop.eup %7508 }
 0x87d   :  { %v1776_v48 = vmul.f32 %v7509_v1, %v1764_v63  ;;  %v1794_v24 = vadd.f32 %v4982_v59, %v1784_v12  ;;  %7510 = vtanh.f32 %v1795_v26  ;;  %v1787_v14 = vmul.f32 %v4981_v36, %v1777_v45 }
 0x87f   :  { %v1786_v28 = vmul.f32 %v4981_v36, %v1776_v48  ;;  %7512 = vtanh.f32 %v1794_v24  ;;  %v1797_v50 = vadd.f32 %v4982_v59, %v1787_v14 }
 0x881   :  { %v1796_v51 = vadd.f32 %v4982_v59, %v1786_v28  ;;  %7514 = vtanh.f32 %v1797_v50 }
 0x883   :  { %7516 = vtanh.f32 %v1796_v51 }
 0x88a   :  { %v7511_v47 = vpop.eup %7510 }
 0x88b   :  { %v8899_v55 = vadd.f32 %v7511_v47, %v8215_v32  ;;  %v7679_v32 = vld [vmem:[%s10602_s7] ss:$0 sm:$0xff] }
 0x88c   :  { %v7513_v27 = vpop.eup %7512 }
 0x88d   :  { %v8896_v11 = vadd.f32 %v7513_v27, %v8213_v53 }
 0x88e   :  { %v7515_v29 = vpop.eup %7514 }
 0x88f   :  { %6429 = vmatprep.mubr.f32.mxu1 %v8896_v11  ;;  %v8908_v4 = vadd.f32 %v7515_v29, %v8223_v54 }
 0x890   :  { %v7517_v58 = vpop.eup %7516  ;;  %6430 = vmatmul.mubr.f32.vlgmr.msra.gmra.mxu1 %v8899_v55 }
 0x891   :  { %v8904_v60 = vadd.f32 %v7517_v58, %v8220_v34  ;;  %6474 = vmatpush3.msra.mxu1 %v8507_v61  ;;  %v7697_v58 = vld [vmem:[%s10603_s8] ss:$0 sm:$0xff] }
 0x892   :  { %6475 = vmatprep.subr.mxu1 %v8524_v56 }
 0x893   :  { %6432 = vmatprep.mubr.f32.mxu1 %v8904_v60  ;;  %6476 = vmatpush3.msra.mxu1 %v8524_v56 }
 0x894   :  { %6433 = vmatmul.mubr.f32.gmra.mxu1 %v8908_v4  ;;  %6477 = vmatprep.subr.mxu1 %v8531_v16 }
 0x895   :  { %6478 = vmatpush3.msra.mxu1 %v8531_v16 }
 0x896   :  { %6479 = vmatprep.subr.mxu1 %v8538_v17 }
 0x897   :  { %6480 = vmatpush3.msra.mxu1 %v8538_v17 }
 0x898   :  { %6481 = vmatprep.subr.mxu1 %v8545_v18 }
 0x899   :  { %6482 = vmatpush3.msra.mxu1 %v8545_v18 }
 0x89a   :  { %6483 = vmatprep.subr.mxu1 %v8552_v19 }
 0x89b   :  { %6484 = vmatpush3.msra.mxu1 %v8552_v19 }
 0x89c   :  { %6485 = vmatprep.subr.mxu1 %v8559_v20 }
 0x89d   :  { %6486 = vmatpush3.msra.mxu1 %v8559_v20 }
 0x89e   :  { %6487 = vmatprep.subr.mxu1 %v8566_v21 }
 0x89f   :  { %6488 = vmatpush3.msra.mxu1 %v8566_v21 }
 0x8a0   :  { %6489 = vmatprep.subr.mxu1 %v8573_v22 }
 0x8a1   :  { %6490 = vmatpush3.msra.mxu1 %v8573_v22 }
 0x8a2   :  { %6491 = vmatprep.subr.mxu1 %v8580_v23 }
 0x8a3   :  { %6492 = vmatpush3.msra.mxu1 %v8580_v23 }
 0x8a4   :  { %6493 = vmatprep.subr.mxu1 %v8587_v62 }
 0x8a5   :  { %6494 = vmatpush3.msra.mxu1 %v8587_v62 }
 0x8a6   :  { %6495 = vmatprep.subr.mxu1 %v8594_v0 }
 0x8a7   :  { %6496 = vmatpush3.msra.mxu1 %v8594_v0 }
 0x8a8   :  { %6497 = vmatprep.subr.mxu1 %v8601_v2 }
 0x8a9   :  { %6498 = vmatpush3.msra.mxu1 %v8601_v2 }
 0x8aa   :  { %6499 = vmatprep.subr.mxu1 %v8608_v3 }
 0x8ab   :  { %6500 = vmatpush3.msra.mxu1 %v8608_v3 }
 0x8ac   :  { %6501 = vmatprep.subr.mxu1 %v8615_v6 }
 0x8ad   :  { %6502 = vmatpush3.msra.mxu1 %v8615_v6 }
 0x8ae   :  { %6503 = vmatprep.subr.mxu1 %v8622_v8 }
 0x8af   :  { %6504 = vmatpush3.msra.mxu1 %v8622_v8 }
 0x8b0   :  { %6549 = vmatprep.subr.mxu1 %v8507_v61 }
 0x950   :  { %v6431_v53 = vpop.f32.mrf.mxu1 }
 0x951   :  { %v8946_v34 = vadd.f32 %v7679_v32, %v6431_v53 }
 0x952   :  { %v1872_v54 = vpop.f32.mrf.mxu1 }
 0x953   :  { %v8948_v5 = vadd.f32 %v7679_v32, %v1872_v54  ;;  %v1977_v57 = vmul.f32 %v8946_v34, %v8946_v34 }
 0x954   :  { %v6434_v7 = vpop.f32.mrf.mxu1 }
 0x955   :  { %6467 = vmatprep.mubr.f32.mxu0 %v8948_v5  ;;  %v1976_v33 = vmul.f32 %v8948_v5, %v8948_v5  ;;  %v8955_v49 = vadd.f32 %v7679_v32, %v6434_v7 }
 0x956   :  { %v1882_v10 = vpop.f32.mrf.mxu1  ;;  %6468 = vmatmul.mubr.f32.vlgmr.msra.gmra.mxu0 %v8946_v34 }
 0x957   :  { %v8958_v13 = vadd.f32 %v7679_v32, %v1882_v10  ;;  %6505 = vmatprep.mubr.f32.mxu1 %v1976_v33  ;;  %6512 = vmatpush3.msra.mxu0 %v8882_v46  ;;  %v1979_v9 = vmul.f32 %v8955_v49, %v8955_v49  ;;  %v7681_v46 = vld [vmem:[%s10599_s6 + $0xe8] sm:$0xff] }
 0x958   :  { %6506 = vmatmul.mubr.f32.vlgmr.msra.gmra.mxu1 %v1977_v57  ;;  %6513 = vmatprep.subr.mxu0 %v7680_v52 }
 0x959   :  { %6470 = vmatprep.mubr.f32.mxu0 %v8958_v13  ;;  %v1978_v15 = vmul.f32 %v8958_v13, %v8958_v13  ;;  %6514 = vmatpush3.msra.mxu0 %v7680_v52 }
 0x95a   :  { %6471 = vmatmul.mubr.f32.gmra.mxu0 %v8955_v49  ;;  %6515 = vmatprep.subr.mxu0 %v7681_v46 }
 0x95b   :  { %6508 = vmatprep.mubr.f32.mxu1 %v1978_v15  ;;  %6516 = vmatpush3.msra.mxu0 %v7681_v46 }
 0x95c   :  { %6509 = vmatmul.mubr.f32.gmra.mxu1 %v1979_v9  ;;  %6517 = vmatprep.subr.mxu0 %v7682_v25 }
 0x95d   :  { %6518 = vmatpush3.msra.mxu0 %v7682_v25  ;;  %6550 = vmatpush3.msra.mxu1 %v8507_v61  ;;  %v7685_v61 = vld [vmem:[%s10599_s6 + $0xc8] sm:$0xff] }
 0x95e   :  { %6519 = vmatprep.subr.mxu0 %v7683_v30  ;;  %6551 = vmatprep.subr.mxu1 %v8524_v56 }
 0x95f   :  { %6520 = vmatpush3.msra.mxu0 %v7683_v30  ;;  %6552 = vmatpush3.msra.mxu1 %v8524_v56  ;;  %v7686_v56 = vld [vmem:[%s10599_s6 + $0xc0] sm:$0xff] }
 0x960   :  { %6521 = vmatprep.subr.mxu0 %v7684_v31  ;;  %6553 = vmatprep.subr.mxu1 %v8531_v16 }
 0x961   :  { %6522 = vmatpush3.msra.mxu0 %v7684_v31  ;;  %6554 = vmatpush3.msra.mxu1 %v8531_v16  ;;  %v7687_v16 = vld [vmem:[%s10599_s6 + $0xb8] sm:$0xff] }
 0x962   :  { %6523 = vmatprep.subr.mxu0 %v7685_v61  ;;  %6555 = vmatprep.subr.mxu1 %v8538_v17 }
 0x963   :  { %6524 = vmatpush3.msra.mxu0 %v7685_v61  ;;  %6556 = vmatpush3.msra.mxu1 %v8538_v17  ;;  %v7688_v17 = vld [vmem:[%s10599_s6 + $0xb0] sm:$0xff] }
 0x964   :  { %6525 = vmatprep.subr.mxu0 %v7686_v56  ;;  %6557 = vmatprep.subr.mxu1 %v8545_v18 }
 0x965   :  { %6526 = vmatpush3.msra.mxu0 %v7686_v56  ;;  %6558 = vmatpush3.msra.mxu1 %v8545_v18  ;;  %v7689_v18 = vld [vmem:[%s10599_s6 + $0xa8] sm:$0xff]  ;;  %v9069_v56 = vld [vmem:[%s10597_s10 + $0x70] sm:$0xff] }
 0x966   :  { %6527 = vmatprep.subr.mxu0 %v7687_v16  ;;  %6559 = vmatprep.subr.mxu1 %v8552_v19 }
 0x967   :  { %6528 = vmatpush3.msra.mxu0 %v7687_v16  ;;  %6560 = vmatpush3.msra.mxu1 %v8552_v19  ;;  %v7690_v19 = vld [vmem:[%s10599_s6 + $0xa0] sm:$0xff] }
 0x968   :  { %6529 = vmatprep.subr.mxu0 %v7688_v17  ;;  %6561 = vmatprep.subr.mxu1 %v8559_v20 }
 0x969   :  { %6530 = vmatpush3.msra.mxu0 %v7688_v17  ;;  %6562 = vmatpush3.msra.mxu1 %v8559_v20  ;;  %v7691_v20 = vld [vmem:[%s10599_s6 + $0x98] sm:$0xff]  ;;  %v9076_v17 = vld [vmem:[%s10597_s10 + $0x68] sm:$0xff] }
 0x96a   :  { %6531 = vmatprep.subr.mxu0 %v7689_v18  ;;  %6563 = vmatprep.subr.mxu1 %v8566_v21 }
 0x96b   :  { %6532 = vmatpush3.msra.mxu0 %v7689_v18  ;;  %6564 = vmatpush3.msra.mxu1 %v8566_v21  ;;  %v7692_v21 = vld [vmem:[%s10599_s6 + $0x90] sm:$0xff]  ;;  %v9083_v18 = vld [vmem:[%s10597_s10 + $0x60] sm:$0xff] }
 0x96c   :  { %6533 = vmatprep.subr.mxu0 %v7690_v19  ;;  %6565 = vmatprep.subr.mxu1 %v8573_v22 }
 0x96d   :  { %6534 = vmatpush3.msra.mxu0 %v7690_v19  ;;  %6566 = vmatpush3.msra.mxu1 %v8573_v22  ;;  %v7693_v22 = vld [vmem:[%s10599_s6 + $0x88] sm:$0xff]  ;;  %v9090_v19 = vld [vmem:[%s10597_s10 + $0x58] sm:$0xff] }
 0x96e   :  { %6535 = vmatprep.subr.mxu0 %v7691_v20  ;;  %6567 = vmatprep.subr.mxu1 %v8580_v23 }
 0x96f   :  { %6536 = vmatpush3.msra.mxu0 %v7691_v20  ;;  %6568 = vmatpush3.msra.mxu1 %v8580_v23  ;;  %v7694_v23 = vld [vmem:[%s10599_s6 + $0x80] sm:$0xff]  ;;  %v9097_v20 = vld [vmem:[%s10597_s10 + $0x50] sm:$0xff] }
 0x970   :  { %6537 = vmatprep.subr.mxu0 %v7692_v21  ;;  %6569 = vmatprep.subr.mxu1 %v8587_v62 }
 0x971   :  { %6538 = vmatpush3.msra.mxu0 %v7692_v21  ;;  %6570 = vmatpush3.msra.mxu1 %v8587_v62  ;;  %v9040_v62 = vld [vmem:[%s10597_s10 + $0x78] sm:$0xff]  ;;  %v9104_v21 = vld [vmem:[%s10597_s10 + $0x48] sm:$0xff] }
 0x972   :  { %6539 = vmatprep.subr.mxu0 %v7693_v22  ;;  %6571 = vmatprep.subr.mxu1 %v8594_v0 }
 0x973   :  { %6540 = vmatpush3.msra.mxu0 %v7693_v22  ;;  %6572 = vmatpush3.msra.mxu1 %v8594_v0  ;;  %v9052_v0 = vld [vmem:[%s10599_s6 + $0x178] sm:$0xff]  ;;  %v9111_v22 = vld [vmem:[%s10597_s10 + $0x40] sm:$0xff] }
 0x974   :  { %6541 = vmatprep.subr.mxu0 %v7694_v23  ;;  %6573 = vmatprep.subr.mxu1 %v8601_v2 }
 0x975   :  { %6542 = vmatpush3.msra.mxu0 %v7694_v23  ;;  %6574 = vmatpush3.msra.mxu1 %v8601_v2  ;;  %v9118_v23 = vld [vmem:[%s10597_s10 + $0x38] sm:$0xff] }
 0x976   :  { %6587 = vmatprep.subr.mxu0 %v9040_v62  ;;  %6575 = vmatprep.subr.mxu1 %v8608_v3 }
 0x977   :  { %6576 = vmatpush3.msra.mxu1 %v8608_v3 }
 0x978   :  { %6577 = vmatprep.subr.mxu1 %v8615_v6 }
 0x979   :  { %6578 = vmatpush3.msra.mxu1 %v8615_v6 }
 0x97a   :  { %6579 = vmatprep.subr.mxu1 %v8622_v8 }
 0x97b   :  { %6580 = vmatpush3.msra.mxu1 %v8622_v8 }
 0x97c   :  { %6625 = vmatprep.subr.mxu1 %v9052_v0 }
 0xa16   :  { %v6469_v2 = vpop.f32.mrf.mxu0 }
 0xa17   :  { %v2066_v35 = vmul.f32 %v6469_v2, %v6469_v2  ;;  %v2078_v50 = vsub.f32 %v8946_v34, %v6469_v2  ;;  %v7698_v34 = vld [vmem:[%s10604_s9] ss:$0 sm:$0xff]  ;;  %v9125_v2 = vld [vmem:[%s10597_s10 + $0x30] sm:$0xff] }
 0xa18   :  { %v1957_v38 = vpop.f32.mrf.mxu0  ;;  %v6507_v36 = vpop.f32.mrf.mxu1 }
 0xa19   :  { %v2065_v3 = vmul.f32 %v1957_v38, %v1957_v38  ;;  %v2070_v37 = vsub.f32 %v6507_v36, %v2066_v35  ;;  %v2077_v47 = vsub.f32 %v8948_v5, %v1957_v38  ;;  %v9132_v35 = vld [vmem:[%s10597_s10 + $0x28] sm:$0xff]  ;;  %v9139_v38 = vld [vmem:[%s10597_s10 + $0x20] sm:$0xff]  ;;  %v9146_v36 = vld [vmem:[%s10597_s10 + $0x18] sm:$0xff] }
 0xa1a   :  { %v6472_v39 = vpop.f32.mrf.mxu0  ;;  %v2046_v40 = vpop.f32.mrf.mxu1 }
 0xa1b   :  { %v2074_v6 = vmax.f32 %v2070_v37, 0.0  ;;  %v2068_v59 = vmul.f32 %v6472_v39, %v6472_v39  ;;  %v2069_v41 = vsub.f32 %v2046_v40, %v2065_v3  ;;  %v2080_v54 = vsub.f32 %v8955_v49, %v6472_v39  ;;  %v9153_v3 = vld [vmem:[%s10597_s10 + $0x10] sm:$0xff]  ;;  %v9160_v37 = vld [vmem:[%s10597_s10 + $0x8] sm:$0xff]  ;;  %v9167_v39 = vld [vmem:[%s10597_s10] sm:$0xff] }
 0xa1c   :  { %v1967_v42 = vpop.f32.mrf.mxu0  ;;  %v6510_v8 = vpop.f32.mrf.mxu1 }
 0xa1d   :  { %v2082_v43 = vadd.f32 1e-05, %v2074_v6  ;;  %v2073_v44 = vmax.f32 %v2069_v41, 0.0  ;;  %v2067_v26 = vmul.f32 %v1967_v42, %v1967_v42  ;;  %v2072_v12 = vsub.f32 %v6510_v8, %v2068_v59  ;;  %v7714_v6 = vld [vmem:[%s10602_s7 + $0x1] ss:$0 sm:$0xff] }
 0xa1e   :  { %v2056_v63 = vpop.f32.mrf.mxu1  ;;  %v2079_v57 = vsub.f32 %v8958_v13, %v1967_v42 }
 0xa1f   :  { %7518 = vrsqrt.f32 %v2082_v43  ;;  %v2081_v1 = vadd.f32 1e-05, %v2073_v44  ;;  %v2071_v45 = vsub.f32 %v2056_v63, %v2067_v26  ;;  %v2076_v48 = vmax.f32 %v2072_v12, 0.0 }
 0xa21   :  { %7520 = vrsqrt.f32 %v2081_v1  ;;  %v2075_v24 = vmax.f32 %v2071_v45, 0.0  ;;  %v2084_v14 = vadd.f32 1e-05, %v2076_v48  ;;  %v7715_v1 = vld [vmem:[%s10599_s6 + $0x170] sm:$0xff] }
 0xa23   :  { %v2083_v28 = vadd.f32 1e-05, %v2075_v24  ;;  %7522 = vrsqrt.f32 %v2084_v14  ;;  %v7717_v24 = vld [vmem:[%s10599_s6 + $0x160] sm:$0xff]  ;;  %v7718_v14 = vld [vmem:[%s10599_s6 + $0x158] sm:$0xff] }
 0xa25   :  { %7524 = vrsqrt.f32 %v2083_v28  ;;  %v7719_v28 = vld [vmem:[%s10599_s6 + $0x150] sm:$0xff] }
 0xa2c   :  { %v7519_v51 = vpop.eup %7518 }
 0xa2d   :  { %v2090_v27 = vmul.f32 %v7519_v51, %v2078_v50  ;;  %v7720_v50 = vld [vmem:[%s10599_s6 + $0x148] sm:$0xff]  ;;  %v7721_v51 = vld [vmem:[%s10599_s6 + $0x140] sm:$0xff] }
 0xa2e   :  { %v7521_v29 = vpop.eup %7520 }
 0xa2f   :  { %v2094_v53 = vmul.f32 %v7697_v58, %v2090_v27  ;;  %v2089_v32 = vmul.f32 %v7521_v29, %v2077_v47  ;;  %v7722_v47 = vld [vmem:[%s10599_s6 + $0x138] sm:$0xff]  ;;  %v7723_v27 = vld [vmem:[%s10599_s6 + $0x130] sm:$0xff]  ;;  %v7724_v29 = vld [vmem:[%s10599_s6 + $0x128] sm:$0xff] }
 0xa30   :  { %v7523_v7 = vpop.eup %7522 }
 0xa31   :  { %v2093_v33 = vmul.f32 %v7697_v58, %v2089_v32  ;;  %v2098_v5 = vadd.f32 %v7698_v34, %v2094_v53  ;;  %v2092_v52 = vmul.f32 %v7523_v7, %v2080_v54  ;;  %v7726_v53 = vld [vmem:[%s10599_s6 + $0x118] sm:$0xff]  ;;  %v7727_v32 = vld [vmem:[%s10599_s6 + $0x110] sm:$0xff]  ;;  %v7728_v54 = vld [vmem:[%s10599_s6 + $0x108] sm:$0xff] }
 0xa32   :  { %v7525_v10 = vpop.eup %7524  ;;  %v7729_v7 = vld [vmem:[%s10599_s6 + $0x100] sm:$0xff] }
 0xa33   :  { %v2097_v15 = vadd.f32 %v7698_v34, %v2093_v33  ;;  %v2091_v9 = vmul.f32 %v7525_v10, %v2079_v57  ;;  %v2096_v46 = vmul.f32 %v7697_v58, %v2092_v52  ;;  %v9276_v33 = vld [vmem:[%s10599_s6 + $0x1f8] sm:$0xff] }
 0xa35   :  { %7526 = vtanh.f32 %v2097_v15  ;;  %v2095_v25 = vmul.f32 %v7697_v58, %v2091_v9  ;;  %v2100_v30 = vadd.f32 %v7698_v34, %v2096_v46  ;;  %v7725_v58 = vld [vmem:[%s10599_s6 + $0x120] sm:$0xff] }
 0xa36   :  { %7528 = vtanh.f32 %v2098_v5 }
 0xa37   :  { %v2099_v31 = vadd.f32 %v7698_v34, %v2095_v25 }
 0xa39   :  { %7530 = vtanh.f32 %v2099_v31 }
 0xa3a   :  { %7532 = vtanh.f32 %v2100_v30 }
 0xa42   :  { %v7527_v49 = vpop.eup %7526 }
 0xa43   :  { %v7529_v61 = vpop.eup %7528  ;;  %6543 = vmatprep.mubr.f32.mxu0 %v7527_v49 }
 0xa44   :  { %6544 = vmatmul.mubr.f32.vlgmr.msra.gmra.mxu0 %v7529_v61 }
 0xa45   :  { %6588 = vmatpush3.msra.mxu0 %v9040_v62 }
 0xa46   :  { %v7531_v13 = vpop.eup %7530  ;;  %6589 = vmatprep.subr.mxu0 %v9069_v56 }
 0xa47   :  { %v7533_v16 = vpop.eup %7532  ;;  %6546 = vmatprep.mubr.f32.mxu0 %v7531_v13  ;;  %6590 = vmatpush3.msra.mxu0 %v9069_v56 }
 0xa48   :  { %6547 = vmatmul.mubr.f32.gmra.mxu0 %v7533_v16  ;;  %6591 = vmatprep.subr.mxu0 %v9076_v17 }
 0xa49   :  { %6592 = vmatpush3.msra.mxu0 %v9076_v17 }
 0xa4a   :  { %6593 = vmatprep.subr.mxu0 %v9083_v18 }
 0xa4b   :  { %6594 = vmatpush3.msra.mxu0 %v9083_v18 }
 0xa4c   :  { %6595 = vmatprep.subr.mxu0 %v9090_v19 }
 0xa4d   :  { %6596 = vmatpush3.msra.mxu0 %v9090_v19 }
 0xa4e   :  { %6597 = vmatprep.subr.mxu0 %v9097_v20 }
 0xa4f   :  { %6598 = vmatpush3.msra.mxu0 %v9097_v20 }
 0xa50   :  { %6599 = vmatprep.subr.mxu0 %v9104_v21 }
 0xa51   :  { %6600 = vmatpush3.msra.mxu0 %v9104_v21 }
 0xa52   :  { %6601 = vmatprep.subr.mxu0 %v9111_v22 }
 0xa53   :  { %6602 = vmatpush3.msra.mxu0 %v9111_v22 }
 0xa54   :  { %6603 = vmatprep.subr.mxu0 %v9118_v23 }
 0xa55   :  { %6604 = vmatpush3.msra.mxu0 %v9118_v23 }
 0xa56   :  { %6605 = vmatprep.subr.mxu0 %v9125_v2 }
 0xa57   :  { %6606 = vmatpush3.msra.mxu0 %v9125_v2 }
 0xa58   :  { %6607 = vmatprep.subr.mxu0 %v9132_v35 }
 0xa59   :  { %6608 = vmatpush3.msra.mxu0 %v9132_v35 }
 0xa5a   :  { %6609 = vmatprep.subr.mxu0 %v9139_v38 }
 0xa5b   :  { %6610 = vmatpush3.msra.mxu0 %v9139_v38 }
 0xa5c   :  { %6611 = vmatprep.subr.mxu0 %v9146_v36 }
 0xa5d   :  { %6612 = vmatpush3.msra.mxu0 %v9146_v36 }
 0xa5e   :  { %6613 = vmatprep.subr.mxu0 %v9153_v3 }
 0xa5f   :  { %6614 = vmatpush3.msra.mxu0 %v9153_v3 }
 0xa60   :  { %6615 = vmatprep.subr.mxu0 %v9160_v37 }
 0xa61   :  { %6616 = vmatpush3.msra.mxu0 %v9160_v37 }
 0xa62   :  { %6617 = vmatprep.subr.mxu0 %v9167_v39 }
 0xa63   :  { %6618 = vmatpush3.msra.mxu0 %v9167_v39 }
 0xa64   :  { %6663 = vmatprep.subr.mxu0 %v9040_v62 }
 0xb04   :  { %v6545_v40 = vpop.f32.mrf.mxu0 }
 0xb05   :  { %v9175_v59 = vadd.f32 %v7714_v6, %v6545_v40 }
 0xb06   :  { %v2171_v41 = vpop.f32.mrf.mxu0 }
 0xb07   :  { %v9177_v42 = vadd.f32 %v7714_v6, %v2171_v41  ;;  %v2276_v44 = vmul.f32 %v9175_v59, %v9175_v59 }
 0xb08   :  { %v6548_v8 = vpop.f32.mrf.mxu0 }
 0xb09   :  { %6581 = vmatprep.mubr.f32.mxu1 %v9177_v42  ;;  %v2275_v43 = vmul.f32 %v9177_v42, %v9177_v42  ;;  %v9184_v26 = vadd.f32 %v7714_v6, %v6548_v8 }
 0xb0a   :  { %v2181_v12 = vpop.f32.mrf.mxu0  ;;  %6582 = vmatmul.mubr.f32.vlgmr.msra.gmra.mxu1 %v9175_v59 }
 0xb0b   :  { %v9187_v63 = vadd.f32 %v7714_v6, %v2181_v12  ;;  %6619 = vmatprep.mubr.f32.mxu0 %v2275_v43  ;;  %6626 = vmatpush3.msra.mxu1 %v9052_v0  ;;  %v2278_v48 = vmul.f32 %v9184_v26, %v9184_v26  ;;  %v7716_v0 = vld [vmem:[%s10599_s6 + $0x168] sm:$0xff] }
 0xb0c   :  { %6620 = vmatmul.mubr.f32.vlgmr.msra.gmra.mxu0 %v2276_v44  ;;  %6627 = vmatprep.subr.mxu1 %v7715_v1 }
 0xb0d   :  { %6584 = vmatprep.mubr.f32.mxu1 %v9187_v63  ;;  %v2277_v45 = vmul.f32 %v9187_v63, %v9187_v63  ;;  %6628 = vmatpush3.msra.mxu1 %v7715_v1 }
 0xb0e   :  { %6585 = vmatmul.mubr.f32.gmra.mxu1 %v9184_v26  ;;  %6629 = vmatprep.subr.mxu1 %v7716_v0 }
 0xb0f   :  { %6622 = vmatprep.mubr.f32.mxu0 %v2277_v45  ;;  %6630 = vmatpush3.msra.mxu1 %v7716_v0 }
 0xb10   :  { %6623 = vmatmul.mubr.f32.gmra.mxu0 %v2278_v48  ;;  %6631 = vmatprep.subr.mxu1 %v7717_v24 }
 0xb11   :  { %6632 = vmatpush3.msra.mxu1 %v7717_v24  ;;  %6664 = vmatpush3.msra.mxu0 %v9040_v62 }
 0xb12   :  { %6633 = vmatprep.subr.mxu1 %v7718_v14  ;;  %6665 = vmatprep.subr.mxu0 %v9069_v56 }
 0xb13   :  { %6634 = vmatpush3.msra.mxu1 %v7718_v14  ;;  %6666 = vmatpush3.msra.mxu0 %v9069_v56 }
 0xb14   :  { %6635 = vmatprep.subr.mxu1 %v7719_v28  ;;  %6667 = vmatprep.subr.mxu0 %v9076_v17 }
 0xb15   :  { %6636 = vmatpush3.msra.mxu1 %v7719_v28  ;;  %6668 = vmatpush3.msra.mxu0 %v9076_v17 }
 0xb16   :  { %6637 = vmatprep.subr.mxu1 %v7720_v50  ;;  %6669 = vmatprep.subr.mxu0 %v9083_v18 }
 0xb17   :  { %6638 = vmatpush3.msra.mxu1 %v7720_v50  ;;  %6670 = vmatpush3.msra.mxu0 %v9083_v18  ;;  %v7731_v50 = vld [vmem:[%s10603_s8 + $0x1] ss:$0 sm:$0xff] }
 0xb18   :  { %6639 = vmatprep.subr.mxu1 %v7721_v51  ;;  %6671 = vmatprep.subr.mxu0 %v9090_v19 }
 0xb19   :  { %6640 = vmatpush3.msra.mxu1 %v7721_v51  ;;  %6672 = vmatpush3.msra.mxu0 %v9090_v19 }
 0xb1a   :  { %6641 = vmatprep.subr.mxu1 %v7722_v47  ;;  %6673 = vmatprep.subr.mxu0 %v9097_v20 }
 0xb1b   :  { %6642 = vmatpush3.msra.mxu1 %v7722_v47  ;;  %6674 = vmatpush3.msra.mxu0 %v9097_v20 }
 0xb1c   :  { %6643 = vmatprep.subr.mxu1 %v7723_v27  ;;  %6675 = vmatprep.subr.mxu0 %v9104_v21 }
 0xb1d   :  { %6644 = vmatpush3.msra.mxu1 %v7723_v27  ;;  %6676 = vmatpush3.msra.mxu0 %v9104_v21 }
 0xb1e   :  { %6645 = vmatprep.subr.mxu1 %v7724_v29  ;;  %6677 = vmatprep.subr.mxu0 %v9111_v22 }
 0xb1f   :  { %6646 = vmatpush3.msra.mxu1 %v7724_v29  ;;  %6678 = vmatpush3.msra.mxu0 %v9111_v22 }
 0xb20   :  { %6647 = vmatprep.subr.mxu1 %v7725_v58  ;;  %6679 = vmatprep.subr.mxu0 %v9118_v23 }
 0xb21   :  { %6648 = vmatpush3.msra.mxu1 %v7725_v58  ;;  %6680 = vmatpush3.msra.mxu0 %v9118_v23 }
 0xb22   :  { %6649 = vmatprep.subr.mxu1 %v7726_v53  ;;  %6681 = vmatprep.subr.mxu0 %v9125_v2 }
 0xb23   :  { %6650 = vmatpush3.msra.mxu1 %v7726_v53  ;;  %6682 = vmatpush3.msra.mxu0 %v9125_v2 }
 0xb24   :  { %6651 = vmatprep.subr.mxu1 %v7727_v32  ;;  %6683 = vmatprep.subr.mxu0 %v9132_v35 }
 0xb25   :  { %6652 = vmatpush3.msra.mxu1 %v7727_v32  ;;  %6684 = vmatpush3.msra.mxu0 %v9132_v35 }
 0xb26   :  { %6653 = vmatprep.subr.mxu1 %v7728_v54  ;;  %6685 = vmatprep.subr.mxu0 %v9139_v38 }
 0xb27   :  { %6654 = vmatpush3.msra.mxu1 %v7728_v54  ;;  %6686 = vmatpush3.msra.mxu0 %v9139_v38 }
 0xb28   :  { %6655 = vmatprep.subr.mxu1 %v7729_v7  ;;  %6687 = vmatprep.subr.mxu0 %v9146_v36 }
 0xb29   :  { %6656 = vmatpush3.msra.mxu1 %v7729_v7  ;;  %6688 = vmatpush3.msra.mxu0 %v9146_v36 }
 0xb2a   :  { %6701 = vmatprep.subr.mxu1 %v9040_v62  ;;  %6689 = vmatprep.subr.mxu0 %v9153_v3 }
 0xb2b   :  { %6690 = vmatpush3.msra.mxu0 %v9153_v3 }
 0xb2c   :  { %6691 = vmatprep.subr.mxu0 %v9160_v37 }
 0xb2d   :  { %6692 = vmatpush3.msra.mxu0 %v9160_v37 }
 0xb2e   :  { %6693 = vmatprep.subr.mxu0 %v9167_v39 }
 0xb2f   :  { %6694 = vmatpush3.msra.mxu0 %v9167_v39 }
 0xb30   :  { %6739 = vmatprep.subr.mxu0 %v9276_v33 }
 0xbca   :  { %v6583_v57 = vpop.f32.mrf.mxu1 }
 0xbcb   :  { %v2365_v10 = vmul.f32 %v6583_v57, %v6583_v57  ;;  %v2377_v48 = vsub.f32 %v9175_v59, %v6583_v57  ;;  %v7732_v59 = vld [vmem:[%s10604_s9 + $0x1] ss:$0 sm:$0xff] }
 0xbcc   :  { %v2256_v34 = vpop.f32.mrf.mxu1  ;;  %v6621_v5 = vpop.f32.mrf.mxu0 }
 0xbcd   :  { %v2364_v52 = vmul.f32 %v2256_v34, %v2256_v34  ;;  %v2369_v15 = vsub.f32 %v6621_v5, %v2365_v10  ;;  %v2376_v24 = vsub.f32 %v9177_v42, %v2256_v34 }
 0xbce   :  { %v6586_v9 = vpop.f32.mrf.mxu1  ;;  %v2345_v46 = vpop.f32.mrf.mxu0 }
 0xbcf   :  { %v2373_v25 = vmax.f32 %v2369_v15, 0.0  ;;  %v2367_v30 = vmul.f32 %v6586_v9, %v6586_v9  ;;  %v2368_v31 = vsub.f32 %v2345_v46, %v2364_v52  ;;  %v2379_v27 = vsub.f32 %v9184_v26, %v6586_v9 }
 0xbd0   :  { %v2266_v49 = vpop.f32.mrf.mxu1  ;;  %v6624_v61 = vpop.f32.mrf.mxu0 }
 0xbd1   :  { %v2381_v13 = vadd.f32 1e-05, %v2373_v25  ;;  %v2372_v16 = vmax.f32 %v2368_v31, 0.0  ;;  %v2366_v40 = vmul.f32 %v2266_v49, %v2266_v49  ;;  %v2371_v6 = vsub.f32 %v6624_v61, %v2367_v30  ;;  %v7733_v25 = vld [vmem:[%s10602_s7 + $0x2] ss:$0 sm:$0xff] }
 0xbd2   :  { %v2355_v41 = vpop.f32.mrf.mxu0  ;;  %v2378_v53 = vsub.f32 %v9187_v63, %v2266_v49 }
 0xbd3   :  { %7534 = vrsqrt.f32 %v2381_v13  ;;  %v2380_v8 = vadd.f32 1e-05, %v2372_v16  ;;  %v2370_v43 = vsub.f32 %v2355_v41, %v2366_v40  ;;  %v2375_v44 = vmax.f32 %v2371_v6, 0.0 }
 0xbd5   :  { %7536 = vrsqrt.f32 %v2380_v8  ;;  %v2374_v12 = vmax.f32 %v2370_v43, 0.0  ;;  %v2383_v1 = vadd.f32 1e-05, %v2375_v44  ;;  %v7734_v8 = vld [vmem:[%s10599_s6 + $0x1f0] sm:$0xff] }
 0xbd7   :  { %v2382_v45 = vadd.f32 1e-05, %v2374_v12  ;;  %7538 = vrsqrt.f32 %v2383_v1  ;;  %v7736_v12 = vld [vmem:[%s10599_s6 + $0x1e0] sm:$0xff]  ;;  %v7737_v1 = vld [vmem:[%s10599_s6 + $0x1d8] sm:$0xff] }
 0xbd9   :  { %7540 = vrsqrt.f32 %v2382_v45  ;;  %v7738_v45 = vld [vmem:[%s10599_s6 + $0x1d0] sm:$0xff] }
 0xbe0   :  { %v7535_v0 = vpop.eup %7534 }
 0xbe1   :  { %v2389_v14 = vmul.f32 %v7535_v0, %v2377_v48  ;;  %v7739_v48 = vld [vmem:[%s10599_s6 + $0x1c8] sm:$0xff]  ;;  %v7740_v0 = vld [vmem:[%s10599_s6 + $0x1c0] sm:$0xff] }
 0xbe2   :  { %v7537_v28 = vpop.eup %7536 }
 0xbe3   :  { %v2393_v51 = vmul.f32 %v7731_v50, %v2389_v14  ;;  %v2388_v47 = vmul.f32 %v7537_v28, %v2376_v24  ;;  %v7741_v24 = vld [vmem:[%s10599_s6 + $0x1b8] sm:$0xff]  ;;  %v7742_v14 = vld [vmem:[%s10599_s6 + $0x1b0] sm:$0xff]  ;;  %v7743_v28 = vld [vmem:[%s10599_s6 + $0x1a8] sm:$0xff] }
 0xbe4   :  { %v7539_v29 = vpop.eup %7538 }
 0xbe5   :  { %v2392_v58 = vmul.f32 %v7731_v50, %v2388_v47  ;;  %v2397_v42 = vadd.f32 %v7732_v59, %v2393_v51  ;;  %v2391_v54 = vmul.f32 %v7539_v29, %v2379_v27  ;;  %v7745_v51 = vld [vmem:[%s10599_s6 + $0x198] sm:$0xff]  ;;  %v7746_v47 = vld [vmem:[%s10599_s6 + $0x190] sm:$0xff]  ;;  %v7747_v27 = vld [vmem:[%s10599_s6 + $0x188] sm:$0xff] }
 0xbe6   :  { %v7541_v32 = vpop.eup %7540  ;;  %v7748_v29 = vld [vmem:[%s10599_s6 + $0x180] sm:$0xff] }
 0xbe7   :  { %v2396_v7 = vadd.f32 %v7732_v59, %v2392_v58  ;;  %v2390_v57 = vmul.f32 %v7541_v32, %v2378_v53  ;;  %v2395_v10 = vmul.f32 %v7731_v50, %v2391_v54  ;;  %v9425_v58 = vld [vmem:[%s10599_s6 + $0x78] sm:$0xff] }
 0xbe9   :  { %7542 = vtanh.f32 %v2396_v7  ;;  %v2394_v34 = vmul.f32 %v7731_v50, %v2390_v57  ;;  %v2399_v5 = vadd.f32 %v7732_v59, %v2395_v10  ;;  %v7744_v50 = vld [vmem:[%s10599_s6 + $0x1a0] sm:$0xff] }
 0xbea   :  { %7544 = vtanh.f32 %v2397_v42 }
 0xbeb   :  { %v2398_v52 = vadd.f32 %v7732_v59, %v2394_v34 }
 0xbed   :  { %7546 = vtanh.f32 %v2398_v52 }
 0xbee   :  { %7548 = vtanh.f32 %v2399_v5 }
 0xbf6   :  { %v7543_v26 = vpop.eup %7542 }
 0xbf7   :  { %v7545_v15 = vpop.eup %7544  ;;  %6657 = vmatprep.mubr.f32.mxu1 %v7543_v26 }
 0xbf8   :  { %6658 = vmatmul.mubr.f32.vlgmr.msra.gmra.mxu1 %v7545_v15 }
 0xbf9   :  { %6702 = vmatpush3.msra.mxu1 %v9040_v62 }
 0xbfa   :  { %v7547_v63 = vpop.eup %7546  ;;  %6703 = vmatprep.subr.mxu1 %v9069_v56 }
 0xbfb   :  { %v7549_v9 = vpop.eup %7548  ;;  %6660 = vmatprep.mubr.f32.mxu1 %v7547_v63  ;;  %6704 = vmatpush3.msra.mxu1 %v9069_v56 }
 0xbfc   :  { %6661 = vmatmul.mubr.f32.gmra.mxu1 %v7549_v9  ;;  %6705 = vmatprep.subr.mxu1 %v9076_v17 }
 0xbfd   :  { %6706 = vmatpush3.msra.mxu1 %v9076_v17 }
 0xbfe   :  { %6707 = vmatprep.subr.mxu1 %v9083_v18 }
 0xbff   :  { %6708 = vmatpush3.msra.mxu1 %v9083_v18 }
 0xc00   :  { %6709 = vmatprep.subr.mxu1 %v9090_v19 }
 0xc01   :  { %6710 = vmatpush3.msra.mxu1 %v9090_v19 }
 0xc02   :  { %6711 = vmatprep.subr.mxu1 %v9097_v20 }
 0xc03   :  { %6712 = vmatpush3.msra.mxu1 %v9097_v20 }
 0xc04   :  { %6713 = vmatprep.subr.mxu1 %v9104_v21 }
 0xc05   :  { %6714 = vmatpush3.msra.mxu1 %v9104_v21 }
 0xc06   :  { %6715 = vmatprep.subr.mxu1 %v9111_v22 }
 0xc07   :  { %6716 = vmatpush3.msra.mxu1 %v9111_v22 }
 0xc08   :  { %6717 = vmatprep.subr.mxu1 %v9118_v23 }
 0xc09   :  { %6718 = vmatpush3.msra.mxu1 %v9118_v23 }
 0xc0a   :  { %6719 = vmatprep.subr.mxu1 %v9125_v2 }
 0xc0b   :  { %6720 = vmatpush3.msra.mxu1 %v9125_v2 }
 0xc0c   :  { %6721 = vmatprep.subr.mxu1 %v9132_v35 }
 0xc0d   :  { %6722 = vmatpush3.msra.mxu1 %v9132_v35 }
 0xc0e   :  { %6723 = vmatprep.subr.mxu1 %v9139_v38 }
 0xc0f   :  { %6724 = vmatpush3.msra.mxu1 %v9139_v38 }
 0xc10   :  { %6725 = vmatprep.subr.mxu1 %v9146_v36 }
 0xc11   :  { %6726 = vmatpush3.msra.mxu1 %v9146_v36 }
 0xc12   :  { %6727 = vmatprep.subr.mxu1 %v9153_v3 }
 0xc13   :  { %6728 = vmatpush3.msra.mxu1 %v9153_v3 }
 0xc14   :  { %6729 = vmatprep.subr.mxu1 %v9160_v37 }
 0xc15   :  { %6730 = vmatpush3.msra.mxu1 %v9160_v37 }
 0xc16   :  { %6731 = vmatprep.subr.mxu1 %v9167_v39 }
 0xc17   :  { %6732 = vmatpush3.msra.mxu1 %v9167_v39 }
 0xc18   :  { %6777 = vmatprep.subr.mxu1 %v9040_v62 }
 0xcb8   :  { %v6659_v46 = vpop.f32.mrf.mxu1 }
 0xcb9   :  { %v9324_v30 = vadd.f32 %v7733_v25, %v6659_v46 }
 0xcba   :  { %v2470_v31 = vpop.f32.mrf.mxu1 }
 0xcbb   :  { %v9326_v49 = vadd.f32 %v7733_v25, %v2470_v31  ;;  %v2575_v16 = vmul.f32 %v9324_v30, %v9324_v30 }
 0xcbc   :  { %v6662_v61 = vpop.f32.mrf.mxu1 }
 0xcbd   :  { %6695 = vmatprep.mubr.f32.mxu0 %v9326_v49  ;;  %v2574_v13 = vmul.f32 %v9326_v49, %v9326_v49  ;;  %v9333_v40 = vadd.f32 %v7733_v25, %v6662_v61 }
 0xcbe   :  { %v2480_v6 = vpop.f32.mrf.mxu1  ;;  %6696 = vmatmul.mubr.f32.vlgmr.msra.gmra.mxu0 %v9324_v30 }
 0xcbf   :  { %v9336_v41 = vadd.f32 %v7733_v25, %v2480_v6  ;;  %6733 = vmatprep.mubr.f32.mxu1 %v2574_v13  ;;  %6740 = vmatpush3.msra.mxu0 %v9276_v33  ;;  %v2577_v44 = vmul.f32 %v9333_v40, %v9333_v40  ;;  %v7735_v33 = vld [vmem:[%s10599_s6 + $0x1e8] sm:$0xff] }
 0xcc0   :  { %6734 = vmatmul.mubr.f32.vlgmr.msra.gmra.mxu1 %v2575_v16  ;;  %6741 = vmatprep.subr.mxu0 %v7734_v8 }
 0xcc1   :  { %6698 = vmatprep.mubr.f32.mxu0 %v9336_v41  ;;  %v2576_v43 = vmul.f32 %v9336_v41, %v9336_v41  ;;  %6742 = vmatpush3.msra.mxu0 %v7734_v8 }
 0xcc2   :  { %6699 = vmatmul.mubr.f32.gmra.mxu0 %v9333_v40  ;;  %6743 = vmatprep.subr.mxu0 %v7735_v33 }
 0xcc3   :  { %6736 = vmatprep.mubr.f32.mxu1 %v2576_v43  ;;  %6744 = vmatpush3.msra.mxu0 %v7735_v33 }
 0xcc4   :  { %6737 = vmatmul.mubr.f32.gmra.mxu1 %v2577_v44  ;;  %6745 = vmatprep.subr.mxu0 %v7736_v12 }
 0xcc5   :  { %6746 = vmatpush3.msra.mxu0 %v7736_v12  ;;  %6778 = vmatpush3.msra.mxu1 %v9040_v62 }
 0xcc6   :  { %6747 = vmatprep.subr.mxu0 %v7737_v1  ;;  %6779 = vmatprep.subr.mxu1 %v9069_v56 }
 0xcc7   :  { %6748 = vmatpush3.msra.mxu0 %v7737_v1  ;;  %6780 = vmatpush3.msra.mxu1 %v9069_v56 }
 0xcc8   :  { %6749 = vmatprep.subr.mxu0 %v7738_v45  ;;  %6781 = vmatprep.subr.mxu1 %v9076_v17 }
 0xcc9   :  { %6750 = vmatpush3.msra.mxu0 %v7738_v45  ;;  %6782 = vmatpush3.msra.mxu1 %v9076_v17 }
 0xcca   :  { %6751 = vmatprep.subr.mxu0 %v7739_v48  ;;  %6783 = vmatprep.subr.mxu1 %v9083_v18 }
 0xccb   :  { %6752 = vmatpush3.msra.mxu0 %v7739_v48  ;;  %6784 = vmatpush3.msra.mxu1 %v9083_v18  ;;  %v7750_v48 = vld [vmem:[%s10603_s8 + $0x2] ss:$0 sm:$0xff] }
 0xccc   :  { %6753 = vmatprep.subr.mxu0 %v7740_v0  ;;  %6785 = vmatprep.subr.mxu1 %v9090_v19 }
 0xccd   :  { %6754 = vmatpush3.msra.mxu0 %v7740_v0  ;;  %6786 = vmatpush3.msra.mxu1 %v9090_v19 }
 0xcce   :  { %6755 = vmatprep.subr.mxu0 %v7741_v24  ;;  %6787 = vmatprep.subr.mxu1 %v9097_v20 }
 0xccf   :  { %6756 = vmatpush3.msra.mxu0 %v7741_v24  ;;  %6788 = vmatpush3.msra.mxu1 %v9097_v20 }
 0xcd0   :  { %6757 = vmatprep.subr.mxu0 %v7742_v14  ;;  %6789 = vmatprep.subr.mxu1 %v9104_v21 }
 0xcd1   :  { %6758 = vmatpush3.msra.mxu0 %v7742_v14  ;;  %6790 = vmatpush3.msra.mxu1 %v9104_v21 }
 0xcd2   :  { %6759 = vmatprep.subr.mxu0 %v7743_v28  ;;  %6791 = vmatprep.subr.mxu1 %v9111_v22 }
 0xcd3   :  { %6760 = vmatpush3.msra.mxu0 %v7743_v28  ;;  %6792 = vmatpush3.msra.mxu1 %v9111_v22 }
 0xcd4   :  { %6761 = vmatprep.subr.mxu0 %v7744_v50  ;;  %6793 = vmatprep.subr.mxu1 %v9118_v23 }
 0xcd5   :  { %6762 = vmatpush3.msra.mxu0 %v7744_v50  ;;  %6794 = vmatpush3.msra.mxu1 %v9118_v23 }
 0xcd6   :  { %6763 = vmatprep.subr.mxu0 %v7745_v51  ;;  %6795 = vmatprep.subr.mxu1 %v9125_v2 }
 0xcd7   :  { %6764 = vmatpush3.msra.mxu0 %v7745_v51  ;;  %6796 = vmatpush3.msra.mxu1 %v9125_v2 }
 0xcd8   :  { %6765 = vmatprep.subr.mxu0 %v7746_v47  ;;  %6797 = vmatprep.subr.mxu1 %v9132_v35 }
 0xcd9   :  { %6766 = vmatpush3.msra.mxu0 %v7746_v47  ;;  %6798 = vmatpush3.msra.mxu1 %v9132_v35 }
 0xcda   :  { %6767 = vmatprep.subr.mxu0 %v7747_v27  ;;  %6799 = vmatprep.subr.mxu1 %v9139_v38 }
 0xcdb   :  { %6768 = vmatpush3.msra.mxu0 %v7747_v27  ;;  %6800 = vmatpush3.msra.mxu1 %v9139_v38 }
 0xcdc   :  { %6769 = vmatprep.subr.mxu0 %v7748_v29  ;;  %6801 = vmatprep.subr.mxu1 %v9146_v36 }
 0xcdd   :  { %6770 = vmatpush3.msra.mxu0 %v7748_v29  ;;  %6802 = vmatpush3.msra.mxu1 %v9146_v36 }
 0xcde   :  { %6815 = vmatprep.subr.mxu0 %v9040_v62  ;;  %6803 = vmatprep.subr.mxu1 %v9153_v3 }
 0xcdf   :  { %6804 = vmatpush3.msra.mxu1 %v9153_v3 }
 0xce0   :  { %6805 = vmatprep.subr.mxu1 %v9160_v37 }
 0xce1   :  { %6806 = vmatpush3.msra.mxu1 %v9160_v37 }
 0xce2   :  { %6807 = vmatprep.subr.mxu1 %v9167_v39 }
 0xce3   :  { %6808 = vmatpush3.msra.mxu1 %v9167_v39 }
 0xce4   :  { %6853 = vmatprep.subr.mxu1 %v9425_v58 }
 0xd7e   :  { %v6697_v53 = vpop.f32.mrf.mxu0 }
 0xd7f   :  { %v2664_v32 = vmul.f32 %v6697_v53, %v6697_v53  ;;  %v2676_v44 = vsub.f32 %v9324_v30, %v6697_v53  ;;  %v7751_v30 = vld [vmem:[%s10604_s9 + $0x2] ss:$0 sm:$0xff] }
 0xd80   :  { %v2555_v59 = vpop.f32.mrf.mxu0  ;;  %v6735_v42 = vpop.f32.mrf.mxu1 }
 0xd81   :  { %v2663_v54 = vmul.f32 %v2555_v59, %v2555_v59  ;;  %v2668_v7 = vsub.f32 %v6735_v42, %v2664_v32  ;;  %v2675_v12 = vsub.f32 %v9326_v49, %v2555_v59 }
 0xd82   :  { %v6700_v57 = vpop.f32.mrf.mxu0  ;;  %v2644_v10 = vpop.f32.mrf.mxu1 }
 0xd83   :  { %v2672_v34 = vmax.f32 %v2668_v7, 0.0  ;;  %v2666_v5 = vmul.f32 %v6700_v57, %v6700_v57  ;;  %v2667_v52 = vsub.f32 %v2644_v10, %v2663_v54  ;;  %v2678_v14 = vsub.f32 %v9333_v40, %v6700_v57 }
 0xd84   :  { %v2565_v26 = vpop.f32.mrf.mxu0  ;;  %v6738_v15 = vpop.f32.mrf.mxu1 }
 0xd85   :  { %v2680_v63 = vadd.f32 1e-05, %v2672_v34  ;;  %v2671_v9 = vmax.f32 %v2667_v52, 0.0  ;;  %v2665_v46 = vmul.f32 %v2565_v26, %v2565_v26  ;;  %v2670_v25 = vsub.f32 %v6738_v15, %v2666_v5  ;;  %v7752_v34 = vld [vmem:[%s10602_s7 + $0x3] ss:$0 sm:$0xff] }
 0xd86   :  { %v2654_v31 = vpop.f32.mrf.mxu1  ;;  %v2677_v51 = vsub.f32 %v9336_v41, %v2565_v26 }
 0xd87   :  { %7550 = vrsqrt.f32 %v2680_v63  ;;  %v2679_v61 = vadd.f32 1e-05, %v2671_v9  ;;  %v2669_v13 = vsub.f32 %v2654_v31, %v2665_v46  ;;  %v2674_v16 = vmax.f32 %v2670_v25, 0.0 }
 0xd89   :  { %7552 = vrsqrt.f32 %v2679_v61  ;;  %v2673_v6 = vmax.f32 %v2669_v13, 0.0  ;;  %v2682_v8 = vadd.f32 1e-05, %v2674_v16  ;;  %v7753_v61 = vld [vmem:[%s10599_s6 + $0x70] sm:$0xff] }
 0xd8b   :  { %v2681_v43 = vadd.f32 1e-05, %v2673_v6  ;;  %7554 = vrsqrt.f32 %v2682_v8  ;;  %v7755_v6 = vld [vmem:[%s10599_s6 + $0x60] sm:$0xff]  ;;  %v7756_v8 = vld [vmem:[%s10599_s6 + $0x58] sm:$0xff] }
 0xd8d   :  { %7556 = vrsqrt.f32 %v2681_v43  ;;  %v7757_v43 = vld [vmem:[%s10599_s6 + $0x50] sm:$0xff] }
 0xd94   :  { %v7551_v33 = vpop.eup %7550 }
 0xd95   :  { %v2688_v1 = vmul.f32 %v7551_v33, %v2676_v44 }
 0xd96   :  { %v7553_v45 = vpop.eup %7552 }
 0xd97   :  { %v2692_v0 = vmul.f32 %v7750_v48, %v2688_v1  ;;  %v2687_v24 = vmul.f32 %v7553_v45, %v2675_v12 }
 0xd98   :  { %v7555_v28 = vpop.eup %7554 }
 0xd99   :  { %v2691_v50 = vmul.f32 %v7750_v48, %v2687_v24  ;;  %v2696_v49 = vadd.f32 %v7751_v30, %v2692_v0  ;;  %v2690_v27 = vmul.f32 %v7555_v28, %v2678_v14 }
 0xd9a   :  { %v7557_v47 = vpop.eup %7556 }
 0xd9b   :  { %v2695_v29 = vadd.f32 %v7751_v30, %v2691_v50  ;;  %v2689_v53 = vmul.f32 %v7557_v47, %v2677_v51  ;;  %v2694_v32 = vmul.f32 %v7750_v48, %v2690_v27 }
 0xd9d   :  { %7558 = vtanh.f32 %v2695_v29  ;;  %v2693_v59 = vmul.f32 %v7750_v48, %v2689_v53  ;;  %v2698_v42 = vadd.f32 %v7751_v30, %v2694_v32 }
 0xd9e   :  { %7560 = vtanh.f32 %v2696_v49 }
 0xd9f   :  { %v2697_v54 = vadd.f32 %v7751_v30, %v2693_v59 }
 0xda1   :  { %7562 = vtanh.f32 %v2697_v54 }
 0xda2   :  { %7564 = vtanh.f32 %v2698_v42 }
 0xdaa   :  { %v7559_v40 = vpop.eup %7558 }
 0xdab   :  { %v7561_v7 = vpop.eup %7560  ;;  %6771 = vmatprep.mubr.f32.mxu0 %v7559_v40 }
 0xdac   :  { %6772 = vmatmul.mubr.f32.vlgmr.msra.gmra.mxu0 %v7561_v7 }
 0xdad   :  { %6816 = vmatpush3.msra.mxu0 %v9040_v62 }
 0xdae   :  { %v7563_v41 = vpop.eup %7562  ;;  %6817 = vmatprep.subr.mxu0 %v9069_v56 }
 0xdaf   :  { %v7565_v57 = vpop.eup %7564  ;;  %6774 = vmatprep.mubr.f32.mxu0 %v7563_v41  ;;  %6818 = vmatpush3.msra.mxu0 %v9069_v56 }
 0xdb0   :  { %6775 = vmatmul.mubr.f32.gmra.mxu0 %v7565_v57  ;;  %6819 = vmatprep.subr.mxu0 %v9076_v17  ;;  %v7770_v57 = vld [vmem:[%s10603_s8 + $0x3] ss:$0 sm:$0xff] }
 0xdb1   :  { %6820 = vmatpush3.msra.mxu0 %v9076_v17 }
 0xdb2   :  { %6821 = vmatprep.subr.mxu0 %v9083_v18 }
 0xdb3   :  { %6822 = vmatpush3.msra.mxu0 %v9083_v18 }
 0xdb4   :  { %6823 = vmatprep.subr.mxu0 %v9090_v19 }
 0xdb5   :  { %6824 = vmatpush3.msra.mxu0 %v9090_v19 }
 0xdb6   :  { %6825 = vmatprep.subr.mxu0 %v9097_v20 }
 0xdb7   :  { %6826 = vmatpush3.msra.mxu0 %v9097_v20 }
 0xdb8   :  { %6827 = vmatprep.subr.mxu0 %v9104_v21 }
 0xdb9   :  { %6828 = vmatpush3.msra.mxu0 %v9104_v21 }
 0xdba   :  { %6829 = vmatprep.subr.mxu0 %v9111_v22 }
 0xdbb   :  { %6830 = vmatpush3.msra.mxu0 %v9111_v22 }
 0xdbc   :  { %6831 = vmatprep.subr.mxu0 %v9118_v23 }
 0xdbd   :  { %6832 = vmatpush3.msra.mxu0 %v9118_v23 }
 0xdbe   :  { %6833 = vmatprep.subr.mxu0 %v9125_v2 }
 0xdbf   :  { %6834 = vmatpush3.msra.mxu0 %v9125_v2 }
 0xdc0   :  { %6835 = vmatprep.subr.mxu0 %v9132_v35 }
 0xdc1   :  { %6836 = vmatpush3.msra.mxu0 %v9132_v35 }
 0xdc2   :  { %6837 = vmatprep.subr.mxu0 %v9139_v38 }
 0xdc3   :  { %6838 = vmatpush3.msra.mxu0 %v9139_v38 }
 0xdc4   :  { %6839 = vmatprep.subr.mxu0 %v9146_v36 }
 0xdc5   :  { %6840 = vmatpush3.msra.mxu0 %v9146_v36 }
 0xdc6   :  { %6841 = vmatprep.subr.mxu0 %v9153_v3 }
 0xdc7   :  { %6842 = vmatpush3.msra.mxu0 %v9153_v3 }
 0xdc8   :  { %6843 = vmatprep.subr.mxu0 %v9160_v37 }
 0xdc9   :  { %6844 = vmatpush3.msra.mxu0 %v9160_v37 }
 0xdca   :  { %6845 = vmatprep.subr.mxu0 %v9167_v39 }
 0xdcb   :  { %6846 = vmatpush3.msra.mxu0 %v9167_v39 }
 0xdcc   :  { %6891 = vmatprep.subr.mxu0 %v9040_v62 }
 0xe6c   :  { %v6773_v10 = vpop.f32.mrf.mxu0 }
 0xe6d   :  { %v9473_v5 = vadd.f32 %v7752_v34, %v6773_v10 }
 0xe6e   :  { %v2769_v52 = vpop.f32.mrf.mxu0 }
 0xe6f   :  { %v9475_v26 = vadd.f32 %v7752_v34, %v2769_v52  ;;  %v2874_v9 = vmul.f32 %v9473_v5, %v9473_v5 }
 0xe70   :  { %v6776_v15 = vpop.f32.mrf.mxu0 }
 0xe71   :  { %6809 = vmatprep.mubr.f32.mxu1 %v9475_v26  ;;  %v2873_v63 = vmul.f32 %v9475_v26, %v9475_v26  ;;  %v9482_v46 = vadd.f32 %v7752_v34, %v6776_v15 }
 0xe72   :  { %v2779_v25 = vpop.f32.mrf.mxu0  ;;  %6810 = vmatmul.mubr.f32.vlgmr.msra.gmra.mxu1 %v9473_v5 }
 0xe73   :  { %v9485_v31 = vadd.f32 %v7752_v34, %v2779_v25  ;;  %6847 = vmatprep.mubr.f32.mxu0 %v2873_v63  ;;  %6854 = vmatpush3.msra.mxu1 %v9425_v58  ;;  %v2876_v16 = vmul.f32 %v9482_v46, %v9482_v46  ;;  %v7754_v58 = vld [vmem:[%s10599_s6 + $0x68] sm:$0xff]  ;;  %v7771_v63 = vld [vmem:[%s10604_s9 + $0x3] ss:$0 sm:$0xff] }
 0xe74   :  { %6848 = vmatmul.mubr.f32.vlgmr.msra.gmra.mxu0 %v2874_v9  ;;  %6855 = vmatprep.subr.mxu1 %v7753_v61 }
 0xe75   :  { %6812 = vmatprep.mubr.f32.mxu1 %v9485_v31  ;;  %v2875_v13 = vmul.f32 %v9485_v31, %v9485_v31  ;;  %6856 = vmatpush3.msra.mxu1 %v7753_v61 }
 0xe76   :  { %6813 = vmatmul.mubr.f32.gmra.mxu1 %v9482_v46  ;;  %6857 = vmatprep.subr.mxu1 %v7754_v58 }
 0xe77   :  { %6850 = vmatprep.mubr.f32.mxu0 %v2875_v13  ;;  %6858 = vmatpush3.msra.mxu1 %v7754_v58 }
 0xe78   :  { %6851 = vmatmul.mubr.f32.gmra.mxu0 %v2876_v16  ;;  %6859 = vmatprep.subr.mxu1 %v7755_v6 }
 0xe79   :  { %6860 = vmatpush3.msra.mxu1 %v7755_v6  ;;  %6892 = vmatpush3.msra.mxu0 %v9040_v62  ;;  %v7758_v62 = vld [vmem:[%s10599_s6 + $0x48] sm:$0xff] }
 0xe7a   :  { %6861 = vmatprep.subr.mxu1 %v7756_v8  ;;  %6893 = vmatprep.subr.mxu0 %v9069_v56 }
 0xe7b   :  { %6862 = vmatpush3.msra.mxu1 %v7756_v8  ;;  %6894 = vmatpush3.msra.mxu0 %v9069_v56  ;;  %v7759_v56 = vld [vmem:[%s10599_s6 + $0x40] sm:$0xff] }
 0xe7c   :  { %6863 = vmatprep.subr.mxu1 %v7757_v43  ;;  %6895 = vmatprep.subr.mxu0 %v9076_v17 }
 0xe7d   :  { %6864 = vmatpush3.msra.mxu1 %v7757_v43  ;;  %6896 = vmatpush3.msra.mxu0 %v9076_v17  ;;  %v7760_v17 = vld [vmem:[%s10599_s6 + $0x38] sm:$0xff] }
 0xe7e   :  { %6865 = vmatprep.subr.mxu1 %v7758_v62  ;;  %6897 = vmatprep.subr.mxu0 %v9083_v18 }
 0xe7f   :  { %6866 = vmatpush3.msra.mxu1 %v7758_v62  ;;  %6898 = vmatpush3.msra.mxu0 %v9083_v18  ;;  %v7761_v18 = vld [vmem:[%s10599_s6 + $0x30] sm:$0xff] }
 0xe80   :  { %6867 = vmatprep.subr.mxu1 %v7759_v56  ;;  %6899 = vmatprep.subr.mxu0 %v9090_v19 }
 0xe81   :  { %6868 = vmatpush3.msra.mxu1 %v7759_v56  ;;  %6900 = vmatpush3.msra.mxu0 %v9090_v19  ;;  %v7762_v19 = vld [vmem:[%s10599_s6 + $0x28] sm:$0xff] }
 0xe82   :  { %6869 = vmatprep.subr.mxu1 %v7760_v17  ;;  %6901 = vmatprep.subr.mxu0 %v9097_v20 }
 0xe83   :  { %6870 = vmatpush3.msra.mxu1 %v7760_v17  ;;  %6902 = vmatpush3.msra.mxu0 %v9097_v20  ;;  %v7763_v20 = vld [vmem:[%s10599_s6 + $0x20] sm:$0xff] }
 0xe84   :  { %6871 = vmatprep.subr.mxu1 %v7761_v18  ;;  %6903 = vmatprep.subr.mxu0 %v9104_v21 }
 0xe85   :  { %6872 = vmatpush3.msra.mxu1 %v7761_v18  ;;  %6904 = vmatpush3.msra.mxu0 %v9104_v21  ;;  %v7764_v21 = vld [vmem:[%s10599_s6 + $0x18] sm:$0xff] }
 0xe86   :  { %6873 = vmatprep.subr.mxu1 %v7762_v19  ;;  %6905 = vmatprep.subr.mxu0 %v9111_v22 }
 0xe87   :  { %6874 = vmatpush3.msra.mxu1 %v7762_v19  ;;  %6906 = vmatpush3.msra.mxu0 %v9111_v22  ;;  %v7765_v22 = vld [vmem:[%s10599_s6 + $0x10] sm:$0xff] }
 0xe88   :  { %6875 = vmatprep.subr.mxu1 %v7763_v20  ;;  %6907 = vmatprep.subr.mxu0 %v9118_v23 }
 0xe89   :  { %6876 = vmatpush3.msra.mxu1 %v7763_v20  ;;  %6908 = vmatpush3.msra.mxu0 %v9118_v23  ;;  %v7766_v23 = vld [vmem:[%s10599_s6 + $0x8] sm:$0xff] }
 0xe8a   :  { %6877 = vmatprep.subr.mxu1 %v7764_v21  ;;  %6909 = vmatprep.subr.mxu0 %v9125_v2 }
 0xe8b   :  { %6878 = vmatpush3.msra.mxu1 %v7764_v21  ;;  %6910 = vmatpush3.msra.mxu0 %v9125_v2  ;;  %v7767_v2 = vld [vmem:[%s10599_s6] sm:$0xff]  ;;  %v9640_v21 = vld [vmem:[%s10597_s10 + $0x50] sm:$0xff] }
 0xe8c   :  { %6879 = vmatprep.subr.mxu1 %v7765_v22  ;;  %6911 = vmatprep.subr.mxu0 %v9132_v35 }
 0xe8d   :  { %6880 = vmatpush3.msra.mxu1 %v7765_v22  ;;  %6912 = vmatpush3.msra.mxu0 %v9132_v35  ;;  %v9567_v35 = vld [vmem:[%s10597_s10 + $0x78] sm:$0xff]  ;;  %v9647_v22 = vld [vmem:[%s10597_s10 + $0x48] sm:$0xff] }
 0xe8e   :  { %6881 = vmatprep.subr.mxu1 %v7766_v23  ;;  %6913 = vmatprep.subr.mxu0 %v9139_v38 }
 0xe8f   :  { %6882 = vmatpush3.msra.mxu1 %v7766_v23  ;;  %6914 = vmatpush3.msra.mxu0 %v9139_v38  ;;  %v9579_v38 = vld [vmem:[%s10599_s6 + $0xf8] sm:$0xff]  ;;  %v9654_v23 = vld [vmem:[%s10597_s10 + $0x40] sm:$0xff] }
 0xe90   :  { %6883 = vmatprep.subr.mxu1 %v7767_v2  ;;  %6915 = vmatprep.subr.mxu0 %v9146_v36 }
 0xe91   :  { %6884 = vmatpush3.msra.mxu1 %v7767_v2  ;;  %6916 = vmatpush3.msra.mxu0 %v9146_v36  ;;  %v9661_v2 = vld [vmem:[%s10597_s10 + $0x38] sm:$0xff] }
 0xe92   :  { %6929 = vmatprep.subr.mxu1 %v9567_v35  ;;  %6917 = vmatprep.subr.mxu0 %v9153_v3 }
 0xe93   :  { %6918 = vmatpush3.msra.mxu0 %v9153_v3 }
 0xe94   :  { %6919 = vmatprep.subr.mxu0 %v9160_v37 }
 0xe95   :  { %6920 = vmatpush3.msra.mxu0 %v9160_v37 }
 0xe96   :  { %6921 = vmatprep.subr.mxu0 %v9167_v39 }
 0xe97   :  { %6922 = vmatpush3.msra.mxu0 %v9167_v39 }
 0xe98   :  { %6967 = vmatprep.subr.mxu0 %v9579_v38 }
 0xf32   :  { %v6811_v36 = vpop.f32.mrf.mxu1 }
 0xf33   :  { %v2963_v44 = vmul.f32 %v6811_v36, %v6811_v36  ;;  %v2975_v42 = vsub.f32 %v9473_v5, %v6811_v36  ;;  %v9668_v36 = vld [vmem:[%s10597_s10 + $0x30] sm:$0xff] }
 0xf34   :  { %v2854_v33 = vpop.f32.mrf.mxu1  ;;  %v6849_v12 = vpop.f32.mrf.mxu0 }
 0xf35   :  { %v2962_v3 = vmul.f32 %v2854_v33, %v2854_v33  ;;  %v2967_v1 = vsub.f32 %v6849_v12, %v2963_v44  ;;  %v2974_v40 = vsub.f32 %v9475_v26, %v2854_v33  ;;  %v9675_v44 = vld [vmem:[%s10597_s10 + $0x28] sm:$0xff]  ;;  %v9682_v33 = vld [vmem:[%s10597_s10 + $0x20] sm:$0xff]  ;;  %v9689_v12 = vld [vmem:[%s10597_s10 + $0x18] sm:$0xff] }
 0xf36   :  { %v6814_v45 = vpop.f32.mrf.mxu1  ;;  %v2943_v48 = vpop.f32.mrf.mxu0 }
 0xf37   :  { %v2971_v37 = vmax.f32 %v2967_v1, 0.0  ;;  %v2965_v0 = vmul.f32 %v6814_v45, %v6814_v45  ;;  %v2966_v24 = vsub.f32 %v2943_v48, %v2962_v3  ;;  %v2977_v52 = vsub.f32 %v9482_v46, %v6814_v45  ;;  %v9696_v3 = vld [vmem:[%s10597_s10 + $0x10] sm:$0xff]  ;;  %v9703_v1 = vld [vmem:[%s10597_s10 + $0x8] sm:$0xff]  ;;  %v9710_v45 = vld [vmem:[%s10597_s10] sm:$0xff] }
 0xf38   :  { %v2864_v14 = vpop.f32.mrf.mxu1  ;;  %v6852_v39 = vpop.f32.mrf.mxu0 }
 0xf39   :  { %v2979_v28 = vadd.f32 1e-05, %v2971_v37  ;;  %v2970_v50 = vmax.f32 %v2966_v24, 0.0  ;;  %v2964_v51 = vmul.f32 %v2864_v14, %v2864_v14  ;;  %v2969_v47 = vsub.f32 %v6852_v39, %v2965_v0  ;;  %v7787_v37 = vld [vmem:[%s10602_s7] ss:$0 sm:$0xff] }
 0xf3a   :  { %v2953_v30 = vpop.f32.mrf.mxu0  ;;  %v2976_v25 = vsub.f32 %v9485_v31, %v2864_v14 }
 0xf3b   :  { %7566 = vrsqrt.f32 %v2979_v28  ;;  %v2978_v49 = vadd.f32 1e-05, %v2970_v50  ;;  %v2968_v27 = vsub.f32 %v2953_v30, %v2964_v51  ;;  %v2973_v29 = vmax.f32 %v2969_v47, 0.0 }
 0xf3d   :  { %7568 = vrsqrt.f32 %v2978_v49  ;;  %v2972_v53 = vmax.f32 %v2968_v27, 0.0  ;;  %v2981_v32 = vadd.f32 1e-05, %v2973_v29  ;;  %v7788_v49 = vld [vmem:[%s10599_s6 + $0xf0] sm:$0xff] }
 0xf3f   :  { %v2980_v59 = vadd.f32 1e-05, %v2972_v53  ;;  %7570 = vrsqrt.f32 %v2981_v32  ;;  %v7790_v53 = vld [vmem:[%s10599_s6 + $0xe0] sm:$0xff]  ;;  %v7791_v32 = vld [vmem:[%s10599_s6 + $0xd8] sm:$0xff] }
 0xf41   :  { %7572 = vrsqrt.f32 %v2980_v59  ;;  %v7792_v59 = vld [vmem:[%s10599_s6 + $0xd0] sm:$0xff] }
 0xf48   :  { %v7567_v54 = vpop.eup %7566 }
 0xf49   :  { %v2987_v7 = vmul.f32 %v7567_v54, %v2975_v42  ;;  %v7793_v42 = vld [vmem:[%s10599_s6 + $0xc8] sm:$0xff]  ;;  %v7794_v54 = vld [vmem:[%s10599_s6 + $0xc0] sm:$0xff] }
 0xf4a   :  { %v7569_v41 = vpop.eup %7568 }
 0xf4b   :  { %v2991_v10 = vmul.f32 %v7770_v57, %v2987_v7  ;;  %v2986_v34 = vmul.f32 %v7569_v41, %v2974_v40  ;;  %v7795_v40 = vld [vmem:[%s10599_s6 + $0xb8] sm:$0xff]  ;;  %v7796_v7 = vld [vmem:[%s10599_s6 + $0xb0] sm:$0xff]  ;;  %v7797_v41 = vld [vmem:[%s10599_s6 + $0xa8] sm:$0xff] }
 0xf4c   :  { %v7571_v15 = vpop.eup %7570 }
 0xf4d   :  { %v2995_v9 = vadd.f32 %v7771_v63, %v2991_v10  ;;  %v2990_v5 = vmul.f32 %v7770_v57, %v2986_v34  ;;  %v2989_v61 = vmul.f32 %v7571_v15, %v2977_v52  ;;  %v7799_v10 = vld [vmem:[%s10599_s6 + $0x98] sm:$0xff]  ;;  %v7800_v34 = vld [vmem:[%s10599_s6 + $0x90] sm:$0xff]  ;;  %v7801_v52 = vld [vmem:[%s10599_s6 + $0x88] sm:$0xff] }
 0xf4e   :  { %v7573_v26 = vpop.eup %7572  ;;  %v7802_v15 = vld [vmem:[%s10599_s6 + $0x80] sm:$0xff] }
 0xf4f   :  { %v2988_v13 = vmul.f32 %v7573_v26, %v2976_v25  ;;  %v2994_v16 = vadd.f32 %v7771_v63, %v2990_v5  ;;  %7574 = vtanh.f32 %v2995_v9  ;;  %v2993_v58 = vmul.f32 %v7770_v57, %v2989_v61 }
 0xf51   :  { %v2992_v6 = vmul.f32 %v7770_v57, %v2988_v13  ;;  %7576 = vtanh.f32 %v2994_v16  ;;  %v2997_v8 = vadd.f32 %v7771_v63, %v2993_v58  ;;  %v7798_v57 = vld [vmem:[%s10599_s6 + $0xa0] sm:$0xff] }
 0xf53   :  { %v2996_v43 = vadd.f32 %v7771_v63, %v2992_v6  ;;  %7578 = vtanh.f32 %v2997_v8  ;;  %v9819_v63 = vld [vmem:[%s10599_s6 + $0x178] sm:$0xff] }
 0xf55   :  { %7580 = vtanh.f32 %v2996_v43 }
 0xf5c   :  { %v7575_v46 = vpop.eup %7574 }
 0xf5d   :  { %v9596_v17 = vadd.f32 %v7575_v46, %v8899_v55  ;;  %v9619_v55 = vld [vmem:[%s10597_s10 + $0x68] sm:$0xff] }
 0xf5e   :  { %v7577_v62 = vpop.eup %7576 }
 0xf5f   :  { %v9593_v56 = vadd.f32 %v7577_v62, %v8896_v11  ;;  %v9610_v11 = vld [vmem:[%s10597_s10 + $0x70] sm:$0xff] }
 0xf60   :  { %v7579_v31 = vpop.eup %7578 }
 0xf61   :  { %6885 = vmatprep.mubr.f32.mxu1 %v9593_v56  ;;  %v9605_v20 = vadd.f32 %v7579_v31, %v8908_v4  ;;  %v9633_v4 = vld [vmem:[%s10597_s10 + $0x58] sm:$0xff] }
 0xf62   :  { %v7581_v18 = vpop.eup %7580  ;;  %6886 = vmatmul.mubr.f32.vlgmr.msra.gmra.mxu1 %v9596_v17 }
 0xf63   :  { %v9601_v19 = vadd.f32 %v7581_v18, %v8904_v60  ;;  %6930 = vmatpush3.msra.mxu1 %v9567_v35  ;;  %v9626_v60 = vld [vmem:[%s10597_s10 + $0x60] sm:$0xff] }
 0xf64   :  { %6931 = vmatprep.subr.mxu1 %v9610_v11 }
 0xf65   :  { %6888 = vmatprep.mubr.f32.mxu1 %v9601_v19  ;;  %6932 = vmatpush3.msra.mxu1 %v9610_v11 }
 0xf66   :  { %6889 = vmatmul.mubr.f32.gmra.mxu1 %v9605_v20  ;;  %6933 = vmatprep.subr.mxu1 %v9619_v55 }
 0xf67   :  { %6934 = vmatpush3.msra.mxu1 %v9619_v55 }
 0xf68   :  { %6935 = vmatprep.subr.mxu1 %v9626_v60 }
 0xf69   :  { %6936 = vmatpush3.msra.mxu1 %v9626_v60 }
 0xf6a   :  { %6937 = vmatprep.subr.mxu1 %v9633_v4 }
 0xf6b   :  { %6938 = vmatpush3.msra.mxu1 %v9633_v4 }
 0xf6c   :  { %6939 = vmatprep.subr.mxu1 %v9640_v21 }
 0xf6d   :  { %6940 = vmatpush3.msra.mxu1 %v9640_v21 }
 0xf6e   :  { %6941 = vmatprep.subr.mxu1 %v9647_v22 }
 0xf6f   :  { %6942 = vmatpush3.msra.mxu1 %v9647_v22 }
 0xf70   :  { %6943 = vmatprep.subr.mxu1 %v9654_v23 }
 0xf71   :  { %6944 = vmatpush3.msra.mxu1 %v9654_v23 }
 0xf72   :  { %6945 = vmatprep.subr.mxu1 %v9661_v2 }
 0xf73   :  { %6946 = vmatpush3.msra.mxu1 %v9661_v2 }
 0xf74   :  { %6947 = vmatprep.subr.mxu1 %v9668_v36 }
 0xf75   :  { %6948 = vmatpush3.msra.mxu1 %v9668_v36 }
 0xf76   :  { %6949 = vmatprep.subr.mxu1 %v9675_v44 }
 0xf77   :  { %6950 = vmatpush3.msra.mxu1 %v9675_v44 }
 0xf78   :  { %6951 = vmatprep.subr.mxu1 %v9682_v33 }
 0xf79   :  { %6952 = vmatpush3.msra.mxu1 %v9682_v33 }
 0xf7a   :  { %6953 = vmatprep.subr.mxu1 %v9689_v12 }
 0xf7b   :  { %6954 = vmatpush3.msra.mxu1 %v9689_v12 }
 0xf7c   :  { %6955 = vmatprep.subr.mxu1 %v9696_v3 }
 0xf7d   :  { %6956 = vmatpush3.msra.mxu1 %v9696_v3 }
 0xf7e   :  { %6957 = vmatprep.subr.mxu1 %v9703_v1 }
 0xf7f   :  { %6958 = vmatpush3.msra.mxu1 %v9703_v1 }
 0xf80   :  { %6959 = vmatprep.subr.mxu1 %v9710_v45 }
 0xf81   :  { %6960 = vmatpush3.msra.mxu1 %v9710_v45 }
 0xf82   :  { %7005 = vmatprep.subr.mxu1 %v9567_v35 }
0x1022   :  { %v6887_v48 = vpop.f32.mrf.mxu1 }
0x1023   :  { %v9718_v0 = vadd.f32 %v7787_v37, %v6887_v48 }
0x1024   :  { %v3072_v24 = vpop.f32.mrf.mxu1 }
0x1025   :  { %v9720_v14 = vadd.f32 %v7787_v37, %v3072_v24  ;;  %v3177_v50 = vmul.f32 %v9718_v0, %v9718_v0 }
0x1026   :  { %v6890_v39 = vpop.f32.mrf.mxu1 }
0x1027   :  { %6923 = vmatprep.mubr.f32.mxu0 %v9720_v14  ;;  %v3176_v28 = vmul.f32 %v9720_v14, %v9720_v14  ;;  %v9727_v51 = vadd.f32 %v7787_v37, %v6890_v39 }
0x1028   :  { %v3082_v47 = vpop.f32.mrf.mxu1  ;;  %6924 = vmatmul.mubr.f32.vlgmr.msra.gmra.mxu0 %v9718_v0 }
0x1029   :  { %v9730_v30 = vadd.f32 %v7787_v37, %v3082_v47  ;;  %6961 = vmatprep.mubr.f32.mxu1 %v3176_v28  ;;  %6968 = vmatpush3.msra.mxu0 %v9579_v38  ;;  %v3179_v29 = vmul.f32 %v9727_v51, %v9727_v51  ;;  %v7789_v38 = vld [vmem:[%s10599_s6 + $0xe8] sm:$0xff] }
0x102a   :  { %6962 = vmatmul.mubr.f32.vlgmr.msra.gmra.mxu1 %v3177_v50  ;;  %6969 = vmatprep.subr.mxu0 %v7788_v49 }
0x102b   :  { %6926 = vmatprep.mubr.f32.mxu0 %v9730_v30  ;;  %v3178_v27 = vmul.f32 %v9730_v30, %v9730_v30  ;;  %6970 = vmatpush3.msra.mxu0 %v7788_v49 }
0x102c   :  { %6927 = vmatmul.mubr.f32.gmra.mxu0 %v9727_v51  ;;  %6971 = vmatprep.subr.mxu0 %v7789_v38 }
0x102d   :  { %6964 = vmatprep.mubr.f32.mxu1 %v3178_v27  ;;  %6972 = vmatpush3.msra.mxu0 %v7789_v38 }
0x102e   :  { %6965 = vmatmul.mubr.f32.gmra.mxu1 %v3179_v29  ;;  %6973 = vmatprep.subr.mxu0 %v7790_v53 }
0x102f   :  { %6974 = vmatpush3.msra.mxu0 %v7790_v53  ;;  %7006 = vmatpush3.msra.mxu1 %v9567_v35 }
0x1030   :  { %6975 = vmatprep.subr.mxu0 %v7791_v32  ;;  %7007 = vmatprep.subr.mxu1 %v9610_v11 }
0x1031   :  { %6976 = vmatpush3.msra.mxu0 %v7791_v32  ;;  %7008 = vmatpush3.msra.mxu1 %v9610_v11 }
0x1032   :  { %6977 = vmatprep.subr.mxu0 %v7792_v59  ;;  %7009 = vmatprep.subr.mxu1 %v9619_v55 }
0x1033   :  { %6978 = vmatpush3.msra.mxu0 %v7792_v59  ;;  %7010 = vmatpush3.msra.mxu1 %v9619_v55 }
0x1034   :  { %6979 = vmatprep.subr.mxu0 %v7793_v42  ;;  %7011 = vmatprep.subr.mxu1 %v9626_v60 }
0x1035   :  { %6980 = vmatpush3.msra.mxu0 %v7793_v42  ;;  %7012 = vmatpush3.msra.mxu1 %v9626_v60  ;;  %v7804_v42 = vld [vmem:[%s10603_s8] ss:$0 sm:$0xff] }
0x1036   :  { %6981 = vmatprep.subr.mxu0 %v7794_v54  ;;  %7013 = vmatprep.subr.mxu1 %v9633_v4 }
0x1037   :  { %6982 = vmatpush3.msra.mxu0 %v7794_v54  ;;  %7014 = vmatpush3.msra.mxu1 %v9633_v4 }
0x1038   :  { %6983 = vmatprep.subr.mxu0 %v7795_v40  ;;  %7015 = vmatprep.subr.mxu1 %v9640_v21 }
0x1039   :  { %6984 = vmatpush3.msra.mxu0 %v7795_v40  ;;  %7016 = vmatpush3.msra.mxu1 %v9640_v21 }
0x103a   :  { %6985 = vmatprep.subr.mxu0 %v7796_v7  ;;  %7017 = vmatprep.subr.mxu1 %v9647_v22 }
0x103b   :  { %6986 = vmatpush3.msra.mxu0 %v7796_v7  ;;  %7018 = vmatpush3.msra.mxu1 %v9647_v22 }
0x103c   :  { %6987 = vmatprep.subr.mxu0 %v7797_v41  ;;  %7019 = vmatprep.subr.mxu1 %v9654_v23 }
0x103d   :  { %6988 = vmatpush3.msra.mxu0 %v7797_v41  ;;  %7020 = vmatpush3.msra.mxu1 %v9654_v23 }
0x103e   :  { %6989 = vmatprep.subr.mxu0 %v7798_v57  ;;  %7021 = vmatprep.subr.mxu1 %v9661_v2 }
0x103f   :  { %6990 = vmatpush3.msra.mxu0 %v7798_v57  ;;  %7022 = vmatpush3.msra.mxu1 %v9661_v2 }
0x1040   :  { %6991 = vmatprep.subr.mxu0 %v7799_v10  ;;  %7023 = vmatprep.subr.mxu1 %v9668_v36 }
0x1041   :  { %6992 = vmatpush3.msra.mxu0 %v7799_v10  ;;  %7024 = vmatpush3.msra.mxu1 %v9668_v36 }
0x1042   :  { %6993 = vmatprep.subr.mxu0 %v7800_v34  ;;  %7025 = vmatprep.subr.mxu1 %v9675_v44 }
0x1043   :  { %6994 = vmatpush3.msra.mxu0 %v7800_v34  ;;  %7026 = vmatpush3.msra.mxu1 %v9675_v44 }
0x1044   :  { %6995 = vmatprep.subr.mxu0 %v7801_v52  ;;  %7027 = vmatprep.subr.mxu1 %v9682_v33 }
0x1045   :  { %6996 = vmatpush3.msra.mxu0 %v7801_v52  ;;  %7028 = vmatpush3.msra.mxu1 %v9682_v33 }
0x1046   :  { %6997 = vmatprep.subr.mxu0 %v7802_v15  ;;  %7029 = vmatprep.subr.mxu1 %v9689_v12 }
0x1047   :  { %6998 = vmatpush3.msra.mxu0 %v7802_v15  ;;  %7030 = vmatpush3.msra.mxu1 %v9689_v12 }
0x1048   :  { %7043 = vmatprep.subr.mxu0 %v9567_v35  ;;  %7031 = vmatprep.subr.mxu1 %v9696_v3 }
0x1049   :  { %7032 = vmatpush3.msra.mxu1 %v9696_v3 }
0x104a   :  { %7033 = vmatprep.subr.mxu1 %v9703_v1 }
0x104b   :  { %7034 = vmatpush3.msra.mxu1 %v9703_v1 }
0x104c   :  { %7035 = vmatprep.subr.mxu1 %v9710_v45 }
0x104d   :  { %7036 = vmatpush3.msra.mxu1 %v9710_v45 }
0x104e   :  { %7081 = vmatprep.subr.mxu1 %v9819_v63 }
0x10e8   :  { %v6925_v9 = vpop.f32.mrf.mxu0 }
0x10e9   :  { %v3266_v5 = vmul.f32 %v6925_v9, %v6925_v9  ;;  %v3278_v29 = vsub.f32 %v9718_v0, %v6925_v9  ;;  %v7805_v0 = vld [vmem:[%s10604_s9] ss:$0 sm:$0xff] }
0x10ea   :  { %v3157_v25 = vpop.f32.mrf.mxu0  ;;  %v6963_v26 = vpop.f32.mrf.mxu1 }
0x10eb   :  { %v3265_v61 = vmul.f32 %v3157_v25, %v3157_v25  ;;  %v3270_v13 = vsub.f32 %v6963_v26, %v3266_v5  ;;  %v3277_v53 = vsub.f32 %v9720_v14, %v3157_v25 }
0x10ec   :  { %v6928_v16 = vpop.f32.mrf.mxu0  ;;  %v3246_v58 = vpop.f32.mrf.mxu1 }
0x10ed   :  { %v3274_v6 = vmax.f32 %v3270_v13, 0.0  ;;  %v3268_v8 = vmul.f32 %v6928_v16, %v6928_v16  ;;  %v3269_v43 = vsub.f32 %v3246_v58, %v3265_v61  ;;  %v3280_v7 = vsub.f32 %v9727_v51, %v6928_v16 }
0x10ee   :  { %v3167_v46 = vpop.f32.mrf.mxu0  ;;  %v6966_v62 = vpop.f32.mrf.mxu1 }
0x10ef   :  { %v3282_v31 = vadd.f32 1e-05, %v3274_v6  ;;  %v3273_v18 = vmax.f32 %v3269_v43, 0.0  ;;  %v3267_v48 = vmul.f32 %v3167_v46, %v3167_v46  ;;  %v3272_v37 = vsub.f32 %v6966_v62, %v3268_v8  ;;  %v7806_v6 = vld [vmem:[%s10602_s7 + $0x1] ss:$0 sm:$0xff] }
0x10f0   :  { %v3256_v24 = vpop.f32.mrf.mxu1  ;;  %v3279_v10 = vsub.f32 %v9730_v30, %v3167_v46 }
0x10f1   :  { %7582 = vrsqrt.f32 %v3282_v31  ;;  %v3281_v39 = vadd.f32 1e-05, %v3273_v18  ;;  %v3271_v28 = vsub.f32 %v3256_v24, %v3267_v48  ;;  %v3276_v50 = vmax.f32 %v3272_v37, 0.0 }
0x10f3   :  { %7584 = vrsqrt.f32 %v3281_v39  ;;  %v3275_v47 = vmax.f32 %v3271_v28, 0.0  ;;  %v3284_v49 = vadd.f32 1e-05, %v3276_v50  ;;  %v7807_v39 = vld [vmem:[%s10599_s6 + $0x170] sm:$0xff] }
0x10f5   :  { %v3283_v27 = vadd.f32 1e-05, %v3275_v47  ;;  %7586 = vrsqrt.f32 %v3284_v49  ;;  %v7809_v47 = vld [vmem:[%s10599_s6 + $0x160] sm:$0xff]  ;;  %v7810_v49 = vld [vmem:[%s10599_s6 + $0x158] sm:$0xff] }
0x10f7   :  { %7588 = vrsqrt.f32 %v3283_v27  ;;  %v7811_v27 = vld [vmem:[%s10599_s6 + $0x150] sm:$0xff] }
0x10fe   :  { %v7583_v38 = vpop.eup %7582 }
0x10ff   :  { %v3290_v32 = vmul.f32 %v7583_v38, %v3278_v29  ;;  %v7812_v29 = vld [vmem:[%s10599_s6 + $0x148] sm:$0xff]  ;;  %v7813_v38 = vld [vmem:[%s10599_s6 + $0x140] sm:$0xff] }
0x1100   :  { %v7585_v59 = vpop.eup %7584 }
0x1101   :  { %v3294_v54 = vmul.f32 %v7804_v42, %v3290_v32  ;;  %v3289_v40 = vmul.f32 %v7585_v59, %v3277_v53  ;;  %v7814_v53 = vld [vmem:[%s10599_s6 + $0x138] sm:$0xff]  ;;  %v7815_v32 = vld [vmem:[%s10599_s6 + $0x130] sm:$0xff]  ;;  %v7816_v59 = vld [vmem:[%s10599_s6 + $0x128] sm:$0xff] }
0x1102   :  { %v7587_v41 = vpop.eup %7586 }
0x1103   :  { %v3293_v57 = vmul.f32 %v7804_v42, %v3289_v40  ;;  %v3298_v14 = vadd.f32 %v7805_v0, %v3294_v54  ;;  %v3292_v52 = vmul.f32 %v7587_v41, %v3280_v7  ;;  %v7818_v54 = vld [vmem:[%s10599_s6 + $0x118] sm:$0xff]  ;;  %v7819_v40 = vld [vmem:[%s10599_s6 + $0x110] sm:$0xff]  ;;  %v7820_v7 = vld [vmem:[%s10599_s6 + $0x108] sm:$0xff] }
0x1104   :  { %v7589_v34 = vpop.eup %7588  ;;  %v7821_v41 = vld [vmem:[%s10599_s6 + $0x100] sm:$0xff] }
0x1105   :  { %v3297_v15 = vadd.f32 %v7805_v0, %v3293_v57  ;;  %v3291_v9 = vmul.f32 %v7589_v34, %v3279_v10  ;;  %v3296_v5 = vmul.f32 %v7804_v42, %v3292_v52  ;;  %v9968_v57 = vld [vmem:[%s10599_s6 + $0x1f8] sm:$0xff] }
0x1107   :  { %7590 = vtanh.f32 %v3297_v15  ;;  %v3295_v25 = vmul.f32 %v7804_v42, %v3291_v9  ;;  %v3300_v26 = vadd.f32 %v7805_v0, %v3296_v5  ;;  %v7817_v42 = vld [vmem:[%s10599_s6 + $0x120] sm:$0xff] }
0x1108   :  { %7592 = vtanh.f32 %v3298_v14 }
0x1109   :  { %v3299_v61 = vadd.f32 %v7805_v0, %v3295_v25 }
0x110b   :  { %7594 = vtanh.f32 %v3299_v61 }
0x110c   :  { %7596 = vtanh.f32 %v3300_v26 }
0x1114   :  { %v7591_v51 = vpop.eup %7590 }
0x1115   :  { %v7593_v13 = vpop.eup %7592  ;;  %6999 = vmatprep.mubr.f32.mxu0 %v7591_v51 }
0x1116   :  { %7000 = vmatmul.mubr.f32.vlgmr.msra.gmra.mxu0 %v7593_v13 }
0x1117   :  { %7044 = vmatpush3.msra.mxu0 %v9567_v35 }
0x1118   :  { %v7595_v30 = vpop.eup %7594  ;;  %7045 = vmatprep.subr.mxu0 %v9610_v11 }
0x1119   :  { %v7597_v16 = vpop.eup %7596  ;;  %7002 = vmatprep.mubr.f32.mxu0 %v7595_v30  ;;  %7046 = vmatpush3.msra.mxu0 %v9610_v11 }
0x111a   :  { %7003 = vmatmul.mubr.f32.gmra.mxu0 %v7597_v16  ;;  %7047 = vmatprep.subr.mxu0 %v9619_v55 }
0x111b   :  { %7048 = vmatpush3.msra.mxu0 %v9619_v55 }
0x111c   :  { %7049 = vmatprep.subr.mxu0 %v9626_v60 }
0x111d   :  { %7050 = vmatpush3.msra.mxu0 %v9626_v60 }
0x111e   :  { %7051 = vmatprep.subr.mxu0 %v9633_v4 }
0x111f   :  { %7052 = vmatpush3.msra.mxu0 %v9633_v4 }
0x1120   :  { %7053 = vmatprep.subr.mxu0 %v9640_v21 }
0x1121   :  { %7054 = vmatpush3.msra.mxu0 %v9640_v21 }
0x1122   :  { %7055 = vmatprep.subr.mxu0 %v9647_v22 }
0x1123   :  { %7056 = vmatpush3.msra.mxu0 %v9647_v22 }
0x1124   :  { %7057 = vmatprep.subr.mxu0 %v9654_v23 }
0x1125   :  { %7058 = vmatpush3.msra.mxu0 %v9654_v23 }
0x1126   :  { %7059 = vmatprep.subr.mxu0 %v9661_v2 }
0x1127   :  { %7060 = vmatpush3.msra.mxu0 %v9661_v2 }
0x1128   :  { %7061 = vmatprep.subr.mxu0 %v9668_v36 }
0x1129   :  { %7062 = vmatpush3.msra.mxu0 %v9668_v36 }
0x112a   :  { %7063 = vmatprep.subr.mxu0 %v9675_v44 }
0x112b   :  { %7064 = vmatpush3.msra.mxu0 %v9675_v44 }
0x112c   :  { %7065 = vmatprep.subr.mxu0 %v9682_v33 }
0x112d   :  { %7066 = vmatpush3.msra.mxu0 %v9682_v33 }
0x112e   :  { %7067 = vmatprep.subr.mxu0 %v9689_v12 }
0x112f   :  { %7068 = vmatpush3.msra.mxu0 %v9689_v12 }
0x1130   :  { %7069 = vmatprep.subr.mxu0 %v9696_v3 }
0x1131   :  { %7070 = vmatpush3.msra.mxu0 %v9696_v3 }
0x1132   :  { %7071 = vmatprep.subr.mxu0 %v9703_v1 }
0x1133   :  { %7072 = vmatpush3.msra.mxu0 %v9703_v1 }
0x1134   :  { %7073 = vmatprep.subr.mxu0 %v9710_v45 }
0x1135   :  { %7074 = vmatpush3.msra.mxu0 %v9710_v45 }
0x1136   :  { %7119 = vmatprep.subr.mxu0 %v9567_v35 }
0x11d6   :  { %v7001_v58 = vpop.f32.mrf.mxu0 }
0x11d7   :  { %v9867_v8 = vadd.f32 %v7806_v6, %v7001_v58 }
0x11d8   :  { %v3371_v43 = vpop.f32.mrf.mxu0 }
0x11d9   :  { %v9869_v46 = vadd.f32 %v7806_v6, %v3371_v43  ;;  %v3476_v18 = vmul.f32 %v9867_v8, %v9867_v8 }
0x11da   :  { %v7004_v62 = vpop.f32.mrf.mxu0 }
0x11db   :  { %7037 = vmatprep.mubr.f32.mxu1 %v9869_v46  ;;  %v3475_v31 = vmul.f32 %v9869_v46, %v9869_v46  ;;  %v9876_v48 = vadd.f32 %v7806_v6, %v7004_v62 }
0x11dc   :  { %v3381_v37 = vpop.f32.mrf.mxu0  ;;  %7038 = vmatmul.mubr.f32.vlgmr.msra.gmra.mxu1 %v9867_v8 }
0x11dd   :  { %v9879_v24 = vadd.f32 %v7806_v6, %v3381_v37  ;;  %7075 = vmatprep.mubr.f32.mxu0 %v3475_v31  ;;  %7082 = vmatpush3.msra.mxu1 %v9819_v63  ;;  %v3478_v50 = vmul.f32 %v9876_v48, %v9876_v48  ;;  %v7808_v63 = vld [vmem:[%s10599_s6 + $0x168] sm:$0xff] }
0x11de   :  { %7076 = vmatmul.mubr.f32.vlgmr.msra.gmra.mxu0 %v3476_v18  ;;  %7083 = vmatprep.subr.mxu1 %v7807_v39 }
0x11df   :  { %7040 = vmatprep.mubr.f32.mxu1 %v9879_v24  ;;  %v3477_v28 = vmul.f32 %v9879_v24, %v9879_v24  ;;  %7084 = vmatpush3.msra.mxu1 %v7807_v39 }
0x11e0   :  { %7041 = vmatmul.mubr.f32.gmra.mxu1 %v9876_v48  ;;  %7085 = vmatprep.subr.mxu1 %v7808_v63 }
0x11e1   :  { %7078 = vmatprep.mubr.f32.mxu0 %v3477_v28  ;;  %7086 = vmatpush3.msra.mxu1 %v7808_v63 }
0x11e2   :  { %7079 = vmatmul.mubr.f32.gmra.mxu0 %v3478_v50  ;;  %7087 = vmatprep.subr.mxu1 %v7809_v47 }
0x11e3   :  { %7088 = vmatpush3.msra.mxu1 %v7809_v47  ;;  %7120 = vmatpush3.msra.mxu0 %v9567_v35 }
0x11e4   :  { %7089 = vmatprep.subr.mxu1 %v7810_v49  ;;  %7121 = vmatprep.subr.mxu0 %v9610_v11 }
0x11e5   :  { %7090 = vmatpush3.msra.mxu1 %v7810_v49  ;;  %7122 = vmatpush3.msra.mxu0 %v9610_v11 }
0x11e6   :  { %7091 = vmatprep.subr.mxu1 %v7811_v27  ;;  %7123 = vmatprep.subr.mxu0 %v9619_v55 }
0x11e7   :  { %7092 = vmatpush3.msra.mxu1 %v7811_v27  ;;  %7124 = vmatpush3.msra.mxu0 %v9619_v55 }
0x11e8   :  { %7093 = vmatprep.subr.mxu1 %v7812_v29  ;;  %7125 = vmatprep.subr.mxu0 %v9626_v60 }
0x11e9   :  { %7094 = vmatpush3.msra.mxu1 %v7812_v29  ;;  %7126 = vmatpush3.msra.mxu0 %v9626_v60  ;;  %v7823_v29 = vld [vmem:[%s10603_s8 + $0x1] ss:$0 sm:$0xff] }
0x11ea   :  { %7095 = vmatprep.subr.mxu1 %v7813_v38  ;;  %7127 = vmatprep.subr.mxu0 %v9633_v4 }
0x11eb   :  { %7096 = vmatpush3.msra.mxu1 %v7813_v38  ;;  %7128 = vmatpush3.msra.mxu0 %v9633_v4 }
0x11ec   :  { %7097 = vmatprep.subr.mxu1 %v7814_v53  ;;  %7129 = vmatprep.subr.mxu0 %v9640_v21 }
0x11ed   :  { %7098 = vmatpush3.msra.mxu1 %v7814_v53  ;;  %7130 = vmatpush3.msra.mxu0 %v9640_v21 }
0x11ee   :  { %7099 = vmatprep.subr.mxu1 %v7815_v32  ;;  %7131 = vmatprep.subr.mxu0 %v9647_v22 }
0x11ef   :  { %7100 = vmatpush3.msra.mxu1 %v7815_v32  ;;  %7132 = vmatpush3.msra.mxu0 %v9647_v22 }
0x11f0   :  { %7101 = vmatprep.subr.mxu1 %v7816_v59  ;;  %7133 = vmatprep.subr.mxu0 %v9654_v23 }
0x11f1   :  { %7102 = vmatpush3.msra.mxu1 %v7816_v59  ;;  %7134 = vmatpush3.msra.mxu0 %v9654_v23 }
0x11f2   :  { %7103 = vmatprep.subr.mxu1 %v7817_v42  ;;  %7135 = vmatprep.subr.mxu0 %v9661_v2 }
0x11f3   :  { %7104 = vmatpush3.msra.mxu1 %v7817_v42  ;;  %7136 = vmatpush3.msra.mxu0 %v9661_v2 }
0x11f4   :  { %7105 = vmatprep.subr.mxu1 %v7818_v54  ;;  %7137 = vmatprep.subr.mxu0 %v9668_v36 }
0x11f5   :  { %7106 = vmatpush3.msra.mxu1 %v7818_v54  ;;  %7138 = vmatpush3.msra.mxu0 %v9668_v36 }
0x11f6   :  { %7107 = vmatprep.subr.mxu1 %v7819_v40  ;;  %7139 = vmatprep.subr.mxu0 %v9675_v44 }
0x11f7   :  { %7108 = vmatpush3.msra.mxu1 %v7819_v40  ;;  %7140 = vmatpush3.msra.mxu0 %v9675_v44 }
0x11f8   :  { %7109 = vmatprep.subr.mxu1 %v7820_v7  ;;  %7141 = vmatprep.subr.mxu0 %v9682_v33 }
0x11f9   :  { %7110 = vmatpush3.msra.mxu1 %v7820_v7  ;;  %7142 = vmatpush3.msra.mxu0 %v9682_v33 }
0x11fa   :  { %7111 = vmatprep.subr.mxu1 %v7821_v41  ;;  %7143 = vmatprep.subr.mxu0 %v9689_v12 }
0x11fb   :  { %7112 = vmatpush3.msra.mxu1 %v7821_v41  ;;  %7144 = vmatpush3.msra.mxu0 %v9689_v12 }
0x11fc   :  { %7157 = vmatprep.subr.mxu1 %v9567_v35  ;;  %7145 = vmatprep.subr.mxu0 %v9696_v3 }
0x11fd   :  { %7146 = vmatpush3.msra.mxu0 %v9696_v3 }
0x11fe   :  { %7147 = vmatprep.subr.mxu0 %v9703_v1 }
0x11ff   :  { %7148 = vmatpush3.msra.mxu0 %v9703_v1 }
0x1200   :  { %7149 = vmatprep.subr.mxu0 %v9710_v45 }
0x1201   :  { %7150 = vmatpush3.msra.mxu0 %v9710_v45 }
0x1202   :  { %7195 = vmatprep.subr.mxu0 %v9968_v57 }
0x129c   :  { %v7039_v10 = vpop.f32.mrf.mxu1 }
0x129d   :  { %v3565_v34 = vmul.f32 %v7039_v10, %v7039_v10  ;;  %v3577_v50 = vsub.f32 %v9867_v8, %v7039_v10  ;;  %v7824_v8 = vld [vmem:[%s10604_s9 + $0x1] ss:$0 sm:$0xff] }
0x129e   :  { %v3456_v0 = vpop.f32.mrf.mxu1  ;;  %v7077_v14 = vpop.f32.mrf.mxu0 }
0x129f   :  { %v3564_v52 = vmul.f32 %v3456_v0, %v3456_v0  ;;  %v3569_v15 = vsub.f32 %v7077_v14, %v3565_v34  ;;  %v3576_v47 = vsub.f32 %v9869_v46, %v3456_v0 }
0x12a0   :  { %v7042_v9 = vpop.f32.mrf.mxu1  ;;  %v3545_v5 = vpop.f32.mrf.mxu0 }
0x12a1   :  { %v3573_v25 = vmax.f32 %v3569_v15, 0.0  ;;  %v3567_v26 = vmul.f32 %v7042_v9, %v7042_v9  ;;  %v3568_v61 = vsub.f32 %v3545_v5, %v3564_v52  ;;  %v3579_v32 = vsub.f32 %v9876_v48, %v7042_v9 }
0x12a2   :  { %v3466_v51 = vpop.f32.mrf.mxu1  ;;  %v7080_v13 = vpop.f32.mrf.mxu0 }
0x12a3   :  { %v3581_v30 = vadd.f32 1e-05, %v3573_v25  ;;  %v3572_v16 = vmax.f32 %v3568_v61, 0.0  ;;  %v3566_v58 = vmul.f32 %v3466_v51, %v3466_v51  ;;  %v3571_v6 = vsub.f32 %v7080_v13, %v3567_v26  ;;  %v7825_v25 = vld [vmem:[%s10602_s7 + $0x2] ss:$0 sm:$0xff] }
0x12a4   :  { %v3555_v43 = vpop.f32.mrf.mxu0  ;;  %v3578_v54 = vsub.f32 %v9879_v24, %v3466_v51 }
0x12a5   :  { %7598 = vrsqrt.f32 %v3581_v30  ;;  %v3580_v62 = vadd.f32 1e-05, %v3572_v16  ;;  %v3570_v31 = vsub.f32 %v3555_v43, %v3566_v58  ;;  %v3575_v18 = vmax.f32 %v3571_v6, 0.0 }
0x12a7   :  { %7600 = vrsqrt.f32 %v3580_v62  ;;  %v3574_v37 = vmax.f32 %v3570_v31, 0.0  ;;  %v3583_v39 = vadd.f32 1e-05, %v3575_v18  ;;  %v7826_v62 = vld [vmem:[%s10599_s6 + $0x1f0] sm:$0xff] }
0x12a9   :  { %v3582_v28 = vadd.f32 1e-05, %v3574_v37  ;;  %7602 = vrsqrt.f32 %v3583_v39  ;;  %v7828_v37 = vld [vmem:[%s10599_s6 + $0x1e0] sm:$0xff]  ;;  %v7829_v39 = vld [vmem:[%s10599_s6 + $0x1d8] sm:$0xff] }
0x12ab   :  { %7604 = vrsqrt.f32 %v3582_v28  ;;  %v7830_v28 = vld [vmem:[%s10599_s6 + $0x1d0] sm:$0xff] }
0x12b2   :  { %v7599_v63 = vpop.eup %7598 }
0x12b3   :  { %v3589_v49 = vmul.f32 %v7599_v63, %v3577_v50 }
0x12b4   :  { %v7601_v27 = vpop.eup %7600 }
0x12b5   :  { %v3593_v38 = vmul.f32 %v7823_v29, %v3589_v49  ;;  %v3588_v53 = vmul.f32 %v7601_v27, %v3576_v47 }
0x12b6   :  { %v7603_v59 = vpop.eup %7602 }
0x12b7   :  { %v3592_v42 = vmul.f32 %v7823_v29, %v3588_v53  ;;  %v3597_v46 = vadd.f32 %v7824_v8, %v3593_v38  ;;  %v3591_v7 = vmul.f32 %v7603_v59, %v3579_v32 }
0x12b8   :  { %v7605_v40 = vpop.eup %7604 }
0x12b9   :  { %v3596_v41 = vadd.f32 %v7824_v8, %v3592_v42  ;;  %v3590_v10 = vmul.f32 %v7605_v40, %v3578_v54  ;;  %v3595_v34 = vmul.f32 %v7823_v29, %v3591_v7 }
0x12bb   :  { %7606 = vtanh.f32 %v3596_v41  ;;  %v3594_v0 = vmul.f32 %v7823_v29, %v3590_v10  ;;  %v3599_v14 = vadd.f32 %v7824_v8, %v3595_v34 }
0x12bc   :  { %7608 = vtanh.f32 %v3597_v46 }
0x12bd   :  { %v3598_v52 = vadd.f32 %v7824_v8, %v3594_v0 }
0x12bf   :  { %7610 = vtanh.f32 %v3598_v52 }
0x12c0   :  { %7612 = vtanh.f32 %v3599_v14 }
0x12c8   :  { %v7607_v48 = vpop.eup %7606 }
0x12c9   :  { %v7609_v15 = vpop.eup %7608  ;;  %7113 = vmatprep.mubr.f32.mxu1 %v7607_v48 }
0x12ca   :  { %7114 = vmatmul.mubr.f32.vlgmr.msra.gmra.mxu1 %v7609_v15 }
0x12cb   :  { %7158 = vmatpush3.msra.mxu1 %v9567_v35 }
0x12cc   :  { %v7611_v24 = vpop.eup %7610  ;;  %7159 = vmatprep.subr.mxu1 %v9610_v11 }
0x12cd   :  { %v7613_v9 = vpop.eup %7612  ;;  %7116 = vmatprep.mubr.f32.mxu1 %v7611_v24  ;;  %7160 = vmatpush3.msra.mxu1 %v9610_v11  ;;  %v7842_v24 = vld [vmem:[%s10603_s8 + $0x2] ss:$0 sm:$0xff] }
0x12ce   :  { %7117 = vmatmul.mubr.f32.gmra.mxu1 %v7613_v9  ;;  %7161 = vmatprep.subr.mxu1 %v9619_v55 }
0x12cf   :  { %7162 = vmatpush3.msra.mxu1 %v9619_v55 }
0x12d0   :  { %7163 = vmatprep.subr.mxu1 %v9626_v60 }
0x12d1   :  { %7164 = vmatpush3.msra.mxu1 %v9626_v60 }
0x12d2   :  { %7165 = vmatprep.subr.mxu1 %v9633_v4 }
0x12d3   :  { %7166 = vmatpush3.msra.mxu1 %v9633_v4 }
0x12d4   :  { %7167 = vmatprep.subr.mxu1 %v9640_v21 }
0x12d5   :  { %7168 = vmatpush3.msra.mxu1 %v9640_v21 }
0x12d6   :  { %7169 = vmatprep.subr.mxu1 %v9647_v22 }
0x12d7   :  { %7170 = vmatpush3.msra.mxu1 %v9647_v22 }
0x12d8   :  { %7171 = vmatprep.subr.mxu1 %v9654_v23 }
0x12d9   :  { %7172 = vmatpush3.msra.mxu1 %v9654_v23 }
0x12da   :  { %7173 = vmatprep.subr.mxu1 %v9661_v2 }
0x12db   :  { %7174 = vmatpush3.msra.mxu1 %v9661_v2 }
0x12dc   :  { %7175 = vmatprep.subr.mxu1 %v9668_v36 }
0x12dd   :  { %7176 = vmatpush3.msra.mxu1 %v9668_v36 }
0x12de   :  { %7177 = vmatprep.subr.mxu1 %v9675_v44 }
0x12df   :  { %7178 = vmatpush3.msra.mxu1 %v9675_v44 }
0x12e0   :  { %7179 = vmatprep.subr.mxu1 %v9682_v33 }
0x12e1   :  { %7180 = vmatpush3.msra.mxu1 %v9682_v33 }
0x12e2   :  { %7181 = vmatprep.subr.mxu1 %v9689_v12 }
0x12e3   :  { %7182 = vmatpush3.msra.mxu1 %v9689_v12 }
0x12e4   :  { %7183 = vmatprep.subr.mxu1 %v9696_v3 }
0x12e5   :  { %7184 = vmatpush3.msra.mxu1 %v9696_v3 }
0x12e6   :  { %7185 = vmatprep.subr.mxu1 %v9703_v1 }
0x12e7   :  { %7186 = vmatpush3.msra.mxu1 %v9703_v1 }
0x12e8   :  { %7187 = vmatprep.subr.mxu1 %v9710_v45 }
0x12e9   :  { %7188 = vmatpush3.msra.mxu1 %v9710_v45 }
0x12ea   :  { %7233 = vmatprep.subr.mxu1 %v9567_v35 }
0x138a   :  { %v7115_v5 = vpop.f32.mrf.mxu1 }
0x138b   :  { %v10016_v26 = vadd.f32 %v7825_v25, %v7115_v5 }
0x138c   :  { %v3670_v61 = vpop.f32.mrf.mxu1 }
0x138d   :  { %v10018_v51 = vadd.f32 %v7825_v25, %v3670_v61  ;;  %v3775_v16 = vmul.f32 %v10016_v26, %v10016_v26 }
0x138e   :  { %v7118_v13 = vpop.f32.mrf.mxu1 }
0x138f   :  { %7151 = vmatprep.mubr.f32.mxu0 %v10018_v51  ;;  %v3774_v30 = vmul.f32 %v10018_v51, %v10018_v51  ;;  %v10025_v58 = vadd.f32 %v7825_v25, %v7118_v13 }
0x1390   :  { %v3680_v6 = vpop.f32.mrf.mxu1  ;;  %7152 = vmatmul.mubr.f32.vlgmr.msra.gmra.mxu0 %v10016_v26 }
0x1391   :  { %v10028_v43 = vadd.f32 %v7825_v25, %v3680_v6  ;;  %7189 = vmatprep.mubr.f32.mxu1 %v3774_v30  ;;  %7196 = vmatpush3.msra.mxu0 %v9968_v57  ;;  %v3777_v18 = vmul.f32 %v10025_v58, %v10025_v58  ;;  %v7827_v57 = vld [vmem:[%s10599_s6 + $0x1e8] sm:$0xff] }
0x1392   :  { %7190 = vmatmul.mubr.f32.vlgmr.msra.gmra.mxu1 %v3775_v16  ;;  %7197 = vmatprep.subr.mxu0 %v7826_v62 }
0x1393   :  { %7154 = vmatprep.mubr.f32.mxu0 %v10028_v43  ;;  %v3776_v31 = vmul.f32 %v10028_v43, %v10028_v43  ;;  %7198 = vmatpush3.msra.mxu0 %v7826_v62 }
0x1394   :  { %7155 = vmatmul.mubr.f32.gmra.mxu0 %v10025_v58  ;;  %7199 = vmatprep.subr.mxu0 %v7827_v57 }
0x1395   :  { %7192 = vmatprep.mubr.f32.mxu1 %v3776_v31  ;;  %7200 = vmatpush3.msra.mxu0 %v7827_v57 }
0x1396   :  { %7193 = vmatmul.mubr.f32.gmra.mxu1 %v3777_v18  ;;  %7201 = vmatprep.subr.mxu0 %v7828_v37 }
0x1397   :  { %7202 = vmatpush3.msra.mxu0 %v7828_v37  ;;  %7234 = vmatpush3.msra.mxu1 %v9567_v35  ;;  %v7831_v35 = vld [vmem:[%s10599_s6 + $0x1c8] sm:$0xff] }
0x1398   :  { %7203 = vmatprep.subr.mxu0 %v7829_v39  ;;  %7235 = vmatprep.subr.mxu1 %v9610_v11 }
0x1399   :  { %7204 = vmatpush3.msra.mxu0 %v7829_v39  ;;  %7236 = vmatpush3.msra.mxu1 %v9610_v11  ;;  %v7832_v11 = vld [vmem:[%s10599_s6 + $0x1c0] sm:$0xff] }
0x139a   :  { %7205 = vmatprep.subr.mxu0 %v7830_v28  ;;  %7237 = vmatprep.subr.mxu1 %v9619_v55 }
0x139b   :  { %7206 = vmatpush3.msra.mxu0 %v7830_v28  ;;  %7238 = vmatpush3.msra.mxu1 %v9619_v55  ;;  %v7833_v55 = vld [vmem:[%s10599_s6 + $0x1b8] sm:$0xff] }
0x139c   :  { %7207 = vmatprep.subr.mxu0 %v7831_v35  ;;  %7239 = vmatprep.subr.mxu1 %v9626_v60 }
0x139d   :  { %7208 = vmatpush3.msra.mxu0 %v7831_v35  ;;  %7240 = vmatpush3.msra.mxu1 %v9626_v60  ;;  %v7834_v60 = vld [vmem:[%s10599_s6 + $0x1b0] sm:$0xff] }
0x139e   :  { %7209 = vmatprep.subr.mxu0 %v7832_v11  ;;  %7241 = vmatprep.subr.mxu1 %v9633_v4  ;;  %v7844_v35 = vld [vmem:[%s10597_s10 + $0x70] sm:$0xff] }
0x139f   :  { %7210 = vmatpush3.msra.mxu0 %v7832_v11  ;;  %7242 = vmatpush3.msra.mxu1 %v9633_v4  ;;  %v7835_v4 = vld [vmem:[%s10599_s6 + $0x1a8] sm:$0xff] }
0x13a0   :  { %7211 = vmatprep.subr.mxu0 %v7833_v55  ;;  %7243 = vmatprep.subr.mxu1 %v9640_v21 }
0x13a1   :  { %7212 = vmatpush3.msra.mxu0 %v7833_v55  ;;  %7244 = vmatpush3.msra.mxu1 %v9640_v21  ;;  %v7836_v21 = vld [vmem:[%s10599_s6 + $0x1a0] sm:$0xff]  ;;  %v7845_v55 = vld [vmem:[%s10597_s10 + $0x68] sm:$0xff] }
0x13a2   :  { %7213 = vmatprep.subr.mxu0 %v7834_v60  ;;  %7245 = vmatprep.subr.mxu1 %v9647_v22 }
0x13a3   :  { %7214 = vmatpush3.msra.mxu0 %v7834_v60  ;;  %7246 = vmatpush3.msra.mxu1 %v9647_v22  ;;  %v7837_v22 = vld [vmem:[%s10599_s6 + $0x198] sm:$0xff]  ;;  %v7846_v60 = vld [vmem:[%s10597_s10 + $0x60] sm:$0xff] }
0x13a4   :  { %7215 = vmatprep.subr.mxu0 %v7835_v4  ;;  %7247 = vmatprep.subr.mxu1 %v9654_v23 }
0x13a5   :  { %7216 = vmatpush3.msra.mxu0 %v7835_v4  ;;  %7248 = vmatpush3.msra.mxu1 %v9654_v23  ;;  %v7838_v23 = vld [vmem:[%s10599_s6 + $0x190] sm:$0xff]  ;;  %v7847_v4 = vld [vmem:[%s10597_s10 + $0x58] sm:$0xff] }
0x13a6   :  { %7217 = vmatprep.subr.mxu0 %v7836_v21  ;;  %7249 = vmatprep.subr.mxu1 %v9661_v2 }
0x13a7   :  { %7218 = vmatpush3.msra.mxu0 %v7836_v21  ;;  %7250 = vmatpush3.msra.mxu1 %v9661_v2  ;;  %v7839_v2 = vld [vmem:[%s10599_s6 + $0x188] sm:$0xff]  ;;  %v7848_v21 = vld [vmem:[%s10597_s10 + $0x50] sm:$0xff] }
0x13a8   :  { %7219 = vmatprep.subr.mxu0 %v7837_v22  ;;  %7251 = vmatprep.subr.mxu1 %v9668_v36 }
0x13a9   :  { %7220 = vmatpush3.msra.mxu0 %v7837_v22  ;;  %7252 = vmatpush3.msra.mxu1 %v9668_v36  ;;  %v7840_v36 = vld [vmem:[%s10599_s6 + $0x180] sm:$0xff]  ;;  %v7849_v22 = vld [vmem:[%s10597_s10 + $0x48] sm:$0xff] }
0x13aa   :  { %7221 = vmatprep.subr.mxu0 %v7838_v23  ;;  %7253 = vmatprep.subr.mxu1 %v9675_v44 }
0x13ab   :  { %7222 = vmatpush3.msra.mxu0 %v7838_v23  ;;  %7254 = vmatpush3.msra.mxu1 %v9675_v44  ;;  %v10110_v44 = vld [vmem:[%s10597_s10 + $0x78] sm:$0xff]  ;;  %v7850_v23 = vld [vmem:[%s10597_s10 + $0x40] sm:$0xff] }
0x13ac   :  { %7223 = vmatprep.subr.mxu0 %v7839_v2  ;;  %7255 = vmatprep.subr.mxu1 %v9682_v33 }
0x13ad   :  { %7224 = vmatpush3.msra.mxu0 %v7839_v2  ;;  %7256 = vmatpush3.msra.mxu1 %v9682_v33  ;;  %v7851_v2 = vld [vmem:[%s10597_s10 + $0x38] sm:$0xff] }
0x13ae   :  { %7225 = vmatprep.subr.mxu0 %v7840_v36  ;;  %7257 = vmatprep.subr.mxu1 %v9689_v12 }
0x13af   :  { %7226 = vmatpush3.msra.mxu0 %v7840_v36  ;;  %7258 = vmatpush3.msra.mxu1 %v9689_v12  ;;  %v7852_v36 = vld [vmem:[%s10597_s10 + $0x30] sm:$0xff] }
0x13b0   :  { %7271 = vmatprep.subr.mxu0 %v10110_v44  ;;  %7259 = vmatprep.subr.mxu1 %v9696_v3 }
0x13b1   :  { %7260 = vmatpush3.msra.mxu1 %v9696_v3 }
0x13b2   :  { %7261 = vmatprep.subr.mxu1 %v9703_v1 }
0x13b3   :  { %7262 = vmatpush3.msra.mxu1 %v9703_v1 }
0x13b4   :  { %7263 = vmatprep.subr.mxu1 %v9710_v45 }
0x13b5   :  { %7264 = vmatpush3.msra.mxu1 %v9710_v45 }
0x1450   :  { %v7153_v33 = vpop.f32.mrf.mxu0 }
0x1451   :  { %v3864_v12 = vmul.f32 %v7153_v33, %v7153_v33  ;;  %v3876_v0 = vsub.f32 %v10016_v26, %v7153_v33  ;;  %v7843_v26 = vld [vmem:[%s10604_s9 + $0x2] ss:$0 sm:$0xff] }
0x1452   :  { %v3755_v50 = vpop.f32.mrf.mxu0  ;;  %v7191_v63 = vpop.f32.mrf.mxu1  ;;  %v7854_v33 = vld [vmem:[%s10597_s10 + $0x20] sm:$0xff] }
0x1453   :  { %v3863_v47 = vmul.f32 %v3755_v50, %v3755_v50  ;;  %v3868_v49 = vsub.f32 %v7191_v63, %v3864_v12  ;;  %v3875_v52 = vsub.f32 %v10018_v51, %v3755_v50  ;;  %v7855_v12 = vld [vmem:[%s10597_s10 + $0x18] sm:$0xff]  ;;  %v7856_v50 = vld [vmem:[%s10597_s10 + $0x10] sm:$0xff]  ;;  %v7857_v63 = vld [vmem:[%s10597_s10 + $0x8] sm:$0xff] }
0x1454   :  { %v7156_v27 = vpop.f32.mrf.mxu0  ;;  %v3844_v29 = vpop.f32.mrf.mxu1 }
0x1455   :  { %v3872_v38 = vmax.f32 %v3868_v49, 0.0  ;;  %v3866_v53 = vmul.f32 %v7156_v27, %v7156_v27  ;;  %v3867_v32 = vsub.f32 %v3844_v29, %v3863_v47  ;;  %v3878_v25 = vsub.f32 %v10025_v58, %v7156_v27  ;;  %v7858_v47 = vld [vmem:[%s10597_s10] sm:$0xff] }
0x1456   :  { %v3765_v3 = vpop.f32.mrf.mxu0  ;;  %v7194_v59 = vpop.f32.mrf.mxu1  ;;  %v7859_v27 = vld [vmem:[%s10602_s7 + $0x3] ss:$0 sm:$0xff] }
0x1457   :  { %v3880_v42 = vadd.f32 1e-05, %v3872_v38  ;;  %v3871_v54 = vmax.f32 %v3867_v32, 0.0  ;;  %v3865_v1 = vmul.f32 %v3765_v3, %v3765_v3  ;;  %v3870_v40 = vsub.f32 %v7194_v59, %v3866_v53 }
0x1458   :  { %v3854_v8 = vpop.f32.mrf.mxu1  ;;  %v3877_v30 = vsub.f32 %v10028_v43, %v3765_v3 }
0x1459   :  { %7614 = vrsqrt.f32 %v3880_v42  ;;  %v3879_v45 = vadd.f32 1e-05, %v3871_v54  ;;  %v3869_v46 = vsub.f32 %v3854_v8, %v3865_v1  ;;  %v3874_v7 = vmax.f32 %v3870_v40, 0.0 }
0x145b   :  { %7616 = vrsqrt.f32 %v3879_v45  ;;  %v3873_v41 = vmax.f32 %v3869_v46, 0.0  ;;  %v3882_v10 = vadd.f32 1e-05, %v3874_v7  ;;  %v7862_v45 = vmov 0.0  }
0x145c   :  { %7309 = vmatprep.subr.mxu1 %v7862_v45 }
0x145d   :  { %v3881_v34 = vadd.f32 1e-05, %v3873_v41  ;;  %7618 = vrsqrt.f32 %v3882_v10 }
0x145f   :  { %7620 = vrsqrt.f32 %v3881_v34 }
0x1466   :  { %v7615_v14 = vpop.eup %7614 }
0x1467   :  { %v3888_v48 = vmul.f32 %v7615_v14, %v3876_v0 }
0x1468   :  { %v7617_v15 = vpop.eup %7616 }
0x1469   :  { %v3892_v9 = vmul.f32 %v7842_v24, %v3888_v48  ;;  %v3887_v5 = vmul.f32 %v7617_v15, %v3875_v52 }
0x146a   :  { %v7619_v61 = vpop.eup %7618 }
0x146b   :  { %v3891_v13 = vmul.f32 %v7842_v24, %v3887_v5  ;;  %v3896_v51 = vadd.f32 %v7843_v26, %v3892_v9  ;;  %v3890_v6 = vmul.f32 %v7619_v61, %v3878_v25 }
0x146c   :  { %v7621_v16 = vpop.eup %7620 }
0x146d   :  { %v3895_v62 = vadd.f32 %v7843_v26, %v3891_v13  ;;  %v3889_v31 = vmul.f32 %v7621_v16, %v3877_v30  ;;  %v3894_v18 = vmul.f32 %v7842_v24, %v3890_v6 }
0x146f   :  { %7622 = vtanh.f32 %v3895_v62  ;;  %v3893_v57 = vmul.f32 %v7842_v24, %v3889_v31  ;;  %v3898_v37 = vadd.f32 %v7843_v26, %v3894_v18 }
0x1470   :  { %7624 = vtanh.f32 %v3896_v51 }
0x1471   :  { %v3897_v39 = vadd.f32 %v7843_v26, %v3893_v57 }
0x1473   :  { %7626 = vtanh.f32 %v3897_v39 }
0x1474   :  { %7628 = vtanh.f32 %v3898_v37 }
0x147c   :  { %v7623_v58 = vpop.eup %7622 }
0x147d   :  { %v7625_v28 = vpop.eup %7624  ;;  %7227 = vmatprep.mubr.f32.mxu0 %v7623_v58 }
0x147e   :  { %7228 = vmatmul.mubr.f32.vlgmr.msra.gmra.mxu0 %v7625_v28 }
0x147f   :  { %7272 = vmatpush3.msra.mxu0 %v10110_v44  ;;  %v7853_v44 = vld [vmem:[%s10597_s10 + $0x28] sm:$0xff] }
0x1480   :  { %v7627_v43 = vpop.eup %7626  ;;  %7273 = vmatprep.subr.mxu0 %v7844_v35 }
0x1481   :  { %v7629_v11 = vpop.eup %7628  ;;  %7230 = vmatprep.mubr.f32.mxu0 %v7627_v43  ;;  %7274 = vmatpush3.msra.mxu0 %v7844_v35  ;;  %v7860_v43 = vld [vmem:[%s10603_s8 + $0x3] ss:$0 sm:$0xff] }
0x1482   :  { %7231 = vmatmul.mubr.f32.gmra.mxu0 %v7629_v11  ;;  %7275 = vmatprep.subr.mxu0 %v7845_v55 }
0x1483   :  { %7276 = vmatpush3.msra.mxu0 %v7845_v55 }
0x1484   :  { %7277 = vmatprep.subr.mxu0 %v7846_v60 }
0x1485   :  { %7278 = vmatpush3.msra.mxu0 %v7846_v60 }
0x1486   :  { %7279 = vmatprep.subr.mxu0 %v7847_v4 }
0x1487   :  { %7280 = vmatpush3.msra.mxu0 %v7847_v4  ;;  %v7861_v4 = vld [vmem:[%s10604_s9 + $0x3] ss:$0 sm:$0xff] }
0x1488   :  { %7281 = vmatprep.subr.mxu0 %v7848_v21 }
0x1489   :  { %7282 = vmatpush3.msra.mxu0 %v7848_v21 }
0x148a   :  { %7283 = vmatprep.subr.mxu0 %v7849_v22 }
0x148b   :  { %7284 = vmatpush3.msra.mxu0 %v7849_v22 }
0x148c   :  { %7285 = vmatprep.subr.mxu0 %v7850_v23 }
0x148d   :  { %7286 = vmatpush3.msra.mxu0 %v7850_v23 }
0x148e   :  { %7287 = vmatprep.subr.mxu0 %v7851_v2 }
0x148f   :  { %7288 = vmatpush3.msra.mxu0 %v7851_v2 }
0x1490   :  { %7289 = vmatprep.subr.mxu0 %v7852_v36 }
0x1491   :  { %7290 = vmatpush3.msra.mxu0 %v7852_v36 }
0x1492   :  { %7291 = vmatprep.subr.mxu0 %v7853_v44 }
0x1493   :  { %7292 = vmatpush3.msra.mxu0 %v7853_v44 }
0x1494   :  { %7293 = vmatprep.subr.mxu0 %v7854_v33 }
0x1495   :  { %7294 = vmatpush3.msra.mxu0 %v7854_v33 }
0x1496   :  { %7295 = vmatprep.subr.mxu0 %v7855_v12 }
0x1497   :  { %7296 = vmatpush3.msra.mxu0 %v7855_v12 }
0x1498   :  { %7297 = vmatprep.subr.mxu0 %v7856_v50 }
0x1499   :  { %7298 = vmatpush3.msra.mxu0 %v7856_v50 }
0x149a   :  { %7299 = vmatprep.subr.mxu0 %v7857_v63 }
0x149b   :  { %7300 = vmatpush3.msra.mxu0 %v7857_v63 }
0x149c   :  { %7301 = vmatprep.subr.mxu0 %v7858_v47 }
0x149d   :  { %7302 = vmatpush3.msra.mxu0 %v7858_v47 }
0x149e   :  { %7338 = vmatprep.subr.mxu0 %v7862_v45 }
0x153e   :  { %v7229_v49 = vpop.f32.mrf.mxu0 }
0x153f   :  { %v3975_v29 = vadd.f32 %v7859_v27, %v7229_v49  ;;  %v4207_v49 = vlaneseq }
0x1540   :  { %v3969_v38 = vpop.f32.mrf.mxu0 }
0x1541   :  { %v3970_v53 = vadd.f32 %v7859_v27, %v3969_v38  ;;  %v4074_v59 = vmul.f32 %v3975_v29, %v3975_v29 }
0x1542   :  { %v7232_v32 = vpop.f32.mrf.mxu0 }
0x1543   :  { %7265 = vmatprep.mubr.f32.mxu1 %v3970_v53  ;;  %v4073_v3 = vmul.f32 %v3970_v53, %v3970_v53  ;;  %v3985_v42 = vadd.f32 %v7859_v27, %v7232_v32 }
0x1544   :  { %v3979_v54 = vpop.f32.mrf.mxu0  ;;  %7266 = vmatmul.mubr.f32.vlgmr.msra.gmra.mxu1 %v3975_v29 }
0x1545   :  { %v3980_v1 = vadd.f32 %v7859_v27, %v3979_v54  ;;  %7303 = vmatprep.mubr.f32.mxu0 %v4073_v3  ;;  %v4076_v8 = vmul.f32 %v3985_v42, %v3985_v42  ;;  %v10186_v27 = vshrl.u32 %v4207_v49, 7 }
0x1546   :  { %7304 = vmatmul.mubr.f32.vlgmr.msra.gmra.mxu0 %v4074_v59 }
0x1547   :  { %7268 = vmatprep.mubr.f32.mxu1 %v3980_v1  ;;  %v4075_v40 = vmul.f32 %v3980_v1, %v3980_v1 }
0x1548   :  { %7269 = vmatmul.mubr.f32.gmra.mxu1 %v3985_v42 }
0x1549   :  { %7306 = vmatprep.mubr.f32.mxu0 %v4075_v40  ;;  %7317 = vmatprep.mubr.msk.f32.mxu1 %vm7864_vm2, %v7862_v45 }
0x154a   :  { %7307 = vmatmul.mubr.f32.gmra.mxu0 %v4076_v8 }
0x154b   :  { %7346 = vmatprep.mubr.msk.f32.mxu0 %vm7864_vm2, %v7862_v45 }
0x1604   :  { %v7267_v46 = vpop.f32.mrf.mxu1 }
0x1605   :  { %v4163_v7 = vmul.f32 %v7267_v46, %v7267_v46  ;;  %v4175_v57 = vsub.f32 %v3975_v29, %v7267_v46  ;;  %v4246_v29 = vsub.s32 1, %v10186_v27 }
0x1606   :  { %v4054_v41 = vpop.f32.mrf.mxu1  ;;  %v7305_v10 = vpop.f32.mrf.mxu0 }
0x1607   :  { %v4162_v34 = vmul.f32 %v4054_v41, %v4054_v41  ;;  %v4167_v0 = vsub.f32 %v7305_v10, %v4163_v7  ;;  %v4174_v39 = vsub.f32 %v3970_v53, %v4054_v41  ;;  %v10192_v53 = vld [vmem:[%s10605_s1] sm:$0xf]  ;;  %v10222_v10 = vadd.s32 16, %v10186_v27  ;;  %s7865_s1 = smov 64  }
0x1608   :  { %v7270_v14 = vpop.f32.mrf.mxu1  ;;  %v4143_v52 = vpop.f32.mrf.mxu0  ;;  %v10198_v3 = vrot.slane %v10192_v53, %v4246_v29 }
0x1609   :  { %v4171_v48 = vmax.f32 %v4167_v0, 0.0  ;;  %v4165_v15 = vmul.f32 %v7270_v14, %v7270_v14  ;;  %v4166_v24 = vsub.f32 %v4143_v52, %v4162_v34  ;;  %v4177_v55 = vsub.f32 %v3985_v42, %v7270_v14 }
0x160a   :  { %v4064_v9 = vpop.f32.mrf.mxu1  ;;  %v7308_v5 = vpop.f32.mrf.mxu0  ;;  %v4217_v42 = vsub.s32 0, %v10186_v27  ;;  %vm4248_vm1 = vcmp.eq.s32.totalorder %v10186_v27, %v10198_v3  ;;  %vm4250_vm5 = vcmp.eq.s32.totalorder %v10222_v10, %v10198_v3  ;;  %v10234_v34 = vadd.s32 24, %v10186_v27 }
0x160b   :  { %v4179_v25 = vadd.f32 1e-05, %v4171_v48  ;;  %v4170_v61 = vmax.f32 %v4166_v24, 0.0  ;;  %v4164_v13 = vmul.f32 %v4064_v9, %v4064_v9  ;;  %v4169_v30 = vsub.f32 %v7308_v5, %v4165_v15 }
0x160c   :  { %v4153_v16 = vpop.f32.mrf.mxu0  ;;  %v4176_v23 = vsub.f32 %v3980_v1, %v4064_v9  ;;  %v10210_v1 = vadd.s32 8, %v10186_v27  ;;  %v10214_v46 = vrot.slane %v10192_v53, %v4217_v42  ;;  %vm4251_vm7 = vcmp.eq.s32.totalorder %v10234_v34, %v10198_v3 }
0x160d   :  { %7630 = vrsqrt.f32 %v4179_v25  ;;  %v4178_v26 = vadd.f32 1e-05, %v4170_v61  ;;  %v4168_v51 = vsub.f32 %v4153_v16, %v4164_v13  ;;  %v4173_v6 = vmax.f32 %v4169_v30, 0.0 }
0x160e   :  { %vm4249_vm3 = vcmp.eq.s32.totalorder %v10210_v1, %v10198_v3  ;;  %vm4219_vm4 = vcmp.eq.s32.totalorder %v10186_v27, %v10214_v46  ;;  %vm4220_vm6 = vcmp.eq.s32.totalorder %v10210_v1, %v10214_v46  ;;  %v10248_v52 = vadd.s32 32, %v10186_v27 }
0x160f   :  { %7632 = vrsqrt.f32 %v4178_v26  ;;  %v4172_v62 = vmax.f32 %v4168_v51, 0.0  ;;  %v4181_v31 = vadd.f32 1e-05, %v4173_v6  ;;  %v4984_v14 = vsel %vm4220_vm6, 1.0, %v7862_v45 }
0x1610   :  { %vm4221_vm8 = vcmp.eq.s32.totalorder %v10222_v10, %v10214_v46  ;;  %vm4252_vm9 = vcmp.eq.s32.totalorder %v10248_v52, %v10198_v3  ;;  %v10260_v15 = vadd.s32 40, %v10186_v27  ;;  %vm4222_vm10 = vcmp.eq.s32.totalorder %v10234_v34, %v10214_v46 }
0x1611   :  { %v4180_v18 = vadd.f32 1e-05, %v4172_v62  ;;  %7634 = vrsqrt.f32 %v4181_v31  ;;  %v4985_v48 = vsel %vm4221_vm8, 1.0, %v7862_v45  ;;  %v4986_v24 = vsel %vm4222_vm10, 1.0, %v7862_v45 }
0x1612   :  { %v10271_v9 = vadd.s32 48, %v10186_v27  ;;  %vm4223_vm12 = vcmp.eq.s32.totalorder %v10248_v52, %v10214_v46  ;;  %v4533_v5 = vsub.s32 2, %v10186_v27  ;;  %vm4224_vm14 = vcmp.eq.s32.totalorder %v10260_v15, %v10214_v46 }
0x1613   :  { %7636 = vrsqrt.f32 %v4180_v18  ;;  %v4987_v25 = vsel %vm4223_vm12, 1.0, %v7862_v45  ;;  %v4702_v13 = vsub.s32 3, %v10186_v27  ;;  %v4988_v16 = vsel %vm4224_vm14, 1.0, %v7862_v45 }
0x1614   :  { %v10284_v61 = vrot.slane %v10192_v53, %v4533_v5 }
0x1615   :  { %v10293_v30 = vrot.slane %v10192_v53, %v4702_v13 }
0x1616   :  { %vm4539_vm15 = vcmp.eq.s32.totalorder %v10248_v52, %v10284_v61  ;;  %vm4540_vm12 = vcmp.eq.s32.totalorder %v10260_v15, %v10284_v61  ;;  %vm4541_vm14 = vcmp.eq.s32.totalorder %v10271_v9, %v10284_v61 }
0x1617   :  { %vm4704_vm6 = vcmp.eq.s32.totalorder %v10186_v27, %v10293_v30  ;;  %vm4705_vm10 = vcmp.eq.s32.totalorder %v10210_v1, %v10293_v30  ;;  %vm4708_vm13 = vcmp.eq.s32.totalorder %v10248_v52, %v10293_v30  ;;  %vm4709_vm11 = vcmp.eq.s32.totalorder %v10260_v15, %v10293_v30 }
0x1618   :  { %vm4710_vm8 = vcmp.eq.s32.totalorder %v10271_v9, %v10293_v30  ;;  %v5025_v49 = vsel %vm4704_vm6, 1.0, %v7862_v45  ;;  %v5026_v53 = vsel %vm4705_vm10, 1.0, %v7862_v45 }
0x161a   :  { %v7631_v37 = vpop.eup %7630 }
0x161b   :  { %v4187_v58 = vmul.f32 %v7631_v37, %v4175_v57 }
0x161c   :  { %v7633_v28 = vpop.eup %7632 }
0x161d   :  { %v4191_v35 = vmul.f32 %v7860_v43, %v4187_v58  ;;  %v4186_v11 = vmul.f32 %v7633_v28, %v4174_v39 }
0x161e   :  { %v7635_v60 = vpop.eup %7634 }
0x161f   :  { %v4195_v21 = vadd.f32 %v7861_v4, %v4191_v35  ;;  %v4190_v22 = vmul.f32 %v7860_v43, %v4186_v11  ;;  %v4189_v36 = vmul.f32 %v7635_v60, %v4177_v55  ;;  %v4991_v60 = vsel %vm4249_vm3, 1.0, %v7862_v45 }
0x1620   :  { %v7637_v2 = vpop.eup %7636  ;;  %vm10608_vm3 = vcmp.eq.s32.totalorder %v10222_v10, %v10293_v30 }
0x1621   :  { %7638 = vtanh.f32 %v4195_v21  ;;  %v4194_v44 = vadd.f32 %v7861_v4, %v4190_v22  ;;  %v4188_v33 = vmul.f32 %v7637_v2, %v4176_v23  ;;  %v4193_v12 = vmul.f32 %v7860_v43, %v4189_v36 }
0x1622   :  { %v4992_v2 = vsel %vm4250_vm5, 1.0, %v7862_v45  ;;  %vm10609_vm5 = vcmp.eq.s32.totalorder %v10271_v9, %v10198_v3 }
0x1623   :  { %7640 = vtanh.f32 %v4194_v44  ;;  %v4192_v50 = vmul.f32 %v7860_v43, %v4188_v33  ;;  %v4197_v63 = vadd.f32 %v7861_v4, %v4193_v12  ;;  %v4990_v43 = vsel %vm4248_vm1, 1.0, %v7862_v45 }
0x1624   :  { %vm10607_vm1 = vcmp.eq.s32.totalorder %v10260_v15, %v10198_v3  ;;  %v4996_v42 = vsel %vm10609_vm5, 1.0, %v7862_v45 }
0x1625   :  { %v4196_v47 = vadd.f32 %v7861_v4, %v4192_v50  ;;  %7642 = vtanh.f32 %v4197_v63  ;;  %v4993_v63 = vsel %vm4251_vm7, 1.0, %v7862_v45  ;;  %vm10610_vm7 = vcmp.eq.s32.totalorder %v10186_v27, %v10284_v61 }
0x1626   :  { %v5011_v3 = vsel %vm10610_vm7, 1.0, %v7862_v45 }
0x1627   :  { %7644 = vtanh.f32 %v4196_v47 }
0x162e   :  { %v7639_v38 = vpop.eup %7638 }
0x162f   :  { %v10195_v32 = vadd.f32 %v7639_v38, %v9596_v17  ;;  %v4994_v38 = vsel %vm4252_vm9, 1.0, %v7862_v45  ;;  %vm10611_vm9 = vcmp.eq.s32.totalorder %v10210_v1, %v10284_v61 }
0x1630   :  { %v7641_v59 = vpop.eup %7640  ;;  %v5012_v27 = vsel %vm10611_vm9, 1.0, %v7862_v45 }
0x1631   :  { %4275 = vrot.lane.b32.xlu1 %v10195_v32, %s7863_s15  ;;  %v4202_v54 = vadd.f32 %v7641_v59, %v9593_v56  ;;  %v5027_v59 = vsel %vm10608_vm3, 1.0, %v7862_v45 }
0x1632   :  { %v7643_v17 = vpop.eup %7642 }
0x1633   :  { %v4205_v8 = vadd.f32 %v7643_v17, %v9605_v20  ;;  %v4983_v20 = vsel %vm4219_vm4, 1.0, %v7862_v45  ;;  %v4240_v0 = vsel %vm120_vm0, %v4202_v54, 1.0  ;;  %vm4225_vm4 = vcmp.eq.s32.totalorder %v10271_v9, %v10214_v46 }
0x1634   :  { %v7645_v40 = vpop.eup %7644  ;;  %v4989_v26 = vsel %vm4225_vm4, 1.0, %v7862_v45  ;;  %vm4707_vm4 = vcmp.eq.s32.totalorder %v10234_v34, %v10293_v30  ;;  %v5015_v46 = vsel %vm4539_vm15, 1.0, %v7862_v45  ;;  %vm81_vm15 = vcmask 269312  }
0x1635   :  { %4273 = vrot.lane.b32.xlu1 %v4202_v54, %s7863_s15  ;;  %v4204_v7 = vadd.f32 %v7645_v40, %v9601_v19  ;;  %4279 = vrot.lane.b32.xlu0 %v4205_v8, %s7863_s15  ;;  %v4243_v41 = vsel %vm120_vm0, %v4205_v8, 1.0  ;;  %v4241_v19 = vsel %vm120_vm0, %v10195_v32, 1.0  ;;  %v5028_v17 = vsel %vm4707_vm4, 1.0, %v7862_v45  ;;  %82 = vst.msk [vmem:[%s10606_s11] sm:$0xff] %vm81_vm15, %v7862_v45  ;;  %83 = vst.msk [vmem:[%s10606_s11 + $0x8] sm:$0xff] %vm81_vm15, %v7862_v45 }
0x1636   :  { %7339 = vmatpush3.msra.mxu0 %v4243_v41  ;;  %v5030_v40 = vsel %vm4709_vm11, 1.0, %v7862_v45  ;;  %vm10613_vm11 = vcmp.eq.s32.totalorder %v10234_v34, %v10284_v61  ;;  %v5017_v41 = vsel %vm4541_vm14, 1.0, %v7862_v45  ;;  %84 = vst.msk [vmem:[%s10606_s11 + $0x10] sm:$0xff] %vm81_vm15, %v7862_v45  ;;  %85 = vst.msk [vmem:[%s10606_s11 + $0x18] sm:$0xff] %vm81_vm15, %v7862_v45 }
0x1637   :  { %v4242_v56 = vsel %vm120_vm0, %v4204_v7, 1.0  ;;  %7340 = vmatprep.subr.mxu0 %v7862_v45  ;;  %86 = vst.msk [vmem:[%s10606_s11 + $0x20] sm:$0xff] %vm81_vm15, %v7862_v45  ;;  %87 = vst.msk [vmem:[%s10606_s11 + $0x28] sm:$0xff] %vm81_vm15, %v7862_v45 }
0x1638   :  { %7341 = vmatpush3.msra.mxu0 %v4242_v56  ;;  %v5031_v56 = vsel %vm4710_vm8, 1.0, %v7862_v45  ;;  %88 = vst.msk [vmem:[%s10606_s11 + $0x30] sm:$0xff] %vm81_vm15, %v7862_v45 }
0x1639   :  { %4560 = vrot.lane.b32.xlu1 %v4204_v7, %s7865_s1  ;;  %4277 = vrot.lane.b32.xlu0 %v4204_v7, %s7863_s15 }
0x163a   :  { %7342 = vmatprep.subr.mxu0 %v7862_v45 }
0x163b   :  { %7343 = vmatpush3.msra.mxu0 %v4241_v19 }
0x163c   :  { %7344 = vmatprep.subr.mxu0 %v7862_v45 }
0x163d   :  { %7345 = vmatpush3.msra.mxu0 %v4240_v0  ;;  %4556 = vrot.lane.b32.xlu1 %v4202_v54, %s7865_s1 }
0x163e   :  { %4562 = vrot.lane.b32.xlu0 %v4205_v8, %s7865_s1  ;;  %7347 = vmatmul.mubr.msk.f32.vlgmr.msra.gmra.mxu0 %vm120_vm0, %v4983_v20 }
0x163f   :  { %7349 = vmatprep.mubr.msk.f32.mxu0 %vm7864_vm2, %v7862_v45  ;;  %7396 = vmatprep.subr.mxu0 %v7862_v45 }
0x1641   :  { %4729 = vrot.lane.b32.xlu1 %v4204_v7, %s7866_s16  ;;  %v5016_v7 = vsel %vm4540_vm12, 1.0, %v7862_v45 }
0x1642   :  { %4558 = vrot.lane.b32.xlu0 %v10195_v32, %s7865_s1  ;;  %7350 = vmatmul.mubr.msk.f32.gmra.mxu0 %vm120_vm0, %v4984_v14 }
0x1643   :  { %7352 = vmatprep.mubr.msk.f32.mxu0 %vm7864_vm2, %v7862_v45 }
0x1645   :  { %4725 = vrot.lane.b32.xlu1 %v4202_v54, %s7866_s16  ;;  %v5029_v54 = vsel %vm4708_vm13, 1.0, %v7862_v45  ;;  %vm10612_vm13 = vcmp.eq.s32.totalorder %v10222_v10, %v10284_v61 }
0x1646   :  { %4731 = vrot.lane.b32.xlu0 %v4205_v8, %s7866_s16  ;;  %7353 = vmatmul.mubr.msk.f32.gmra.mxu0 %vm120_vm0, %v4985_v48  ;;  %v5013_v1 = vsel %vm10612_vm13, 1.0, %v7862_v45  ;;  %v5014_v8 = vsel %vm10613_vm11, 1.0, %v7862_v45 }
0x1647   :  { %7355 = vmatprep.mubr.msk.f32.mxu0 %vm7864_vm2, %v7862_v45 }
0x164a   :  { %4727 = vrot.lane.b32.xlu0 %v10195_v32, %s7866_s16  ;;  %7356 = vmatmul.mubr.msk.f32.gmra.mxu0 %vm120_vm0, %v4986_v24  ;;  %v4995_v32 = vsel %vm10607_vm1, 1.0, %v7862_v45 }
0x164b   :  { %7358 = vmatprep.mubr.msk.f32.mxu0 %vm7864_vm2, %v7862_v45 }
0x164e   :  { %7359 = vmatmul.mubr.msk.f32.gmra.mxu0 %vm120_vm0, %v4987_v25 }
0x164f   :  { %7361 = vmatprep.mubr.msk.f32.mxu0 %vm7864_vm2, %v7862_v45 }
0x1652   :  { %7362 = vmatmul.mubr.msk.f32.gmra.mxu0 %vm120_vm0, %v4988_v16 }
0x1653   :  { %7364 = vmatprep.mubr.msk.f32.mxu0 %vm7864_vm2, %v7862_v45 }
0x1656   :  { %7365 = vmatmul.mubr.msk.f32.gmra.mxu0 %vm120_vm0, %v4989_v26 }
0x1657   :  { %7404 = vmatprep.mubr.msk.f32.mxu0 %vm7864_vm2, %v7862_v45 }
0x16a3   :  { %v4276_v51 = vpop.permute.xlu1 %4275 }
0x16a4   :  { %v4286_v39 = vsel %vm120_vm0, %v4276_v51, 1.0 }
0x16a7   :  { %v4274_v6 = vpop.permute.xlu1 %4273  ;;  %v4280_v62 = vpop.permute.xlu0 %4279 }
0x16a8   :  { %v4288_v31 = vsel %vm120_vm0, %v4280_v62, 1.0  ;;  %v4285_v35 = vsel %vm120_vm0, %v4274_v6, 1.0 }
0x16a9   :  { %7310 = vmatpush3.msra.mxu1 %v4288_v31 }
0x16aa   :  { %7311 = vmatprep.subr.mxu1 %v7862_v45 }
0x16ab   :  { %v4561_v18 = vpop.permute.xlu1 %4560  ;;  %v4278_v57 = vpop.permute.xlu0 %4277 }
0x16ac   :  { %v4287_v37 = vsel %vm120_vm0, %v4278_v57, 1.0  ;;  %v4570_v4 = vsel %vm120_vm0, %v4561_v18, 1.0 }
0x16ad   :  { %7312 = vmatpush3.msra.mxu1 %v4287_v37 }
0x16ae   :  { %7313 = vmatprep.subr.mxu1 %v7862_v45 }
0x16af   :  { %v4557_v58 = vpop.permute.xlu1 %4556  ;;  %7314 = vmatpush3.msra.mxu1 %v4286_v39 }
0x16b0   :  { %v4563_v28 = vpop.permute.xlu0 %4562  ;;  %7315 = vmatprep.subr.mxu1 %v7862_v45  ;;  %v4568_v36 = vsel %vm120_vm0, %v4557_v58, 1.0 }
0x16b1   :  { %7316 = vmatpush3.msra.mxu1 %v4285_v35  ;;  %v4571_v11 = vsel %vm120_vm0, %v4563_v28, 1.0 }
0x16b2   :  { %7318 = vmatmul.mubr.msk.f32.vlgmr.msra.gmra.mxu1 %vm120_vm0, %v4990_v43  ;;  %7367 = vmatprep.subr.mxu1 %v7862_v45 }
0x16b3   :  { %7368 = vmatpush3.msra.mxu1 %v4571_v11  ;;  %7320 = vmatprep.mubr.msk.f32.mxu1 %vm7864_vm2, %v7862_v45  ;;  %v4730_v21 = vpop.permute.xlu1 %4729 }
0x16b4   :  { %v4559_v55 = vpop.permute.xlu0 %4558  ;;  %7369 = vmatprep.subr.mxu1 %v7862_v45  ;;  %v4739_v33 = vsel %vm120_vm0, %v4730_v21, 1.0 }
0x16b5   :  { %7370 = vmatpush3.msra.mxu1 %v4570_v4  ;;  %v4569_v22 = vsel %vm120_vm0, %v4559_v55, 1.0 }
0x16b6   :  { %7321 = vmatmul.mubr.msk.f32.gmra.mxu1 %vm120_vm0, %v4991_v60  ;;  %7371 = vmatprep.subr.mxu1 %v7862_v45 }
0x16b7   :  { %7372 = vmatpush3.msra.mxu1 %v4569_v22  ;;  %7323 = vmatprep.mubr.msk.f32.mxu1 %vm7864_vm2, %v7862_v45  ;;  %v4726_v12 = vpop.permute.xlu1 %4725 }
0x16b8   :  { %v4732_v23 = vpop.permute.xlu0 %4731  ;;  %7373 = vmatprep.subr.mxu1 %v7862_v45  ;;  %v4737_v29 = vsel %vm120_vm0, %v4726_v12, 1.0 }
0x16b9   :  { %v4740_v44 = vsel %vm120_vm0, %v4732_v23, 1.0  ;;  %7374 = vmatpush3.msra.mxu1 %v4568_v36 }
0x16ba   :  { %7397 = vmatpush3.msra.mxu0 %v4740_v44  ;;  %7324 = vmatmul.mubr.msk.f32.gmra.mxu1 %vm120_vm0, %v4992_v2 }
0x16bb   :  { %7398 = vmatprep.subr.mxu0 %v7862_v45  ;;  %7326 = vmatprep.mubr.msk.f32.mxu1 %vm7864_vm2, %v7862_v45 }
0x16bc   :  { %v4728_v50 = vpop.permute.xlu0 %4727  ;;  %7399 = vmatpush3.msra.mxu0 %v4739_v33  ;;  %7425 = vmatprep.subr.mxu1 %v7862_v45 }
0x16bd   :  { %v4738_v47 = vsel %vm120_vm0, %v4728_v50, 1.0  ;;  %7400 = vmatprep.subr.mxu0 %v7862_v45 }
0x16be   :  { %7401 = vmatpush3.msra.mxu0 %v4738_v47  ;;  %7327 = vmatmul.mubr.msk.f32.gmra.mxu1 %vm120_vm0, %v4993_v63 }
0x16bf   :  { %7402 = vmatprep.subr.mxu0 %v7862_v45  ;;  %7329 = vmatprep.mubr.msk.f32.mxu1 %vm7864_vm2, %v7862_v45 }
0x16c0   :  { %7403 = vmatpush3.msra.mxu0 %v4737_v29 }
0x16c1   :  { %7405 = vmatmul.mubr.msk.f32.vlgmr.msra.gmra.mxu0 %vm120_vm0, %v5025_v49 }
0x16c2   :  { %7407 = vmatprep.mubr.msk.f32.mxu0 %vm7864_vm2, %v7862_v45  ;;  %7330 = vmatmul.mubr.msk.f32.gmra.mxu1 %vm120_vm0, %v4994_v38 }
0x16c3   :  { %7332 = vmatprep.mubr.msk.f32.mxu1 %vm7864_vm2, %v7862_v45 }
0x16c5   :  { %7408 = vmatmul.mubr.msk.f32.gmra.mxu0 %vm120_vm0, %v5026_v53  ;;  %v4870_v53 = vld [vmem:[%s10606_s11 + $0x8] sm:$0xff] }
0x16c6   :  { %7410 = vmatprep.mubr.msk.f32.mxu0 %vm7864_vm2, %v7862_v45  ;;  %7333 = vmatmul.mubr.msk.f32.gmra.mxu1 %vm120_vm0, %v4995_v32 }
0x16c7   :  { %7335 = vmatprep.mubr.msk.f32.mxu1 %vm7864_vm2, %v7862_v45 }
0x16c9   :  { %7411 = vmatmul.mubr.msk.f32.gmra.mxu0 %vm120_vm0, %v5027_v59 }
0x16ca   :  { %7413 = vmatprep.mubr.msk.f32.mxu0 %vm7864_vm2, %v7862_v45  ;;  %7336 = vmatmul.mubr.msk.f32.gmra.mxu1 %vm120_vm0, %v4996_v42 }
0x16cb   :  { %7375 = vmatprep.mubr.msk.f32.mxu1 %vm7864_vm2, %v7862_v45 }
0x16cd   :  { %7414 = vmatmul.mubr.msk.f32.gmra.mxu0 %vm120_vm0, %v5028_v17 }
0x16ce   :  { %7416 = vmatprep.mubr.msk.f32.mxu0 %vm7864_vm2, %v7862_v45  ;;  %7376 = vmatmul.mubr.msk.f32.vlgmr.msra.gmra.mxu1 %vm120_vm0, %v5011_v3 }
0x16cf   :  { %7429 = vmatpush3.msra.mxu1 %v4740_v44  ;;  %7378 = vmatprep.mubr.msk.f32.mxu1 %vm7864_vm2, %v7862_v45  ;;  %v4869_v44 = vld [vmem:[%s10606_s11] sm:$0xff] }
0x16d0   :  { %7426 = vmatprep.subr.mxu1 %v7862_v45 }
0x16d1   :  { %7417 = vmatmul.mubr.msk.f32.gmra.mxu0 %vm120_vm0, %v5029_v54  ;;  %7430 = vmatpush3.msra.mxu1 %v4739_v33 }
0x16d2   :  { %7419 = vmatprep.mubr.msk.f32.mxu0 %vm7864_vm2, %v7862_v45  ;;  %7427 = vmatprep.subr.mxu1 %v7862_v45 }
0x16d3   :  { %7379 = vmatmul.mubr.msk.f32.gmra.mxu1 %vm120_vm0, %v5012_v27 }
0x16d4   :  { %7431 = vmatpush3.msra.mxu1 %v4738_v47  ;;  %7381 = vmatprep.mubr.msk.f32.mxu1 %vm7864_vm2, %v7862_v45 }
0x16d5   :  { %7428 = vmatprep.subr.mxu1 %v7862_v45  ;;  %7420 = vmatmul.mubr.msk.f32.gmra.mxu0 %vm120_vm0, %v5030_v40 }
0x16d6   :  { %7432 = vmatpush3.msra.mxu1 %v4737_v29 }
0x16d7   :  { %7382 = vmatmul.mubr.msk.f32.gmra.mxu1 %vm120_vm0, %v5013_v1  ;;  %v4871_v1 = vld [vmem:[%s10606_s11 + $0x10] sm:$0xff] }
0x16d8   :  { %7384 = vmatprep.mubr.msk.f32.mxu1 %vm7864_vm2, %v7862_v45 }
0x16db   :  { %7385 = vmatmul.mubr.msk.f32.gmra.mxu1 %vm120_vm0, %v5014_v8 }
0x16dc   :  { %7387 = vmatprep.mubr.msk.f32.mxu1 %vm7864_vm2, %v7862_v45 }
0x16df   :  { %7388 = vmatmul.mubr.msk.f32.gmra.mxu1 %vm120_vm0, %v5015_v46 }
0x16e0   :  { %7390 = vmatprep.mubr.msk.f32.mxu1 %vm7864_vm2, %v7862_v45 }
0x16e3   :  { %7391 = vmatmul.mubr.msk.f32.gmra.mxu1 %vm120_vm0, %v5016_v7 }
0x16e4   :  { %7393 = vmatprep.mubr.msk.f32.mxu1 %vm7864_vm2, %v7862_v45 }
0x16e7   :  { %7394 = vmatmul.mubr.msk.f32.gmra.mxu1 %vm120_vm0, %v5017_v41 }
0x16e8   :  { %7422 = vmatprep.mubr.msk.f32.mxu1 %vm7864_vm2, %v7862_v45 }
0x16eb   :  { %7423 = vmatmul.mubr.msk.f32.vlgmr.msra.gmra.mxu1 %vm120_vm0, %v5031_v56 }
0x16fe   :  { %v4497_v10 = vpop.f32.mrf.mxu0 }
0x1700   :  { %v7348_v19 = vpop.f32.mrf.mxu0 }
0x1701   :  { %v4872_v19 = vld [vmem:[%s10606_s11 + $0x18] sm:$0xff] }
0x1702   :  { %v4502_v20 = vpop.f32.mrf.mxu0 }
0x1704   :  { %v7351_v34 = vpop.f32.mrf.mxu0 }
0x1706   :  { %v4507_v0 = vpop.f32.mrf.mxu0 }
0x1708   :  { %v7354_v14 = vpop.f32.mrf.mxu0 }
0x170a   :  { %v10502_v52 = vpop.f32.mrf.mxu0 }
0x170c   :  { %v7357_v48 = vpop.f32.mrf.mxu0 }
0x170e   :  { %v4517_v15 = vpop.f32.mrf.mxu0 }
0x1710   :  { %v7360_v24 = vpop.f32.mrf.mxu0 }
0x1711   :  { %v4873_v24 = vld [vmem:[%s10606_s11 + $0x20] sm:$0xff] }
0x1712   :  { %v10539_v9 = vpop.f32.mrf.mxu0 }
0x1714   :  { %v7363_v5 = vpop.f32.mrf.mxu0 }
0x1716   :  { %v10541_v25 = vpop.f32.mrf.mxu0 }
0x1718   :  { %v7366_v61 = vpop.f32.mrf.mxu0 }
0x1772   :  { %v4376_v13 = vpop.f32.mrf.mxu1 }
0x1773   :  { %v4498_v21 = vadd.f32 %v4497_v10, %v4376_v13 }
0x1774   :  { %v7319_v30 = vpop.f32.mrf.mxu1 }
0x1776   :  { %v4381_v16 = vpop.f32.mrf.mxu1 }
0x1777   :  { %v4503_v12 = vadd.f32 %v4502_v20, %v4381_v16 }
0x1778   :  { %v7322_v26 = vpop.f32.mrf.mxu1 }
0x1779   :  { %v4874_v26 = vld [vmem:[%s10606_s11 + $0x28] sm:$0xff] }
0x177a   :  { %v4386_v51 = vpop.f32.mrf.mxu1 }
0x177b   :  { %v4508_v59 = vadd.f32 %v4507_v0, %v4386_v51 }
0x177c   :  { %v7325_v6 = vpop.f32.mrf.mxu1 }
0x177e   :  { %v4391_v62 = vpop.f32.mrf.mxu1 }
0x177f   :  { %v4513_v8 = vadd.f32 %v10502_v52, %v4391_v62 }
0x1780   :  { %v7328_v31 = vpop.f32.mrf.mxu1 }
0x1781   :  { %v4828_v18 = vpop.f32.mrf.mxu0 }
0x1782   :  { %v4396_v57 = vpop.f32.mrf.mxu1 }
0x1783   :  { %v7406_v37 = vpop.f32.mrf.mxu0  ;;  %v4518_v20 = vadd.f32 %v4517_v15, %v4396_v57 }
0x1784   :  { %v7331_v45 = vpop.f32.mrf.mxu1  ;;  %v4875_v37 = vld [vmem:[%s10606_s11 + $0x30] sm:$0xff] }
0x1785   :  { %v4833_v39 = vpop.f32.mrf.mxu0 }
0x1786   :  { %v4401_v58 = vpop.f32.mrf.mxu1 }
0x1787   :  { %v7409_v28 = vpop.f32.mrf.mxu0  ;;  %v4523_v5 = vadd.f32 %v10539_v9, %v4401_v58 }
0x1788   :  { %v7334_v43 = vpop.f32.mrf.mxu1 }
0x1789   :  { %v4838_v35 = vpop.f32.mrf.mxu0 }
0x178a   :  { %v4406_v11 = vpop.f32.mrf.mxu1 }
0x178b   :  { %v7412_v55 = vpop.f32.mrf.mxu0  ;;  %v4528_v6 = vadd.f32 %v10541_v25, %v4406_v11 }
0x178c   :  { %v7337_v60 = vpop.f32.mrf.mxu1 }
0x178d   :  { %v4843_v4 = vpop.f32.mrf.mxu0 }
0x178e   :  { %v4659_v22 = vpop.f32.mrf.mxu1 }
0x178f   :  { %v7415_v23 = vpop.f32.mrf.mxu0  ;;  %v4693_v2 = vadd.f32 %v4659_v22, %v4498_v21 }
0x1790   :  { %v7377_v36 = vpop.f32.mrf.mxu1 }
0x1791   :  { %v4848_v33 = vpop.f32.mrf.mxu0  ;;  %v4862_v50 = vadd.f32 %v4828_v18, %v4693_v2 }
0x1793   :  { %v4664_v63 = vpop.f32.mrf.mxu1  ;;  %v7418_v47 = vpop.f32.mrf.mxu0  ;;  %v4876_v49 = vadd.f32 %v4869_v44, %v4862_v50 }
0x1794   :  { %v4694_v29 = vadd.f32 %v4664_v63, %v4503_v12 }
0x1795   :  { %v7380_v38 = vpop.f32.mrf.mxu1  ;;  %v4853_v32 = vpop.f32.mrf.mxu0  ;;  %4884 = vst.msk [vmem:[%s10606_s11] sm:$0xff] %vm81_vm15, %v4876_v49 }
0x1796   :  { %v4863_v42 = vadd.f32 %v4833_v39, %v4694_v29 }
0x1797   :  { %v4669_v17 = vpop.f32.mrf.mxu1  ;;  %v7421_v3 = vpop.f32.mrf.mxu0 }
0x1798   :  { %v4877_v54 = vadd.f32 %v4870_v53, %v4863_v42  ;;  %v4695_v27 = vadd.f32 %v4669_v17, %v4508_v59 }
0x1799   :  { %v7383_v40 = vpop.f32.mrf.mxu1 }
0x179a   :  { %4885 = vst.msk [vmem:[%s10606_s11 + $0x8] sm:$0xff] %vm81_vm15, %v4877_v54  ;;  %v4864_v46 = vadd.f32 %v4838_v35, %v4695_v27 }
0x179b   :  { %v4674_v7 = vpop.f32.mrf.mxu1 }
0x179c   :  { %v4878_v41 = vadd.f32 %v4871_v1, %v4864_v46  ;;  %v4696_v56 = vadd.f32 %v4674_v7, %v4513_v8 }
0x179d   :  { %v7386_v10 = vpop.f32.mrf.mxu1 }
0x179e   :  { %4886 = vst.msk [vmem:[%s10606_s11 + $0x10] sm:$0xff] %vm81_vm15, %v4878_v41  ;;  %v4865_v34 = vadd.f32 %v4843_v4, %v4696_v56 }
0x179f   :  { %v4679_v0 = vpop.f32.mrf.mxu1 }
0x17a0   :  { %v4879_v14 = vadd.f32 %v4872_v19, %v4865_v34  ;;  %v4697_v52 = vadd.f32 %v4679_v0, %v4518_v20 }
0x17a1   :  { %v7389_v48 = vpop.f32.mrf.mxu1 }
0x17a2   :  { %4887 = vst.msk [vmem:[%s10606_s11 + $0x18] sm:$0xff] %vm81_vm15, %v4879_v14  ;;  %v4866_v15 = vadd.f32 %v4848_v33, %v4697_v52 }
0x17a3   :  { %v4684_v61 = vpop.f32.mrf.mxu1 }
0x17a4   :  { %v4880_v13 = vadd.f32 %v4873_v24, %v4866_v15  ;;  %v4698_v30 = vadd.f32 %v4684_v61, %v4523_v5 }
0x17a5   :  { %v7392_v16 = vpop.f32.mrf.mxu1 }
0x17a6   :  { %4888 = vst.msk [vmem:[%s10606_s11 + $0x20] sm:$0xff] %vm81_vm15, %v4880_v13  ;;  %v4867_v9 = vadd.f32 %v4853_v32, %v4698_v30 }
0x17a7   :  { %v4689_v51 = vpop.f32.mrf.mxu1 }
0x17a8   :  { %v4881_v62 = vadd.f32 %v4874_v26, %v4867_v9  ;;  %v4699_v18 = vadd.f32 %v4689_v51, %v4528_v6 }
0x17a9   :  { %v7395_v31 = vpop.f32.mrf.mxu1 }
0x17aa   :  { %4889 = vst.msk [vmem:[%s10606_s11 + $0x28] sm:$0xff] %vm81_vm15, %v4881_v62 }
0x17ab   :  { %v4858_v57 = vpop.f32.mrf.mxu1 }
0x17ac   :  { %v4868_v45 = vadd.f32 %v4858_v57, %v4699_v18 }
0x17ad   :  { %v7424_v39 = vpop.f32.mrf.mxu1 }
0x17ae   :  { %v4882_v58 = vadd.f32 %v4875_v37, %v4868_v45 }
0x17b0   :  { %4890 = vst.msk [vmem:[%s10606_s11 + $0x30] sm:$0xff] %vm81_vm15, %v4882_v58 }

</bundles_post_ra>
